<compile_context>
chip_gen: v7x
topology: tpu7x:2x2x1
jax: 0.10.0
libtpu: 0.0.40
codegen_flags: <defaults>
</compile_context>

<pallas_src>
import jax
import jax.numpy as jnp
from jax import lax
from jax.experimental import pallas as pl
from jax.experimental.pallas import tpu as pltpu

P = 7                    # max dilation among the branches (d=7) -> halo width
LANE = 128               # TPU lane width: output channels padded to this
DILATIONS = (3, 5, 7)
NUM_TAPS = 1 + 9 * len(DILATIONS)          # 1x1 tap + three dilated 3x3 = 28


def _round_up(x, m):
    return (x + m - 1) // m * m


def _pad_to(a, shape):
    return jnp.pad(a, [(0, t - s) for s, t in zip(a.shape, shape)])


def _tap_offsets():
    """Static (dh, dw) input offsets; order must match the host weight stack."""
    offs = [(0, 0)]                                    # 1x1 branch
    for d in DILATIONS:
        for kh in (-1, 0, 1):
            for kw in (-1, 0, 1):
                offs.append((kh * d, kw * d))
    return offs


def make_aspp_kernel(H, W, Cin, K, Cout_p, TH):
    HW = H * W
    Hp, Wp = H + 2 * P, W + 2 * P
    offsets = _tap_offsets()
    assert len(offsets) * Cin == K

    def kernel(x_ref, wall_ref, wg_ref, shift_ref, out_ref, xp_ref, slab_ref):
        # --- spatially padded activation (true channel count, no lane pad).
        # Zero only the four P-wide halo bands; the interior is overwritten
        # below, so every element of xp is (re)written each grid step.
        xp_ref[:P, :, :] = jnp.zeros((P, Wp, Cin), jnp.float32)
        xp_ref[P + H:, :, :] = jnp.zeros((P, Wp, Cin), jnp.float32)
        xp_ref[:, :P, :] = jnp.zeros((Hp, P, Cin), jnp.float32)
        xp_ref[:, P + W:, :] = jnp.zeros((Hp, P, Cin), jnp.float32)
        xp_ref[P:P + H, P:P + W, :] = x_ref[0]

        # --- im2col: pack every tap window along the K (lane) axis.  Each
        # copy moves only (H, W, Cin) true channels (tiny), replacing the old
        # per-tap (HW, 128)-padded reshape copies.
        for t, (dh, dw) in enumerate(offsets):
            slab_ref[:, :, t * Cin:(t + 1) * Cin] = (
                xp_ref[P + dh:P + dh + H, P + dw:P + dw + W, :])

        # --- global-average branch (folded with wc[4] + BN scale) + BN shift
        # collapse into one per-image bias row, off the matmul chain.  The
        # mean uses the un-padded input, never the halo scratch.
        xs = x_ref[0]                                           # (H, W, Cin)
        gmean = jnp.sum(jnp.sum(xs, axis=0), axis=0, keepdims=True) * (1.0 / HW)
        bias = jnp.dot(gmean, wg_ref[...],
                       preferred_element_type=jnp.float32) + shift_ref[...]

        # --- one fused matmul + bias + ReLU per M-tile of TH*W rows; the
        # output slab (HW, Cout_p) stays lane-dense (Cout_p % 128 == 0).
        for h0 in range(0, H, TH):
            th = min(TH, H - h0)
            a = slab_ref[h0:h0 + th, :, :].reshape(th * W, K)
            y = jnp.dot(a, wall_ref[...], preferred_element_type=jnp.float32)
            out_ref[0, h0 * W:(h0 + th) * W, :] = jnp.maximum(y + bias, 0.0)

    return kernel


def aspp_pallas(x_nchw, params):
    N, Cin, H, W = x_nchw.shape
    Cout = params["scale"].shape[-1]
    Cout_p = _round_up(Cout, LANE)
    HW = H * W
    K = NUM_TAPS * Cin

    # im2col only pays off while the packed K stays MXU-sized; see the
    # TODO(synk) at the top for the production-size (Cin~2048) tiling.
    assert K <= 1024, "im2col path expects small Cin; see TODO(synk) above"

    x = jnp.transpose(x_nchw, (0, 2, 3, 1)).astype(jnp.float32)       # NHWC

    # ---- fold fuse-conv (wc) + BN scale into every branch weight and stack
    # all 28 taps into one (K, Cout_p) matrix (one-time, tiny host matmuls).
    scale = params["scale"].reshape(-1)                 # (Cout,)
    wc = params["wc"]                                   # (5, Cout, Cout)

    def fold1(w, b):                                    # (Cin, Cout)
        return (w @ wc[b]) * scale[None, :]

    def fold3(w, b):                                    # (3, 3, Cin, Cout)
        return jnp.einsum("hwio,op->hwip", w, wc[b]) * scale

    blocks = [fold1(params["w1"], 0)]
    for b, name in ((1, "w3"), (2, "w5"), (3, "w7")):
        wf = fold3(params[name], b)
        for kh in range(3):
            for kw in range(3):
                blocks.append(wf[kh, kw])
    wall = _pad_to(jnp.concatenate(blocks, axis=0), (K, Cout_p))
    wgf = _pad_to(fold1(params["wg"], 4), (Cin, Cout_p))   # rows match gmean
    shiftp = _pad_to(params["shift"], (1, Cout_p))

    # M-tile ~128 rows so each output chunk stays register-resident.
    TH = max(1, min(H, max(1, 128 // W)))

    kernel = make_aspp_kernel(H, W, Cin, K, Cout_p, TH)

    # Grid-invariant weights: constant block index -> fetched once, no
    # per-step re-DMA.
    winv = lambda shape: pl.BlockSpec(shape, lambda n: (0, 0))

    out = pl.pallas_call(
        kernel,
        out_shape=jax.ShapeDtypeStruct((N, HW, Cout_p), jnp.float32),
        grid=(N,),
        in_specs=[
            pl.BlockSpec((1, H, W, Cin), lambda n: (n, 0, 0, 0)),
            winv((K, Cout_p)),        # stacked tap weights (wc + BN folded)
            winv((Cin, Cout_p)),      # global-pool branch weight (folded)
            winv((1, Cout_p)),        # BN shift
        ],
        # lane-dense output slab: last dim Cout_p is a multiple of 128
        out_specs=pl.BlockSpec((1, HW, Cout_p), lambda n: (n, 0, 0)),
        scratch_shapes=[
            pltpu.VMEM((H + 2 * P, W + 2 * P, Cin), jnp.float32),  # padded x
            pltpu.VMEM((H, W, K), jnp.float32),                    # im2col
        ],
        compiler_params=pltpu.CompilerParams(
            dimension_semantics=("parallel",)),
    )(x, wall, wgf, shiftp)

    out = out.reshape(N, H, W, Cout_p)[..., :Cout]       # drop lane padding
    return jnp.transpose(out, (0, 3, 1, 2))              # NCHW


def aspp_reference(x, p):
    """Pure-JAX reference (NCHW, lax convolutions), eval-mode BN."""
    dn = ("NCHW", "OIHW", "NCHW")

    def conv(a, w, pad, dil):
        return lax.conv_general_dilated(
            a, w, (1, 1), [(pad, pad), (pad, pad)],
            rhs_dilation=(dil, dil), dimension_numbers=dn)

    o1 = conv(x, p["w1_oihw"], 0, 1)
    o3 = conv(x, p["w3_oihw"], 3, 3)
    o5 = conv(x, p["w5_oihw"], 5, 5)
    o7 = conv(x, p["w7_oihw"], 7, 7)
    gap = jnp.mean(x, axis=(2, 3), keepdims=True)
    og = conv(gap, p["wg_oihw"], 0, 1)
    og = jnp.broadcast_to(og, o1.shape)
    cat = jnp.concatenate([o1, o3, o5, o7, og], axis=1)
    y = conv(cat, p["wc_oihw"], 0, 1)
    y = y * p["scale"][0][None, :, None, None] + p["shift"][0][None, :, None, None]
    return jnp.maximum(y, 0.0)


def init_params(key, Cin, Cout):
    ks = jax.random.split(key, 10)
    nrm = lambda k, s: (0.1 * jax.random.normal(k, s)).astype(jnp.float32)

    w1_oihw = nrm(ks[0], (Cout, Cin, 1, 1))
    w3_oihw = nrm(ks[1], (Cout, Cin, 3, 3))
    w5_oihw = nrm(ks[2], (Cout, Cin, 3, 3))
    w7_oihw = nrm(ks[3], (Cout, Cin, 3, 3))
    wg_oihw = nrm(ks[4], (Cout, Cin, 1, 1))
    wc_oihw = nrm(ks[5], (Cout, 5 * Cout, 1, 1))

    gamma = 1.0 + nrm(ks[6], (Cout,))
    beta = nrm(ks[7], (Cout,))
    run_mean = nrm(ks[8], (Cout,))
    run_var = jnp.abs(jax.random.normal(ks[9], (Cout,))).astype(jnp.float32) + 0.5
    eps = 1e-5
    scale = gamma / jnp.sqrt(run_var + eps)
    shift = beta - run_mean * scale

    return {
        # kernel-friendly layouts
        "w1": jnp.transpose(w1_oihw[:, :, 0, 0], (1, 0)),          # (Cin, Cout)
        "w3": jnp.transpose(w3_oihw, (2, 3, 1, 0)),                # (3,3,Cin,Cout)
        "w5": jnp.transpose(w5_oihw, (2, 3, 1, 0)),
        "w7": jnp.transpose(w7_oihw, (2, 3, 1, 0)),
        "wg": jnp.transpose(wg_oihw[:, :, 0, 0], (1, 0)),          # (Cin, Cout)
        "wc": jnp.transpose(wc_oihw[:, :, 0, 0], (1, 0)).reshape(5, Cout, Cout),
        "scale": scale.reshape(1, Cout),
        "shift": shift.reshape(1, Cout),
        # reference layouts
        "w1_oihw": w1_oihw, "w3_oihw": w3_oihw, "w5_oihw": w5_oihw,
        "w7_oihw": w7_oihw, "wg_oihw": wg_oihw, "wc_oihw": wc_oihw,
    }


if __name__ == "__main__":
    key = jax.random.PRNGKey(0)
    k_x, k_p = jax.random.split(key)

    N, Cin, H, W = 2, 4, 16, 16
    Cout = 8

    x = jax.random.normal(k_x, (N, Cin, H, W), dtype=jnp.float32)
    params = init_params(k_p, Cin, Cout)

    out = jax.block_until_ready(aspp_pallas(x, params))
    ref = jax.block_until_ready(aspp_reference(x, params))

    assert out.shape == (N, Cout, H, W), out.shape
    max_err = float(jnp.max(jnp.abs(out - ref)))
    assert jnp.allclose(out, ref, atol=2e-4, rtol=2e-4), max_err

    print("KERNEL_OK")
</pallas_src>

<mosaic_0001>
module attributes {stable_mosaic.version = 11 : i64} {
  func.func @kernel(%arg0: i32, %arg1: memref<1x16x16x4xf32, #tpu.memory_space<vmem>>, %arg2: memref<112x128xf32, #tpu.memory_space<vmem>>, %arg3: memref<4x128xf32, #tpu.memory_space<vmem>>, %arg4: memref<1x128xf32, #tpu.memory_space<vmem>>, %arg5: memref<1x256x128xf32, #tpu.memory_space<vmem>>, %arg6: memref<30x30x4xf32, #tpu.memory_space<vmem>>, %arg7: memref<16x16x112xf32, #tpu.memory_space<vmem>>) attributes {dimension_semantics = [#tpu.dimension_semantics<parallel>], iteration_bounds = array<i64: 2>, scalar_prefetch = 0 : i64, scratch_operands = 2 : i64, tpu.core_type = #tpu.core_type<tc>, window_params = [{transform_indices = @transform_0, window_bounds = array<i64: 1, 16, 16, 4>}, {pipeline_mode = #tpu.pipeline_mode<synchronous>, transform_indices = @transform_1, window_bounds = array<i64: 112, 128>}, {pipeline_mode = #tpu.pipeline_mode<synchronous>, transform_indices = @transform_2, window_bounds = array<i64: 4, 128>}, {pipeline_mode = #tpu.pipeline_mode<synchronous>, transform_indices = @transform_3, window_bounds = array<i64: 1, 128>}, {transform_indices = @transform_4, window_bounds = array<i64: 1, 256, 128>}]} {
    %cst = arith.constant 0.000000e+00 : f32
    %0 = vector.broadcast %cst : f32 to vector<7x30x4xf32>
    %c0 = arith.constant 0 : index
    %c0_0 = arith.constant 0 : index
    %c0_1 = arith.constant 0 : index
    %1 = vector.load %arg6[%c0, %c0_0, %c0_1] : memref<30x30x4xf32, #tpu.memory_space<vmem>>, vector<7x30x4xf32>
    tpu.vector_store %arg6[%c0, %c0_0, %c0_1], %0 {strides = array<i32>} : memref<30x30x4xf32, #tpu.memory_space<vmem>>, vector<7x30x4xf32>,
    %cst_2 = arith.constant 0.000000e+00 : f32
    %2 = vector.broadcast %cst_2 : f32 to vector<7x30x4xf32>
    %c23 = arith.constant 23 : index
    %c0_3 = arith.constant 0 : index
    %c0_4 = arith.constant 0 : index
    %3 = vector.load %arg6[%c23, %c0_3, %c0_4] : memref<30x30x4xf32, #tpu.memory_space<vmem>>, vector<7x30x4xf32>
    tpu.vector_store %arg6[%c23, %c0_3, %c0_4], %2 {strides = array<i32>} : memref<30x30x4xf32, #tpu.memory_space<vmem>>, vector<7x30x4xf32>,
    %cst_5 = arith.constant 0.000000e+00 : f32
    %4 = vector.broadcast %cst_5 : f32 to vector<30x7x4xf32>
    %c0_6 = arith.constant 0 : index
    %c0_7 = arith.constant 0 : index
    %c0_8 = arith.constant 0 : index
    %5 = vector.load %arg6[%c0_6, %c0_7, %c0_8] : memref<30x30x4xf32, #tpu.memory_space<vmem>>, vector<30x7x4xf32>
    tpu.vector_store %arg6[%c0_6, %c0_7, %c0_8], %4 {strides = array<i32>} : memref<30x30x4xf32, #tpu.memory_space<vmem>>, vector<30x7x4xf32>,
    %cst_9 = arith.constant 0.000000e+00 : f32
    %6 = vector.broadcast %cst_9 : f32 to vector<30x7x4xf32>
    %c0_10 = arith.constant 0 : index
    %c23_11 = arith.constant 23 : index
    %c0_12 = arith.constant 0 : index
    %7 = vector.load %arg6[%c0_10, %c23_11, %c0_12] : memref<30x30x4xf32, #tpu.memory_space<vmem>>, vector<30x7x4xf32>
    tpu.vector_store %arg6[%c0_10, %c23_11, %c0_12], %6 {strides = array<i32>} : memref<30x30x4xf32, #tpu.memory_space<vmem>>, vector<30x7x4xf32>,
    %c0_13 = arith.constant 0 : index
    %c0_14 = arith.constant 0 : index
    %c0_15 = arith.constant 0 : index
    %c0_16 = arith.constant 0 : index
    %8 = vector.load %arg1[%c0_13, %c0_14, %c0_15, %c0_16] : memref<1x16x16x4xf32, #tpu.memory_space<vmem>>, vector<1x16x16x4xf32>
    %9 = vector.shape_cast %8 : vector<1x16x16x4xf32> to vector<16x16x4xf32>
    %c7 = arith.constant 7 : index
    %c7_17 = arith.constant 7 : index
    %c0_18 = arith.constant 0 : index
    %10 = vector.load %arg6[%c7, %c7_17, %c0_18] : memref<30x30x4xf32, #tpu.memory_space<vmem>>, vector<16x16x4xf32>
    tpu.vector_store %arg6[%c7, %c7_17, %c0_18], %9 {strides = array<i32>} : memref<30x30x4xf32, #tpu.memory_space<vmem>>, vector<16x16x4xf32>,
    %c7_19 = arith.constant 7 : index
    %c7_20 = arith.constant 7 : index
    %c0_21 = arith.constant 0 : index
    %11 = vector.load %arg6[%c7_19, %c7_20, %c0_21] : memref<30x30x4xf32, #tpu.memory_space<vmem>>, vector<16x16x4xf32>
    %c0_22 = arith.constant 0 : index
    %c0_23 = arith.constant 0 : index
    %c0_24 = arith.constant 0 : index
    %12 = vector.load %arg7[%c0_22, %c0_23, %c0_24] : memref<16x16x112xf32, #tpu.memory_space<vmem>>, vector<16x16x4xf32>
    tpu.vector_store %arg7[%c0_22, %c0_23, %c0_24], %11 {strides = array<i32>} : memref<16x16x112xf32, #tpu.memory_space<vmem>>, vector<16x16x4xf32>,
    %c4 = arith.constant 4 : index
    %c4_25 = arith.constant 4 : index
    %c0_26 = arith.constant 0 : index
    %13 = vector.load %arg6[%c4, %c4_25, %c0_26] : memref<30x30x4xf32, #tpu.memory_space<vmem>>, vector<16x16x4xf32>
    %c0_27 = arith.constant 0 : index
    %c0_28 = arith.constant 0 : index
    %c4_29 = arith.constant 4 : index
    %14 = vector.load %arg7[%c0_27, %c0_28, %c4_29] : memref<16x16x112xf32, #tpu.memory_space<vmem>>, vector<16x16x4xf32>
    tpu.vector_store %arg7[%c0_27, %c0_28, %c4_29], %13 {strides = array<i32>} : memref<16x16x112xf32, #tpu.memory_space<vmem>>, vector<16x16x4xf32>,
    %c4_30 = arith.constant 4 : index
    %c7_31 = arith.constant 7 : index
    %c0_32 = arith.constant 0 : index
    %15 = vector.load %arg6[%c4_30, %c7_31, %c0_32] : memref<30x30x4xf32, #tpu.memory_space<vmem>>, vector<16x16x4xf32>
    %c0_33 = arith.constant 0 : index
    %c0_34 = arith.constant 0 : index
    %c8 = arith.constant 8 : index
    %16 = vector.load %arg7[%c0_33, %c0_34, %c8] : memref<16x16x112xf32, #tpu.memory_space<vmem>>, vector<16x16x4xf32>
    tpu.vector_store %arg7[%c0_33, %c0_34, %c8], %15 {strides = array<i32>} : memref<16x16x112xf32, #tpu.memory_space<vmem>>, vector<16x16x4xf32>,
    %c4_35 = arith.constant 4 : index
    %c10 = arith.constant 10 : index
    %c0_36 = arith.constant 0 : index
    %17 = vector.load %arg6[%c4_35, %c10, %c0_36] : memref<30x30x4xf32, #tpu.memory_space<vmem>>, vector<16x16x4xf32>
    %c0_37 = arith.constant 0 : index
    %c0_38 = arith.constant 0 : index
    %c12 = arith.constant 12 : index
    %18 = vector.load %arg7[%c0_37, %c0_38, %c12] : memref<16x16x112xf32, #tpu.memory_space<vmem>>, vector<16x16x4xf32>
    tpu.vector_store %arg7[%c0_37, %c0_38, %c12], %17 {strides = array<i32>} : memref<16x16x112xf32, #tpu.memory_space<vmem>>, vector<16x16x4xf32>,
    %c7_39 = arith.constant 7 : index
    %c4_40 = arith.constant 4 : index
    %c0_41 = arith.constant 0 : index
    %19 = vector.load %arg6[%c7_39, %c4_40, %c0_41] : memref<30x30x4xf32, #tpu.memory_space<vmem>>, vector<16x16x4xf32>
    %c0_42 = arith.constant 0 : index
    %c0_43 = arith.constant 0 : index
    %c16 = arith.constant 16 : index
    %20 = vector.load %arg7[%c0_42, %c0_43, %c16] : memref<16x16x112xf32, #tpu.memory_space<vmem>>, vector<16x16x4xf32>
    tpu.vector_store %arg7[%c0_42, %c0_43, %c16], %19 {strides = array<i32>} : memref<16x16x112xf32, #tpu.memory_space<vmem>>, vector<16x16x4xf32>,
    %c7_44 = arith.constant 7 : index
    %c7_45 = arith.constant 7 : index
    %c0_46 = arith.constant 0 : index
    %21 = vector.load %arg6[%c7_44, %c7_45, %c0_46] : memref<30x30x4xf32, #tpu.memory_space<vmem>>, vector<16x16x4xf32>
    %c0_47 = arith.constant 0 : index
    %c0_48 = arith.constant 0 : index
    %c20 = arith.constant 20 : index
    %22 = vector.load %arg7[%c0_47, %c0_48, %c20] : memref<16x16x112xf32, #tpu.memory_space<vmem>>, vector<16x16x4xf32>
    tpu.vector_store %arg7[%c0_47, %c0_48, %c20], %21 {strides = array<i32>} : memref<16x16x112xf32, #tpu.memory_space<vmem>>, vector<16x16x4xf32>,
    %c7_49 = arith.constant 7 : index
    %c10_50 = arith.constant 10 : index
    %c0_51 = arith.constant 0 : index
    %23 = vector.load %arg6[%c7_49, %c10_50, %c0_51] : memref<30x30x4xf32, #tpu.memory_space<vmem>>, vector<16x16x4xf32>
    %c0_52 = arith.constant 0 : index
    %c0_53 = arith.constant 0 : index
    %c24 = arith.constant 24 : index
    %24 = vector.load %arg7[%c0_52, %c0_53, %c24] : memref<16x16x112xf32, #tpu.memory_space<vmem>>, vector<16x16x4xf32>
    tpu.vector_store %arg7[%c0_52, %c0_53, %c24], %23 {strides = array<i32>} : memref<16x16x112xf32, #tpu.memory_space<vmem>>, vector<16x16x4xf32>,
    %c10_54 = arith.constant 10 : index
    %c4_55 = arith.constant 4 : index
    %c0_56 = arith.constant 0 : index
    %25 = vector.load %arg6[%c10_54, %c4_55, %c0_56] : memref<30x30x4xf32, #tpu.memory_space<vmem>>, vector<16x16x4xf32>
    %c0_57 = arith.constant 0 : index
    %c0_58 = arith.constant 0 : index
    %c28 = arith.constant 28 : index
    %26 = vector.load %arg7[%c0_57, %c0_58, %c28] : memref<16x16x112xf32, #tpu.memory_space<vmem>>, vector<16x16x4xf32>
    tpu.vector_store %arg7[%c0_57, %c0_58, %c28], %25 {strides = array<i32>} : memref<16x16x112xf32, #tpu.memory_space<vmem>>, vector<16x16x4xf32>,
    %c10_59 = arith.constant 10 : index
    %c7_60 = arith.constant 7 : index
    %c0_61 = arith.constant 0 : index
    %27 = vector.load %arg6[%c10_59, %c7_60, %c0_61] : memref<30x30x4xf32, #tpu.memory_space<vmem>>, vector<16x16x4xf32>
    %c0_62 = arith.constant 0 : index
    %c0_63 = arith.constant 0 : index
    %c32 = arith.constant 32 : index
    %28 = vector.load %arg7[%c0_62, %c0_63, %c32] : memref<16x16x112xf32, #tpu.memory_space<vmem>>, vector<16x16x4xf32>
    tpu.vector_store %arg7[%c0_62, %c0_63, %c32], %27 {strides = array<i32>} : memref<16x16x112xf32, #tpu.memory_space<vmem>>, vector<16x16x4xf32>,
    %c10_64 = arith.constant 10 : index
    %c10_65 = arith.constant 10 : index
    %c0_66 = arith.constant 0 : index
    %29 = vector.load %arg6[%c10_64, %c10_65, %c0_66] : memref<30x30x4xf32, #tpu.memory_space<vmem>>, vector<16x16x4xf32>
    %c0_67 = arith.constant 0 : index
    %c0_68 = arith.constant 0 : index
    %c36 = arith.constant 36 : index
    %30 = vector.load %arg7[%c0_67, %c0_68, %c36] : memref<16x16x112xf32, #tpu.memory_space<vmem>>, vector<16x16x4xf32>
    tpu.vector_store %arg7[%c0_67, %c0_68, %c36], %29 {strides = array<i32>} : memref<16x16x112xf32, #tpu.memory_space<vmem>>, vector<16x16x4xf32>,
    %c2 = arith.constant 2 : index
    %c2_69 = arith.constant 2 : index
    %c0_70 = arith.constant 0 : index
    %31 = vector.load %arg6[%c2, %c2_69, %c0_70] : memref<30x30x4xf32, #tpu.memory_space<vmem>>, vector<16x16x4xf32>
    %c0_71 = arith.constant 0 : index
    %c0_72 = arith.constant 0 : index
    %c40 = arith.constant 40 : index
    %32 = vector.load %arg7[%c0_71, %c0_72, %c40] : memref<16x16x112xf32, #tpu.memory_space<vmem>>, vector<16x16x4xf32>
    tpu.vector_store %arg7[%c0_71, %c0_72, %c40], %31 {strides = array<i32>} : memref<16x16x112xf32, #tpu.memory_space<vmem>>, vector<16x16x4xf32>,
    %c2_73 = arith.constant 2 : index
    %c7_74 = arith.constant 7 : index
    %c0_75 = arith.constant 0 : index
    %33 = vector.load %arg6[%c2_73, %c7_74, %c0_75] : memref<30x30x4xf32, #tpu.memory_space<vmem>>, vector<16x16x4xf32>
    %c0_76 = arith.constant 0 : index
    %c0_77 = arith.constant 0 : index
    %c44 = arith.constant 44 : index
    %34 = vector.load %arg7[%c0_76, %c0_77, %c44] : memref<16x16x112xf32, #tpu.memory_space<vmem>>, vector<16x16x4xf32>
    tpu.vector_store %arg7[%c0_76, %c0_77, %c44], %33 {strides = array<i32>} : memref<16x16x112xf32, #tpu.memory_space<vmem>>, vector<16x16x4xf32>,
    %c2_78 = arith.constant 2 : index
    %c12_79 = arith.constant 12 : index
    %c0_80 = arith.constant 0 : index
    %35 = vector.load %arg6[%c2_78, %c12_79, %c0_80] : memref<30x30x4xf32, #tpu.memory_space<vmem>>, vector<16x16x4xf32>
    %c0_81 = arith.constant 0 : index
    %c0_82 = arith.constant 0 : index
    %c48 = arith.constant 48 : index
    %36 = vector.load %arg7[%c0_81, %c0_82, %c48] : memref<16x16x112xf32, #tpu.memory_space<vmem>>, vector<16x16x4xf32>
    tpu.vector_store %arg7[%c0_81, %c0_82, %c48], %35 {strides = array<i32>} : memref<16x16x112xf32, #tpu.memory_space<vmem>>, vector<16x16x4xf32>,
    %c7_83 = arith.constant 7 : index
    %c2_84 = arith.constant 2 : index
    %c0_85 = arith.constant 0 : index
    %37 = vector.load %arg6[%c7_83, %c2_84, %c0_85] : memref<30x30x4xf32, #tpu.memory_space<vmem>>, vector<16x16x4xf32>
    %c0_86 = arith.constant 0 : index
    %c0_87 = arith.constant 0 : index
    %c52 = arith.constant 52 : index
    %38 = vector.load %arg7[%c0_86, %c0_87, %c52] : memref<16x16x112xf32, #tpu.memory_space<vmem>>, vector<16x16x4xf32>
    tpu.vector_store %arg7[%c0_86, %c0_87, %c52], %37 {strides = array<i32>} : memref<16x16x112xf32, #tpu.memory_space<vmem>>, vector<16x16x4xf32>,
    %c7_88 = arith.constant 7 : index
    %c7_89 = arith.constant 7 : index
    %c0_90 = arith.constant 0 : index
    %39 = vector.load %arg6[%c7_88, %c7_89, %c0_90] : memref<30x30x4xf32, #tpu.memory_space<vmem>>, vector<16x16x4xf32>
    %c0_91 = arith.constant 0 : index
    %c0_92 = arith.constant 0 : index
    %c56 = arith.constant 56 : index
    %40 = vector.load %arg7[%c0_91, %c0_92, %c56] : memref<16x16x112xf32, #tpu.memory_space<vmem>>, vector<16x16x4xf32>
    tpu.vector_store %arg7[%c0_91, %c0_92, %c56], %39 {strides = array<i32>} : memref<16x16x112xf32, #tpu.memory_space<vmem>>, vector<16x16x4xf32>,
    %c7_93 = arith.constant 7 : index
    %c12_94 = arith.constant 12 : index
    %c0_95 = arith.constant 0 : index
    %41 = vector.load %arg6[%c7_93, %c12_94, %c0_95] : memref<30x30x4xf32, #tpu.memory_space<vmem>>, vector<16x16x4xf32>
    %c0_96 = arith.constant 0 : index
    %c0_97 = arith.constant 0 : index
    %c60 = arith.constant 60 : index
    %42 = vector.load %arg7[%c0_96, %c0_97, %c60] : memref<16x16x112xf32, #tpu.memory_space<vmem>>, vector<16x16x4xf32>
    tpu.vector_store %arg7[%c0_96, %c0_97, %c60], %41 {strides = array<i32>} : memref<16x16x112xf32, #tpu.memory_space<vmem>>, vector<16x16x4xf32>,
    %c12_98 = arith.constant 12 : index
    %c2_99 = arith.constant 2 : index
    %c0_100 = arith.constant 0 : index
    %43 = vector.load %arg6[%c12_98, %c2_99, %c0_100] : memref<30x30x4xf32, #tpu.memory_space<vmem>>, vector<16x16x4xf32>
    %c0_101 = arith.constant 0 : index
    %c0_102 = arith.constant 0 : index
    %c64 = arith.constant 64 : index
    %44 = vector.load %arg7[%c0_101, %c0_102, %c64] : memref<16x16x112xf32, #tpu.memory_space<vmem>>, vector<16x16x4xf32>
    tpu.vector_store %arg7[%c0_101, %c0_102, %c64], %43 {strides = array<i32>} : memref<16x16x112xf32, #tpu.memory_space<vmem>>, vector<16x16x4xf32>,
    %c12_103 = arith.constant 12 : index
    %c7_104 = arith.constant 7 : index
    %c0_105 = arith.constant 0 : index
    %45 = vector.load %arg6[%c12_103, %c7_104, %c0_105] : memref<30x30x4xf32, #tpu.memory_space<vmem>>, vector<16x16x4xf32>
    %c0_106 = arith.constant 0 : index
    %c0_107 = arith.constant 0 : index
    %c68 = arith.constant 68 : index
    %46 = vector.load %arg7[%c0_106, %c0_107, %c68] : memref<16x16x112xf32, #tpu.memory_space<vmem>>, vector<16x16x4xf32>
    tpu.vector_store %arg7[%c0_106, %c0_107, %c68], %45 {strides = array<i32>} : memref<16x16x112xf32, #tpu.memory_space<vmem>>, vector<16x16x4xf32>,
    %c12_108 = arith.constant 12 : index
    %c12_109 = arith.constant 12 : index
    %c0_110 = arith.constant 0 : index
    %47 = vector.load %arg6[%c12_108, %c12_109, %c0_110] : memref<30x30x4xf32, #tpu.memory_space<vmem>>, vector<16x16x4xf32>
    %c0_111 = arith.constant 0 : index
    %c0_112 = arith.constant 0 : index
    %c72 = arith.constant 72 : index
    %48 = vector.load %arg7[%c0_111, %c0_112, %c72] : memref<16x16x112xf32, #tpu.memory_space<vmem>>, vector<16x16x4xf32>
    tpu.vector_store %arg7[%c0_111, %c0_112, %c72], %47 {strides = array<i32>} : memref<16x16x112xf32, #tpu.memory_space<vmem>>, vector<16x16x4xf32>,
    %c0_113 = arith.constant 0 : index
    %c0_114 = arith.constant 0 : index
    %c0_115 = arith.constant 0 : index
    %49 = vector.load %arg6[%c0_113, %c0_114, %c0_115] : memref<30x30x4xf32, #tpu.memory_space<vmem>>, vector<16x16x4xf32>
    %c0_116 = arith.constant 0 : index
    %c0_117 = arith.constant 0 : index
    %c76 = arith.constant 76 : index
    %50 = vector.load %arg7[%c0_116, %c0_117, %c76] : memref<16x16x112xf32, #tpu.memory_space<vmem>>, vector<16x16x4xf32>
    tpu.vector_store %arg7[%c0_116, %c0_117, %c76], %49 {strides = array<i32>} : memref<16x16x112xf32, #tpu.memory_space<vmem>>, vector<16x16x4xf32>,
    %c0_118 = arith.constant 0 : index
    %c7_119 = arith.constant 7 : index
    %c0_120 = arith.constant 0 : index
    %51 = vector.load %arg6[%c0_118, %c7_119, %c0_120] : memref<30x30x4xf32, #tpu.memory_space<vmem>>, vector<16x16x4xf32>
    %c0_121 = arith.constant 0 : index
    %c0_122 = arith.constant 0 : index
    %c80 = arith.constant 80 : index
    %52 = vector.load %arg7[%c0_121, %c0_122, %c80] : memref<16x16x112xf32, #tpu.memory_space<vmem>>, vector<16x16x4xf32>
    tpu.vector_store %arg7[%c0_121, %c0_122, %c80], %51 {strides = array<i32>} : memref<16x16x112xf32, #tpu.memory_space<vmem>>, vector<16x16x4xf32>,
    %c0_123 = arith.constant 0 : index
    %c14 = arith.constant 14 : index
    %c0_124 = arith.constant 0 : index
    %53 = vector.load %arg6[%c0_123, %c14, %c0_124] : memref<30x30x4xf32, #tpu.memory_space<vmem>>, vector<16x16x4xf32>
    %c0_125 = arith.constant 0 : index
    %c0_126 = arith.constant 0 : index
    %c84 = arith.constant 84 : index
    %54 = vector.load %arg7[%c0_125, %c0_126, %c84] : memref<16x16x112xf32, #tpu.memory_space<vmem>>, vector<16x16x4xf32>
    tpu.vector_store %arg7[%c0_125, %c0_126, %c84], %53 {strides = array<i32>} : memref<16x16x112xf32, #tpu.memory_space<vmem>>, vector<16x16x4xf32>,
    %c7_127 = arith.constant 7 : index
    %c0_128 = arith.constant 0 : index
    %c0_129 = arith.constant 0 : index
    %55 = vector.load %arg6[%c7_127, %c0_128, %c0_129] : memref<30x30x4xf32, #tpu.memory_space<vmem>>, vector<16x16x4xf32>
    %c0_130 = arith.constant 0 : index
    %c0_131 = arith.constant 0 : index
    %c88 = arith.constant 88 : index
    %56 = vector.load %arg7[%c0_130, %c0_131, %c88] : memref<16x16x112xf32, #tpu.memory_space<vmem>>, vector<16x16x4xf32>
    tpu.vector_store %arg7[%c0_130, %c0_131, %c88], %55 {strides = array<i32>} : memref<16x16x112xf32, #tpu.memory_space<vmem>>, vector<16x16x4xf32>,
    %c7_132 = arith.constant 7 : index
    %c7_133 = arith.constant 7 : index
    %c0_134 = arith.constant 0 : index
    %57 = vector.load %arg6[%c7_132, %c7_133, %c0_134] : memref<30x30x4xf32, #tpu.memory_space<vmem>>, vector<16x16x4xf32>
    %c0_135 = arith.constant 0 : index
    %c0_136 = arith.constant 0 : index
    %c92 = arith.constant 92 : index
    %58 = vector.load %arg7[%c0_135, %c0_136, %c92] : memref<16x16x112xf32, #tpu.memory_space<vmem>>, vector<16x16x4xf32>
    tpu.vector_store %arg7[%c0_135, %c0_136, %c92], %57 {strides = array<i32>} : memref<16x16x112xf32, #tpu.memory_space<vmem>>, vector<16x16x4xf32>,
    %c7_137 = arith.constant 7 : index
    %c14_138 = arith.constant 14 : index
    %c0_139 = arith.constant 0 : index
    %59 = vector.load %arg6[%c7_137, %c14_138, %c0_139] : memref<30x30x4xf32, #tpu.memory_space<vmem>>, vector<16x16x4xf32>
    %c0_140 = arith.constant 0 : index
    %c0_141 = arith.constant 0 : index
    %c96 = arith.constant 96 : index
    %60 = vector.load %arg7[%c0_140, %c0_141, %c96] : memref<16x16x112xf32, #tpu.memory_space<vmem>>, vector<16x16x4xf32>
    tpu.vector_store %arg7[%c0_140, %c0_141, %c96], %59 {strides = array<i32>} : memref<16x16x112xf32, #tpu.memory_space<vmem>>, vector<16x16x4xf32>,
    %c14_142 = arith.constant 14 : index
    %c0_143 = arith.constant 0 : index
    %c0_144 = arith.constant 0 : index
    %61 = vector.load %arg6[%c14_142, %c0_143, %c0_144] : memref<30x30x4xf32, #tpu.memory_space<vmem>>, vector<16x16x4xf32>
    %c0_145 = arith.constant 0 : index
    %c0_146 = arith.constant 0 : index
    %c100 = arith.constant 100 : index
    %62 = vector.load %arg7[%c0_145, %c0_146, %c100] : memref<16x16x112xf32, #tpu.memory_space<vmem>>, vector<16x16x4xf32>
    tpu.vector_store %arg7[%c0_145, %c0_146, %c100], %61 {strides = array<i32>} : memref<16x16x112xf32, #tpu.memory_space<vmem>>, vector<16x16x4xf32>,
    %c14_147 = arith.constant 14 : index
    %c7_148 = arith.constant 7 : index
    %c0_149 = arith.constant 0 : index
    %63 = vector.load %arg6[%c14_147, %c7_148, %c0_149] : memref<30x30x4xf32, #tpu.memory_space<vmem>>, vector<16x16x4xf32>
    %c0_150 = arith.constant 0 : index
    %c0_151 = arith.constant 0 : index
    %c104 = arith.constant 104 : index
    %64 = vector.load %arg7[%c0_150, %c0_151, %c104] : memref<16x16x112xf32, #tpu.memory_space<vmem>>, vector<16x16x4xf32>
    tpu.vector_store %arg7[%c0_150, %c0_151, %c104], %63 {strides = array<i32>} : memref<16x16x112xf32, #tpu.memory_space<vmem>>, vector<16x16x4xf32>,
    %c14_152 = arith.constant 14 : index
    %c14_153 = arith.constant 14 : index
    %c0_154 = arith.constant 0 : index
    %65 = vector.load %arg6[%c14_152, %c14_153, %c0_154] : memref<30x30x4xf32, #tpu.memory_space<vmem>>, vector<16x16x4xf32>
    %c0_155 = arith.constant 0 : index
    %c0_156 = arith.constant 0 : index
    %c108 = arith.constant 108 : index
    %66 = vector.load %arg7[%c0_155, %c0_156, %c108] : memref<16x16x112xf32, #tpu.memory_space<vmem>>, vector<16x16x4xf32>
    tpu.vector_store %arg7[%c0_155, %c0_156, %c108], %65 {strides = array<i32>} : memref<16x16x112xf32, #tpu.memory_space<vmem>>, vector<16x16x4xf32>,
    %c0_157 = arith.constant 0 : index
    %c0_158 = arith.constant 0 : index
    %c0_159 = arith.constant 0 : index
    %c0_160 = arith.constant 0 : index
    %67 = vector.load %arg1[%c0_157, %c0_158, %c0_159, %c0_160] : memref<1x16x16x4xf32, #tpu.memory_space<vmem>>, vector<1x16x16x4xf32>
    %68 = vector.shape_cast %67 : vector<1x16x16x4xf32> to vector<16x16x4xf32>
    %cst_161 = arith.constant dense<0.000000e+00> : vector<16x4xf32>
    %69 = vector.multi_reduction <add>, %68, %cst_161 [0] : vector<16x16x4xf32> to vector<16x4xf32>
    %cst_162 = arith.constant dense<0.000000e+00> : vector<4xf32>
    %70 = vector.multi_reduction <add>, %69, %cst_162 [0] : vector<16x4xf32> to vector<4xf32>
    %71 = vector.shape_cast %70 : vector<4xf32> to vector<1x4xf32>
    %cst_163 = arith.constant 3.906250e-03 : f32
    %72 = vector.broadcast %cst_163 : f32 to vector<1x4xf32>
    %73 = arith.mulf %71, %72 : vector<1x4xf32>
    %c0_164 = arith.constant 0 : index
    %c0_165 = arith.constant 0 : index
    %74 = vector.load %arg3[%c0_164, %c0_165] : memref<4x128xf32, #tpu.memory_space<vmem>>, vector<4x128xf32>
    %cst_166 = arith.constant dense<0.000000e+00> : vector<1x128xf32>
    %75 = tpu.matmul %73, %74, %cst_166 {dimension_numbers = #tpu.dot_dimension_numbers<[1], [0], [0], [1], [0, 0, 1, 1], [], []>} : vector<1x4xf32>, vector<4x128xf32>, vector<1x128xf32> -> vector<1x128xf32>
    %c0_167 = arith.constant 0 : index
    %c0_168 = arith.constant 0 : index
    %76 = vector.load %arg4[%c0_167, %c0_168] : memref<1x128xf32, #tpu.memory_space<vmem>>, vector<1x128xf32>
    %77 = arith.addf %75, %76 : vector<1x128xf32>
    %c0_169 = arith.constant 0 : index
    %c0_170 = arith.constant 0 : index
    %c0_171 = arith.constant 0 : index
    %78 = vector.load %arg7[%c0_169, %c0_170, %c0_171] : memref<16x16x112xf32, #tpu.memory_space<vmem>>, vector<8x16x112xf32>
    %79 = vector.shape_cast %78 : vector<8x16x112xf32> to vector<128x112xf32>
    %c0_172 = arith.constant 0 : index
    %c0_173 = arith.constant 0 : index
    %80 = vector.load %arg2[%c0_172, %c0_173] : memref<112x128xf32, #tpu.memory_space<vmem>>, vector<112x128xf32>
    %cst_174 = arith.constant dense<0.000000e+00> : vector<128x128xf32>
    %81 = tpu.matmul %79, %80, %cst_174 {dimension_numbers = #tpu.dot_dimension_numbers<[1], [0], [0], [1], [0, 0, 1, 1], [], []>} : vector<128x112xf32>, vector<112x128xf32>, vector<128x128xf32> -> vector<128x128xf32>
    %82 = vector.broadcast %77 : vector<1x128xf32> to vector<128x128xf32>
    %83 = arith.addf %81, %82 : vector<128x128xf32>
    %cst_175 = arith.constant 0.000000e+00 : f32
    %84 = vector.broadcast %cst_175 : f32 to vector<128x128xf32>
    %85 = arith.maximumf %83, %84 : vector<128x128xf32>
    %c0_176 = arith.constant 0 : index
    %c0_177 = arith.constant 0 : index
    %c0_178 = arith.constant 0 : index
    %86 = vector.load %arg5[%c0_176, %c0_177, %c0_178] : memref<1x256x128xf32, #tpu.memory_space<vmem>>, vector<1x128x128xf32>
    %87 = vector.shape_cast %86 : vector<1x128x128xf32> to vector<128x128xf32>
    %88 = vector.shape_cast %85 : vector<128x128xf32> to vector<1x128x128xf32>
    tpu.vector_store %arg5[%c0_176, %c0_177, %c0_178], %88 {strides = array<i32>} : memref<1x256x128xf32, #tpu.memory_space<vmem>>, vector<1x128x128xf32>,
    %c8_179 = arith.constant 8 : index
    %c0_180 = arith.constant 0 : index
    %c0_181 = arith.constant 0 : index
    %89 = vector.load %arg7[%c8_179, %c0_180, %c0_181] : memref<16x16x112xf32, #tpu.memory_space<vmem>>, vector<8x16x112xf32>
    %90 = vector.shape_cast %89 : vector<8x16x112xf32> to vector<128x112xf32>
    %c0_182 = arith.constant 0 : index
    %c0_183 = arith.constant 0 : index
    %91 = vector.load %arg2[%c0_182, %c0_183] : memref<112x128xf32, #tpu.memory_space<vmem>>, vector<112x128xf32>
    %cst_184 = arith.constant dense<0.000000e+00> : vector<128x128xf32>
    %92 = tpu.matmul %90, %91, %cst_184 {dimension_numbers = #tpu.dot_dimension_numbers<[1], [0], [0], [1], [0, 0, 1, 1], [], []>} : vector<128x112xf32>, vector<112x128xf32>, vector<128x128xf32> -> vector<128x128xf32>
    %93 = vector.broadcast %77 : vector<1x128xf32> to vector<128x128xf32>
    %94 = arith.addf %92, %93 : vector<128x128xf32>
    %cst_185 = arith.constant 0.000000e+00 : f32
    %95 = vector.broadcast %cst_185 : f32 to vector<128x128xf32>
    %96 = arith.maximumf %94, %95 : vector<128x128xf32>
    %c0_186 = arith.constant 0 : index
    %c128 = arith.constant 128 : index
    %c0_187 = arith.constant 0 : index
    %97 = vector.load %arg5[%c0_186, %c128, %c0_187] : memref<1x256x128xf32, #tpu.memory_space<vmem>>, vector<1x128x128xf32>
    %98 = vector.shape_cast %97 : vector<1x128x128xf32> to vector<128x128xf32>
    %99 = vector.shape_cast %96 : vector<128x128xf32> to vector<1x128x128xf32>
    tpu.vector_store %arg5[%c0_186, %c128, %c0_187], %99 {strides = array<i32>} : memref<1x256x128xf32, #tpu.memory_space<vmem>>, vector<1x128x128xf32>,
    return
  }
  func.func @transform_0(%arg0: i32) -> (i32, i32, i32, i32) {
    %c0_i32 = arith.constant 0 : i32
    %c0_i32_0 = arith.constant 0 : i32
    %c0_i32_1 = arith.constant 0 : i32
    %c0_i32_2 = arith.constant 0 : i32
    return %arg0, %c0_i32, %c0_i32_0, %c0_i32_1 : i32, i32, i32, i32
  }
  func.func @transform_1(%arg0: i32) -> (i32, i32) {
    %c0_i32 = arith.constant 0 : i32
    %c0_i32_0 = arith.constant 0 : i32
    %c0_i32_1 = arith.constant 0 : i32
    return %c0_i32, %c0_i32_0 : i32, i32
  }
  func.func @transform_2(%arg0: i32) -> (i32, i32) {
    %c0_i32 = arith.constant 0 : i32
    %c0_i32_0 = arith.constant 0 : i32
    %c0_i32_1 = arith.constant 0 : i32
    return %c0_i32, %c0_i32_0 : i32, i32
  }
  func.func @transform_3(%arg0: i32) -> (i32, i32) {
    %c0_i32 = arith.constant 0 : i32
    %c0_i32_0 = arith.constant 0 : i32
    %c0_i32_1 = arith.constant 0 : i32
    return %c0_i32, %c0_i32_0 : i32, i32
  }
  func.func @transform_4(%arg0: i32) -> (i32, i32, i32) {
    %c0_i32 = arith.constant 0 : i32
    %c0_i32_0 = arith.constant 0 : i32
    %c0_i32_1 = arith.constant 0 : i32
    return %arg0, %c0_i32, %c0_i32_0 : i32, i32, i32
  }
}

</mosaic_0001>

<bundles_post_ra>
// kernel: tpu_custom_call.1
= control target key start
LH: loop header
LB: loop body
LE: loop exit
PB: predicated region body
PF: predicated region fallthrough
CT: control target
= control target key end

     0   :  { %9 = vsyncpa [#allocation5], 0  ;;  %s10429_s0 = inlined_call_operand.vmem [shape: f32[2,16,16,4], index: 0, kind: input, shape index: {}]   ;;  %s10430_s1 = inlined_call_operand.vmem [shape: f32[112,128], index: 1, kind: input, shape index: {}]   ;;  %s10431_s2 = inlined_call_operand.vmem [shape: f32[4,128], index: 2, kind: input, shape index: {}]   ;;  %s10432_s3 = inlined_call_operand.vmem [shape: f32[1,128], index: 3, kind: input, shape index: {}]   ;;  %s10433_s4 = inlined_call_operand.hbm [shape: f32[2,256,128], index: 4, kind: output, shape index: {}]  }
   0x1   :  { %11 = vsyncpa [#allocation5 + $0x1], 0  ;;  %s6909_s15 = smov 0   ;;  %s6911_s16 = smov 0  }
   0x2   :  { %s6913_s17 = smov 0   ;;  %s6915_s18 = smov 0  }
   0x3 LB: > { %s6930_s19 = sadd.s32 4294967295, %s6851_s18   ;;  %s6436_s20 = sadd.s32 4294967294, %s6851_s18   ;;  %s6851_s18 = sphi %s6915_s18, %s10513_s18   ;;  %s6847_s17 = sphi %s6913_s17, %s10512_s17   ;;  %s6843_s16 = sphi %s6911_s16, %s10511_s16   ;;  %s6839_s15 = sphi %s6909_s15, %s10510_s15  }
   0x4   : > { %s6934_s21 = sadd.s32 1, %s6851_s18   ;;  %s113_s22 = sadd.s32 1, %s6847_s17 }
   0x5   : > { %s110_s23 = ssub.s32 %s6851_s18, %s6934_s21  ;;  %p123_p0 = scmp.ne.s32.totalorder %s6847_s17, %s6843_s16 }
   0x6   : > { %p111_p1 = scmp.eq.s32.totalorder %s110_s23, 0  ;;  %p124_p2 = scmp.eq.s32.totalorder %s6930_s19, 1 }
   0x7   : > { %p129_p3 = scmp.ne.s32.totalorder %s6843_s16, %s6839_s15  ;;  %p130_p4 = scmp.eq.s32.totalorder %s6436_s20, 1 }
   0x8   : > { %s6945_s24 = scalar_select %p111_p1, %s6847_s17, %s113_s22  }
   0x9   : > { %p6947_p5 = por %p124_p2, %p123_p0  ;;  %p6951_p6 = por %p130_p4, %p129_p3 }
   0xa   : > { %p6439_p7 = scmp.ge.s32.totalorder %s6851_s18, 1  ;;  %p165_p8 = scmp.lt.s32.totalorder %s6851_s18, 3 }
   0xc   : > { %p166_p9 = pnand %p6439_p7, %p165_p8 }
   0xe   : > { %169 = sbr.rel (%p166_p9) target bundleno = 2156 (0x86c), region = 36 }
  0x15   : > { %vm196_vm0 = vcmask 31744   ;;  %vm255_vm1 = vcmask 30720   ;;  %p191_p10 = scmp.lt.s32.totalorder %s6930_s19, 1  ;;  %v10434_v0 = vmov 0.0   ;;  %vm200_vm2 = vcmask 29696   ;;  %s6854_s6 = smov 4  }
  0x16   : > { %219 = vst.msk [vmem:[#allocation2 + $0xa8] sm:$0xff] %vm196_vm0, %v10434_v0  ;;  %220 = vst.msk [vmem:[#allocation2 + $0xb0] sm:$0xff] %vm196_vm0, %v10434_v0  ;;  %6546 = vmatprep.subr.mxu0 %v10434_v0  ;;  %s6855_s7 = smov 8   ;;  %vm606_vm3 = vcmask 64544   ;;  %s6856_s8 = smov 12   ;;  %vm799_vm4 = vcmask 97344  }
  0x17   : > { %197 = vst.msk [vmem:[#allocation2] sm:$0xff] %vm196_vm0, %v10434_v0  ;;  %198 = vst.msk [vmem:[#allocation2 + $0x8] sm:$0xff] %vm196_vm0, %v10434_v0  ;;  %s7138_s27 = scalar_select %p191_p10, %s6930_s19, 1  ;;  %vm992_vm5 = vcmask 130144   ;;  %vm1185_vm6 = vcmask 162944   ;;  %vm1378_vm7 = vcmask 195744  }
  0x18   : > { %199 = vst.msk [vmem:[#allocation2 + $0x10] sm:$0xff] %vm196_vm0, %v10434_v0  ;;  %202 = vst.msk [vmem:[#allocation2 + $0x20] sm:$0xff] %vm196_vm0, %v10434_v0  ;;  %s6857_s9 = smov 16   ;;  %s6858_s10 = smov 20   ;;  %vm1571_vm8 = vcmask 228544   ;;  %vm1765_vm9 = vcmask 261344  }
  0x19   : > { %203 = vst.msk [vmem:[#allocation2 + $0x28] sm:$0xff] %vm196_vm0, %v10434_v0  ;;  %204 = vst.msk [vmem:[#allocation2 + $0x30] sm:$0xff] %vm196_vm0, %v10434_v0  ;;  %s6482_s28 = sshll.u32 %s7138_s27, 8  ;;  %s6859_s11 = smov 24   ;;  %vm1958_vm10 = vcmask 294144   ;;  %vm2151_vm11 = vcmask 326944  }
  0x1a   : > { %206 = vst.msk [vmem:[#allocation2 + $0x40] sm:$0xff] %vm196_vm0, %v10434_v0  ;;  %207 = vst.msk [vmem:[#allocation2 + $0x48] sm:$0xff] %vm196_vm0, %v10434_v0  ;;  %s7200_s5 = scalar_lea.vmem %s10429_s0, %s6482_s28  ;;  %s6860_s12 = smov 28   ;;  %vm2345_vm12 = vcmask 359744   ;;  %vm2538_vm13 = vcmask 392544   ;;  %vm2731_vm14 = vcmask 425344  }
  0x1b   : > { %208 = vst.msk [vmem:[#allocation2 + $0x50] sm:$0xff] %vm196_vm0, %v10434_v0  ;;  %210 = vst.msk [vmem:[#allocation2 + $0x60] sm:$0xff] %vm196_vm0, %v10434_v0  ;;  %v316_v1 = vld [vmem:[%s7200_s5] sm:$0xff]  ;;  %v317_v2 = vld [vmem:[%s7200_s5 + $0x8] sm:$0xff]  ;;  %s6861_s13 = smov 32   ;;  %s6862_s14 = smov 36  }
  0x1c   : > { %211 = vst.msk [vmem:[#allocation2 + $0x68] sm:$0xff] %vm196_vm0, %v10434_v0  ;;  %212 = vst.msk [vmem:[#allocation2 + $0x70] sm:$0xff] %vm196_vm0, %v10434_v0  ;;  %v318_v3 = vld [vmem:[%s7200_s5 + $0x10] sm:$0xff]  ;;  %v319_v4 = vld [vmem:[%s7200_s5 + $0x18] sm:$0xff]  ;;  %s6863_s20 = smov 40   ;;  %s6864_s22 = smov 44  }
  0x1d   : > { %214 = vst.msk [vmem:[#allocation2 + $0x80] sm:$0xff] %vm196_vm0, %v10434_v0  ;;  %215 = vst.msk [vmem:[#allocation2 + $0x88] sm:$0xff] %vm196_vm0, %v10434_v0  ;;  %v320_v5 = vld [vmem:[%s7200_s5 + $0x20] sm:$0xff]  ;;  %v321_v6 = vld [vmem:[%s7200_s5 + $0x28] sm:$0xff]  ;;  %s6865_s23 = smov 48   ;;  %s6866_s27 = smov 52  }
  0x1e   : > { %216 = vst.msk [vmem:[#allocation2 + $0x90] sm:$0xff] %vm196_vm0, %v10434_v0  ;;  %218 = vst.msk [vmem:[#allocation2 + $0xa0] sm:$0xff] %vm196_vm0, %v10434_v0  ;;  %v449_v7 = vld [vmem:[#allocation2 + $0xac] sm:$0xff]  ;;  %v323_v12 = vld [vmem:[%s7200_s5 + $0x38] sm:$0xff]  ;;  %s6867_s28 = smov 56   ;;  %vm2924_vm15 = vcmask 458144  }
  0x1f   : > { %222 = vst.msk [vmem:[#allocation2 + $0xc0] sm:$0xff] %vm196_vm0, %v10434_v0  ;;  %223 = vst.msk [vmem:[#allocation2 + $0xc8] sm:$0xff] %vm196_vm0, %v10434_v0  ;;  %516 = vrot.lane.b32.xlu1 %v449_v7, %s6854_s6  ;;  %v322_v11 = vld [vmem:[%s7200_s5 + $0x30] sm:$0xff]  ;;  %v324_v13 = vld [vmem:[%s7200_s5 + $0x40] sm:$0xff]  ;;  %s6868_s29 = smov 60   ;;  %s6869_s30 = smov 64  }
  0x20   : > { %224 = vst.msk [vmem:[#allocation2 + $0xd0] sm:$0xff] %vm196_vm0, %v10434_v0  ;;  %227 = vst.msk [vmem:[#allocation2 + $0x2e0] sm:$0xff] %vm196_vm0, %v10434_v0  ;;  %v325_v14 = vld [vmem:[%s7200_s5 + $0x48] sm:$0xff]  ;;  %v326_v15 = vld [vmem:[%s7200_s5 + $0x50] sm:$0xff] }
  0x21   : > { %228 = vst.msk [vmem:[#allocation2 + $0x2e8] sm:$0xff] %vm196_vm0, %v10434_v0  ;;  %229 = vst.msk [vmem:[#allocation2 + $0x2f0] sm:$0xff] %vm196_vm0, %v10434_v0  ;;  %v327_v16 = vld [vmem:[%s7200_s5 + $0x58] sm:$0xff]  ;;  %v328_v17 = vld [vmem:[%s7200_s5 + $0x60] sm:$0xff] }
  0x22   : > { %231 = vst.msk [vmem:[#allocation2 + $0x300] sm:$0xff] %vm196_vm0, %v10434_v0  ;;  %232 = vst.msk [vmem:[#allocation2 + $0x308] sm:$0xff] %vm196_vm0, %v10434_v0  ;;  %v329_v18 = vld [vmem:[%s7200_s5 + $0x68] sm:$0xff]  ;;  %v330_v19 = vld [vmem:[%s7200_s5 + $0x70] sm:$0xff] }
  0x23   : > { %233 = vst.msk [vmem:[#allocation2 + $0x310] sm:$0xff] %vm196_vm0, %v10434_v0  ;;  %235 = vst.msk [vmem:[#allocation2 + $0x320] sm:$0xff] %vm196_vm0, %v10434_v0  ;;  %v331_v20 = vld [vmem:[%s7200_s5 + $0x78] sm:$0xff]  ;;  %v332_v21 = vld [vmem:[%s7200_s5 + $0x80] sm:$0xff] }
  0x24   : > { %236 = vst.msk [vmem:[#allocation2 + $0x328] sm:$0xff] %vm196_vm0, %v10434_v0  ;;  %237 = vst.msk [vmem:[#allocation2 + $0x330] sm:$0xff] %vm196_vm0, %v10434_v0  ;;  %v333_v24 = vld [vmem:[%s7200_s5 + $0x88] sm:$0xff]  ;;  %v334_v25 = vld [vmem:[%s7200_s5 + $0x90] sm:$0xff] }
  0x25   : > { %239 = vst.msk [vmem:[#allocation2 + $0x340] sm:$0xff] %vm196_vm0, %v10434_v0  ;;  %240 = vst.msk [vmem:[#allocation2 + $0x348] sm:$0xff] %vm196_vm0, %v10434_v0  ;;  %v447_v8 = vld [vmem:[#allocation2 + $0x8c] sm:$0xff]  ;;  %v335_v26 = vld [vmem:[%s7200_s5 + $0x98] sm:$0xff] }
  0x26   : > { %241 = vst.msk [vmem:[#allocation2 + $0x350] sm:$0xff] %vm196_vm0, %v10434_v0  ;;  %243 = vst.msk [vmem:[#allocation2 + $0x360] sm:$0xff] %vm196_vm0, %v10434_v0  ;;  %512 = vrot.lane.b32.xlu0 %v447_v8, %s6854_s6  ;;  %v336_v27 = vld [vmem:[%s7200_s5 + $0xa0] sm:$0xff]  ;;  %v337_v28 = vld [vmem:[%s7200_s5 + $0xa8] sm:$0xff] }
  0x27   : > { %244 = vst.msk [vmem:[#allocation2 + $0x368] sm:$0xff] %vm196_vm0, %v10434_v0  ;;  %245 = vst.msk [vmem:[#allocation2 + $0x370] sm:$0xff] %vm196_vm0, %v10434_v0  ;;  %v451_v9 = vld [vmem:[#allocation2 + $0xcc] sm:$0xff]  ;;  %v339_v34 = vld [vmem:[%s7200_s5 + $0xb8] sm:$0xff] }
  0x28   : > { %247 = vst.msk [vmem:[#allocation2 + $0x380] sm:$0xff] %vm196_vm0, %v10434_v0  ;;  %248 = vst.msk [vmem:[#allocation2 + $0x388] sm:$0xff] %vm196_vm0, %v10434_v0  ;;  %520 = vrot.lane.b32.xlu1 %v451_v9, %s6854_s6  ;;  %v338_v33 = vld [vmem:[%s7200_s5 + $0xb0] sm:$0xff]  ;;  %v340_v35 = vld [vmem:[%s7200_s5 + $0xc0] sm:$0xff] }
  0x29   : > { %249 = vst.msk [vmem:[#allocation2 + $0x390] sm:$0xff] %vm196_vm0, %v10434_v0  ;;  %251 = vst.msk [vmem:[#allocation2 + $0x3a0] sm:$0xff] %vm196_vm0, %v10434_v0  ;;  %v341_v36 = vld [vmem:[%s7200_s5 + $0xc8] sm:$0xff] }
  0x2a   : > { %252 = vst.msk [vmem:[#allocation2 + $0x3a8] sm:$0xff] %vm196_vm0, %v10434_v0  ;;  %253 = vst.msk [vmem:[#allocation2 + $0x3b0] sm:$0xff] %vm196_vm0, %v10434_v0 }
  0x2b   : > { %263 = vst.msk [vmem:[#allocation2 + $0xe0] sm:$0x7f] %vm255_vm1, %v10434_v0  ;;  %264 = vst.msk [vmem:[#allocation2 + $0x100] sm:$0x7f] %vm255_vm1, %v10434_v0 }
  0x2c   : > { %265 = vst.msk [vmem:[#allocation2 + $0x120] sm:$0x7f] %vm255_vm1, %v10434_v0  ;;  %266 = vst.msk [vmem:[#allocation2 + $0x140] sm:$0x7f] %vm255_vm1, %v10434_v0 }
  0x2d   : > { %267 = vst.msk [vmem:[#allocation2 + $0x160] sm:$0x7f] %vm255_vm1, %v10434_v0  ;;  %268 = vst.msk [vmem:[#allocation2 + $0x180] sm:$0x7f] %vm255_vm1, %v10434_v0 }
  0x2e   : > { %269 = vst.msk [vmem:[#allocation2 + $0x1a0] sm:$0x7f] %vm255_vm1, %v10434_v0  ;;  %270 = vst.msk [vmem:[#allocation2 + $0x1c0] sm:$0x7f] %vm255_vm1, %v10434_v0 }
  0x2f   : > { %271 = vst.msk [vmem:[#allocation2 + $0x1e0] sm:$0x7f] %vm255_vm1, %v10434_v0  ;;  %272 = vst.msk [vmem:[#allocation2 + $0x200] sm:$0x7f] %vm255_vm1, %v10434_v0 }
  0x30   : > { %273 = vst.msk [vmem:[#allocation2 + $0x220] sm:$0x7f] %vm255_vm1, %v10434_v0  ;;  %274 = vst.msk [vmem:[#allocation2 + $0x240] sm:$0x7f] %vm255_vm1, %v10434_v0 }
  0x31   : > { %275 = vst.msk [vmem:[#allocation2 + $0x260] sm:$0x7f] %vm255_vm1, %v10434_v0  ;;  %276 = vst.msk [vmem:[#allocation2 + $0x280] sm:$0x7f] %vm255_vm1, %v10434_v0 }
  0x32   : > { %277 = vst.msk [vmem:[#allocation2 + $0x2a0] sm:$0x7f] %vm255_vm1, %v10434_v0  ;;  %278 = vst.msk [vmem:[#allocation2 + $0x2c0] sm:$0x7f] %vm255_vm1, %v10434_v0 }
  0x33   : > { %293 = vst.msk [vmem:[#allocation2 + $0xf7] sm:$0x7f] %vm255_vm1, %v10434_v0  ;;  %294 = vst.msk [vmem:[#allocation2 + $0x117] sm:$0x7f] %vm255_vm1, %v10434_v0 }
  0x34   : > { %295 = vst.msk [vmem:[#allocation2 + $0x137] sm:$0x7f] %vm255_vm1, %v10434_v0  ;;  %296 = vst.msk [vmem:[#allocation2 + $0x157] sm:$0x7f] %vm255_vm1, %v10434_v0 }
  0x35   : > { %297 = vst.msk [vmem:[#allocation2 + $0x177] sm:$0x7f] %vm255_vm1, %v10434_v0  ;;  %298 = vst.msk [vmem:[#allocation2 + $0x197] sm:$0x7f] %vm255_vm1, %v10434_v0 }
  0x36   : > { %299 = vst.msk [vmem:[#allocation2 + $0x1b7] sm:$0x7f] %vm255_vm1, %v10434_v0  ;;  %300 = vst.msk [vmem:[#allocation2 + $0x1d7] sm:$0x7f] %vm255_vm1, %v10434_v0 }
  0x37   : > { %301 = vst.msk [vmem:[#allocation2 + $0x1f7] sm:$0x7f] %vm255_vm1, %v10434_v0  ;;  %302 = vst.msk [vmem:[#allocation2 + $0x217] sm:$0x7f] %vm255_vm1, %v10434_v0 }
  0x38   : > { %303 = vst.msk [vmem:[#allocation2 + $0x237] sm:$0x7f] %vm255_vm1, %v10434_v0  ;;  %304 = vst.msk [vmem:[#allocation2 + $0x257] sm:$0x7f] %vm255_vm1, %v10434_v0 }
  0x39   : > { %305 = vst.msk [vmem:[#allocation2 + $0x277] sm:$0x7f] %vm255_vm1, %v10434_v0  ;;  %306 = vst.msk [vmem:[#allocation2 + $0x297] sm:$0x7f] %vm255_vm1, %v10434_v0 }
  0x3a   : > { %307 = vst.msk [vmem:[#allocation2 + $0x2b7] sm:$0x7f] %vm255_vm1, %v10434_v0  ;;  %308 = vst.msk [vmem:[#allocation2 + $0x2d7] sm:$0x7f] %vm255_vm1, %v10434_v0 }
  0x3b   : > { %260 = vst.msk [vmem:[#allocation2 + $0x80] sm:$0x7f] %vm255_vm1, %v10434_v0  ;;  %256 = vst.msk [vmem:[#allocation2] sm:$0x7f] %vm255_vm1, %v10434_v0 }
  0x3c   : > { %257 = vst.msk [vmem:[#allocation2 + $0x20] sm:$0x7f] %vm255_vm1, %v10434_v0  ;;  %258 = vst.msk [vmem:[#allocation2 + $0x40] sm:$0x7f] %vm255_vm1, %v10434_v0 }
  0x3d   : > { %259 = vst.msk [vmem:[#allocation2 + $0x60] sm:$0x7f] %vm255_vm1, %v10434_v0  ;;  %261 = vst.msk [vmem:[#allocation2 + $0xa0] sm:$0x7f] %vm255_vm1, %v10434_v0 }
  0x3e   : > { %262 = vst.msk [vmem:[#allocation2 + $0xc0] sm:$0x7f] %vm255_vm1, %v10434_v0  ;;  %279 = vst.msk [vmem:[#allocation2 + $0x2e0] sm:$0x7f] %vm255_vm1, %v10434_v0 }
  0x3f   : > { %280 = vst.msk [vmem:[#allocation2 + $0x300] sm:$0x7f] %vm255_vm1, %v10434_v0  ;;  %281 = vst.msk [vmem:[#allocation2 + $0x320] sm:$0x7f] %vm255_vm1, %v10434_v0 }
  0x40   : > { %282 = vst.msk [vmem:[#allocation2 + $0x340] sm:$0x7f] %vm255_vm1, %v10434_v0  ;;  %283 = vst.msk [vmem:[#allocation2 + $0x360] sm:$0x7f] %vm255_vm1, %v10434_v0 }
  0x41   : > { %284 = vst.msk [vmem:[#allocation2 + $0x380] sm:$0x7f] %vm255_vm1, %v10434_v0  ;;  %285 = vst.msk [vmem:[#allocation2 + $0x3a0] sm:$0x7f] %vm255_vm1, %v10434_v0 }
  0x42   : > { %217 = vst.msk [vmem:[#allocation2 + $0x98] sm:$0x3f] %vm200_vm2, %v10434_v0  ;;  %201 = vst.msk [vmem:[#allocation2 + $0x18] sm:$0x3f] %vm200_vm2, %v10434_v0  ;;  %v446_v10 = vld [vmem:[#allocation2 + $0x84] sm:$0xff] }
  0x43   : > { %205 = vst.msk [vmem:[#allocation2 + $0x38] sm:$0x3f] %vm200_vm2, %v10434_v0  ;;  %209 = vst.msk [vmem:[#allocation2 + $0x58] sm:$0x3f] %vm200_vm2, %v10434_v0  ;;  %510 = vrot.lane.b32.xlu0 %v446_v10, %s6854_s6  ;;  %v343_v10 = vld [vmem:[%s7200_s5 + $0xd8] sm:$0xff] }
  0x44   : > { %213 = vst.msk [vmem:[#allocation2 + $0x78] sm:$0x3f] %vm200_vm2, %v10434_v0  ;;  %221 = vst.msk [vmem:[#allocation2 + $0xb8] sm:$0x3f] %vm200_vm2, %v10434_v0  ;;  %v448_v22 = vld [vmem:[#allocation2 + $0xa4] sm:$0xff] }
  0x45   : > { %225 = vst.msk [vmem:[#allocation2 + $0xd8] sm:$0x3f] %vm200_vm2, %v10434_v0  ;;  %230 = vst.msk [vmem:[#allocation2 + $0x2f8] sm:$0x3f] %vm200_vm2, %v10434_v0  ;;  %v450_v23 = vld [vmem:[#allocation2 + $0xc4] sm:$0xff]  ;;  %514 = vrot.lane.b32.xlu1 %v448_v22, %s6854_s6 }
  0x46   : > { %234 = vst.msk [vmem:[#allocation2 + $0x318] sm:$0x3f] %vm200_vm2, %v10434_v0  ;;  %238 = vst.msk [vmem:[#allocation2 + $0x338] sm:$0x3f] %vm200_vm2, %v10434_v0 }
  0x47   : > { %242 = vst.msk [vmem:[#allocation2 + $0x358] sm:$0x3f] %vm200_vm2, %v10434_v0  ;;  %246 = vst.msk [vmem:[#allocation2 + $0x378] sm:$0x3f] %vm200_vm2, %v10434_v0  ;;  %518 = vrot.lane.b32.xlu0 %v450_v23, %s6854_s6 }
  0x48   : > { %250 = vst.msk [vmem:[#allocation2 + $0x398] sm:$0x3f] %vm200_vm2, %v10434_v0  ;;  %254 = vst.msk [vmem:[#allocation2 + $0x3b8] sm:$0x3f] %vm200_vm2, %v10434_v0  ;;  %vm3310_vm2 = vcmask 523744  }
  0x49   : > { %290 = vst.msk [vmem:[#allocation2 + $0x97] sm:$0x7f] %vm255_vm1, %v10434_v0  ;;  %286 = vst.msk [vmem:[#allocation2 + $0x17] sm:$0x7f] %vm255_vm1, %v10434_v0 }
  0x4a   : > { %287 = vst.msk [vmem:[#allocation2 + $0x37] sm:$0x7f] %vm255_vm1, %v10434_v0  ;;  %288 = vst.msk [vmem:[#allocation2 + $0x57] sm:$0x7f] %vm255_vm1, %v10434_v0 }
  0x4b   : > { %289 = vst.msk [vmem:[#allocation2 + $0x77] sm:$0x7f] %vm255_vm1, %v10434_v0  ;;  %291 = vst.msk [vmem:[#allocation2 + $0xb7] sm:$0x7f] %vm255_vm1, %v10434_v0 }
  0x4c   : > { %292 = vst.msk [vmem:[#allocation2 + $0xd7] sm:$0x7f] %vm255_vm1, %v10434_v0  ;;  %309 = vst.msk [vmem:[#allocation2 + $0x2f7] sm:$0x7f] %vm255_vm1, %v10434_v0 }
  0x4d   : > { %310 = vst.msk [vmem:[#allocation2 + $0x317] sm:$0x7f] %vm255_vm1, %v10434_v0  ;;  %311 = vst.msk [vmem:[#allocation2 + $0x337] sm:$0x7f] %vm255_vm1, %v10434_v0 }
  0x4e   : > { %312 = vst.msk [vmem:[#allocation2 + $0x357] sm:$0x7f] %vm255_vm1, %v10434_v0  ;;  %313 = vst.msk [vmem:[#allocation2 + $0x377] sm:$0x7f] %vm255_vm1, %v10434_v0 }
  0x4f   : > { %314 = vst.msk [vmem:[#allocation2 + $0x397] sm:$0x7f] %vm255_vm1, %v10434_v0  ;;  %315 = vst.msk [vmem:[#allocation2 + $0x3b7] sm:$0x7f] %vm255_vm1, %v10434_v0  ;;  %v643_v0 = vld [vmem:[#allocation2 + $0xc7] sm:$0xff]  ;;  %vm3117_vm1 = vcmask 490944  }
  0x50   : > { %349 = vst.msk [vmem:[#allocation2 + $0xe7] sm:$0xff] %vm196_vm0, %v316_v1  ;;  %350 = vst.msk [vmem:[#allocation2 + $0xef] sm:$0xff] %vm196_vm0, %v317_v2 }
  0x51   : > { %351 = vst.msk [vmem:[#allocation2 + $0x107] sm:$0xff] %vm196_vm0, %v318_v3  ;;  %352 = vst.msk [vmem:[#allocation2 + $0x10f] sm:$0xff] %vm196_vm0, %v319_v4 }
  0x52   : > { %353 = vst.msk [vmem:[#allocation2 + $0x127] sm:$0xff] %vm196_vm0, %v320_v5  ;;  %354 = vst.msk [vmem:[#allocation2 + $0x12f] sm:$0xff] %vm196_vm0, %v321_v6 }
  0x53   : > { %355 = vst.msk [vmem:[#allocation2 + $0x147] sm:$0xff] %vm196_vm0, %v322_v11  ;;  %356 = vst.msk [vmem:[#allocation2 + $0x14f] sm:$0xff] %vm196_vm0, %v323_v12  ;;  %v342_v11 = vld [vmem:[%s7200_s5 + $0xd0] sm:$0xff]  ;;  %v345_v12 = vld [vmem:[%s7200_s5 + $0xe8] sm:$0xff] }
  0x54   : > { %357 = vst.msk [vmem:[#allocation2 + $0x167] sm:$0xff] %vm196_vm0, %v324_v13  ;;  %358 = vst.msk [vmem:[#allocation2 + $0x16f] sm:$0xff] %vm196_vm0, %v325_v14  ;;  %v344_v13 = vld [vmem:[%s7200_s5 + $0xe0] sm:$0xff] }
  0x55   : > { %359 = vst.msk [vmem:[#allocation2 + $0x187] sm:$0xff] %vm196_vm0, %v326_v15  ;;  %360 = vst.msk [vmem:[#allocation2 + $0x18f] sm:$0xff] %vm196_vm0, %v327_v16  ;;  %v347_v16 = vld [vmem:[%s7200_s5 + $0xf8] sm:$0xff] }
  0x56   : > { %361 = vst.msk [vmem:[#allocation2 + $0x1a7] sm:$0xff] %vm196_vm0, %v328_v17  ;;  %362 = vst.msk [vmem:[#allocation2 + $0x1af] sm:$0xff] %vm196_vm0, %v329_v18  ;;  %v346_v17 = vld [vmem:[%s7200_s5 + $0xf0] sm:$0xff] }
  0x57   : > { %363 = vst.msk [vmem:[#allocation2 + $0x1c7] sm:$0xff] %vm196_vm0, %v330_v19  ;;  %364 = vst.msk [vmem:[#allocation2 + $0x1cf] sm:$0xff] %vm196_vm0, %v331_v20  ;;  %v7250_v29 = vld [vmem:[#allocation2 + $0xec] sm:$0xff]  ;;  %v7252_v30 = vld [vmem:[#allocation2 + $0xe4] sm:$0xff] }
  0x58   : > { %365 = vst.msk [vmem:[#allocation2 + $0x1e7] sm:$0xff] %vm196_vm0, %v332_v21  ;;  %366 = vst.msk [vmem:[#allocation2 + $0x1ef] sm:$0xff] %vm196_vm0, %v333_v24  ;;  %524 = vrot.lane.b32.xlu1 %v7250_v29, %s6854_s6  ;;  %522 = vrot.lane.b32.xlu0 %v7252_v30, %s6854_s6  ;;  %v7260_v31 = vld [vmem:[#allocation2 + $0x10c] sm:$0xff]  ;;  %v7262_v32 = vld [vmem:[#allocation2 + $0x104] sm:$0xff] }
  0x59   : > { %367 = vst.msk [vmem:[#allocation2 + $0x207] sm:$0xff] %vm196_vm0, %v334_v25  ;;  %368 = vst.msk [vmem:[#allocation2 + $0x20f] sm:$0xff] %vm196_vm0, %v335_v26  ;;  %v7276_v37 = vld [vmem:[#allocation2 + $0x12c] sm:$0xff]  ;;  %v7278_v38 = vld [vmem:[#allocation2 + $0x124] sm:$0xff] }
  0x5a   : > { %369 = vst.msk [vmem:[#allocation2 + $0x227] sm:$0xff] %vm196_vm0, %v336_v27  ;;  %370 = vst.msk [vmem:[#allocation2 + $0x22f] sm:$0xff] %vm196_vm0, %v337_v28  ;;  %v7280_v39 = vld [vmem:[#allocation2 + $0xef] sm:$0xff]  ;;  %v7282_v40 = vld [vmem:[#allocation2 + $0xe7] sm:$0xff] }
  0x5b   : > { %371 = vst.msk [vmem:[#allocation2 + $0x247] sm:$0xff] %vm196_vm0, %v338_v33  ;;  %372 = vst.msk [vmem:[#allocation2 + $0x24f] sm:$0xff] %vm196_vm0, %v339_v34  ;;  %v7284_v41 = vld [vmem:[#allocation2 + $0x10f] sm:$0xff]  ;;  %v7286_v42 = vld [vmem:[#allocation2 + $0x107] sm:$0xff] }
  0x5c   : > { %373 = vst.msk [vmem:[#allocation2 + $0x267] sm:$0xff] %vm196_vm0, %v340_v35  ;;  %374 = vst.msk [vmem:[#allocation2 + $0x26f] sm:$0xff] %vm196_vm0, %v341_v36  ;;  %528 = vrot.lane.b32.xlu1 %v7260_v31, %s6854_s6  ;;  %526 = vrot.lane.b32.xlu0 %v7262_v32, %s6854_s6  ;;  %v7288_v43 = vld [vmem:[#allocation2 + $0x12f] sm:$0xff]  ;;  %v7290_v44 = vld [vmem:[#allocation2 + $0x127] sm:$0xff] }
  0x5d   : > { %416 = vst.msk [vmem:[#allocation3 + $0x18] sm:$0xff] %vm196_vm0, %v7284_v41  ;;  %414 = vst.msk [vmem:[#allocation3 + $0x8] sm:$0xff] %vm196_vm0, %v7280_v39  ;;  %v7298_v45 = vld [vmem:[#allocation2 + $0x14f] sm:$0xff]  ;;  %v7300_v46 = vld [vmem:[#allocation2 + $0x147] sm:$0xff] }
  0x5e   : > { %413 = vst.msk [vmem:[#allocation3] sm:$0xff] %vm196_vm0, %v7282_v40  ;;  %v7302_v47 = vld [vmem:[#allocation2 + $0x16f] sm:$0xff]  ;;  %418 = vst.msk [vmem:[#allocation3 + $0x28] sm:$0xff] %vm196_vm0, %v7288_v43  ;;  %v7314_v48 = vld [vmem:[#allocation2 + $0x167] sm:$0xff] }
  0x5f   : > { %415 = vst.msk [vmem:[#allocation3 + $0x10] sm:$0xff] %vm196_vm0, %v7286_v42  ;;  %417 = vst.msk [vmem:[#allocation3 + $0x20] sm:$0xff] %vm196_vm0, %v7290_v44  ;;  %v7316_v49 = vld [vmem:[#allocation2 + $0x18f] sm:$0xff]  ;;  %v7326_v51 = vld [vmem:[#allocation2 + $0x144] sm:$0xff] }
  0x60   : > { %532 = vrot.lane.b32.xlu1 %v7276_v37, %s6854_s6  ;;  %530 = vrot.lane.b32.xlu0 %v7278_v38, %s6854_s6  ;;  %420 = vst.msk [vmem:[#allocation3 + $0x38] sm:$0xff] %vm196_vm0, %v7298_v45  ;;  %419 = vst.msk [vmem:[#allocation3 + $0x30] sm:$0xff] %vm196_vm0, %v7300_v46  ;;  %v7324_v50 = vld [vmem:[#allocation2 + $0x14c] sm:$0xff]  ;;  %v7340_v56 = vld [vmem:[#allocation2 + $0x164] sm:$0xff] }
  0x61   : > { %422 = vst.msk [vmem:[#allocation3 + $0x48] sm:$0xff] %vm196_vm0, %v7302_v47  ;;  %421 = vst.msk [vmem:[#allocation3 + $0x40] sm:$0xff] %vm196_vm0, %v7314_v48  ;;  %v7332_v52 = vld [vmem:[#allocation2 + $0x187] sm:$0xff]  ;;  %v7334_v53 = vld [vmem:[#allocation2 + $0x1af] sm:$0xff] }
  0x62   : > { %424 = vst.msk [vmem:[#allocation3 + $0x58] sm:$0xff] %vm196_vm0, %v7316_v49  ;;  %v7336_v54 = vld [vmem:[#allocation2 + $0x1a7] sm:$0xff]  ;;  %v7342_v57 = vld [vmem:[#allocation2 + $0x1cf] sm:$0xff]  ;;  %423 = vst.msk [vmem:[#allocation3 + $0x50] sm:$0xff] %vm196_vm0, %v7332_v52 }
  0x63   : > { %v7338_v55 = vld [vmem:[#allocation2 + $0x16c] sm:$0xff]  ;;  %426 = vst.msk [vmem:[#allocation3 + $0x68] sm:$0xff] %vm196_vm0, %v7334_v53  ;;  %425 = vst.msk [vmem:[#allocation3 + $0x60] sm:$0xff] %vm196_vm0, %v7336_v54  ;;  %v7406_v7 = vld [vmem:[#allocation2 + $0x184] sm:$0xff] }
  0x64   : > { %v7344_v58 = vld [vmem:[#allocation2 + $0x1c7] sm:$0xff]  ;;  %v7346_v59 = vld [vmem:[#allocation2 + $0x1ef] sm:$0xff]  ;;  %536 = vrot.lane.b32.xlu1 %v7324_v50, %s6854_s6  ;;  %534 = vrot.lane.b32.xlu0 %v7326_v51, %s6854_s6  ;;  %428 = vst.msk [vmem:[#allocation3 + $0x78] sm:$0xff] %vm196_vm0, %v7342_v57  ;;  %376 = vst.msk [vmem:[#allocation2 + $0x28f] sm:$0xff] %vm196_vm0, %v343_v10 }
  0x65   : > { %v7358_v60 = vld [vmem:[#allocation2 + $0x1e7] sm:$0xff]  ;;  %v7360_v61 = vld [vmem:[#allocation2 + $0x20f] sm:$0xff]  ;;  %427 = vst.msk [vmem:[#allocation3 + $0x70] sm:$0xff] %vm196_vm0, %v7344_v58  ;;  %430 = vst.msk [vmem:[#allocation3 + $0x88] sm:$0xff] %vm196_vm0, %v7346_v59 }
  0x66   : > { %v7362_v62 = vld [vmem:[#allocation2 + $0x207] sm:$0xff]  ;;  %v7370_v63 = vld [vmem:[#allocation2 + $0x22f] sm:$0xff]  ;;  %429 = vst.msk [vmem:[#allocation3 + $0x80] sm:$0xff] %vm196_vm0, %v7358_v60  ;;  %432 = vst.msk [vmem:[#allocation3 + $0x98] sm:$0xff] %vm196_vm0, %v7360_v61 }
  0x67   : > { %v7372_v1 = vld [vmem:[#allocation2 + $0x227] sm:$0xff]  ;;  %v7374_v2 = vld [vmem:[#allocation2 + $0x24f] sm:$0xff]  ;;  %431 = vst.msk [vmem:[#allocation3 + $0x90] sm:$0xff] %vm196_vm0, %v7362_v62  ;;  %434 = vst.msk [vmem:[#allocation3 + $0xa8] sm:$0xff] %vm196_vm0, %v7370_v63 }
  0x68   : > { %v7382_v3 = vld [vmem:[#allocation2 + $0x247] sm:$0xff]  ;;  %v7384_v4 = vld [vmem:[#allocation2 + $0x26f] sm:$0xff]  ;;  %433 = vst.msk [vmem:[#allocation3 + $0xa0] sm:$0xff] %vm196_vm0, %v7372_v1  ;;  %436 = vst.msk [vmem:[#allocation3 + $0xb8] sm:$0xff] %vm196_vm0, %v7374_v2  ;;  %540 = vrot.lane.b32.xlu1 %v7338_v55, %s6854_s6  ;;  %538 = vrot.lane.b32.xlu0 %v7340_v56, %s6854_s6 }
  0x69   : > { %v7386_v5 = vld [vmem:[#allocation2 + $0x267] sm:$0xff]  ;;  %435 = vst.msk [vmem:[#allocation3 + $0xb0] sm:$0xff] %vm196_vm0, %v7382_v3  ;;  %438 = vst.msk [vmem:[#allocation3 + $0xc8] sm:$0xff] %vm196_vm0, %v7384_v4 }
  0x6a   : > { %437 = vst.msk [vmem:[#allocation3 + $0xc0] sm:$0xff] %vm196_vm0, %v7386_v5  ;;  %v7404_v6 = vld [vmem:[#allocation2 + $0x18c] sm:$0xff]  ;;  %v7414_v9 = vld [vmem:[#allocation2 + $0x1a4] sm:$0xff]  ;;  %375 = vst.msk [vmem:[#allocation2 + $0x287] sm:$0xff] %vm196_vm0, %v342_v11 }
  0x6b   : > { %v7412_v8 = vld [vmem:[#allocation2 + $0x1ac] sm:$0xff]  ;;  %378 = vst.msk [vmem:[#allocation2 + $0x2af] sm:$0xff] %vm196_vm0, %v345_v12  ;;  %377 = vst.msk [vmem:[#allocation2 + $0x2a7] sm:$0xff] %vm196_vm0, %v344_v13  ;;  %v7428_v14 = vld [vmem:[#allocation2 + $0x1c4] sm:$0xff] }
  0x6c   : > { %544 = vrot.lane.b32.xlu1 %v7404_v6, %s6854_s6  ;;  %542 = vrot.lane.b32.xlu0 %v7406_v7, %s6854_s6  ;;  %v7430_v15 = vld [vmem:[#allocation2 + $0x1cc] sm:$0xff]  ;;  %380 = vst.msk [vmem:[#allocation2 + $0x2cf] sm:$0xff] %vm196_vm0, %v347_v16  ;;  %379 = vst.msk [vmem:[#allocation2 + $0x2c7] sm:$0xff] %vm196_vm0, %v346_v17  ;;  %v7442_v19 = vld [vmem:[#allocation2 + $0x1e4] sm:$0xff] }
  0x6d   : > { %v7440_v18 = vld [vmem:[#allocation2 + $0x1ec] sm:$0xff]  ;;  %v7466_v25 = vld [vmem:[#allocation2 + $0x204] sm:$0xff] }
  0x6e   : > { %v7444_v20 = vld [vmem:[#allocation2 + $0x28f] sm:$0xff]  ;;  %v7482_v33 = vld [vmem:[#allocation2 + $0x224] sm:$0xff] }
  0x6f   : > { %440 = vst.msk [vmem:[#allocation3 + $0xd8] sm:$0xff] %vm196_vm0, %v7444_v20  ;;  %v7464_v24 = vld [vmem:[#allocation2 + $0x20c] sm:$0xff]  ;;  %v7490_v35 = vld [vmem:[#allocation2 + $0x244] sm:$0xff] }
  0x70   : > { %548 = vrot.lane.b32.xlu1 %v7412_v8, %s6854_s6  ;;  %546 = vrot.lane.b32.xlu0 %v7414_v9, %s6854_s6  ;;  %v7480_v28 = vld [vmem:[#allocation2 + $0x22c] sm:$0xff]  ;;  %v7498_v10 = vld [vmem:[#allocation2 + $0x264] sm:$0xff] }
  0x71   : > { %v7446_v21 = vld [vmem:[#allocation2 + $0x287] sm:$0xff]  ;;  %v640_v11 = vld [vmem:[#allocation2 + $0x8f] sm:$0xff] }
  0x72   : > { %v7448_v22 = vld [vmem:[#allocation2 + $0x2af] sm:$0xff]  ;;  %439 = vst.msk [vmem:[#allocation3 + $0xd0] sm:$0xff] %vm196_vm0, %v7446_v21  ;;  %v7456_v23 = vld [vmem:[#allocation2 + $0x2a7] sm:$0xff] }
  0x73   : > { %10461 = vst [vmem:[#allocation7_spill] sm:$0xff] %v7448_v22  ;;  %442 = vst.msk [vmem:[#allocation3 + $0xe8] sm:$0xff] %vm196_vm0, %v7448_v22  ;;  %v7468_v26 = vld [vmem:[#allocation2 + $0x2cf] sm:$0xff]  ;;  %v7470_v27 = vld [vmem:[#allocation2 + $0x2c7] sm:$0xff] }
  0x74   : > { %552 = vrot.lane.b32.xlu1 %v7430_v15, %s6854_s6  ;;  %550 = vrot.lane.b32.xlu0 %v7428_v14, %s6854_s6  ;;  %10462 = vst [vmem:[#allocation8_spill] sm:$0xff] %v7456_v23  ;;  %441 = vst.msk [vmem:[#allocation3 + $0xe0] sm:$0xff] %vm196_vm0, %v7456_v23  ;;  %v7488_v34 = vld [vmem:[#allocation2 + $0x24c] sm:$0xff] }
  0x75   : > { %10463 = vst [vmem:[#allocation9_spill] sm:$0xff] %v7468_v26  ;;  %10464 = vst [vmem:[#allocation10_spill] sm:$0xff] %v7470_v27  ;;  %v7496_v36 = vld [vmem:[#allocation2 + $0x26c] sm:$0xff] }
  0x76   : > { %444 = vst.msk [vmem:[#allocation3 + $0xf8] sm:$0xff] %vm196_vm0, %v7468_v26  ;;  %443 = vst.msk [vmem:[#allocation3 + $0xf0] sm:$0xff] %vm196_vm0, %v7470_v27  ;;  %v639_v12 = vld [vmem:[#allocation2 + $0x87] sm:$0xff]  ;;  %v642_v13 = vld [vmem:[#allocation2 + $0xaf] sm:$0xff] }
  0x77   : > { %v641_v16 = vld [vmem:[#allocation2 + $0xa7] sm:$0xff]  ;;  %v644_v17 = vld [vmem:[#allocation2 + $0xcf] sm:$0xff] }
  0x78   : > { %556 = vrot.lane.b32.xlu1 %v7440_v18, %s6854_s6  ;;  %554 = vrot.lane.b32.xlu0 %v7442_v19, %s6854_s6  ;;  %v836_v23 = vld [vmem:[#allocation2 + $0xca] sm:$0xff] }
  0x7c   : > { %560 = vrot.lane.b32.xlu1 %v7464_v24, %s6854_s6  ;;  %558 = vrot.lane.b32.xlu0 %v7466_v25, %s6854_s6 }
  0x80   : > { %564 = vrot.lane.b32.xlu1 %v7480_v28, %s6854_s6  ;;  %562 = vrot.lane.b32.xlu0 %v7482_v33, %s6854_s6 }
  0x84   : > { %568 = vrot.lane.b32.xlu1 %v7488_v34, %s6854_s6  ;;  %566 = vrot.lane.b32.xlu0 %v7490_v35, %s6854_s6 }
  0x88   : > { %572 = vrot.lane.b32.xlu1 %v7496_v36, %s6854_s6  ;;  %570 = vrot.lane.b32.xlu0 %v7498_v10, %s6854_s6  ;;  %s6870_s6 = smov 68  }
  0x8c   : > { %705 = vrot.lane.b32.xlu1 %v640_v11, %s6855_s7  ;;  %703 = vrot.lane.b32.xlu0 %v639_v12, %s6855_s7 }
  0x90   : > { %709 = vrot.lane.b32.xlu1 %v642_v13, %s6855_s7  ;;  %707 = vrot.lane.b32.xlu0 %v641_v16, %s6855_s7 }
  0x94   : > { %713 = vrot.lane.b32.xlu1 %v644_v17, %s6855_s7  ;;  %711 = vrot.lane.b32.xlu0 %v643_v0, %s6855_s7  ;;  %v517_v0 = vpop.permute.xlu1 %516 }
  0x95   : > { %610 = vst.msk [vmem:[#allocation3 + $0x18] sm:$0xff] %vm606_vm3, %v517_v0  ;;  %v833_v0 = vld [vmem:[#allocation2 + $0x92] sm:$0xff] }
  0x98   : > { %717 = vrot.lane.b32.xlu1 %v7280_v39, %s6855_s7  ;;  %715 = vrot.lane.b32.xlu0 %v7282_v40, %s6855_s7  ;;  %v513_v11 = vpop.permute.xlu0 %512 }
  0x99   : > { %608 = vst.msk [vmem:[#allocation3 + $0x8] sm:$0xff] %vm606_vm3, %v513_v11  ;;  %v832_v11 = vld [vmem:[#allocation2 + $0x8a] sm:$0xff] }
  0x9a   : > { %v521_v12 = vpop.permute.xlu1 %520 }
  0x9b   : > { %612 = vst.msk [vmem:[#allocation3 + $0x28] sm:$0xff] %vm606_vm3, %v521_v12 }
  0x9c   : > { %721 = vrot.lane.b32.xlu1 %v7284_v41, %s6855_s7  ;;  %719 = vrot.lane.b32.xlu0 %v7286_v42, %s6855_s7 }
  0xa0   : > { %725 = vrot.lane.b32.xlu1 %v7288_v43, %s6855_s7  ;;  %723 = vrot.lane.b32.xlu0 %v7290_v44, %s6855_s7 }
  0xa4   : > { %729 = vrot.lane.b32.xlu1 %v7298_v45, %s6855_s7  ;;  %727 = vrot.lane.b32.xlu0 %v7300_v46, %s6855_s7 }
  0xa8   : > { %733 = vrot.lane.b32.xlu1 %v7302_v47, %s6855_s7  ;;  %731 = vrot.lane.b32.xlu0 %v7314_v48, %s6855_s7 }
  0xac   : > { %737 = vrot.lane.b32.xlu1 %v7316_v49, %s6855_s7  ;;  %735 = vrot.lane.b32.xlu0 %v7332_v52, %s6855_s7 }
  0xb0   : > { %741 = vrot.lane.b32.xlu1 %v7334_v53, %s6855_s7  ;;  %739 = vrot.lane.b32.xlu0 %v7336_v54, %s6855_s7 }
  0xb4   : > { %745 = vrot.lane.b32.xlu1 %v7342_v57, %s6855_s7  ;;  %743 = vrot.lane.b32.xlu0 %v7344_v58, %s6855_s7 }
  0xb5   : > { %v511_v13 = vpop.permute.xlu0 %510 }
  0xb6   : > { %607 = vst.msk [vmem:[#allocation3] sm:$0xff] %vm606_vm3, %v511_v13 }
  0xb7   : > { %v515_v16 = vpop.permute.xlu1 %514 }
  0xb8   : > { %749 = vrot.lane.b32.xlu1 %v7346_v59, %s6855_s7  ;;  %747 = vrot.lane.b32.xlu0 %v7358_v60, %s6855_s7  ;;  %609 = vst.msk [vmem:[#allocation3 + $0x10] sm:$0xff] %vm606_vm3, %v515_v16  ;;  %v835_v16 = vld [vmem:[#allocation2 + $0xb2] sm:$0xff] }
  0xb9   : > { %v519_v17 = vpop.permute.xlu0 %518 }
  0xba   : > { %611 = vst.msk [vmem:[#allocation3 + $0x20] sm:$0xff] %vm606_vm3, %v519_v17  ;;  %v834_v17 = vld [vmem:[#allocation2 + $0xaa] sm:$0xff] }
  0xbc   : > { %753 = vrot.lane.b32.xlu1 %v7360_v61, %s6855_s7  ;;  %751 = vrot.lane.b32.xlu0 %v7362_v62, %s6855_s7 }
  0xc0   : > { %757 = vrot.lane.b32.xlu1 %v7370_v63, %s6855_s7  ;;  %755 = vrot.lane.b32.xlu0 %v7372_v1, %s6855_s7 }
  0xc4   : > { %761 = vrot.lane.b32.xlu1 %v7374_v2, %s6855_s7  ;;  %759 = vrot.lane.b32.xlu0 %v7382_v3, %s6855_s7 }
  0xc8   : > { %765 = vrot.lane.b32.xlu1 %v7384_v4, %s6855_s7  ;;  %763 = vrot.lane.b32.xlu0 %v7386_v5, %s6855_s7 }
  0xca   : > { %v525_v12 = vpop.permute.xlu1 %524  ;;  %v523_v13 = vpop.permute.xlu0 %522 }
  0xcb   : > { %614 = vst.msk [vmem:[#allocation3 + $0x38] sm:$0xff] %vm606_vm3, %v525_v12  ;;  %613 = vst.msk [vmem:[#allocation3 + $0x30] sm:$0xff] %vm606_vm3, %v523_v13  ;;  %v837_v12 = vld [vmem:[#allocation2 + $0xd2] sm:$0xff] }
  0xcc   : > { %898 = vrot.lane.b32.xlu1 %v833_v0, %s6856_s8  ;;  %896 = vrot.lane.b32.xlu0 %v832_v11, %s6856_s8  ;;  %v7580_v0 = vld [vmem:[#allocation2 + $0xf2] sm:$0xff] }
  0xce   : > { %v529_v27 = vpop.permute.xlu1 %528  ;;  %v527_v26 = vpop.permute.xlu0 %526 }
  0xcf   : > { %616 = vst.msk [vmem:[#allocation3 + $0x48] sm:$0xff] %vm606_vm3, %v529_v27  ;;  %615 = vst.msk [vmem:[#allocation3 + $0x40] sm:$0xff] %vm606_vm3, %v527_v26  ;;  %v7582_v27 = vld [vmem:[#allocation2 + $0xea] sm:$0xff] }
  0xd0   : > { %902 = vrot.lane.b32.xlu1 %v835_v16, %s6856_s8  ;;  %900 = vrot.lane.b32.xlu0 %v834_v17, %s6856_s8  ;;  %v7592_v16 = vld [vmem:[#allocation2 + $0x10a] sm:$0xff] }
  0xd1   : > { %10466 = vst [vmem:[#allocation12_spill] sm:$0xff] %v7592_v16 }
  0xd2   : > { %v533_v13 = vpop.permute.xlu1 %532  ;;  %v531_v22 = vpop.permute.xlu0 %530 }
  0xd3   : > { %618 = vst.msk [vmem:[#allocation3 + $0x58] sm:$0xff] %vm606_vm3, %v533_v13  ;;  %617 = vst.msk [vmem:[#allocation3 + $0x50] sm:$0xff] %vm606_vm3, %v531_v22  ;;  %v7590_v22 = vld [vmem:[#allocation2 + $0x112] sm:$0xff]  ;;  %v7602_v13 = vld [vmem:[#allocation2 + $0x12a] sm:$0xff] }
  0xd4   : > { %906 = vrot.lane.b32.xlu1 %v837_v12, %s6856_s8  ;;  %904 = vrot.lane.b32.xlu0 %v836_v23, %s6856_s8  ;;  %10465 = vst [vmem:[#allocation11_spill] sm:$0xff] %v7590_v22  ;;  %v7600_v12 = vld [vmem:[#allocation2 + $0x132] sm:$0xff]  ;;  %10468 = vst [vmem:[#allocation14_spill] sm:$0xff] %v7602_v13 }
  0xd5   : > { %10467 = vst [vmem:[#allocation13_spill] sm:$0xff] %v7600_v12 }
  0xd6   : > { %v537_v26 = vpop.permute.xlu1 %536  ;;  %v535_v11 = vpop.permute.xlu0 %534 }
  0xd7   : > { %620 = vst.msk [vmem:[#allocation3 + $0x68] sm:$0xff] %vm606_vm3, %v537_v26  ;;  %619 = vst.msk [vmem:[#allocation3 + $0x60] sm:$0xff] %vm606_vm3, %v535_v11 }
  0xd8   : > { %910 = vrot.lane.b32.xlu1 %v7580_v0, %s6856_s8  ;;  %908 = vrot.lane.b32.xlu0 %v7582_v27, %s6856_s8 }
  0xda   : > { %v541_v23 = vpop.permute.xlu1 %540  ;;  %v539_v17 = vpop.permute.xlu0 %538 }
  0xdb   : > { %622 = vst.msk [vmem:[#allocation3 + $0x78] sm:$0xff] %vm606_vm3, %v541_v23  ;;  %621 = vst.msk [vmem:[#allocation3 + $0x70] sm:$0xff] %vm606_vm3, %v539_v17  ;;  %v7610_v23 = vld [vmem:[#allocation2 + $0x152] sm:$0xff]  ;;  %v7612_v17 = vld [vmem:[#allocation2 + $0x14a] sm:$0xff] }
  0xdc   : > { %914 = vrot.lane.b32.xlu1 %v7590_v22, %s6856_s8  ;;  %912 = vrot.lane.b32.xlu0 %v7592_v16, %s6856_s8  ;;  %10469 = vst [vmem:[#allocation15_spill] sm:$0xff] %v7610_v23  ;;  %10470 = vst [vmem:[#allocation16_spill] sm:$0xff] %v7612_v17 }
  0xde   : > { %v545_v26 = vpop.permute.xlu1 %544  ;;  %v543_v11 = vpop.permute.xlu0 %542 }
  0xdf   : > { %624 = vst.msk [vmem:[#allocation3 + $0x88] sm:$0xff] %vm606_vm3, %v545_v26  ;;  %623 = vst.msk [vmem:[#allocation3 + $0x80] sm:$0xff] %vm606_vm3, %v543_v11  ;;  %v7620_v26 = vld [vmem:[#allocation2 + $0x172] sm:$0xff]  ;;  %v7622_v11 = vld [vmem:[#allocation2 + $0x16a] sm:$0xff] }
  0xe0   : > { %918 = vrot.lane.b32.xlu1 %v7600_v12, %s6856_s8  ;;  %916 = vrot.lane.b32.xlu0 %v7602_v13, %s6856_s8  ;;  %10471 = vst [vmem:[#allocation17_spill] sm:$0xff] %v7620_v26  ;;  %10472 = vst [vmem:[#allocation18_spill] sm:$0xff] %v7622_v11 }
  0xe2   : > { %v549_v16 = vpop.permute.xlu1 %548  ;;  %v547_v22 = vpop.permute.xlu0 %546 }
  0xe3   : > { %626 = vst.msk [vmem:[#allocation3 + $0x98] sm:$0xff] %vm606_vm3, %v549_v16  ;;  %625 = vst.msk [vmem:[#allocation3 + $0x90] sm:$0xff] %vm606_vm3, %v547_v22  ;;  %v7630_v22 = vld [vmem:[#allocation2 + $0x192] sm:$0xff]  ;;  %v7632_v16 = vld [vmem:[#allocation2 + $0x18a] sm:$0xff] }
  0xe4   : > { %922 = vrot.lane.b32.xlu1 %v7610_v23, %s6856_s8  ;;  %920 = vrot.lane.b32.xlu0 %v7612_v17, %s6856_s8  ;;  %10473 = vst [vmem:[#allocation19_spill] sm:$0xff] %v7630_v22  ;;  %10474 = vst [vmem:[#allocation20_spill] sm:$0xff] %v7632_v16 }
  0xe6   : > { %v553_v13 = vpop.permute.xlu1 %552  ;;  %v551_v12 = vpop.permute.xlu0 %550 }
  0xe7   : > { %628 = vst.msk [vmem:[#allocation3 + $0xa8] sm:$0xff] %vm606_vm3, %v553_v13  ;;  %627 = vst.msk [vmem:[#allocation3 + $0xa0] sm:$0xff] %vm606_vm3, %v551_v12  ;;  %v7640_v12 = vld [vmem:[#allocation2 + $0x1b2] sm:$0xff]  ;;  %v7642_v13 = vld [vmem:[#allocation2 + $0x1aa] sm:$0xff] }
  0xe8   : > { %926 = vrot.lane.b32.xlu1 %v7620_v26, %s6856_s8  ;;  %924 = vrot.lane.b32.xlu0 %v7622_v11, %s6856_s8  ;;  %10475 = vst [vmem:[#allocation21_spill] sm:$0xff] %v7640_v12  ;;  %10476 = vst [vmem:[#allocation22_spill] sm:$0xff] %v7642_v13 }
  0xea   : > { %v557_v17 = vpop.permute.xlu1 %556  ;;  %v555_v23 = vpop.permute.xlu0 %554 }
  0xeb   : > { %630 = vst.msk [vmem:[#allocation3 + $0xb8] sm:$0xff] %vm606_vm3, %v557_v17  ;;  %629 = vst.msk [vmem:[#allocation3 + $0xb0] sm:$0xff] %vm606_vm3, %v555_v23  ;;  %v7650_v23 = vld [vmem:[#allocation2 + $0x1d2] sm:$0xff]  ;;  %v7652_v17 = vld [vmem:[#allocation2 + $0x1ca] sm:$0xff] }
  0xec   : > { %930 = vrot.lane.b32.xlu1 %v7630_v22, %s6856_s8  ;;  %928 = vrot.lane.b32.xlu0 %v7632_v16, %s6856_s8  ;;  %10477 = vst [vmem:[#allocation23_spill] sm:$0xff] %v7650_v23  ;;  %10478 = vst [vmem:[#allocation24_spill] sm:$0xff] %v7652_v17 }
  0xee   : > { %v561_v11 = vpop.permute.xlu1 %560  ;;  %v559_v26 = vpop.permute.xlu0 %558 }
  0xef   : > { %632 = vst.msk [vmem:[#allocation3 + $0xc8] sm:$0xff] %vm606_vm3, %v561_v11  ;;  %631 = vst.msk [vmem:[#allocation3 + $0xc0] sm:$0xff] %vm606_vm3, %v559_v26  ;;  %v7660_v26 = vld [vmem:[#allocation2 + $0x1f2] sm:$0xff]  ;;  %v7662_v11 = vld [vmem:[#allocation2 + $0x1ea] sm:$0xff] }
  0xf0   : > { %934 = vrot.lane.b32.xlu1 %v7640_v12, %s6856_s8  ;;  %932 = vrot.lane.b32.xlu0 %v7642_v13, %s6856_s8  ;;  %10479 = vst [vmem:[#allocation25_spill] sm:$0xff] %v7660_v26  ;;  %10480 = vst [vmem:[#allocation26_spill] sm:$0xff] %v7662_v11 }
  0xf2   : > { %v565_v16 = vpop.permute.xlu1 %564  ;;  %v563_v22 = vpop.permute.xlu0 %562 }
  0xf3   : > { %634 = vst.msk [vmem:[#allocation3 + $0xd8] sm:$0xff] %vm606_vm3, %v565_v16  ;;  %633 = vst.msk [vmem:[#allocation3 + $0xd0] sm:$0xff] %vm606_vm3, %v563_v22  ;;  %v7670_v22 = vld [vmem:[#allocation2 + $0x212] sm:$0xff]  ;;  %v7672_v16 = vld [vmem:[#allocation2 + $0x20a] sm:$0xff] }
  0xf4   : > { %938 = vrot.lane.b32.xlu1 %v7650_v23, %s6856_s8  ;;  %936 = vrot.lane.b32.xlu0 %v7652_v17, %s6856_s8  ;;  %10481 = vst [vmem:[#allocation27_spill] sm:$0xff] %v7670_v22  ;;  %10482 = vst [vmem:[#allocation28_spill] sm:$0xff] %v7672_v16 }
  0xf6   : > { %v569_v13 = vpop.permute.xlu1 %568  ;;  %v567_v12 = vpop.permute.xlu0 %566 }
  0xf7   : > { %636 = vst.msk [vmem:[#allocation3 + $0xe8] sm:$0xff] %vm606_vm3, %v569_v13  ;;  %635 = vst.msk [vmem:[#allocation3 + $0xe0] sm:$0xff] %vm606_vm3, %v567_v12  ;;  %v7680_v12 = vld [vmem:[#allocation2 + $0x232] sm:$0xff]  ;;  %v7682_v13 = vld [vmem:[#allocation2 + $0x22a] sm:$0xff] }
  0xf8   : > { %942 = vrot.lane.b32.xlu1 %v7660_v26, %s6856_s8  ;;  %940 = vrot.lane.b32.xlu0 %v7662_v11, %s6856_s8  ;;  %10483 = vst [vmem:[#allocation29_spill] sm:$0xff] %v7680_v12  ;;  %10484 = vst [vmem:[#allocation30_spill] sm:$0xff] %v7682_v13 }
  0xfa   : > { %v573_v17 = vpop.permute.xlu1 %572  ;;  %v571_v23 = vpop.permute.xlu0 %570 }
  0xfb   : > { %638 = vst.msk [vmem:[#allocation3 + $0xf8] sm:$0xff] %vm606_vm3, %v573_v17  ;;  %637 = vst.msk [vmem:[#allocation3 + $0xf0] sm:$0xff] %vm606_vm3, %v571_v23  ;;  %v7690_v23 = vld [vmem:[#allocation2 + $0x252] sm:$0xff]  ;;  %v7692_v17 = vld [vmem:[#allocation2 + $0x24a] sm:$0xff]  ;;  %vm3504_vm3 = vcmask 556544  }
  0xfc   : > { %946 = vrot.lane.b32.xlu1 %v7670_v22, %s6856_s8  ;;  %944 = vrot.lane.b32.xlu0 %v7672_v16, %s6856_s8 }
  0xfe   : > { %v706_v11 = vpop.permute.xlu1 %705  ;;  %v704_v26 = vpop.permute.xlu0 %703 }
  0xff   : > { %801 = vst.msk [vmem:[#allocation3 + $0x8] sm:$0xff] %vm799_vm4, %v706_v11  ;;  %800 = vst.msk [vmem:[#allocation3] sm:$0xff] %vm799_vm4, %v704_v26  ;;  %v7700_v26 = vld [vmem:[#allocation2 + $0x272] sm:$0xff]  ;;  %v7702_v11 = vld [vmem:[#allocation2 + $0x26a] sm:$0xff] }
 0x100   : > { %950 = vrot.lane.b32.xlu1 %v7680_v12, %s6856_s8  ;;  %948 = vrot.lane.b32.xlu0 %v7682_v13, %s6856_s8 }
 0x102   : > { %v710_v16 = vpop.permute.xlu1 %709  ;;  %v708_v22 = vpop.permute.xlu0 %707 }
 0x103   : > { %803 = vst.msk [vmem:[#allocation3 + $0x18] sm:$0xff] %vm799_vm4, %v710_v16  ;;  %802 = vst.msk [vmem:[#allocation3 + $0x10] sm:$0xff] %vm799_vm4, %v708_v22 }
 0x104   : > { %954 = vrot.lane.b32.xlu1 %v7690_v23, %s6856_s8  ;;  %952 = vrot.lane.b32.xlu0 %v7692_v17, %s6856_s8 }
 0x106   : > { %v714_v13 = vpop.permute.xlu1 %713  ;;  %v712_v12 = vpop.permute.xlu0 %711 }
 0x107   : > { %805 = vst.msk [vmem:[#allocation3 + $0x28] sm:$0xff] %vm799_vm4, %v714_v13  ;;  %804 = vst.msk [vmem:[#allocation3 + $0x20] sm:$0xff] %vm799_vm4, %v712_v12 }
 0x108   : > { %958 = vrot.lane.b32.xlu1 %v7700_v26, %s6856_s8  ;;  %956 = vrot.lane.b32.xlu0 %v7702_v11, %s6856_s8  ;;  %s6871_s8 = smov 72  }
 0x10a   : > { %v718_v22 = vpop.permute.xlu1 %717  ;;  %v716_v16 = vpop.permute.xlu0 %715 }
 0x10b   : > { %807 = vst.msk [vmem:[#allocation3 + $0x38] sm:$0xff] %vm799_vm4, %v718_v22  ;;  %806 = vst.msk [vmem:[#allocation3 + $0x30] sm:$0xff] %vm799_vm4, %v716_v16 }
 0x10c   : > { %1091 = vrot.lane.b32.xlu1 %v7250_v29, %s6857_s9  ;;  %1089 = vrot.lane.b32.xlu0 %v7252_v30, %s6857_s9 }
 0x10e   : > { %v722_v12 = vpop.permute.xlu1 %721  ;;  %v720_v13 = vpop.permute.xlu0 %719 }
 0x10f   : > { %809 = vst.msk [vmem:[#allocation3 + $0x48] sm:$0xff] %vm799_vm4, %v722_v12  ;;  %808 = vst.msk [vmem:[#allocation3 + $0x40] sm:$0xff] %vm799_vm4, %v720_v13 }
 0x110   : > { %1095 = vrot.lane.b32.xlu1 %v7260_v31, %s6857_s9  ;;  %1093 = vrot.lane.b32.xlu0 %v7262_v32, %s6857_s9 }
 0x112   : > { %v726_v22 = vpop.permute.xlu1 %725  ;;  %v724_v16 = vpop.permute.xlu0 %723 }
 0x113   : > { %811 = vst.msk [vmem:[#allocation3 + $0x58] sm:$0xff] %vm799_vm4, %v726_v22  ;;  %810 = vst.msk [vmem:[#allocation3 + $0x50] sm:$0xff] %vm799_vm4, %v724_v16  ;;  %v7808_v22 = vld [vmem:[#allocation2 + $0x2cc] sm:$0xff]  ;;  %v7810_v16 = vld [vmem:[#allocation2 + $0x2c4] sm:$0xff] }
 0x114   : > { %1099 = vrot.lane.b32.xlu1 %v7276_v37, %s6857_s9  ;;  %1097 = vrot.lane.b32.xlu0 %v7278_v38, %s6857_s9 }
 0x116   : > { %v730_v29 = vpop.permute.xlu1 %729  ;;  %v728_v30 = vpop.permute.xlu0 %727 }
 0x117   : > { %813 = vst.msk [vmem:[#allocation3 + $0x68] sm:$0xff] %vm799_vm4, %v730_v29  ;;  %812 = vst.msk [vmem:[#allocation3 + $0x60] sm:$0xff] %vm799_vm4, %v728_v30 }
 0x118   : > { %1103 = vrot.lane.b32.xlu1 %v7324_v50, %s6857_s9  ;;  %1101 = vrot.lane.b32.xlu0 %v7326_v51, %s6857_s9 }
 0x11a   : > { %v734_v31 = vpop.permute.xlu1 %733  ;;  %v732_v32 = vpop.permute.xlu0 %731 }
 0x11b   : > { %815 = vst.msk [vmem:[#allocation3 + $0x78] sm:$0xff] %vm799_vm4, %v734_v31  ;;  %814 = vst.msk [vmem:[#allocation3 + $0x70] sm:$0xff] %vm799_vm4, %v732_v32 }
 0x11c   : > { %1107 = vrot.lane.b32.xlu1 %v7338_v55, %s6857_s9  ;;  %1105 = vrot.lane.b32.xlu0 %v7340_v56, %s6857_s9 }
 0x11e   : > { %v738_v37 = vpop.permute.xlu1 %737  ;;  %v736_v38 = vpop.permute.xlu0 %735 }
 0x11f   : > { %817 = vst.msk [vmem:[#allocation3 + $0x88] sm:$0xff] %vm799_vm4, %v738_v37  ;;  %816 = vst.msk [vmem:[#allocation3 + $0x80] sm:$0xff] %vm799_vm4, %v736_v38 }
 0x120   : > { %1111 = vrot.lane.b32.xlu1 %v7404_v6, %s6857_s9  ;;  %1109 = vrot.lane.b32.xlu0 %v7406_v7, %s6857_s9 }
 0x122   : > { %v742_v50 = vpop.permute.xlu1 %741  ;;  %v740_v51 = vpop.permute.xlu0 %739 }
 0x123   : > { %819 = vst.msk [vmem:[#allocation3 + $0x98] sm:$0xff] %vm799_vm4, %v742_v50  ;;  %818 = vst.msk [vmem:[#allocation3 + $0x90] sm:$0xff] %vm799_vm4, %v740_v51 }
 0x124   : > { %1115 = vrot.lane.b32.xlu1 %v7412_v8, %s6857_s9  ;;  %1113 = vrot.lane.b32.xlu0 %v7414_v9, %s6857_s9 }
 0x126   : > { %v746_v55 = vpop.permute.xlu1 %745  ;;  %v744_v56 = vpop.permute.xlu0 %743 }
 0x127   : > { %821 = vst.msk [vmem:[#allocation3 + $0xa8] sm:$0xff] %vm799_vm4, %v746_v55  ;;  %820 = vst.msk [vmem:[#allocation3 + $0xa0] sm:$0xff] %vm799_vm4, %v744_v56 }
 0x128   : > { %1119 = vrot.lane.b32.xlu1 %v7430_v15, %s6857_s9  ;;  %1117 = vrot.lane.b32.xlu0 %v7428_v14, %s6857_s9 }
 0x12a   : > { %v750_v6 = vpop.permute.xlu1 %749  ;;  %v748_v7 = vpop.permute.xlu0 %747 }
 0x12b   : > { %823 = vst.msk [vmem:[#allocation3 + $0xb8] sm:$0xff] %vm799_vm4, %v750_v6  ;;  %822 = vst.msk [vmem:[#allocation3 + $0xb0] sm:$0xff] %vm799_vm4, %v748_v7 }
 0x12c   : > { %1123 = vrot.lane.b32.xlu1 %v7440_v18, %s6857_s9  ;;  %1121 = vrot.lane.b32.xlu0 %v7442_v19, %s6857_s9 }
 0x12e   : > { %v754_v8 = vpop.permute.xlu1 %753  ;;  %v752_v9 = vpop.permute.xlu0 %751 }
 0x12f   : > { %825 = vst.msk [vmem:[#allocation3 + $0xc8] sm:$0xff] %vm799_vm4, %v754_v8  ;;  %824 = vst.msk [vmem:[#allocation3 + $0xc0] sm:$0xff] %vm799_vm4, %v752_v9 }
 0x130   : > { %1127 = vrot.lane.b32.xlu1 %v7464_v24, %s6857_s9  ;;  %1125 = vrot.lane.b32.xlu0 %v7466_v25, %s6857_s9 }
 0x132   : > { %v758_v14 = vpop.permute.xlu1 %757  ;;  %v756_v15 = vpop.permute.xlu0 %755 }
 0x133   : > { %827 = vst.msk [vmem:[#allocation3 + $0xd8] sm:$0xff] %vm799_vm4, %v758_v14  ;;  %826 = vst.msk [vmem:[#allocation3 + $0xd0] sm:$0xff] %vm799_vm4, %v756_v15  ;;  %v10489_v14 = vld [vmem:[#allocation11_spill] sm:$0xff]  ;;  %v10490_v15 = vld [vmem:[#allocation12_spill] sm:$0xff] }
 0x134   : > { %1131 = vrot.lane.b32.xlu1 %v7480_v28, %s6857_s9  ;;  %1129 = vrot.lane.b32.xlu0 %v7482_v33, %s6857_s9  ;;  %v7788_v28 = vld [vmem:[#allocation2 + $0x28c] sm:$0xff]  ;;  %v7790_v33 = vld [vmem:[#allocation2 + $0x284] sm:$0xff] }
 0x136   : > { %v762_v18 = vpop.permute.xlu1 %761  ;;  %v760_v19 = vpop.permute.xlu0 %759 }
 0x137   : > { %829 = vst.msk [vmem:[#allocation3 + $0xe8] sm:$0xff] %vm799_vm4, %v762_v18  ;;  %828 = vst.msk [vmem:[#allocation3 + $0xe0] sm:$0xff] %vm799_vm4, %v760_v19 }
 0x138   : > { %1135 = vrot.lane.b32.xlu1 %v7488_v34, %s6857_s9  ;;  %1133 = vrot.lane.b32.xlu0 %v7490_v35, %s6857_s9  ;;  %v7798_v35 = vld [vmem:[#allocation2 + $0x2ac] sm:$0xff] }
 0x13a   : > { %v766_v24 = vpop.permute.xlu1 %765  ;;  %v764_v25 = vpop.permute.xlu0 %763 }
 0x13b   : > { %831 = vst.msk [vmem:[#allocation3 + $0xf8] sm:$0xff] %vm799_vm4, %v766_v24  ;;  %830 = vst.msk [vmem:[#allocation3 + $0xf0] sm:$0xff] %vm799_vm4, %v764_v25  ;;  %vm3697_vm4 = vcmask 589344  }
 0x13c   : > { %1139 = vrot.lane.b32.xlu1 %v7496_v36, %s6857_s9  ;;  %1137 = vrot.lane.b32.xlu0 %v7498_v10, %s6857_s9  ;;  %v7800_v36 = vld [vmem:[#allocation2 + $0x2a4] sm:$0xff] }
 0x13e   : > { %v899_v34 = vpop.permute.xlu1 %898  ;;  %v897_v12 = vpop.permute.xlu0 %896 }
 0x13f   : > { %994 = vst.msk [vmem:[#allocation3 + $0x8] sm:$0xff] %vm992_vm5, %v899_v34  ;;  %993 = vst.msk [vmem:[#allocation3] sm:$0xff] %vm992_vm5, %v897_v12  ;;  %v10493_v34 = vld [vmem:[#allocation15_spill] sm:$0xff]  ;;  %v10494_v12 = vld [vmem:[#allocation16_spill] sm:$0xff] }
 0x140   : > { %1143 = vrot.lane.b32.xlu1 %v7788_v28, %s6857_s9  ;;  %1141 = vrot.lane.b32.xlu0 %v7790_v33, %s6857_s9 }
 0x142   : > { %v903_v10 = vpop.permute.xlu1 %902  ;;  %v901_v13 = vpop.permute.xlu0 %900 }
 0x143   : > { %996 = vst.msk [vmem:[#allocation3 + $0x18] sm:$0xff] %vm992_vm5, %v903_v10  ;;  %995 = vst.msk [vmem:[#allocation3 + $0x10] sm:$0xff] %vm992_vm5, %v901_v13 }
 0x144   : > { %1147 = vrot.lane.b32.xlu1 %v7798_v35, %s6857_s9  ;;  %1145 = vrot.lane.b32.xlu0 %v7800_v36, %s6857_s9 }
 0x146   : > { %v907_v29 = vpop.permute.xlu1 %906  ;;  %v905_v30 = vpop.permute.xlu0 %904 }
 0x147   : > { %998 = vst.msk [vmem:[#allocation3 + $0x28] sm:$0xff] %vm992_vm5, %v907_v29  ;;  %997 = vst.msk [vmem:[#allocation3 + $0x20] sm:$0xff] %vm992_vm5, %v905_v30  ;;  %v10495_v29 = vld [vmem:[#allocation17_spill] sm:$0xff]  ;;  %v10496_v30 = vld [vmem:[#allocation18_spill] sm:$0xff] }
 0x148   : > { %1151 = vrot.lane.b32.xlu1 %v7808_v22, %s6857_s9  ;;  %1149 = vrot.lane.b32.xlu0 %v7810_v16, %s6857_s9  ;;  %s6872_s9 = smov 76  }
 0x14a   : > { %v911_v31 = vpop.permute.xlu1 %910  ;;  %v909_v32 = vpop.permute.xlu0 %908 }
 0x14b   : > { %1000 = vst.msk [vmem:[#allocation3 + $0x38] sm:$0xff] %vm992_vm5, %v911_v31  ;;  %999 = vst.msk [vmem:[#allocation3 + $0x30] sm:$0xff] %vm992_vm5, %v909_v32 }
 0x14c   : > { %1284 = vrot.lane.b32.xlu1 %v7280_v39, %s6858_s10  ;;  %1282 = vrot.lane.b32.xlu0 %v7282_v40, %s6858_s10 }
 0x14e   : > { %v915_v37 = vpop.permute.xlu1 %914  ;;  %v913_v38 = vpop.permute.xlu0 %912 }
 0x14f   : > { %1002 = vst.msk [vmem:[#allocation3 + $0x48] sm:$0xff] %vm992_vm5, %v915_v37  ;;  %1001 = vst.msk [vmem:[#allocation3 + $0x40] sm:$0xff] %vm992_vm5, %v913_v38  ;;  %v10497_v37 = vld [vmem:[#allocation19_spill] sm:$0xff]  ;;  %v10498_v38 = vld [vmem:[#allocation20_spill] sm:$0xff] }
 0x150   : > { %1288 = vrot.lane.b32.xlu1 %v7284_v41, %s6858_s10  ;;  %1286 = vrot.lane.b32.xlu0 %v7286_v42, %s6858_s10 }
 0x152   : > { %v919_v50 = vpop.permute.xlu1 %918  ;;  %v917_v51 = vpop.permute.xlu0 %916 }
 0x153   : > { %1004 = vst.msk [vmem:[#allocation3 + $0x58] sm:$0xff] %vm992_vm5, %v919_v50  ;;  %1003 = vst.msk [vmem:[#allocation3 + $0x50] sm:$0xff] %vm992_vm5, %v917_v51 }
 0x154   : > { %1292 = vrot.lane.b32.xlu1 %v7288_v43, %s6858_s10  ;;  %1290 = vrot.lane.b32.xlu0 %v7290_v44, %s6858_s10 }
 0x156   : > { %v923_v39 = vpop.permute.xlu1 %922  ;;  %v921_v40 = vpop.permute.xlu0 %920 }
 0x157   : > { %1006 = vst.msk [vmem:[#allocation3 + $0x68] sm:$0xff] %vm992_vm5, %v923_v39  ;;  %1005 = vst.msk [vmem:[#allocation3 + $0x60] sm:$0xff] %vm992_vm5, %v921_v40  ;;  %v10499_v39 = vld [vmem:[#allocation21_spill] sm:$0xff]  ;;  %v10500_v40 = vld [vmem:[#allocation22_spill] sm:$0xff] }
 0x158   : > { %1296 = vrot.lane.b32.xlu1 %v7298_v45, %s6858_s10  ;;  %1294 = vrot.lane.b32.xlu0 %v7300_v46, %s6858_s10 }
 0x15a   : > { %v927_v41 = vpop.permute.xlu1 %926  ;;  %v925_v42 = vpop.permute.xlu0 %924 }
 0x15b   : > { %1008 = vst.msk [vmem:[#allocation3 + $0x78] sm:$0xff] %vm992_vm5, %v927_v41  ;;  %1007 = vst.msk [vmem:[#allocation3 + $0x70] sm:$0xff] %vm992_vm5, %v925_v42 }
 0x15c   : > { %1300 = vrot.lane.b32.xlu1 %v7302_v47, %s6858_s10  ;;  %1298 = vrot.lane.b32.xlu0 %v7314_v48, %s6858_s10 }
 0x15e   : > { %v931_v43 = vpop.permute.xlu1 %930  ;;  %v929_v44 = vpop.permute.xlu0 %928 }
 0x15f   : > { %1010 = vst.msk [vmem:[#allocation3 + $0x88] sm:$0xff] %vm992_vm5, %v931_v43  ;;  %1009 = vst.msk [vmem:[#allocation3 + $0x80] sm:$0xff] %vm992_vm5, %v929_v44  ;;  %v10501_v43 = vld [vmem:[#allocation23_spill] sm:$0xff]  ;;  %v10502_v44 = vld [vmem:[#allocation24_spill] sm:$0xff] }
 0x160   : > { %1304 = vrot.lane.b32.xlu1 %v7316_v49, %s6858_s10  ;;  %1302 = vrot.lane.b32.xlu0 %v7332_v52, %s6858_s10 }
 0x162   : > { %v935_v45 = vpop.permute.xlu1 %934  ;;  %v933_v46 = vpop.permute.xlu0 %932 }
 0x163   : > { %1012 = vst.msk [vmem:[#allocation3 + $0x98] sm:$0xff] %vm992_vm5, %v935_v45  ;;  %1011 = vst.msk [vmem:[#allocation3 + $0x90] sm:$0xff] %vm992_vm5, %v933_v46 }
 0x164   : > { %1308 = vrot.lane.b32.xlu1 %v7334_v53, %s6858_s10  ;;  %1306 = vrot.lane.b32.xlu0 %v7336_v54, %s6858_s10 }
 0x166   : > { %v939_v47 = vpop.permute.xlu1 %938  ;;  %v937_v48 = vpop.permute.xlu0 %936 }
 0x167   : > { %1014 = vst.msk [vmem:[#allocation3 + $0xa8] sm:$0xff] %vm992_vm5, %v939_v47  ;;  %1013 = vst.msk [vmem:[#allocation3 + $0xa0] sm:$0xff] %vm992_vm5, %v937_v48  ;;  %v10503_v47 = vld [vmem:[#allocation25_spill] sm:$0xff]  ;;  %v10504_v48 = vld [vmem:[#allocation26_spill] sm:$0xff] }
 0x168   : > { %1312 = vrot.lane.b32.xlu1 %v7342_v57, %s6858_s10  ;;  %1310 = vrot.lane.b32.xlu0 %v7344_v58, %s6858_s10 }
 0x16a   : > { %v943_v49 = vpop.permute.xlu1 %942  ;;  %v941_v52 = vpop.permute.xlu0 %940 }
 0x16b   : > { %1016 = vst.msk [vmem:[#allocation3 + $0xb8] sm:$0xff] %vm992_vm5, %v943_v49  ;;  %1015 = vst.msk [vmem:[#allocation3 + $0xb0] sm:$0xff] %vm992_vm5, %v941_v52 }
 0x16c   : > { %1316 = vrot.lane.b32.xlu1 %v7346_v59, %s6858_s10  ;;  %1314 = vrot.lane.b32.xlu0 %v7358_v60, %s6858_s10 }
 0x16e   : > { %v947_v53 = vpop.permute.xlu1 %946  ;;  %v945_v54 = vpop.permute.xlu0 %944 }
 0x16f   : > { %1018 = vst.msk [vmem:[#allocation3 + $0xc8] sm:$0xff] %vm992_vm5, %v947_v53  ;;  %1017 = vst.msk [vmem:[#allocation3 + $0xc0] sm:$0xff] %vm992_vm5, %v945_v54  ;;  %v10505_v53 = vld [vmem:[#allocation27_spill] sm:$0xff]  ;;  %v10506_v54 = vld [vmem:[#allocation28_spill] sm:$0xff] }
 0x170   : > { %1320 = vrot.lane.b32.xlu1 %v7360_v61, %s6858_s10  ;;  %1318 = vrot.lane.b32.xlu0 %v7362_v62, %s6858_s10 }
 0x172   : > { %v951_v57 = vpop.permute.xlu1 %950  ;;  %v949_v58 = vpop.permute.xlu0 %948 }
 0x173   : > { %1020 = vst.msk [vmem:[#allocation3 + $0xd8] sm:$0xff] %vm992_vm5, %v951_v57  ;;  %1019 = vst.msk [vmem:[#allocation3 + $0xd0] sm:$0xff] %vm992_vm5, %v949_v58 }
 0x174   : > { %1324 = vrot.lane.b32.xlu1 %v7370_v63, %s6858_s10  ;;  %1322 = vrot.lane.b32.xlu0 %v7372_v1, %s6858_s10 }
 0x176   : > { %v955_v59 = vpop.permute.xlu1 %954  ;;  %v953_v60 = vpop.permute.xlu0 %952 }
 0x177   : > { %1022 = vst.msk [vmem:[#allocation3 + $0xe8] sm:$0xff] %vm992_vm5, %v955_v59  ;;  %1021 = vst.msk [vmem:[#allocation3 + $0xe0] sm:$0xff] %vm992_vm5, %v953_v60  ;;  %v10507_v59 = vld [vmem:[#allocation29_spill] sm:$0xff]  ;;  %v10508_v60 = vld [vmem:[#allocation30_spill] sm:$0xff] }
 0x178   : > { %1328 = vrot.lane.b32.xlu1 %v7374_v2, %s6858_s10  ;;  %1326 = vrot.lane.b32.xlu0 %v7382_v3, %s6858_s10 }
 0x17a   : > { %v959_v61 = vpop.permute.xlu1 %958  ;;  %v957_v62 = vpop.permute.xlu0 %956 }
 0x17b   : > { %1024 = vst.msk [vmem:[#allocation3 + $0xf8] sm:$0xff] %vm992_vm5, %v959_v61  ;;  %1023 = vst.msk [vmem:[#allocation3 + $0xf0] sm:$0xff] %vm992_vm5, %v957_v62  ;;  %vm3890_vm5 = vcmask 622144  }
 0x17c   : > { %1332 = vrot.lane.b32.xlu1 %v7384_v4, %s6858_s10  ;;  %1330 = vrot.lane.b32.xlu0 %v7386_v5, %s6858_s10  ;;  %v10485_v4 = vld [vmem:[#allocation7_spill] sm:$0xff]  ;;  %v10486_v5 = vld [vmem:[#allocation8_spill] sm:$0xff] }
 0x17e   : > { %v1092_v63 = vpop.permute.xlu1 %1091  ;;  %v1090_v1 = vpop.permute.xlu0 %1089 }
 0x17f   : > { %1187 = vst.msk [vmem:[#allocation3 + $0x8] sm:$0xff] %vm1185_vm6, %v1092_v63  ;;  %1186 = vst.msk [vmem:[#allocation3] sm:$0xff] %vm1185_vm6, %v1090_v1 }
 0x180   : > { %1336 = vrot.lane.b32.xlu1 %v7444_v20, %s6858_s10  ;;  %1334 = vrot.lane.b32.xlu0 %v7446_v21, %s6858_s10  ;;  %v10487_v20 = vld [vmem:[#allocation9_spill] sm:$0xff]  ;;  %v10488_v21 = vld [vmem:[#allocation10_spill] sm:$0xff] }
 0x182   : > { %v1096_v2 = vpop.permute.xlu1 %1095  ;;  %v1094_v3 = vpop.permute.xlu0 %1093 }
 0x183   : > { %1189 = vst.msk [vmem:[#allocation3 + $0x18] sm:$0xff] %vm1185_vm6, %v1096_v2  ;;  %1188 = vst.msk [vmem:[#allocation3 + $0x10] sm:$0xff] %vm1185_vm6, %v1094_v3  ;;  %v7992_v2 = vld [vmem:[#allocation2 + $0x292] sm:$0xff]  ;;  %v7994_v3 = vld [vmem:[#allocation2 + $0x28a] sm:$0xff] }
 0x184   : > { %1340 = vrot.lane.b32.xlu1 %v10485_v4, %s6858_s10  ;;  %1338 = vrot.lane.b32.xlu0 %v10486_v5, %s6858_s10 }
 0x186   : > { %v1100_v55 = vpop.permute.xlu1 %1099  ;;  %v1098_v56 = vpop.permute.xlu0 %1097 }
 0x187   : > { %1191 = vst.msk [vmem:[#allocation3 + $0x28] sm:$0xff] %vm1185_vm6, %v1100_v55  ;;  %1190 = vst.msk [vmem:[#allocation3 + $0x20] sm:$0xff] %vm1185_vm6, %v1098_v56  ;;  %v8012_v55 = vld [vmem:[#allocation2 + $0x2d2] sm:$0xff]  ;;  %v8014_v56 = vld [vmem:[#allocation2 + $0x2ca] sm:$0xff] }
 0x188   : > { %1344 = vrot.lane.b32.xlu1 %v10487_v20, %s6858_s10  ;;  %1342 = vrot.lane.b32.xlu0 %v10488_v21, %s6858_s10  ;;  %s6873_s10 = smov 80  }
 0x18a   : > { %v1104_v6 = vpop.permute.xlu1 %1103  ;;  %v1102_v7 = vpop.permute.xlu0 %1101 }
 0x18b   : > { %1193 = vst.msk [vmem:[#allocation3 + $0x38] sm:$0xff] %vm1185_vm6, %v1104_v6  ;;  %1192 = vst.msk [vmem:[#allocation3 + $0x30] sm:$0xff] %vm1185_vm6, %v1102_v7  ;;  %v1606_v6 = vld [vmem:[#allocation2 + $0x14c] sm:$0xff]  ;;  %v1605_v7 = vld [vmem:[#allocation2 + $0x144] sm:$0xff] }
 0x18c   : > { %1477 = vrot.lane.b32.xlu1 %v7580_v0, %s6859_s11  ;;  %1475 = vrot.lane.b32.xlu0 %v7582_v27, %s6859_s11  ;;  %v10491_v0 = vld [vmem:[#allocation13_spill] sm:$0xff]  ;;  %v10492_v27 = vld [vmem:[#allocation14_spill] sm:$0xff] }
 0x18e   : > { %v1108_v8 = vpop.permute.xlu1 %1107  ;;  %v1106_v9 = vpop.permute.xlu0 %1105 }
 0x18f   : > { %1195 = vst.msk [vmem:[#allocation3 + $0x48] sm:$0xff] %vm1185_vm6, %v1108_v8  ;;  %1194 = vst.msk [vmem:[#allocation3 + $0x40] sm:$0xff] %vm1185_vm6, %v1106_v9 }
 0x190   : > { %1481 = vrot.lane.b32.xlu1 %v10489_v14, %s6859_s11  ;;  %1479 = vrot.lane.b32.xlu0 %v10490_v15, %s6859_s11  ;;  %v1608_v14 = vld [vmem:[#allocation2 + $0x16c] sm:$0xff]  ;;  %v1607_v15 = vld [vmem:[#allocation2 + $0x164] sm:$0xff] }
 0x192   : > { %v1112_v18 = vpop.permute.xlu1 %1111  ;;  %v1110_v19 = vpop.permute.xlu0 %1109 }
 0x193   : > { %1197 = vst.msk [vmem:[#allocation3 + $0x58] sm:$0xff] %vm1185_vm6, %v1112_v18  ;;  %1196 = vst.msk [vmem:[#allocation3 + $0x50] sm:$0xff] %vm1185_vm6, %v1110_v19 }
 0x194   : > { %1485 = vrot.lane.b32.xlu1 %v10491_v0, %s6859_s11  ;;  %1483 = vrot.lane.b32.xlu0 %v10492_v27, %s6859_s11  ;;  %v1610_v0 = vld [vmem:[#allocation2 + $0x18c] sm:$0xff]  ;;  %v1609_v27 = vld [vmem:[#allocation2 + $0x184] sm:$0xff] }
 0x196   : > { %v1116_v24 = vpop.permute.xlu1 %1115  ;;  %v1114_v25 = vpop.permute.xlu0 %1113 }
 0x197   : > { %1199 = vst.msk [vmem:[#allocation3 + $0x68] sm:$0xff] %vm1185_vm6, %v1116_v24  ;;  %1198 = vst.msk [vmem:[#allocation3 + $0x60] sm:$0xff] %vm1185_vm6, %v1114_v25 }
 0x198   : > { %1489 = vrot.lane.b32.xlu1 %v10493_v34, %s6859_s11  ;;  %1487 = vrot.lane.b32.xlu0 %v10494_v12, %s6859_s11  ;;  %v1612_v34 = vld [vmem:[#allocation2 + $0x1ac] sm:$0xff]  ;;  %v1611_v12 = vld [vmem:[#allocation2 + $0x1a4] sm:$0xff] }
 0x19a   : > { %v1120_v10 = vpop.permute.xlu1 %1119  ;;  %v1118_v13 = vpop.permute.xlu0 %1117 }
 0x19b   : > { %1201 = vst.msk [vmem:[#allocation3 + $0x78] sm:$0xff] %vm1185_vm6, %v1120_v10  ;;  %1200 = vst.msk [vmem:[#allocation3 + $0x70] sm:$0xff] %vm1185_vm6, %v1118_v13 }
 0x19c   : > { %1493 = vrot.lane.b32.xlu1 %v10495_v29, %s6859_s11  ;;  %1491 = vrot.lane.b32.xlu0 %v10496_v30, %s6859_s11  ;;  %v1614_v29 = vld [vmem:[#allocation2 + $0x1cc] sm:$0xff]  ;;  %v1613_v30 = vld [vmem:[#allocation2 + $0x1c4] sm:$0xff] }
 0x19e   : > { %v1124_v31 = vpop.permute.xlu1 %1123  ;;  %v1122_v32 = vpop.permute.xlu0 %1121 }
 0x19f   : > { %1203 = vst.msk [vmem:[#allocation3 + $0x88] sm:$0xff] %vm1185_vm6, %v1124_v31  ;;  %1202 = vst.msk [vmem:[#allocation3 + $0x80] sm:$0xff] %vm1185_vm6, %v1122_v32 }
 0x1a0   : > { %1497 = vrot.lane.b32.xlu1 %v10497_v37, %s6859_s11  ;;  %1495 = vrot.lane.b32.xlu0 %v10498_v38, %s6859_s11  ;;  %v1616_v37 = vld [vmem:[#allocation2 + $0x1ec] sm:$0xff]  ;;  %v1615_v38 = vld [vmem:[#allocation2 + $0x1e4] sm:$0xff] }
 0x1a2   : > { %v1128_v50 = vpop.permute.xlu1 %1127  ;;  %v1126_v51 = vpop.permute.xlu0 %1125 }
 0x1a3   : > { %1205 = vst.msk [vmem:[#allocation3 + $0x98] sm:$0xff] %vm1185_vm6, %v1128_v50  ;;  %1204 = vst.msk [vmem:[#allocation3 + $0x90] sm:$0xff] %vm1185_vm6, %v1126_v51 }
 0x1a4   : > { %1501 = vrot.lane.b32.xlu1 %v10499_v39, %s6859_s11  ;;  %1499 = vrot.lane.b32.xlu0 %v10500_v40, %s6859_s11  ;;  %v1618_v39 = vld [vmem:[#allocation2 + $0x20c] sm:$0xff]  ;;  %v1617_v40 = vld [vmem:[#allocation2 + $0x204] sm:$0xff] }
 0x1a6   : > { %v1132_v41 = vpop.permute.xlu1 %1131  ;;  %v1130_v42 = vpop.permute.xlu0 %1129 }
 0x1a7   : > { %1207 = vst.msk [vmem:[#allocation3 + $0xa8] sm:$0xff] %vm1185_vm6, %v1132_v41  ;;  %1206 = vst.msk [vmem:[#allocation3 + $0xa0] sm:$0xff] %vm1185_vm6, %v1130_v42 }
 0x1a8   : > { %1505 = vrot.lane.b32.xlu1 %v10501_v43, %s6859_s11  ;;  %1503 = vrot.lane.b32.xlu0 %v10502_v44, %s6859_s11  ;;  %v1620_v43 = vld [vmem:[#allocation2 + $0x22c] sm:$0xff]  ;;  %v1619_v44 = vld [vmem:[#allocation2 + $0x224] sm:$0xff] }
 0x1aa   : > { %v1136_v45 = vpop.permute.xlu1 %1135  ;;  %v1134_v46 = vpop.permute.xlu0 %1133 }
 0x1ab   : > { %1209 = vst.msk [vmem:[#allocation3 + $0xb8] sm:$0xff] %vm1185_vm6, %v1136_v45  ;;  %1208 = vst.msk [vmem:[#allocation3 + $0xb0] sm:$0xff] %vm1185_vm6, %v1134_v46 }
 0x1ac   : > { %1509 = vrot.lane.b32.xlu1 %v10503_v47, %s6859_s11  ;;  %1507 = vrot.lane.b32.xlu0 %v10504_v48, %s6859_s11  ;;  %v1622_v47 = vld [vmem:[#allocation2 + $0x24c] sm:$0xff]  ;;  %v1621_v48 = vld [vmem:[#allocation2 + $0x244] sm:$0xff] }
 0x1ae   : > { %v1140_v49 = vpop.permute.xlu1 %1139  ;;  %v1138_v52 = vpop.permute.xlu0 %1137 }
 0x1af   : > { %1211 = vst.msk [vmem:[#allocation3 + $0xc8] sm:$0xff] %vm1185_vm6, %v1140_v49  ;;  %1210 = vst.msk [vmem:[#allocation3 + $0xc0] sm:$0xff] %vm1185_vm6, %v1138_v52 }
 0x1b0   : > { %1513 = vrot.lane.b32.xlu1 %v10505_v53, %s6859_s11  ;;  %1511 = vrot.lane.b32.xlu0 %v10506_v54, %s6859_s11  ;;  %v1624_v53 = vld [vmem:[#allocation2 + $0x26c] sm:$0xff]  ;;  %v1623_v54 = vld [vmem:[#allocation2 + $0x264] sm:$0xff] }
 0x1b2   : > { %v1144_v57 = vpop.permute.xlu1 %1143  ;;  %v1142_v58 = vpop.permute.xlu0 %1141 }
 0x1b3   : > { %1213 = vst.msk [vmem:[#allocation3 + $0xd8] sm:$0xff] %vm1185_vm6, %v1144_v57  ;;  %1212 = vst.msk [vmem:[#allocation3 + $0xd0] sm:$0xff] %vm1185_vm6, %v1142_v58 }
 0x1b4   : > { %1517 = vrot.lane.b32.xlu1 %v10507_v59, %s6859_s11  ;;  %1515 = vrot.lane.b32.xlu0 %v10508_v60, %s6859_s11 }
 0x1b6   : > { %v1148_v61 = vpop.permute.xlu1 %1147  ;;  %v1146_v62 = vpop.permute.xlu0 %1145 }
 0x1b7   : > { %1215 = vst.msk [vmem:[#allocation3 + $0xe8] sm:$0xff] %vm1185_vm6, %v1148_v61  ;;  %1214 = vst.msk [vmem:[#allocation3 + $0xe0] sm:$0xff] %vm1185_vm6, %v1146_v62 }
 0x1b8   : > { %1521 = vrot.lane.b32.xlu1 %v7690_v23, %s6859_s11  ;;  %1519 = vrot.lane.b32.xlu0 %v7692_v17, %s6859_s11  ;;  %v8002_v17 = vld [vmem:[#allocation2 + $0x2b2] sm:$0xff] }
 0x1ba   : > { %v1152_v63 = vpop.permute.xlu1 %1151  ;;  %v1150_v1 = vpop.permute.xlu0 %1149 }
 0x1bb   : > { %1217 = vst.msk [vmem:[#allocation3 + $0xf8] sm:$0xff] %vm1185_vm6, %v1152_v63  ;;  %1216 = vst.msk [vmem:[#allocation3 + $0xf0] sm:$0xff] %vm1185_vm6, %v1150_v1  ;;  %vm4083_vm6 = vcmask 654944  }
 0x1bc   : > { %1525 = vrot.lane.b32.xlu1 %v7700_v26, %s6859_s11  ;;  %1523 = vrot.lane.b32.xlu0 %v7702_v11, %s6859_s11  ;;  %v8004_v26 = vld [vmem:[#allocation2 + $0x2aa] sm:$0xff] }
 0x1be   : > { %v1285_v23 = vpop.permute.xlu1 %1284  ;;  %v1283_v4 = vpop.permute.xlu0 %1282 }
 0x1bf   : > { %1380 = vst.msk [vmem:[#allocation3 + $0x8] sm:$0xff] %vm1378_vm7, %v1285_v23  ;;  %1379 = vst.msk [vmem:[#allocation3] sm:$0xff] %vm1378_vm7, %v1283_v4  ;;  %v1633_v4 = vld [vmem:[#allocation2 + $0x304] sm:$0xff] }
 0x1c0   : > { %1529 = vrot.lane.b32.xlu1 %v7992_v2, %s6859_s11  ;;  %1527 = vrot.lane.b32.xlu0 %v7994_v3, %s6859_s11 }
 0x1c2   : > { %v1289_v11 = vpop.permute.xlu1 %1288  ;;  %v1287_v5 = vpop.permute.xlu0 %1286 }
 0x1c3   : > { %1382 = vst.msk [vmem:[#allocation3 + $0x18] sm:$0xff] %vm1378_vm7, %v1289_v11  ;;  %1381 = vst.msk [vmem:[#allocation3 + $0x10] sm:$0xff] %vm1378_vm7, %v1287_v5  ;;  %v1635_v5 = vld [vmem:[#allocation2 + $0x324] sm:$0xff] }
 0x1c4   : > { %1533 = vrot.lane.b32.xlu1 %v8002_v17, %s6859_s11  ;;  %1531 = vrot.lane.b32.xlu0 %v8004_v26, %s6859_s11 }
 0x1c6   : > { %v1293_v20 = vpop.permute.xlu1 %1292  ;;  %v1291_v21 = vpop.permute.xlu0 %1290 }
 0x1c7   : > { %1384 = vst.msk [vmem:[#allocation3 + $0x28] sm:$0xff] %vm1378_vm7, %v1293_v20  ;;  %1383 = vst.msk [vmem:[#allocation3 + $0x20] sm:$0xff] %vm1378_vm7, %v1291_v21 }
 0x1c8   : > { %1537 = vrot.lane.b32.xlu1 %v8012_v55, %s6859_s11  ;;  %1535 = vrot.lane.b32.xlu0 %v8014_v56, %s6859_s11  ;;  %s6874_s11 = smov 84  }
 0x1ca   : > { %v1297_v8 = vpop.permute.xlu1 %1296  ;;  %v1295_v9 = vpop.permute.xlu0 %1294 }
 0x1cb   : > { %1386 = vst.msk [vmem:[#allocation3 + $0x38] sm:$0xff] %vm1378_vm7, %v1297_v8  ;;  %1385 = vst.msk [vmem:[#allocation3 + $0x30] sm:$0xff] %vm1378_vm7, %v1295_v9 }
 0x1cc   : > { %1671 = vrot.lane.b32.xlu1 %v1606_v6, %s6860_s12  ;;  %1669 = vrot.lane.b32.xlu0 %v1605_v7, %s6860_s12  ;;  %v8092_v6 = vld [vmem:[#allocation2 + $0x14f] sm:$0xff]  ;;  %v8094_v7 = vld [vmem:[#allocation2 + $0x147] sm:$0xff] }
 0x1ce   : > { %v1301_v18 = vpop.permute.xlu1 %1300  ;;  %v1299_v19 = vpop.permute.xlu0 %1298 }
 0x1cf   : > { %1388 = vst.msk [vmem:[#allocation3 + $0x48] sm:$0xff] %vm1378_vm7, %v1301_v18  ;;  %1387 = vst.msk [vmem:[#allocation3 + $0x40] sm:$0xff] %vm1378_vm7, %v1299_v19 }
 0x1d0   : > { %1675 = vrot.lane.b32.xlu1 %v1608_v14, %s6860_s12  ;;  %1673 = vrot.lane.b32.xlu0 %v1607_v15, %s6860_s12  ;;  %v8102_v14 = vld [vmem:[#allocation2 + $0x16f] sm:$0xff]  ;;  %v8104_v15 = vld [vmem:[#allocation2 + $0x167] sm:$0xff] }
 0x1d2   : > { %v1305_v24 = vpop.permute.xlu1 %1304  ;;  %v1303_v25 = vpop.permute.xlu0 %1302 }
 0x1d3   : > { %1390 = vst.msk [vmem:[#allocation3 + $0x58] sm:$0xff] %vm1378_vm7, %v1305_v24  ;;  %1389 = vst.msk [vmem:[#allocation3 + $0x50] sm:$0xff] %vm1378_vm7, %v1303_v25 }
 0x1d4   : > { %1679 = vrot.lane.b32.xlu1 %v1610_v0, %s6860_s12  ;;  %1677 = vrot.lane.b32.xlu0 %v1609_v27, %s6860_s12  ;;  %v8112_v0 = vld [vmem:[#allocation2 + $0x18f] sm:$0xff]  ;;  %v8114_v27 = vld [vmem:[#allocation2 + $0x187] sm:$0xff] }
 0x1d6   : > { %v1309_v10 = vpop.permute.xlu1 %1308  ;;  %v1307_v13 = vpop.permute.xlu0 %1306 }
 0x1d7   : > { %1392 = vst.msk [vmem:[#allocation3 + $0x68] sm:$0xff] %vm1378_vm7, %v1309_v10  ;;  %1391 = vst.msk [vmem:[#allocation3 + $0x60] sm:$0xff] %vm1378_vm7, %v1307_v13 }
 0x1d8   : > { %1683 = vrot.lane.b32.xlu1 %v1612_v34, %s6860_s12  ;;  %1681 = vrot.lane.b32.xlu0 %v1611_v12, %s6860_s12  ;;  %v8122_v34 = vld [vmem:[#allocation2 + $0x1af] sm:$0xff]  ;;  %v8124_v12 = vld [vmem:[#allocation2 + $0x1a7] sm:$0xff] }
 0x1da   : > { %v1313_v31 = vpop.permute.xlu1 %1312  ;;  %v1311_v32 = vpop.permute.xlu0 %1310 }
 0x1db   : > { %1394 = vst.msk [vmem:[#allocation3 + $0x78] sm:$0xff] %vm1378_vm7, %v1313_v31  ;;  %1393 = vst.msk [vmem:[#allocation3 + $0x70] sm:$0xff] %vm1378_vm7, %v1311_v32 }
 0x1dc   : > { %1687 = vrot.lane.b32.xlu1 %v1614_v29, %s6860_s12  ;;  %1685 = vrot.lane.b32.xlu0 %v1613_v30, %s6860_s12  ;;  %v8132_v29 = vld [vmem:[#allocation2 + $0x1cf] sm:$0xff]  ;;  %v8134_v30 = vld [vmem:[#allocation2 + $0x1c7] sm:$0xff] }
 0x1de   : > { %v1317_v50 = vpop.permute.xlu1 %1316  ;;  %v1315_v51 = vpop.permute.xlu0 %1314 }
 0x1df   : > { %1396 = vst.msk [vmem:[#allocation3 + $0x88] sm:$0xff] %vm1378_vm7, %v1317_v50  ;;  %1395 = vst.msk [vmem:[#allocation3 + $0x80] sm:$0xff] %vm1378_vm7, %v1315_v51 }
 0x1e0   : > { %1691 = vrot.lane.b32.xlu1 %v1616_v37, %s6860_s12  ;;  %1689 = vrot.lane.b32.xlu0 %v1615_v38, %s6860_s12  ;;  %v8142_v37 = vld [vmem:[#allocation2 + $0x1ef] sm:$0xff]  ;;  %v8144_v38 = vld [vmem:[#allocation2 + $0x1e7] sm:$0xff] }
 0x1e2   : > { %v1321_v41 = vpop.permute.xlu1 %1320  ;;  %v1319_v42 = vpop.permute.xlu0 %1318 }
 0x1e3   : > { %1398 = vst.msk [vmem:[#allocation3 + $0x98] sm:$0xff] %vm1378_vm7, %v1321_v41  ;;  %1397 = vst.msk [vmem:[#allocation3 + $0x90] sm:$0xff] %vm1378_vm7, %v1319_v42 }
 0x1e4   : > { %1695 = vrot.lane.b32.xlu1 %v1618_v39, %s6860_s12  ;;  %1693 = vrot.lane.b32.xlu0 %v1617_v40, %s6860_s12  ;;  %v8152_v39 = vld [vmem:[#allocation2 + $0x20f] sm:$0xff]  ;;  %v8154_v40 = vld [vmem:[#allocation2 + $0x207] sm:$0xff] }
 0x1e6   : > { %v1325_v45 = vpop.permute.xlu1 %1324  ;;  %v1323_v46 = vpop.permute.xlu0 %1322 }
 0x1e7   : > { %1400 = vst.msk [vmem:[#allocation3 + $0xa8] sm:$0xff] %vm1378_vm7, %v1325_v45  ;;  %1399 = vst.msk [vmem:[#allocation3 + $0xa0] sm:$0xff] %vm1378_vm7, %v1323_v46 }
 0x1e8   : > { %1699 = vrot.lane.b32.xlu1 %v1620_v43, %s6860_s12  ;;  %1697 = vrot.lane.b32.xlu0 %v1619_v44, %s6860_s12  ;;  %v8162_v43 = vld [vmem:[#allocation2 + $0x22f] sm:$0xff]  ;;  %v8164_v44 = vld [vmem:[#allocation2 + $0x227] sm:$0xff] }
 0x1ea   : > { %v1329_v49 = vpop.permute.xlu1 %1328  ;;  %v1327_v52 = vpop.permute.xlu0 %1326 }
 0x1eb   : > { %1402 = vst.msk [vmem:[#allocation3 + $0xb8] sm:$0xff] %vm1378_vm7, %v1329_v49  ;;  %1401 = vst.msk [vmem:[#allocation3 + $0xb0] sm:$0xff] %vm1378_vm7, %v1327_v52 }
 0x1ec   : > { %1703 = vrot.lane.b32.xlu1 %v1622_v47, %s6860_s12  ;;  %1701 = vrot.lane.b32.xlu0 %v1621_v48, %s6860_s12  ;;  %v1815_v47 = vld [vmem:[#allocation2 + $0x24f] sm:$0xff]  ;;  %v1814_v48 = vld [vmem:[#allocation2 + $0x247] sm:$0xff] }
 0x1ee   : > { %v1333_v57 = vpop.permute.xlu1 %1332  ;;  %v1331_v58 = vpop.permute.xlu0 %1330 }
 0x1ef   : > { %1404 = vst.msk [vmem:[#allocation3 + $0xc8] sm:$0xff] %vm1378_vm7, %v1333_v57  ;;  %1403 = vst.msk [vmem:[#allocation3 + $0xc0] sm:$0xff] %vm1378_vm7, %v1331_v58 }
 0x1f0   : > { %1707 = vrot.lane.b32.xlu1 %v1624_v53, %s6860_s12  ;;  %1705 = vrot.lane.b32.xlu0 %v1623_v54, %s6860_s12  ;;  %v1817_v53 = vld [vmem:[#allocation2 + $0x26f] sm:$0xff]  ;;  %v1816_v54 = vld [vmem:[#allocation2 + $0x267] sm:$0xff] }
 0x1f2   : > { %v1337_v59 = vpop.permute.xlu1 %1336  ;;  %v1335_v60 = vpop.permute.xlu0 %1334 }
 0x1f3   : > { %1406 = vst.msk [vmem:[#allocation3 + $0xd8] sm:$0xff] %vm1378_vm7, %v1337_v59  ;;  %1405 = vst.msk [vmem:[#allocation3 + $0xd0] sm:$0xff] %vm1378_vm7, %v1335_v60  ;;  %v1819_v59 = vld [vmem:[#allocation2 + $0x28f] sm:$0xff]  ;;  %v1818_v60 = vld [vmem:[#allocation2 + $0x287] sm:$0xff] }
 0x1f4   : > { %1711 = vrot.lane.b32.xlu1 %v7788_v28, %s6860_s12  ;;  %1709 = vrot.lane.b32.xlu0 %v7790_v33, %s6860_s12  ;;  %v1632_v28 = vld [vmem:[#allocation2 + $0x2ec] sm:$0xff]  ;;  %v1631_v33 = vld [vmem:[#allocation2 + $0x2e4] sm:$0xff] }
 0x1f6   : > { %v1341_v61 = vpop.permute.xlu1 %1340  ;;  %v1339_v62 = vpop.permute.xlu0 %1338 }
 0x1f7   : > { %1408 = vst.msk [vmem:[#allocation3 + $0xe8] sm:$0xff] %vm1378_vm7, %v1341_v61  ;;  %1407 = vst.msk [vmem:[#allocation3 + $0xe0] sm:$0xff] %vm1378_vm7, %v1339_v62 }
 0x1f8   : > { %1715 = vrot.lane.b32.xlu1 %v7798_v35, %s6860_s12  ;;  %1713 = vrot.lane.b32.xlu0 %v7800_v36, %s6860_s12  ;;  %v1634_v36 = vld [vmem:[#allocation2 + $0x30c] sm:$0xff] }
 0x1fa   : > { %v1345_v63 = vpop.permute.xlu1 %1344  ;;  %v1343_v1 = vpop.permute.xlu0 %1342 }
 0x1fb   : > { %1410 = vst.msk [vmem:[#allocation3 + $0xf8] sm:$0xff] %vm1378_vm7, %v1345_v63  ;;  %1409 = vst.msk [vmem:[#allocation3 + $0xf0] sm:$0xff] %vm1378_vm7, %v1343_v1  ;;  %v1821_v63 = vld [vmem:[#allocation2 + $0x2af] sm:$0xff]  ;;  %v1820_v1 = vld [vmem:[#allocation2 + $0x2a7] sm:$0xff]  ;;  %vm4276_vm7 = vcmask 687744  }
 0x1fc   : > { %1719 = vrot.lane.b32.xlu1 %v7808_v22, %s6860_s12  ;;  %1717 = vrot.lane.b32.xlu0 %v7810_v16, %s6860_s12  ;;  %v1636_v16 = vld [vmem:[#allocation2 + $0x32c] sm:$0xff] }
 0x1fe   : > { %v1478_v23 = vpop.permute.xlu1 %1477  ;;  %v1476_v35 = vpop.permute.xlu0 %1475 }
 0x1ff   : > { %1573 = vst.msk [vmem:[#allocation3 + $0x8] sm:$0xff] %vm1571_vm8, %v1478_v23  ;;  %1572 = vst.msk [vmem:[#allocation3] sm:$0xff] %vm1571_vm8, %v1476_v35  ;;  %v1823_v23 = vld [vmem:[#allocation2 + $0x2cf] sm:$0xff]  ;;  %v1822_v35 = vld [vmem:[#allocation2 + $0x2c7] sm:$0xff] }
 0x200   : > { %1723 = vrot.lane.b32.xlu1 %v1632_v28, %s6860_s12  ;;  %1721 = vrot.lane.b32.xlu0 %v1631_v33, %s6860_s12 }
 0x202   : > { %v1482_v11 = vpop.permute.xlu1 %1481  ;;  %v1480_v22 = vpop.permute.xlu0 %1479 }
 0x203   : > { %1575 = vst.msk [vmem:[#allocation3 + $0x18] sm:$0xff] %vm1571_vm8, %v1482_v11  ;;  %1574 = vst.msk [vmem:[#allocation3 + $0x10] sm:$0xff] %vm1571_vm8, %v1480_v22  ;;  %v1825_v11 = vld [vmem:[#allocation2 + $0x2ef] sm:$0xff]  ;;  %v1824_v22 = vld [vmem:[#allocation2 + $0x2e7] sm:$0xff] }
 0x204   : > { %1727 = vrot.lane.b32.xlu1 %v1634_v36, %s6860_s12  ;;  %1725 = vrot.lane.b32.xlu0 %v1633_v4, %s6860_s12 }
 0x206   : > { %v1486_v20 = vpop.permute.xlu1 %1485  ;;  %v1484_v21 = vpop.permute.xlu0 %1483 }
 0x207   : > { %1577 = vst.msk [vmem:[#allocation3 + $0x28] sm:$0xff] %vm1571_vm8, %v1486_v20  ;;  %1576 = vst.msk [vmem:[#allocation3 + $0x20] sm:$0xff] %vm1571_vm8, %v1484_v21  ;;  %v1827_v20 = vld [vmem:[#allocation2 + $0x30f] sm:$0xff]  ;;  %v1826_v21 = vld [vmem:[#allocation2 + $0x307] sm:$0xff] }
 0x208   : > { %1731 = vrot.lane.b32.xlu1 %v1636_v16, %s6860_s12  ;;  %1729 = vrot.lane.b32.xlu0 %v1635_v5, %s6860_s12  ;;  %s6875_s12 = smov 88  }
 0x20a   : > { %v1490_v8 = vpop.permute.xlu1 %1489  ;;  %v1488_v9 = vpop.permute.xlu0 %1487 }
 0x20b   : > { %1579 = vst.msk [vmem:[#allocation3 + $0x38] sm:$0xff] %vm1571_vm8, %v1490_v8  ;;  %1578 = vst.msk [vmem:[#allocation3 + $0x30] sm:$0xff] %vm1571_vm8, %v1488_v9 }
 0x20c   : > { %1864 = vrot.lane.b32.xlu1 %v8092_v6, %s6861_s13  ;;  %1862 = vrot.lane.b32.xlu0 %v8094_v7, %s6861_s13 }
 0x20e   : > { %v1494_v18 = vpop.permute.xlu1 %1493  ;;  %v1492_v19 = vpop.permute.xlu0 %1491 }
 0x20f   : > { %1581 = vst.msk [vmem:[#allocation3 + $0x48] sm:$0xff] %vm1571_vm8, %v1494_v18  ;;  %1580 = vst.msk [vmem:[#allocation3 + $0x40] sm:$0xff] %vm1571_vm8, %v1492_v19  ;;  %v1829_v18 = vld [vmem:[#allocation2 + $0x32f] sm:$0xff]  ;;  %v1828_v19 = vld [vmem:[#allocation2 + $0x327] sm:$0xff] }
 0x210   : > { %1868 = vrot.lane.b32.xlu1 %v8102_v14, %s6861_s13  ;;  %1866 = vrot.lane.b32.xlu0 %v8104_v15, %s6861_s13 }
 0x212   : > { %v1498_v24 = vpop.permute.xlu1 %1497  ;;  %v1496_v25 = vpop.permute.xlu0 %1495 }
 0x213   : > { %1583 = vst.msk [vmem:[#allocation3 + $0x58] sm:$0xff] %vm1571_vm8, %v1498_v24  ;;  %1582 = vst.msk [vmem:[#allocation3 + $0x50] sm:$0xff] %vm1571_vm8, %v1496_v25 }
 0x214   : > { %1872 = vrot.lane.b32.xlu1 %v8112_v0, %s6861_s13  ;;  %1870 = vrot.lane.b32.xlu0 %v8114_v27, %s6861_s13 }
 0x216   : > { %v1502_v10 = vpop.permute.xlu1 %1501  ;;  %v1500_v13 = vpop.permute.xlu0 %1499 }
 0x217   : > { %1585 = vst.msk [vmem:[#allocation3 + $0x68] sm:$0xff] %vm1571_vm8, %v1502_v10  ;;  %1584 = vst.msk [vmem:[#allocation3 + $0x60] sm:$0xff] %vm1571_vm8, %v1500_v13  ;;  %v1992_v10 = vld [vmem:[#allocation2 + $0x152] sm:$0xff]  ;;  %v8204_v13 = vld [vmem:[#allocation2 + $0x14a] sm:$0xff] }
 0x218   : > { %1876 = vrot.lane.b32.xlu1 %v8122_v34, %s6861_s13  ;;  %1874 = vrot.lane.b32.xlu0 %v8124_v12, %s6861_s13 }
 0x21a   : > { %v1506_v31 = vpop.permute.xlu1 %1505  ;;  %v1504_v32 = vpop.permute.xlu0 %1503 }
 0x21b   : > { %1587 = vst.msk [vmem:[#allocation3 + $0x78] sm:$0xff] %vm1571_vm8, %v1506_v31  ;;  %1586 = vst.msk [vmem:[#allocation3 + $0x70] sm:$0xff] %vm1571_vm8, %v1504_v32 }
 0x21c   : > { %1880 = vrot.lane.b32.xlu1 %v8132_v29, %s6861_s13  ;;  %1878 = vrot.lane.b32.xlu0 %v8134_v30, %s6861_s13 }
 0x21e   : > { %v1510_v50 = vpop.permute.xlu1 %1509  ;;  %v1508_v51 = vpop.permute.xlu0 %1507 }
 0x21f   : > { %1589 = vst.msk [vmem:[#allocation3 + $0x88] sm:$0xff] %vm1571_vm8, %v1510_v50  ;;  %1588 = vst.msk [vmem:[#allocation3 + $0x80] sm:$0xff] %vm1571_vm8, %v1508_v51  ;;  %v1994_v50 = vld [vmem:[#allocation2 + $0x172] sm:$0xff]  ;;  %v8211_v51 = vld [vmem:[#allocation2 + $0x16a] sm:$0xff] }
 0x220   : > { %1884 = vrot.lane.b32.xlu1 %v8142_v37, %s6861_s13  ;;  %1882 = vrot.lane.b32.xlu0 %v8144_v38, %s6861_s13 }
 0x222   : > { %v1514_v41 = vpop.permute.xlu1 %1513  ;;  %v1512_v42 = vpop.permute.xlu0 %1511 }
 0x223   : > { %1591 = vst.msk [vmem:[#allocation3 + $0x98] sm:$0xff] %vm1571_vm8, %v1514_v41  ;;  %1590 = vst.msk [vmem:[#allocation3 + $0x90] sm:$0xff] %vm1571_vm8, %v1512_v42 }
 0x224   : > { %1888 = vrot.lane.b32.xlu1 %v8152_v39, %s6861_s13  ;;  %1886 = vrot.lane.b32.xlu0 %v8154_v40, %s6861_s13 }
 0x226   : > { %v1518_v45 = vpop.permute.xlu1 %1517  ;;  %v1516_v46 = vpop.permute.xlu0 %1515 }
 0x227   : > { %1593 = vst.msk [vmem:[#allocation3 + $0xa8] sm:$0xff] %vm1571_vm8, %v1518_v45  ;;  %1592 = vst.msk [vmem:[#allocation3 + $0xa0] sm:$0xff] %vm1571_vm8, %v1516_v46  ;;  %v1996_v45 = vld [vmem:[#allocation2 + $0x192] sm:$0xff]  ;;  %v8218_v46 = vld [vmem:[#allocation2 + $0x18a] sm:$0xff] }
 0x228   : > { %1892 = vrot.lane.b32.xlu1 %v8162_v43, %s6861_s13  ;;  %1890 = vrot.lane.b32.xlu0 %v8164_v44, %s6861_s13 }
 0x22a   : > { %v1522_v49 = vpop.permute.xlu1 %1521  ;;  %v1520_v52 = vpop.permute.xlu0 %1519 }
 0x22b   : > { %1595 = vst.msk [vmem:[#allocation3 + $0xb8] sm:$0xff] %vm1571_vm8, %v1522_v49  ;;  %1594 = vst.msk [vmem:[#allocation3 + $0xb0] sm:$0xff] %vm1571_vm8, %v1520_v52  ;;  %v1998_v49 = vld [vmem:[#allocation2 + $0x1b2] sm:$0xff]  ;;  %v8225_v52 = vld [vmem:[#allocation2 + $0x1aa] sm:$0xff] }
 0x22c   : > { %1896 = vrot.lane.b32.xlu1 %v1815_v47, %s6861_s13  ;;  %1894 = vrot.lane.b32.xlu0 %v1814_v48, %s6861_s13 }
 0x22e   : > { %v1526_v57 = vpop.permute.xlu1 %1525  ;;  %v1524_v58 = vpop.permute.xlu0 %1523 }
 0x22f   : > { %1597 = vst.msk [vmem:[#allocation3 + $0xc8] sm:$0xff] %vm1571_vm8, %v1526_v57  ;;  %1596 = vst.msk [vmem:[#allocation3 + $0xc0] sm:$0xff] %vm1571_vm8, %v1524_v58  ;;  %v2000_v57 = vld [vmem:[#allocation2 + $0x1d2] sm:$0xff]  ;;  %v8232_v58 = vld [vmem:[#allocation2 + $0x1ca] sm:$0xff] }
 0x230   : > { %1900 = vrot.lane.b32.xlu1 %v1817_v53, %s6861_s13  ;;  %1898 = vrot.lane.b32.xlu0 %v1816_v54, %s6861_s13 }
 0x232   : > { %v1530_v61 = vpop.permute.xlu1 %1529  ;;  %v1528_v62 = vpop.permute.xlu0 %1527 }
 0x233   : > { %1599 = vst.msk [vmem:[#allocation3 + $0xd8] sm:$0xff] %vm1571_vm8, %v1530_v61  ;;  %1598 = vst.msk [vmem:[#allocation3 + $0xd0] sm:$0xff] %vm1571_vm8, %v1528_v62  ;;  %v2002_v61 = vld [vmem:[#allocation2 + $0x1f2] sm:$0xff]  ;;  %v8239_v62 = vld [vmem:[#allocation2 + $0x1ea] sm:$0xff] }
 0x234   : > { %1904 = vrot.lane.b32.xlu1 %v1819_v59, %s6861_s13  ;;  %1902 = vrot.lane.b32.xlu0 %v1818_v60, %s6861_s13 }
 0x236   : > { %v1534_v28 = vpop.permute.xlu1 %1533  ;;  %v1532_v33 = vpop.permute.xlu0 %1531 }
 0x237   : > { %1601 = vst.msk [vmem:[#allocation3 + $0xe8] sm:$0xff] %vm1571_vm8, %v1534_v28  ;;  %1600 = vst.msk [vmem:[#allocation3 + $0xe0] sm:$0xff] %vm1571_vm8, %v1532_v33  ;;  %v2004_v28 = vld [vmem:[#allocation2 + $0x212] sm:$0xff]  ;;  %v8246_v33 = vld [vmem:[#allocation2 + $0x20a] sm:$0xff] }
 0x238   : > { %1908 = vrot.lane.b32.xlu1 %v1821_v63, %s6861_s13  ;;  %1906 = vrot.lane.b32.xlu0 %v1820_v1, %s6861_s13 }
 0x23a   : > { %v1538_v36 = vpop.permute.xlu1 %1537  ;;  %v1536_v4 = vpop.permute.xlu0 %1535 }
 0x23b   : > { %1603 = vst.msk [vmem:[#allocation3 + $0xf8] sm:$0xff] %vm1571_vm8, %v1538_v36  ;;  %1602 = vst.msk [vmem:[#allocation3 + $0xf0] sm:$0xff] %vm1571_vm8, %v1536_v4  ;;  %v2006_v36 = vld [vmem:[#allocation2 + $0x232] sm:$0xff]  ;;  %v8253_v4 = vld [vmem:[#allocation2 + $0x22a] sm:$0xff]  ;;  %vm4469_vm8 = vcmask 720544  }
 0x23c   : > { %1912 = vrot.lane.b32.xlu1 %v1823_v23, %s6861_s13  ;;  %1910 = vrot.lane.b32.xlu0 %v1822_v35, %s6861_s13 }
 0x23e   : > { %v1672_v16 = vpop.permute.xlu1 %1671  ;;  %v1670_v5 = vpop.permute.xlu0 %1669 }
 0x23f   : > { %1767 = vst.msk [vmem:[#allocation3 + $0x8] sm:$0xff] %vm1765_vm9, %v1672_v16  ;;  %1766 = vst.msk [vmem:[#allocation3] sm:$0xff] %vm1765_vm9, %v1670_v5  ;;  %v2008_v16 = vld [vmem:[#allocation2 + $0x252] sm:$0xff]  ;;  %v2007_v5 = vld [vmem:[#allocation2 + $0x24a] sm:$0xff] }
 0x240   : > { %1916 = vrot.lane.b32.xlu1 %v1825_v11, %s6861_s13  ;;  %1914 = vrot.lane.b32.xlu0 %v1824_v22, %s6861_s13 }
 0x242   : > { %v1676_v8 = vpop.permute.xlu1 %1675  ;;  %v1674_v9 = vpop.permute.xlu0 %1673 }
 0x243   : > { %1769 = vst.msk [vmem:[#allocation3 + $0x18] sm:$0xff] %vm1765_vm9, %v1676_v8  ;;  %1768 = vst.msk [vmem:[#allocation3 + $0x10] sm:$0xff] %vm1765_vm9, %v1674_v9  ;;  %v2010_v8 = vld [vmem:[#allocation2 + $0x272] sm:$0xff]  ;;  %v2009_v9 = vld [vmem:[#allocation2 + $0x26a] sm:$0xff] }
 0x244   : > { %1920 = vrot.lane.b32.xlu1 %v1827_v20, %s6861_s13  ;;  %1918 = vrot.lane.b32.xlu0 %v1826_v21, %s6861_s13 }
 0x246   : > { %v1680_v24 = vpop.permute.xlu1 %1679  ;;  %v1678_v25 = vpop.permute.xlu0 %1677 }
 0x247   : > { %1771 = vst.msk [vmem:[#allocation3 + $0x28] sm:$0xff] %vm1765_vm9, %v1680_v24  ;;  %1770 = vst.msk [vmem:[#allocation3 + $0x20] sm:$0xff] %vm1765_vm9, %v1678_v25 }
 0x248   : > { %1924 = vrot.lane.b32.xlu1 %v1829_v18, %s6861_s13  ;;  %1922 = vrot.lane.b32.xlu0 %v1828_v19, %s6861_s13  ;;  %s6877_s13 = smov 96  }
 0x24a   : > { %v1684_v31 = vpop.permute.xlu1 %1683  ;;  %v1682_v32 = vpop.permute.xlu0 %1681 }
 0x24b   : > { %1773 = vst.msk [vmem:[#allocation3 + $0x38] sm:$0xff] %vm1765_vm9, %v1684_v31  ;;  %1772 = vst.msk [vmem:[#allocation3 + $0x30] sm:$0xff] %vm1765_vm9, %v1682_v32 }
 0x24c   : > { %2057 = vrot.lane.b32.xlu1 %v1992_v10, %s6862_s14  ;;  %2055 = vrot.lane.b32.xlu0 %v8204_v13, %s6862_s14 }
 0x24e   : > { %v1688_v41 = vpop.permute.xlu1 %1687  ;;  %v1686_v42 = vpop.permute.xlu0 %1685 }
 0x24f   : > { %1775 = vst.msk [vmem:[#allocation3 + $0x48] sm:$0xff] %vm1765_vm9, %v1688_v41  ;;  %1774 = vst.msk [vmem:[#allocation3 + $0x40] sm:$0xff] %vm1765_vm9, %v1686_v42  ;;  %v2019_v42 = vld [vmem:[#allocation2 + $0x30a] sm:$0xff] }
 0x250   : > { %2061 = vrot.lane.b32.xlu1 %v1994_v50, %s6862_s14  ;;  %2059 = vrot.lane.b32.xlu0 %v8211_v51, %s6862_s14 }
 0x252   : > { %v1692_v47 = vpop.permute.xlu1 %1691  ;;  %v1690_v48 = vpop.permute.xlu0 %1689 }
 0x253   : > { %1777 = vst.msk [vmem:[#allocation3 + $0x58] sm:$0xff] %vm1765_vm9, %v1692_v47  ;;  %1776 = vst.msk [vmem:[#allocation3 + $0x50] sm:$0xff] %vm1765_vm9, %v1690_v48  ;;  %v2021_v47 = vld [vmem:[#allocation2 + $0x32a] sm:$0xff] }
 0x254   : > { %2065 = vrot.lane.b32.xlu1 %v1996_v45, %s6862_s14  ;;  %2063 = vrot.lane.b32.xlu0 %v8218_v46, %s6862_s14 }
 0x256   : > { %v1696_v53 = vpop.permute.xlu1 %1695  ;;  %v1694_v54 = vpop.permute.xlu0 %1693 }
 0x257   : > { %1779 = vst.msk [vmem:[#allocation3 + $0x68] sm:$0xff] %vm1765_vm9, %v1696_v53  ;;  %1778 = vst.msk [vmem:[#allocation3 + $0x60] sm:$0xff] %vm1765_vm9, %v1694_v54  ;;  %v2186_v53 = vld [vmem:[#allocation2 + $0x4a] sm:$0xff]  ;;  %v2185_v54 = vld [vmem:[#allocation2 + $0x42] sm:$0xff] }
 0x258   : > { %2069 = vrot.lane.b32.xlu1 %v1998_v49, %s6862_s14  ;;  %2067 = vrot.lane.b32.xlu0 %v8225_v52, %s6862_s14 }
 0x25a   : > { %v1700_v59 = vpop.permute.xlu1 %1699  ;;  %v1698_v60 = vpop.permute.xlu0 %1697 }
 0x25b   : > { %1781 = vst.msk [vmem:[#allocation3 + $0x78] sm:$0xff] %vm1765_vm9, %v1700_v59  ;;  %1780 = vst.msk [vmem:[#allocation3 + $0x70] sm:$0xff] %vm1765_vm9, %v1698_v60  ;;  %v2188_v60 = vld [vmem:[#allocation2 + $0x6a] sm:$0xff] }
 0x25c   : > { %2073 = vrot.lane.b32.xlu1 %v2000_v57, %s6862_s14  ;;  %2071 = vrot.lane.b32.xlu0 %v8232_v58, %s6862_s14 }
 0x25e   : > { %v1704_v63 = vpop.permute.xlu1 %1703  ;;  %v1702_v1 = vpop.permute.xlu0 %1701 }
 0x25f   : > { %1783 = vst.msk [vmem:[#allocation3 + $0x88] sm:$0xff] %vm1765_vm9, %v1704_v63  ;;  %1782 = vst.msk [vmem:[#allocation3 + $0x80] sm:$0xff] %vm1765_vm9, %v1702_v1 }
 0x260   : > { %2077 = vrot.lane.b32.xlu1 %v2002_v61, %s6862_s14  ;;  %2075 = vrot.lane.b32.xlu0 %v8239_v62, %s6862_s14  ;;  %v2187_v61 = vld [vmem:[#allocation2 + $0x62] sm:$0xff] }
 0x262   : > { %v1708_v23 = vpop.permute.xlu1 %1707  ;;  %v1706_v35 = vpop.permute.xlu0 %1705 }
 0x263   : > { %1785 = vst.msk [vmem:[#allocation3 + $0x98] sm:$0xff] %vm1765_vm9, %v1708_v23  ;;  %1784 = vst.msk [vmem:[#allocation3 + $0x90] sm:$0xff] %vm1765_vm9, %v1706_v35  ;;  %v2189_v23 = vld [vmem:[#allocation2 + $0x82] sm:$0xff] }
 0x264   : > { %2081 = vrot.lane.b32.xlu1 %v2004_v28, %s6862_s14  ;;  %2079 = vrot.lane.b32.xlu0 %v8246_v33, %s6862_s14  ;;  %v2190_v28 = vld [vmem:[#allocation2 + $0x8a] sm:$0xff] }
 0x266   : > { %v1712_v11 = vpop.permute.xlu1 %1711  ;;  %v1710_v22 = vpop.permute.xlu0 %1709 }
 0x267   : > { %1787 = vst.msk [vmem:[#allocation3 + $0xa8] sm:$0xff] %vm1765_vm9, %v1712_v11  ;;  %1786 = vst.msk [vmem:[#allocation3 + $0xa0] sm:$0xff] %vm1765_vm9, %v1710_v22  ;;  %v2192_v11 = vld [vmem:[#allocation2 + $0xaa] sm:$0xff]  ;;  %v2191_v22 = vld [vmem:[#allocation2 + $0xa2] sm:$0xff] }
 0x268   : > { %2085 = vrot.lane.b32.xlu1 %v2006_v36, %s6862_s14  ;;  %2083 = vrot.lane.b32.xlu0 %v8253_v4, %s6862_s14 }
 0x26a   : > { %v1716_v20 = vpop.permute.xlu1 %1715  ;;  %v1714_v21 = vpop.permute.xlu0 %1713 }
 0x26b   : > { %1789 = vst.msk [vmem:[#allocation3 + $0xb8] sm:$0xff] %vm1765_vm9, %v1716_v20  ;;  %1788 = vst.msk [vmem:[#allocation3 + $0xb0] sm:$0xff] %vm1765_vm9, %v1714_v21  ;;  %v2194_v20 = vld [vmem:[#allocation2 + $0xca] sm:$0xff]  ;;  %v2193_v21 = vld [vmem:[#allocation2 + $0xc2] sm:$0xff] }
 0x26c   : > { %2089 = vrot.lane.b32.xlu1 %v2008_v16, %s6862_s14  ;;  %2087 = vrot.lane.b32.xlu0 %v2007_v5, %s6862_s14 }
 0x26e   : > { %v1720_v18 = vpop.permute.xlu1 %1719  ;;  %v1718_v19 = vpop.permute.xlu0 %1717 }
 0x26f   : > { %1791 = vst.msk [vmem:[#allocation3 + $0xc8] sm:$0xff] %vm1765_vm9, %v1720_v18  ;;  %1790 = vst.msk [vmem:[#allocation3 + $0xc0] sm:$0xff] %vm1765_vm9, %v1718_v19  ;;  %v8318_v18 = vld [vmem:[#allocation2 + $0xea] sm:$0xff]  ;;  %v8320_v19 = vld [vmem:[#allocation2 + $0xe2] sm:$0xff] }
 0x270   : > { %2093 = vrot.lane.b32.xlu1 %v2010_v8, %s6862_s14  ;;  %2091 = vrot.lane.b32.xlu0 %v2009_v9, %s6862_s14 }
 0x272   : > { %v1724_v24 = vpop.permute.xlu1 %1723  ;;  %v1722_v25 = vpop.permute.xlu0 %1721 }
 0x273   : > { %1793 = vst.msk [vmem:[#allocation3 + $0xd8] sm:$0xff] %vm1765_vm9, %v1724_v24  ;;  %1792 = vst.msk [vmem:[#allocation3 + $0xd0] sm:$0xff] %vm1765_vm9, %v1722_v25 }
 0x274   : > { %2097 = vrot.lane.b32.xlu1 %v7992_v2, %s6862_s14  ;;  %2095 = vrot.lane.b32.xlu0 %v7994_v3, %s6862_s14  ;;  %v2018_v2 = vld [vmem:[#allocation2 + $0x2f2] sm:$0xff]  ;;  %v2017_v3 = vld [vmem:[#allocation2 + $0x2ea] sm:$0xff] }
 0x276   : > { %v1728_v10 = vpop.permute.xlu1 %1727  ;;  %v1726_v31 = vpop.permute.xlu0 %1725 }
 0x277   : > { %1795 = vst.msk [vmem:[#allocation3 + $0xe8] sm:$0xff] %vm1765_vm9, %v1728_v10  ;;  %1794 = vst.msk [vmem:[#allocation3 + $0xe0] sm:$0xff] %vm1765_vm9, %v1726_v31  ;;  %v8328_v10 = vld [vmem:[#allocation2 + $0x10a] sm:$0xff]  ;;  %v8330_v31 = vld [vmem:[#allocation2 + $0x102] sm:$0xff] }
 0x278   : > { %2101 = vrot.lane.b32.xlu1 %v8002_v17, %s6862_s14  ;;  %2099 = vrot.lane.b32.xlu0 %v8004_v26, %s6862_s14  ;;  %v2020_v26 = vld [vmem:[#allocation2 + $0x312] sm:$0xff] }
 0x27a   : > { %v1732_v32 = vpop.permute.xlu1 %1731  ;;  %v1730_v50 = vpop.permute.xlu0 %1729 }
 0x27b   : > { %1797 = vst.msk [vmem:[#allocation3 + $0xf8] sm:$0xff] %vm1765_vm9, %v1732_v32  ;;  %1796 = vst.msk [vmem:[#allocation3 + $0xf0] sm:$0xff] %vm1765_vm9, %v1730_v50  ;;  %vm5770_vm9 = vcmask 1043456  }
 0x27c   : > { %2105 = vrot.lane.b32.xlu1 %v8012_v55, %s6862_s14  ;;  %2103 = vrot.lane.b32.xlu0 %v8014_v56, %s6862_s14  ;;  %v2022_v56 = vld [vmem:[#allocation2 + $0x332] sm:$0xff] }
 0x27e   : > { %v1865_v41 = vpop.permute.xlu1 %1864  ;;  %v1863_v17 = vpop.permute.xlu0 %1862 }
 0x27f   : > { %1960 = vst.msk [vmem:[#allocation3 + $0x8] sm:$0xff] %vm1958_vm10, %v1865_v41  ;;  %1959 = vst.msk [vmem:[#allocation3] sm:$0xff] %vm1958_vm10, %v1863_v17 }
 0x280   : > { %2109 = vrot.lane.b32.xlu1 %v2018_v2, %s6862_s14  ;;  %2107 = vrot.lane.b32.xlu0 %v2017_v3, %s6862_s14  ;;  %v8338_v2 = vld [vmem:[#allocation2 + $0x12a] sm:$0xff]  ;;  %v8340_v3 = vld [vmem:[#allocation2 + $0x122] sm:$0xff] }
 0x282   : > { %v1869_v45 = vpop.permute.xlu1 %1868  ;;  %v1867_v55 = vpop.permute.xlu0 %1866 }
 0x283   : > { %1962 = vst.msk [vmem:[#allocation3 + $0x18] sm:$0xff] %vm1958_vm10, %v1869_v45  ;;  %1961 = vst.msk [vmem:[#allocation3 + $0x10] sm:$0xff] %vm1958_vm10, %v1867_v55  ;;  %v8356_v55 = vld [vmem:[#allocation2 + $0x162] sm:$0xff] }
 0x284   : > { %2113 = vrot.lane.b32.xlu1 %v2020_v26, %s6862_s14  ;;  %2111 = vrot.lane.b32.xlu0 %v2019_v42, %s6862_s14  ;;  %v8348_v26 = vld [vmem:[#allocation2 + $0x142] sm:$0xff] }
 0x286   : > { %v1873_v48 = vpop.permute.xlu1 %1872  ;;  %v1871_v49 = vpop.permute.xlu0 %1870 }
 0x287   : > { %1964 = vst.msk [vmem:[#allocation3 + $0x28] sm:$0xff] %vm1958_vm10, %v1873_v48  ;;  %1963 = vst.msk [vmem:[#allocation3 + $0x20] sm:$0xff] %vm1958_vm10, %v1871_v49  ;;  %v8364_v48 = vld [vmem:[#allocation2 + $0x182] sm:$0xff] }
 0x288   : > { %2117 = vrot.lane.b32.xlu1 %v2022_v56, %s6862_s14  ;;  %2115 = vrot.lane.b32.xlu0 %v2021_v47, %s6862_s14 }
 0x28a   : > { %v1877_v57 = vpop.permute.xlu1 %1876  ;;  %v1875_v59 = vpop.permute.xlu0 %1874 }
 0x28b   : > { %1966 = vst.msk [vmem:[#allocation3 + $0x38] sm:$0xff] %vm1958_vm10, %v1877_v57  ;;  %1965 = vst.msk [vmem:[#allocation3 + $0x30] sm:$0xff] %vm1958_vm10, %v1875_v59  ;;  %v8380_v57 = vld [vmem:[#allocation2 + $0x1c2] sm:$0xff] }
 0x28c   : > { %2251 = vrot.lane.b32.xlu1 %v2186_v53, %s6863_s20  ;;  %2249 = vrot.lane.b32.xlu0 %v2185_v54, %s6863_s20  ;;  %v8372_v53 = vld [vmem:[#allocation2 + $0x1a2] sm:$0xff] }
 0x28e   : > { %v1881_v63 = vpop.permute.xlu1 %1880  ;;  %v1879_v1 = vpop.permute.xlu0 %1878 }
 0x28f   : > { %1968 = vst.msk [vmem:[#allocation3 + $0x48] sm:$0xff] %vm1958_vm10, %v1881_v63  ;;  %1967 = vst.msk [vmem:[#allocation3 + $0x40] sm:$0xff] %vm1958_vm10, %v1879_v1  ;;  %v8396_v63 = vld [vmem:[#allocation2 + $0x202] sm:$0xff] }
 0x290   : > { %2255 = vrot.lane.b32.xlu1 %v2188_v60, %s6863_s20  ;;  %2253 = vrot.lane.b32.xlu0 %v2187_v61, %s6863_s20  ;;  %v8388_v60 = vld [vmem:[#allocation2 + $0x1e2] sm:$0xff] }
 0x292   : > { %v1885_v35 = vpop.permute.xlu1 %1884  ;;  %v1883_v36 = vpop.permute.xlu0 %1882 }
 0x293   : > { %1970 = vst.msk [vmem:[#allocation3 + $0x58] sm:$0xff] %vm1958_vm10, %v1885_v35  ;;  %1969 = vst.msk [vmem:[#allocation3 + $0x50] sm:$0xff] %vm1958_vm10, %v1883_v36  ;;  %v2379_v35 = vld [vmem:[#allocation2 + $0x4f] sm:$0xff]  ;;  %v2378_v36 = vld [vmem:[#allocation2 + $0x47] sm:$0xff] }
 0x294   : > { %2259 = vrot.lane.b32.xlu1 %v2190_v28, %s6863_s20  ;;  %2257 = vrot.lane.b32.xlu0 %v2189_v23, %s6863_s20  ;;  %v8404_v28 = vld [vmem:[#allocation2 + $0x222] sm:$0xff] }
 0x296   : > { %v1889_v16 = vpop.permute.xlu1 %1888  ;;  %v1887_v5 = vpop.permute.xlu0 %1886 }
 0x297   : > { %1972 = vst.msk [vmem:[#allocation3 + $0x68] sm:$0xff] %vm1958_vm10, %v1889_v16  ;;  %1971 = vst.msk [vmem:[#allocation3 + $0x60] sm:$0xff] %vm1958_vm10, %v1887_v5  ;;  %v2380_v16 = vld [vmem:[#allocation2 + $0x67] sm:$0xff] }
 0x298   : > { %2263 = vrot.lane.b32.xlu1 %v2192_v11, %s6863_s20  ;;  %2261 = vrot.lane.b32.xlu0 %v2191_v22, %s6863_s20  ;;  %v2381_v22 = vld [vmem:[#allocation2 + $0x6f] sm:$0xff] }
 0x29a   : > { %v1893_v8 = vpop.permute.xlu1 %1892  ;;  %v1891_v9 = vpop.permute.xlu0 %1890 }
 0x29b   : > { %1974 = vst.msk [vmem:[#allocation3 + $0x78] sm:$0xff] %vm1958_vm10, %v1893_v8  ;;  %1973 = vst.msk [vmem:[#allocation3 + $0x70] sm:$0xff] %vm1958_vm10, %v1891_v9 }
 0x29c   : > { %2267 = vrot.lane.b32.xlu1 %v2194_v20, %s6863_s20  ;;  %2265 = vrot.lane.b32.xlu0 %v2193_v21, %s6863_s20  ;;  %v2383_v20 = vld [vmem:[#allocation2 + $0x8f] sm:$0xff]  ;;  %v2382_v21 = vld [vmem:[#allocation2 + $0x87] sm:$0xff] }
 0x29e   : > { %v1897_v24 = vpop.permute.xlu1 %1896  ;;  %v1895_v25 = vpop.permute.xlu0 %1894 }
 0x29f   : > { %1976 = vst.msk [vmem:[#allocation3 + $0x88] sm:$0xff] %vm1958_vm10, %v1897_v24  ;;  %1975 = vst.msk [vmem:[#allocation3 + $0x80] sm:$0xff] %vm1958_vm10, %v1895_v25  ;;  %v2385_v24 = vld [vmem:[#allocation2 + $0xaf] sm:$0xff]  ;;  %v2384_v25 = vld [vmem:[#allocation2 + $0xa7] sm:$0xff] }
 0x2a0   : > { %2271 = vrot.lane.b32.xlu1 %v8318_v18, %s6863_s20  ;;  %2269 = vrot.lane.b32.xlu0 %v8320_v19, %s6863_s20 }
 0x2a2   : > { %v1901_v32 = vpop.permute.xlu1 %1900  ;;  %v1899_v50 = vpop.permute.xlu0 %1898 }
 0x2a3   : > { %1978 = vst.msk [vmem:[#allocation3 + $0x98] sm:$0xff] %vm1958_vm10, %v1901_v32  ;;  %1977 = vst.msk [vmem:[#allocation3 + $0x90] sm:$0xff] %vm1958_vm10, %v1899_v50 }
 0x2a4   : > { %2275 = vrot.lane.b32.xlu1 %v8328_v10, %s6863_s20  ;;  %2273 = vrot.lane.b32.xlu0 %v8330_v31, %s6863_s20 }
 0x2a6   : > { %v1905_v41 = vpop.permute.xlu1 %1904  ;;  %v1903_v17 = vpop.permute.xlu0 %1902 }
 0x2a7   : > { %1980 = vst.msk [vmem:[#allocation3 + $0xa8] sm:$0xff] %vm1958_vm10, %v1905_v41  ;;  %1979 = vst.msk [vmem:[#allocation3 + $0xa0] sm:$0xff] %vm1958_vm10, %v1903_v17  ;;  %v2387_v41 = vld [vmem:[#allocation2 + $0xcf] sm:$0xff]  ;;  %v2386_v17 = vld [vmem:[#allocation2 + $0xc7] sm:$0xff] }
 0x2a8   : > { %2279 = vrot.lane.b32.xlu1 %v8338_v2, %s6863_s20  ;;  %2277 = vrot.lane.b32.xlu0 %v8340_v3, %s6863_s20 }
 0x2aa   : > { %v1909_v42 = vpop.permute.xlu1 %1908  ;;  %v1907_v45 = vpop.permute.xlu0 %1906 }
 0x2ab   : > { %1982 = vst.msk [vmem:[#allocation3 + $0xb8] sm:$0xff] %vm1958_vm10, %v1909_v42  ;;  %1981 = vst.msk [vmem:[#allocation3 + $0xb0] sm:$0xff] %vm1958_vm10, %v1907_v45 }
 0x2ac   : > { %2283 = vrot.lane.b32.xlu1 %v8204_v13, %s6863_s20  ;;  %2281 = vrot.lane.b32.xlu0 %v8348_v26, %s6863_s20 }
 0x2ae   : > { %v1913_v56 = vpop.permute.xlu1 %1912  ;;  %v1911_v47 = vpop.permute.xlu0 %1910 }
 0x2af   : > { %1984 = vst.msk [vmem:[#allocation3 + $0xc8] sm:$0xff] %vm1958_vm10, %v1913_v56  ;;  %1983 = vst.msk [vmem:[#allocation3 + $0xc0] sm:$0xff] %vm1958_vm10, %v1911_v47  ;;  %v8432_v56 = vld [vmem:[#allocation2 + $0xef] sm:$0xff]  ;;  %v8434_v47 = vld [vmem:[#allocation2 + $0xe7] sm:$0xff] }
 0x2b0   : > { %2287 = vrot.lane.b32.xlu1 %v8211_v51, %s6863_s20  ;;  %2285 = vrot.lane.b32.xlu0 %v8356_v55, %s6863_s20 }
 0x2b2   : > { %v1917_v13 = vpop.permute.xlu1 %1916  ;;  %v1915_v49 = vpop.permute.xlu0 %1914 }
 0x2b3   : > { %1986 = vst.msk [vmem:[#allocation3 + $0xd8] sm:$0xff] %vm1958_vm10, %v1917_v13  ;;  %1985 = vst.msk [vmem:[#allocation3 + $0xd0] sm:$0xff] %vm1958_vm10, %v1915_v49 }
 0x2b4   : > { %2291 = vrot.lane.b32.xlu1 %v8218_v46, %s6863_s20  ;;  %2289 = vrot.lane.b32.xlu0 %v8364_v48, %s6863_s20 }
 0x2b6   : > { %v1921_v51 = vpop.permute.xlu1 %1920  ;;  %v1919_v54 = vpop.permute.xlu0 %1918 }
 0x2b7   : > { %1988 = vst.msk [vmem:[#allocation3 + $0xe8] sm:$0xff] %vm1958_vm10, %v1921_v51  ;;  %1987 = vst.msk [vmem:[#allocation3 + $0xe0] sm:$0xff] %vm1958_vm10, %v1919_v54  ;;  %v8442_v51 = vld [vmem:[#allocation2 + $0x10f] sm:$0xff]  ;;  %v8444_v54 = vld [vmem:[#allocation2 + $0x107] sm:$0xff] }
 0x2b8   : > { %2295 = vrot.lane.b32.xlu1 %v8225_v52, %s6863_s20  ;;  %2293 = vrot.lane.b32.xlu0 %v8372_v53, %s6863_s20 }
 0x2ba   : > { %v1925_v46 = vpop.permute.xlu1 %1924  ;;  %v1923_v59 = vpop.permute.xlu0 %1922 }
 0x2bb   : > { %1990 = vst.msk [vmem:[#allocation3 + $0xf8] sm:$0xff] %vm1958_vm10, %v1925_v46  ;;  %1989 = vst.msk [vmem:[#allocation3 + $0xf0] sm:$0xff] %vm1958_vm10, %v1923_v59  ;;  %vm6878_vm10 = vmmov 0  }
 0x2bc   : > { %2299 = vrot.lane.b32.xlu1 %v8232_v58, %s6863_s20  ;;  %2297 = vrot.lane.b32.xlu0 %v8380_v57, %s6863_s20 }
 0x2be   : > { %v2058_v52 = vpop.permute.xlu1 %2057  ;;  %v2056_v61 = vpop.permute.xlu0 %2055 }
 0x2bf   : > { %2153 = vst.msk [vmem:[#allocation3 + $0x8] sm:$0xff] %vm2151_vm11, %v2058_v52  ;;  %2152 = vst.msk [vmem:[#allocation3] sm:$0xff] %vm2151_vm11, %v2056_v61  ;;  %v8452_v52 = vld [vmem:[#allocation2 + $0x12f] sm:$0xff]  ;;  %v8454_v61 = vld [vmem:[#allocation2 + $0x127] sm:$0xff] }
 0x2c0   : > { %2303 = vrot.lane.b32.xlu1 %v8239_v62, %s6863_s20  ;;  %2301 = vrot.lane.b32.xlu0 %v8388_v60, %s6863_s20 }
 0x2c2   : > { %v2062_v58 = vpop.permute.xlu1 %2061  ;;  %v2060_v1 = vpop.permute.xlu0 %2059 }
 0x2c3   : > { %2155 = vst.msk [vmem:[#allocation3 + $0x18] sm:$0xff] %vm2151_vm11, %v2062_v58  ;;  %2154 = vst.msk [vmem:[#allocation3 + $0x10] sm:$0xff] %vm2151_vm11, %v2060_v1 }
 0x2c4   : > { %2307 = vrot.lane.b32.xlu1 %v8246_v33, %s6863_s20  ;;  %2305 = vrot.lane.b32.xlu0 %v8396_v63, %s6863_s20 }
 0x2c6   : > { %v2066_v62 = vpop.permute.xlu1 %2065  ;;  %v2064_v23 = vpop.permute.xlu0 %2063 }
 0x2c7   : > { %2157 = vst.msk [vmem:[#allocation3 + $0x28] sm:$0xff] %vm2151_vm11, %v2066_v62  ;;  %2156 = vst.msk [vmem:[#allocation3 + $0x20] sm:$0xff] %vm2151_vm11, %v2064_v23 }
 0x2c8   : > { %2311 = vrot.lane.b32.xlu1 %v8253_v4, %s6863_s20  ;;  %2309 = vrot.lane.b32.xlu0 %v8404_v28, %s6863_s20  ;;  %s6880_s20 = smov 104  }
 0x2ca   : > { %v2070_v33 = vpop.permute.xlu1 %2069  ;;  %v2068_v11 = vpop.permute.xlu0 %2067 }
 0x2cb   : > { %2159 = vst.msk [vmem:[#allocation3 + $0x38] sm:$0xff] %vm2151_vm11, %v2070_v33  ;;  %2158 = vst.msk [vmem:[#allocation3 + $0x30] sm:$0xff] %vm2151_vm11, %v2068_v11 }
 0x2cc   : > { %2444 = vrot.lane.b32.xlu1 %v2379_v35, %s6864_s22  ;;  %2442 = vrot.lane.b32.xlu0 %v2378_v36, %s6864_s22 }
 0x2ce   : > { %v2074_v5 = vpop.permute.xlu1 %2073  ;;  %v2072_v4 = vpop.permute.xlu0 %2071 }
 0x2cf   : > { %2161 = vst.msk [vmem:[#allocation3 + $0x48] sm:$0xff] %vm2151_vm11, %v2074_v5  ;;  %2160 = vst.msk [vmem:[#allocation3 + $0x40] sm:$0xff] %vm2151_vm11, %v2072_v4  ;;  %v2575_v4 = vld [vmem:[#allocation2 + $0x8c] sm:$0xff] }
 0x2d0   : > { %2448 = vrot.lane.b32.xlu1 %v2381_v22, %s6864_s22  ;;  %2446 = vrot.lane.b32.xlu0 %v2380_v16, %s6864_s22 }
 0x2d2   : > { %v2078_v8 = vpop.permute.xlu1 %2077  ;;  %v2076_v9 = vpop.permute.xlu0 %2075 }
 0x2d3   : > { %2163 = vst.msk [vmem:[#allocation3 + $0x58] sm:$0xff] %vm2151_vm11, %v2078_v8  ;;  %2162 = vst.msk [vmem:[#allocation3 + $0x50] sm:$0xff] %vm2151_vm11, %v2076_v9  ;;  %v2578_v8 = vld [vmem:[#allocation2 + $0xb4] sm:$0xff]  ;;  %v2577_v9 = vld [vmem:[#allocation2 + $0xac] sm:$0xff] }
 0x2d4   : > { %2452 = vrot.lane.b32.xlu1 %v2383_v20, %s6864_s22  ;;  %2450 = vrot.lane.b32.xlu0 %v2382_v21, %s6864_s22 }
 0x2d6   : > { %v2082_v32 = vpop.permute.xlu1 %2081  ;;  %v2080_v50 = vpop.permute.xlu0 %2079 }
 0x2d7   : > { %2165 = vst.msk [vmem:[#allocation3 + $0x68] sm:$0xff] %vm2151_vm11, %v2082_v32  ;;  %2164 = vst.msk [vmem:[#allocation3 + $0x60] sm:$0xff] %vm2151_vm11, %v2080_v50  ;;  %v2580_v32 = vld [vmem:[#allocation2 + $0xd4] sm:$0xff]  ;;  %v2579_v50 = vld [vmem:[#allocation2 + $0xcc] sm:$0xff] }
 0x2d8   : > { %2456 = vrot.lane.b32.xlu1 %v2385_v24, %s6864_s22  ;;  %2454 = vrot.lane.b32.xlu0 %v2384_v25, %s6864_s22 }
 0x2da   : > { %v2086_v42 = vpop.permute.xlu1 %2085  ;;  %v2084_v45 = vpop.permute.xlu0 %2083 }
 0x2db   : > { %2167 = vst.msk [vmem:[#allocation3 + $0x78] sm:$0xff] %vm2151_vm11, %v2086_v42  ;;  %2166 = vst.msk [vmem:[#allocation3 + $0x70] sm:$0xff] %vm2151_vm11, %v2084_v45  ;;  %v8530_v42 = vld [vmem:[#allocation2 + $0xf4] sm:$0xff]  ;;  %v8532_v45 = vld [vmem:[#allocation2 + $0xec] sm:$0xff] }
 0x2dc   : > { %2460 = vrot.lane.b32.xlu1 %v2387_v41, %s6864_s22  ;;  %2458 = vrot.lane.b32.xlu0 %v2386_v17, %s6864_s22 }
 0x2de   : > { %v2090_v13 = vpop.permute.xlu1 %2089  ;;  %v2088_v49 = vpop.permute.xlu0 %2087 }
 0x2df   : > { %2169 = vst.msk [vmem:[#allocation3 + $0x88] sm:$0xff] %vm2151_vm11, %v2090_v13  ;;  %2168 = vst.msk [vmem:[#allocation3 + $0x80] sm:$0xff] %vm2151_vm11, %v2088_v49 }
 0x2e0   : > { %2464 = vrot.lane.b32.xlu1 %v8432_v56, %s6864_s22  ;;  %2462 = vrot.lane.b32.xlu0 %v8434_v47, %s6864_s22 }
 0x2e2   : > { %v2094_v46 = vpop.permute.xlu1 %2093  ;;  %v2092_v59 = vpop.permute.xlu0 %2091 }
 0x2e3   : > { %2171 = vst.msk [vmem:[#allocation3 + $0x98] sm:$0xff] %vm2151_vm11, %v2094_v46  ;;  %2170 = vst.msk [vmem:[#allocation3 + $0x90] sm:$0xff] %vm2151_vm11, %v2092_v59  ;;  %v8540_v46 = vld [vmem:[#allocation2 + $0x114] sm:$0xff]  ;;  %v8542_v59 = vld [vmem:[#allocation2 + $0x10c] sm:$0xff] }
 0x2e4   : > { %2468 = vrot.lane.b32.xlu1 %v8442_v51, %s6864_s22  ;;  %2466 = vrot.lane.b32.xlu0 %v8444_v54, %s6864_s22 }
 0x2e6   : > { %v2098_v58 = vpop.permute.xlu1 %2097  ;;  %v2096_v1 = vpop.permute.xlu0 %2095 }
 0x2e7   : > { %2173 = vst.msk [vmem:[#allocation3 + $0xa8] sm:$0xff] %vm2151_vm11, %v2098_v58  ;;  %2172 = vst.msk [vmem:[#allocation3 + $0xa0] sm:$0xff] %vm2151_vm11, %v2096_v1 }
 0x2e8   : > { %2472 = vrot.lane.b32.xlu1 %v8452_v52, %s6864_s22  ;;  %2470 = vrot.lane.b32.xlu0 %v8454_v61, %s6864_s22 }
 0x2ea   : > { %v2102_v62 = vpop.permute.xlu1 %2101  ;;  %v2100_v23 = vpop.permute.xlu0 %2099 }
 0x2eb   : > { %2175 = vst.msk [vmem:[#allocation3 + $0xb8] sm:$0xff] %vm2151_vm11, %v2102_v62  ;;  %2174 = vst.msk [vmem:[#allocation3 + $0xb0] sm:$0xff] %vm2151_vm11, %v2100_v23  ;;  %v8550_v62 = vld [vmem:[#allocation2 + $0x134] sm:$0xff]  ;;  %v8552_v23 = vld [vmem:[#allocation2 + $0x12c] sm:$0xff] }
 0x2ec   : > { %2476 = vrot.lane.b32.xlu1 %v8092_v6, %s6864_s22  ;;  %2474 = vrot.lane.b32.xlu0 %v8094_v7, %s6864_s22 }
 0x2ee   : > { %v2106_v35 = vpop.permute.xlu1 %2105  ;;  %v2104_v36 = vpop.permute.xlu0 %2103 }
 0x2ef   : > { %2177 = vst.msk [vmem:[#allocation3 + $0xc8] sm:$0xff] %vm2151_vm11, %v2106_v35  ;;  %2176 = vst.msk [vmem:[#allocation3 + $0xc0] sm:$0xff] %vm2151_vm11, %v2104_v36 }
 0x2f0   : > { %2480 = vrot.lane.b32.xlu1 %v8102_v14, %s6864_s22  ;;  %2478 = vrot.lane.b32.xlu0 %v8104_v15, %s6864_s22 }
 0x2f2   : > { %v2110_v33 = vpop.permute.xlu1 %2109  ;;  %v2108_v11 = vpop.permute.xlu0 %2107 }
 0x2f3   : > { %2179 = vst.msk [vmem:[#allocation3 + $0xd8] sm:$0xff] %vm2151_vm11, %v2110_v33  ;;  %2178 = vst.msk [vmem:[#allocation3 + $0xd0] sm:$0xff] %vm2151_vm11, %v2108_v11  ;;  %v8560_v33 = vld [vmem:[#allocation2 + $0x154] sm:$0xff]  ;;  %v8562_v11 = vld [vmem:[#allocation2 + $0x14c] sm:$0xff] }
 0x2f4   : > { %2484 = vrot.lane.b32.xlu1 %v8112_v0, %s6864_s22  ;;  %2482 = vrot.lane.b32.xlu0 %v8114_v27, %s6864_s22 }
 0x2f6   : > { %v2114_v6 = vpop.permute.xlu1 %2113  ;;  %v2112_v7 = vpop.permute.xlu0 %2111 }
 0x2f7   : > { %2181 = vst.msk [vmem:[#allocation3 + $0xe8] sm:$0xff] %vm2151_vm11, %v2114_v6  ;;  %2180 = vst.msk [vmem:[#allocation3 + $0xe0] sm:$0xff] %vm2151_vm11, %v2112_v7 }
 0x2f8   : > { %2488 = vrot.lane.b32.xlu1 %v8122_v34, %s6864_s22  ;;  %2486 = vrot.lane.b32.xlu0 %v8124_v12, %s6864_s22 }
 0x2fa   : > { %v2118_v14 = vpop.permute.xlu1 %2117  ;;  %v2116_v15 = vpop.permute.xlu0 %2115 }
 0x2fb   : > { %2183 = vst.msk [vmem:[#allocation3 + $0xf8] sm:$0xff] %vm2151_vm11, %v2118_v14  ;;  %2182 = vst.msk [vmem:[#allocation3 + $0xf0] sm:$0xff] %vm2151_vm11, %v2116_v15  ;;  %v8570_v14 = vld [vmem:[#allocation2 + $0x174] sm:$0xff]  ;;  %v8572_v15 = vld [vmem:[#allocation2 + $0x16c] sm:$0xff]  ;;  %vm4855_vm11 = vcmask 786144  }
 0x2fc   : > { %2492 = vrot.lane.b32.xlu1 %v8132_v29, %s6864_s22  ;;  %2490 = vrot.lane.b32.xlu0 %v8134_v30, %s6864_s22 }
 0x2fe   : > { %v2252_v0 = vpop.permute.xlu1 %2251  ;;  %v2250_v27 = vpop.permute.xlu0 %2249 }
 0x2ff   : > { %2347 = vst.msk [vmem:[#allocation3 + $0x8] sm:$0xff] %vm2345_vm12, %v2252_v0  ;;  %2346 = vst.msk [vmem:[#allocation3] sm:$0xff] %vm2345_vm12, %v2250_v27 }
 0x300   : > { %2496 = vrot.lane.b32.xlu1 %v8142_v37, %s6864_s22  ;;  %2494 = vrot.lane.b32.xlu0 %v8144_v38, %s6864_s22  ;;  %v2572_v37 = vld [vmem:[#allocation2 + $0x54] sm:$0xff]  ;;  %v2571_v38 = vld [vmem:[#allocation2 + $0x4c] sm:$0xff] }
 0x302   : > { %v2256_v34 = vpop.permute.xlu1 %2255  ;;  %v2254_v12 = vpop.permute.xlu0 %2253 }
 0x303   : > { %2349 = vst.msk [vmem:[#allocation3 + $0x18] sm:$0xff] %vm2345_vm12, %v2256_v34  ;;  %2348 = vst.msk [vmem:[#allocation3 + $0x10] sm:$0xff] %vm2345_vm12, %v2254_v12  ;;  %v8580_v34 = vld [vmem:[#allocation2 + $0x194] sm:$0xff]  ;;  %v8582_v12 = vld [vmem:[#allocation2 + $0x18c] sm:$0xff] }
 0x304   : > { %2500 = vrot.lane.b32.xlu1 %v8152_v39, %s6864_s22  ;;  %2498 = vrot.lane.b32.xlu0 %v8154_v40, %s6864_s22  ;;  %v2574_v39 = vld [vmem:[#allocation2 + $0x74] sm:$0xff]  ;;  %v2573_v40 = vld [vmem:[#allocation2 + $0x6c] sm:$0xff] }
 0x306   : > { %v2260_v29 = vpop.permute.xlu1 %2259  ;;  %v2258_v30 = vpop.permute.xlu0 %2257 }
 0x307   : > { %2351 = vst.msk [vmem:[#allocation3 + $0x28] sm:$0xff] %vm2345_vm12, %v2260_v29  ;;  %2350 = vst.msk [vmem:[#allocation3 + $0x20] sm:$0xff] %vm2345_vm12, %v2258_v30 }
 0x308   : > { %2504 = vrot.lane.b32.xlu1 %v8162_v43, %s6864_s22  ;;  %2502 = vrot.lane.b32.xlu0 %v8164_v44, %s6864_s22  ;;  %v2576_v44 = vld [vmem:[#allocation2 + $0x94] sm:$0xff]  ;;  %s6881_s22 = smov 108  }
 0x30a   : > { %v2264_v22 = vpop.permute.xlu1 %2263  ;;  %v2262_v16 = vpop.permute.xlu0 %2261 }
 0x30b   : > { %2353 = vst.msk [vmem:[#allocation3 + $0x38] sm:$0xff] %vm2345_vm12, %v2264_v22  ;;  %2352 = vst.msk [vmem:[#allocation3 + $0x30] sm:$0xff] %vm2345_vm12, %v2262_v16 }
 0x30c   : > { %2637 = vrot.lane.b32.xlu1 %v2572_v37, %s6865_s23  ;;  %2635 = vrot.lane.b32.xlu0 %v2571_v38, %s6865_s23  ;;  %v8590_v37 = vld [vmem:[#allocation2 + $0x1b4] sm:$0xff]  ;;  %v8592_v38 = vld [vmem:[#allocation2 + $0x1ac] sm:$0xff] }
 0x30e   : > { %v2268_v5 = vpop.permute.xlu1 %2267  ;;  %v2266_v43 = vpop.permute.xlu0 %2265 }
 0x30f   : > { %2355 = vst.msk [vmem:[#allocation3 + $0x48] sm:$0xff] %vm2345_vm12, %v2268_v5  ;;  %2354 = vst.msk [vmem:[#allocation3 + $0x40] sm:$0xff] %vm2345_vm12, %v2266_v43 }
 0x310   : > { %2641 = vrot.lane.b32.xlu1 %v2574_v39, %s6865_s23  ;;  %2639 = vrot.lane.b32.xlu0 %v2573_v40, %s6865_s23  ;;  %v8600_v39 = vld [vmem:[#allocation2 + $0x1d4] sm:$0xff]  ;;  %v8602_v40 = vld [vmem:[#allocation2 + $0x1cc] sm:$0xff] }
 0x312   : > { %v2272_v20 = vpop.permute.xlu1 %2271  ;;  %v2270_v21 = vpop.permute.xlu0 %2269 }
 0x313   : > { %2357 = vst.msk [vmem:[#allocation3 + $0x58] sm:$0xff] %vm2345_vm12, %v2272_v20  ;;  %2356 = vst.msk [vmem:[#allocation3 + $0x50] sm:$0xff] %vm2345_vm12, %v2270_v21 }
 0x314   : > { %2645 = vrot.lane.b32.xlu1 %v2576_v44, %s6865_s23  ;;  %2643 = vrot.lane.b32.xlu0 %v2575_v4, %s6865_s23  ;;  %v8610_v44 = vld [vmem:[#allocation2 + $0x1f4] sm:$0xff]  ;;  %v8612_v4 = vld [vmem:[#allocation2 + $0x1ec] sm:$0xff] }
 0x316   : > { %v2276_v24 = vpop.permute.xlu1 %2275  ;;  %v2274_v25 = vpop.permute.xlu0 %2273 }
 0x317   : > { %2359 = vst.msk [vmem:[#allocation3 + $0x68] sm:$0xff] %vm2345_vm12, %v2276_v24  ;;  %2358 = vst.msk [vmem:[#allocation3 + $0x60] sm:$0xff] %vm2345_vm12, %v2274_v25 }
 0x318   : > { %2649 = vrot.lane.b32.xlu1 %v2578_v8, %s6865_s23  ;;  %2647 = vrot.lane.b32.xlu0 %v2577_v9, %s6865_s23  ;;  %v8620_v8 = vld [vmem:[#allocation2 + $0x214] sm:$0xff]  ;;  %v8622_v9 = vld [vmem:[#allocation2 + $0x20c] sm:$0xff] }
 0x31a   : > { %v2280_v41 = vpop.permute.xlu1 %2279  ;;  %v2278_v17 = vpop.permute.xlu0 %2277 }
 0x31b   : > { %2361 = vst.msk [vmem:[#allocation3 + $0x78] sm:$0xff] %vm2345_vm12, %v2280_v41  ;;  %2360 = vst.msk [vmem:[#allocation3 + $0x70] sm:$0xff] %vm2345_vm12, %v2278_v17 }
 0x31c   : > { %2653 = vrot.lane.b32.xlu1 %v2580_v32, %s6865_s23  ;;  %2651 = vrot.lane.b32.xlu0 %v2579_v50, %s6865_s23  ;;  %v8630_v32 = vld [vmem:[#allocation2 + $0x234] sm:$0xff]  ;;  %v8632_v50 = vld [vmem:[#allocation2 + $0x22c] sm:$0xff] }
 0x31e   : > { %v2284_v13 = vpop.permute.xlu1 %2283  ;;  %v2282_v49 = vpop.permute.xlu0 %2281 }
 0x31f   : > { %2363 = vst.msk [vmem:[#allocation3 + $0x88] sm:$0xff] %vm2345_vm12, %v2284_v13  ;;  %2362 = vst.msk [vmem:[#allocation3 + $0x80] sm:$0xff] %vm2345_vm12, %v2282_v49 }
 0x320   : > { %2657 = vrot.lane.b32.xlu1 %v8530_v42, %s6865_s23  ;;  %2655 = vrot.lane.b32.xlu0 %v8532_v45, %s6865_s23 }
 0x322   : > { %v2288_v58 = vpop.permute.xlu1 %2287  ;;  %v2286_v1 = vpop.permute.xlu0 %2285 }
 0x323   : > { %2365 = vst.msk [vmem:[#allocation3 + $0x98] sm:$0xff] %vm2345_vm12, %v2288_v58  ;;  %2364 = vst.msk [vmem:[#allocation3 + $0x90] sm:$0xff] %vm2345_vm12, %v2286_v1 }
 0x324   : > { %2661 = vrot.lane.b32.xlu1 %v8540_v46, %s6865_s23  ;;  %2659 = vrot.lane.b32.xlu0 %v8542_v59, %s6865_s23 }
 0x326   : > { %v2292_v35 = vpop.permute.xlu1 %2291  ;;  %v2290_v36 = vpop.permute.xlu0 %2289 }
 0x327   : > { %2367 = vst.msk [vmem:[#allocation3 + $0xa8] sm:$0xff] %vm2345_vm12, %v2292_v35  ;;  %2366 = vst.msk [vmem:[#allocation3 + $0xa0] sm:$0xff] %vm2345_vm12, %v2290_v36 }
 0x328   : > { %2665 = vrot.lane.b32.xlu1 %v8550_v62, %s6865_s23  ;;  %2663 = vrot.lane.b32.xlu0 %v8552_v23, %s6865_s23 }
 0x32a   : > { %v2296_v6 = vpop.permute.xlu1 %2295  ;;  %v2294_v7 = vpop.permute.xlu0 %2293 }
 0x32b   : > { %2369 = vst.msk [vmem:[#allocation3 + $0xb8] sm:$0xff] %vm2345_vm12, %v2296_v6  ;;  %2368 = vst.msk [vmem:[#allocation3 + $0xb0] sm:$0xff] %vm2345_vm12, %v2294_v7 }
 0x32c   : > { %2669 = vrot.lane.b32.xlu1 %v8560_v33, %s6865_s23  ;;  %2667 = vrot.lane.b32.xlu0 %v8562_v11, %s6865_s23 }
 0x32e   : > { %v2300_v0 = vpop.permute.xlu1 %2299  ;;  %v2298_v27 = vpop.permute.xlu0 %2297 }
 0x32f   : > { %2371 = vst.msk [vmem:[#allocation3 + $0xc8] sm:$0xff] %vm2345_vm12, %v2300_v0  ;;  %2370 = vst.msk [vmem:[#allocation3 + $0xc0] sm:$0xff] %vm2345_vm12, %v2298_v27 }
 0x330   : > { %2673 = vrot.lane.b32.xlu1 %v8570_v14, %s6865_s23  ;;  %2671 = vrot.lane.b32.xlu0 %v8572_v15, %s6865_s23 }
 0x332   : > { %v2304_v29 = vpop.permute.xlu1 %2303  ;;  %v2302_v30 = vpop.permute.xlu0 %2301 }
 0x333   : > { %2373 = vst.msk [vmem:[#allocation3 + $0xd8] sm:$0xff] %vm2345_vm12, %v2304_v29  ;;  %2372 = vst.msk [vmem:[#allocation3 + $0xd0] sm:$0xff] %vm2345_vm12, %v2302_v30 }
 0x334   : > { %2677 = vrot.lane.b32.xlu1 %v8580_v34, %s6865_s23  ;;  %2675 = vrot.lane.b32.xlu0 %v8582_v12, %s6865_s23 }
 0x336   : > { %v2308_v22 = vpop.permute.xlu1 %2307  ;;  %v2306_v16 = vpop.permute.xlu0 %2305 }
 0x337   : > { %2375 = vst.msk [vmem:[#allocation3 + $0xe8] sm:$0xff] %vm2345_vm12, %v2308_v22  ;;  %2374 = vst.msk [vmem:[#allocation3 + $0xe0] sm:$0xff] %vm2345_vm12, %v2306_v16 }
 0x338   : > { %2681 = vrot.lane.b32.xlu1 %v8590_v37, %s6865_s23  ;;  %2679 = vrot.lane.b32.xlu0 %v8592_v38, %s6865_s23 }
 0x33a   : > { %v2312_v5 = vpop.permute.xlu1 %2311  ;;  %v2310_v43 = vpop.permute.xlu0 %2309 }
 0x33b   : > { %2377 = vst.msk [vmem:[#allocation3 + $0xf8] sm:$0xff] %vm2345_vm12, %v2312_v5  ;;  %2376 = vst.msk [vmem:[#allocation3 + $0xf0] sm:$0xff] %vm2345_vm12, %v2310_v43  ;;  %vm5048_vm12 = vcmask 818944  }
 0x33c   : > { %2685 = vrot.lane.b32.xlu1 %v8600_v39, %s6865_s23  ;;  %2683 = vrot.lane.b32.xlu0 %v8602_v40, %s6865_s23 }
 0x33e   : > { %v2445_v20 = vpop.permute.xlu1 %2444  ;;  %v2443_v21 = vpop.permute.xlu0 %2442 }
 0x33f   : > { %2540 = vst.msk [vmem:[#allocation3 + $0x8] sm:$0xff] %vm2538_vm13, %v2445_v20  ;;  %2539 = vst.msk [vmem:[#allocation3] sm:$0xff] %vm2538_vm13, %v2443_v21 }
 0x340   : > { %2689 = vrot.lane.b32.xlu1 %v8610_v44, %s6865_s23  ;;  %2687 = vrot.lane.b32.xlu0 %v8612_v4, %s6865_s23 }
 0x342   : > { %v2449_v24 = vpop.permute.xlu1 %2448  ;;  %v2447_v25 = vpop.permute.xlu0 %2446 }
 0x343   : > { %2542 = vst.msk [vmem:[#allocation3 + $0x18] sm:$0xff] %vm2538_vm13, %v2449_v24  ;;  %2541 = vst.msk [vmem:[#allocation3 + $0x10] sm:$0xff] %vm2538_vm13, %v2447_v25  ;;  %v8718_v25 = vld [vmem:[#allocation2 + $0x242] sm:$0xff] }
 0x344   : > { %2693 = vrot.lane.b32.xlu1 %v8620_v8, %s6865_s23  ;;  %2691 = vrot.lane.b32.xlu0 %v8622_v9, %s6865_s23 }
 0x346   : > { %v2453_v41 = vpop.permute.xlu1 %2452  ;;  %v2451_v17 = vpop.permute.xlu0 %2450 }
 0x347   : > { %2544 = vst.msk [vmem:[#allocation3 + $0x28] sm:$0xff] %vm2538_vm13, %v2453_v41  ;;  %2543 = vst.msk [vmem:[#allocation3 + $0x20] sm:$0xff] %vm2538_vm13, %v2451_v17  ;;  %v8726_v17 = vld [vmem:[#allocation2 + $0x26a] sm:$0xff] }
 0x348   : > { %2697 = vrot.lane.b32.xlu1 %v8630_v32, %s6865_s23  ;;  %2695 = vrot.lane.b32.xlu0 %v8632_v50, %s6865_s23 }
 0x34a   : > { %v2457_v13 = vpop.permute.xlu1 %2456  ;;  %v2455_v49 = vpop.permute.xlu0 %2454 }
 0x34b   : > { %2546 = vst.msk [vmem:[#allocation3 + $0x38] sm:$0xff] %vm2538_vm13, %v2457_v13  ;;  %2545 = vst.msk [vmem:[#allocation3 + $0x30] sm:$0xff] %vm2538_vm13, %v2455_v49  ;;  %v8728_v13 = vld [vmem:[#allocation2 + $0x262] sm:$0xff] }
 0x34c   : > { %2830 = vrot.lane.b32.xlu1 %v8318_v18, %s6866_s27  ;;  %2828 = vrot.lane.b32.xlu0 %v8320_v19, %s6866_s27  ;;  %v2771_v18 = vld [vmem:[#allocation2 + $0x14a] sm:$0xff] }
 0x34e   : > { %v2461_v58 = vpop.permute.xlu1 %2460  ;;  %v2459_v1 = vpop.permute.xlu0 %2458 }
 0x34f   : > { %2548 = vst.msk [vmem:[#allocation3 + $0x48] sm:$0xff] %vm2538_vm13, %v2461_v58  ;;  %2547 = vst.msk [vmem:[#allocation3 + $0x40] sm:$0xff] %vm2538_vm13, %v2459_v1  ;;  %v8736_v58 = vld [vmem:[#allocation2 + $0x28a] sm:$0xff]  ;;  %v8738_v1 = vld [vmem:[#allocation2 + $0x282] sm:$0xff] }
 0x350   : > { %2834 = vrot.lane.b32.xlu1 %v8328_v10, %s6866_s27  ;;  %2832 = vrot.lane.b32.xlu0 %v8330_v31, %s6866_s27  ;;  %v2773_v10 = vld [vmem:[#allocation2 + $0x16a] sm:$0xff] }
 0x352   : > { %v2465_v35 = vpop.permute.xlu1 %2464  ;;  %v2463_v36 = vpop.permute.xlu0 %2462 }
 0x353   : > { %2550 = vst.msk [vmem:[#allocation3 + $0x58] sm:$0xff] %vm2538_vm13, %v2465_v35  ;;  %2549 = vst.msk [vmem:[#allocation3 + $0x50] sm:$0xff] %vm2538_vm13, %v2463_v36 }
 0x354   : > { %2838 = vrot.lane.b32.xlu1 %v8338_v2, %s6866_s27  ;;  %2836 = vrot.lane.b32.xlu0 %v8340_v3, %s6866_s27  ;;  %v8668_v2 = vld [vmem:[#allocation2 + $0x18a] sm:$0xff] }
 0x356   : > { %v2469_v19 = vpop.permute.xlu1 %2468  ;;  %v2467_v6 = vpop.permute.xlu0 %2466 }
 0x357   : > { %2552 = vst.msk [vmem:[#allocation3 + $0x68] sm:$0xff] %vm2538_vm13, %v2469_v19  ;;  %2551 = vst.msk [vmem:[#allocation3 + $0x60] sm:$0xff] %vm2538_vm13, %v2467_v6  ;;  %v8748_v19 = vld [vmem:[#allocation2 + $0x2a2] sm:$0xff] }
 0x358   : > { %2842 = vrot.lane.b32.xlu1 %v2771_v18, %s6866_s27  ;;  %2840 = vrot.lane.b32.xlu0 %v8348_v26, %s6866_s27  ;;  %v8676_v26 = vld [vmem:[#allocation2 + $0x1aa] sm:$0xff] }
 0x359   : > { %v8746_v18 = vld [vmem:[#allocation2 + $0x2aa] sm:$0xff] }
 0x35a   : > { %v2473_v31 = vpop.permute.xlu1 %2472  ;;  %v2471_v7 = vpop.permute.xlu0 %2470 }
 0x35b   : > { %2554 = vst.msk [vmem:[#allocation3 + $0x78] sm:$0xff] %vm2538_vm13, %v2473_v31  ;;  %2553 = vst.msk [vmem:[#allocation3 + $0x70] sm:$0xff] %vm2538_vm13, %v2471_v7  ;;  %v8756_v31 = vld [vmem:[#allocation2 + $0x2ca] sm:$0xff]  ;;  %v8758_v7 = vld [vmem:[#allocation2 + $0x2c2] sm:$0xff] }
 0x35c   : > { %2846 = vrot.lane.b32.xlu1 %v2773_v10, %s6866_s27  ;;  %2844 = vrot.lane.b32.xlu0 %v8356_v55, %s6866_s27  ;;  %v8684_v55 = vld [vmem:[#allocation2 + $0x1ca] sm:$0xff] }
 0x35e   : > { %v2477_v3 = vpop.permute.xlu1 %2476  ;;  %v2475_v0 = vpop.permute.xlu0 %2474 }
 0x35f   : > { %2556 = vst.msk [vmem:[#allocation3 + $0x88] sm:$0xff] %vm2538_vm13, %v2477_v3  ;;  %2555 = vst.msk [vmem:[#allocation3 + $0x80] sm:$0xff] %vm2538_vm13, %v2475_v0 }
 0x360   : > { %2850 = vrot.lane.b32.xlu1 %v8668_v2, %s6866_s27  ;;  %2848 = vrot.lane.b32.xlu0 %v8364_v48, %s6866_s27  ;;  %v8692_v48 = vld [vmem:[#allocation2 + $0x1ea] sm:$0xff] }
 0x362   : > { %v2481_v27 = vpop.permute.xlu1 %2480  ;;  %v2479_v29 = vpop.permute.xlu0 %2478 }
 0x363   : > { %2558 = vst.msk [vmem:[#allocation3 + $0x98] sm:$0xff] %vm2538_vm13, %v2481_v27  ;;  %2557 = vst.msk [vmem:[#allocation3 + $0x90] sm:$0xff] %vm2538_vm13, %v2479_v29 }
 0x364   : > { %2854 = vrot.lane.b32.xlu1 %v8676_v26, %s6866_s27  ;;  %2852 = vrot.lane.b32.xlu0 %v8372_v53, %s6866_s27  ;;  %v8700_v53 = vld [vmem:[#allocation2 + $0x20a] sm:$0xff] }
 0x366   : > { %v2485_v30 = vpop.permute.xlu1 %2484  ;;  %v2483_v22 = vpop.permute.xlu0 %2482 }
 0x367   : > { %2560 = vst.msk [vmem:[#allocation3 + $0xa8] sm:$0xff] %vm2538_vm13, %v2485_v30  ;;  %2559 = vst.msk [vmem:[#allocation3 + $0xa0] sm:$0xff] %vm2538_vm13, %v2483_v22 }
 0x368   : > { %2858 = vrot.lane.b32.xlu1 %v8684_v55, %s6866_s27  ;;  %2856 = vrot.lane.b32.xlu0 %v8380_v57, %s6866_s27  ;;  %v8708_v57 = vld [vmem:[#allocation2 + $0x22a] sm:$0xff] }
 0x36a   : > { %v2489_v16 = vpop.permute.xlu1 %2488  ;;  %v2487_v5 = vpop.permute.xlu0 %2486 }
 0x36b   : > { %2562 = vst.msk [vmem:[#allocation3 + $0xb8] sm:$0xff] %vm2538_vm13, %v2489_v16  ;;  %2561 = vst.msk [vmem:[#allocation3 + $0xb0] sm:$0xff] %vm2538_vm13, %v2487_v5 }
 0x36c   : > { %2862 = vrot.lane.b32.xlu1 %v8692_v48, %s6866_s27  ;;  %2860 = vrot.lane.b32.xlu0 %v8388_v60, %s6866_s27  ;;  %v8716_v60 = vld [vmem:[#allocation2 + $0x24a] sm:$0xff] }
 0x36e   : > { %v2493_v43 = vpop.permute.xlu1 %2492  ;;  %v2491_v20 = vpop.permute.xlu0 %2490 }
 0x36f   : > { %2564 = vst.msk [vmem:[#allocation3 + $0xc8] sm:$0xff] %vm2538_vm13, %v2493_v43  ;;  %2563 = vst.msk [vmem:[#allocation3 + $0xc0] sm:$0xff] %vm2538_vm13, %v2491_v20 }
 0x370   : > { %2866 = vrot.lane.b32.xlu1 %v8700_v53, %s6866_s27  ;;  %2864 = vrot.lane.b32.xlu0 %v8396_v63, %s6866_s27 }
 0x372   : > { %v2497_v21 = vpop.permute.xlu1 %2496  ;;  %v2495_v24 = vpop.permute.xlu0 %2494 }
 0x373   : > { %2566 = vst.msk [vmem:[#allocation3 + $0xd8] sm:$0xff] %vm2538_vm13, %v2497_v21  ;;  %2565 = vst.msk [vmem:[#allocation3 + $0xd0] sm:$0xff] %vm2538_vm13, %v2495_v24 }
 0x374   : > { %2870 = vrot.lane.b32.xlu1 %v8708_v57, %s6866_s27  ;;  %2868 = vrot.lane.b32.xlu0 %v8404_v28, %s6866_s27 }
 0x376   : > { %v2501_v41 = vpop.permute.xlu1 %2500  ;;  %v2499_v63 = vpop.permute.xlu0 %2498 }
 0x377   : > { %2568 = vst.msk [vmem:[#allocation3 + $0xe8] sm:$0xff] %vm2538_vm13, %v2501_v41  ;;  %2567 = vst.msk [vmem:[#allocation3 + $0xe0] sm:$0xff] %vm2538_vm13, %v2499_v63 }
 0x378   : > { %2874 = vrot.lane.b32.xlu1 %v8716_v60, %s6866_s27  ;;  %2872 = vrot.lane.b32.xlu0 %v8718_v25, %s6866_s27 }
 0x37a   : > { %v2505_v28 = vpop.permute.xlu1 %2504  ;;  %v2503_v49 = vpop.permute.xlu0 %2502 }
 0x37b   : > { %2570 = vst.msk [vmem:[#allocation3 + $0xf8] sm:$0xff] %vm2538_vm13, %v2505_v28  ;;  %2569 = vst.msk [vmem:[#allocation3 + $0xf0] sm:$0xff] %vm2538_vm13, %v2503_v49  ;;  %v8802_v28 = vld [vmem:[#allocation2 + $0x1af] sm:$0xff]  ;;  %v8804_v49 = vld [vmem:[#allocation2 + $0x1a7] sm:$0xff]  ;;  %vm5242_vm13 = vcmask 851744  }
 0x37c   : > { %2878 = vrot.lane.b32.xlu1 %v8726_v17, %s6866_s27  ;;  %2876 = vrot.lane.b32.xlu0 %v8728_v13, %s6866_s27 }
 0x37e   : > { %v2638_v35 = vpop.permute.xlu1 %2637  ;;  %v2636_v36 = vpop.permute.xlu0 %2635 }
 0x37f   : > { %2733 = vst.msk [vmem:[#allocation3 + $0x8] sm:$0xff] %vm2731_vm14, %v2638_v35  ;;  %2732 = vst.msk [vmem:[#allocation3] sm:$0xff] %vm2731_vm14, %v2636_v36 }
 0x380   : > { %2882 = vrot.lane.b32.xlu1 %v8736_v58, %s6866_s27  ;;  %2880 = vrot.lane.b32.xlu0 %v8738_v1, %s6866_s27 }
 0x382   : > { %v2642_v6 = vpop.permute.xlu1 %2641  ;;  %v2640_v10 = vpop.permute.xlu0 %2639 }
 0x383   : > { %2735 = vst.msk [vmem:[#allocation3 + $0x18] sm:$0xff] %vm2731_vm14, %v2642_v6  ;;  %2734 = vst.msk [vmem:[#allocation3 + $0x10] sm:$0xff] %vm2731_vm14, %v2640_v10  ;;  %v8812_v6 = vld [vmem:[#allocation2 + $0x1cf] sm:$0xff]  ;;  %v8814_v10 = vld [vmem:[#allocation2 + $0x1c7] sm:$0xff] }
 0x384   : > { %2886 = vrot.lane.b32.xlu1 %v8746_v18, %s6866_s27  ;;  %2884 = vrot.lane.b32.xlu0 %v8748_v19, %s6866_s27 }
 0x386   : > { %v2646_v3 = vpop.permute.xlu1 %2645  ;;  %v2644_v0 = vpop.permute.xlu0 %2643 }
 0x387   : > { %2737 = vst.msk [vmem:[#allocation3 + $0x28] sm:$0xff] %vm2731_vm14, %v2646_v3  ;;  %2736 = vst.msk [vmem:[#allocation3 + $0x20] sm:$0xff] %vm2731_vm14, %v2644_v0 }
 0x388   : > { %2890 = vrot.lane.b32.xlu1 %v8756_v31, %s6866_s27  ;;  %2888 = vrot.lane.b32.xlu0 %v8758_v7, %s6866_s27 }
 0x38a   : > { %v2650_v27 = vpop.permute.xlu1 %2649  ;;  %v2648_v29 = vpop.permute.xlu0 %2647 }
 0x38b   : > { %2739 = vst.msk [vmem:[#allocation3 + $0x38] sm:$0xff] %vm2731_vm14, %v2650_v27  ;;  %2738 = vst.msk [vmem:[#allocation3 + $0x30] sm:$0xff] %vm2731_vm14, %v2648_v29  ;;  %v8822_v27 = vld [vmem:[#allocation2 + $0x1ef] sm:$0xff]  ;;  %v8824_v29 = vld [vmem:[#allocation2 + $0x1e7] sm:$0xff] }
 0x38c   : > { %3023 = vrot.lane.b32.xlu1 %v8432_v56, %s6867_s28  ;;  %3021 = vrot.lane.b32.xlu0 %v8434_v47, %s6867_s28  ;;  %v2964_v56 = vld [vmem:[#allocation2 + $0x14f] sm:$0xff]  ;;  %v2963_v47 = vld [vmem:[#allocation2 + $0x147] sm:$0xff] }
 0x38e   : > { %v2654_v30 = vpop.permute.xlu1 %2653  ;;  %v2652_v22 = vpop.permute.xlu0 %2651 }
 0x38f   : > { %2741 = vst.msk [vmem:[#allocation3 + $0x48] sm:$0xff] %vm2731_vm14, %v2654_v30  ;;  %2740 = vst.msk [vmem:[#allocation3 + $0x40] sm:$0xff] %vm2731_vm14, %v2652_v22 }
 0x390   : > { %3027 = vrot.lane.b32.xlu1 %v8442_v51, %s6867_s28  ;;  %3025 = vrot.lane.b32.xlu0 %v8444_v54, %s6867_s28  ;;  %v2966_v51 = vld [vmem:[#allocation2 + $0x16f] sm:$0xff]  ;;  %v2965_v54 = vld [vmem:[#allocation2 + $0x167] sm:$0xff] }
 0x392   : > { %v2658_v16 = vpop.permute.xlu1 %2657  ;;  %v2656_v5 = vpop.permute.xlu0 %2655 }
 0x393   : > { %2743 = vst.msk [vmem:[#allocation3 + $0x58] sm:$0xff] %vm2731_vm14, %v2658_v16  ;;  %2742 = vst.msk [vmem:[#allocation3 + $0x50] sm:$0xff] %vm2731_vm14, %v2656_v5  ;;  %v8832_v16 = vld [vmem:[#allocation2 + $0x20f] sm:$0xff]  ;;  %v8834_v5 = vld [vmem:[#allocation2 + $0x207] sm:$0xff] }
 0x394   : > { %3031 = vrot.lane.b32.xlu1 %v8452_v52, %s6867_s28  ;;  %3029 = vrot.lane.b32.xlu0 %v8454_v61, %s6867_s28  ;;  %v8792_v52 = vld [vmem:[#allocation2 + $0x18f] sm:$0xff]  ;;  %v8794_v61 = vld [vmem:[#allocation2 + $0x187] sm:$0xff] }
 0x396   : > { %v2662_v43 = vpop.permute.xlu1 %2661  ;;  %v2660_v20 = vpop.permute.xlu0 %2659 }
 0x397   : > { %2745 = vst.msk [vmem:[#allocation3 + $0x68] sm:$0xff] %vm2731_vm14, %v2662_v43  ;;  %2744 = vst.msk [vmem:[#allocation3 + $0x60] sm:$0xff] %vm2731_vm14, %v2660_v20  ;;  %v8842_v43 = vld [vmem:[#allocation2 + $0x22f] sm:$0xff]  ;;  %v8844_v20 = vld [vmem:[#allocation2 + $0x227] sm:$0xff] }
 0x398   : > { %3035 = vrot.lane.b32.xlu1 %v2964_v56, %s6867_s28  ;;  %3033 = vrot.lane.b32.xlu0 %v2963_v47, %s6867_s28 }
 0x39a   : > { %v2666_v21 = vpop.permute.xlu1 %2665  ;;  %v2664_v24 = vpop.permute.xlu0 %2663 }
 0x39b   : > { %2747 = vst.msk [vmem:[#allocation3 + $0x78] sm:$0xff] %vm2731_vm14, %v2666_v21  ;;  %2746 = vst.msk [vmem:[#allocation3 + $0x70] sm:$0xff] %vm2731_vm14, %v2664_v24  ;;  %v8852_v21 = vld [vmem:[#allocation2 + $0x24f] sm:$0xff]  ;;  %v8854_v24 = vld [vmem:[#allocation2 + $0x247] sm:$0xff] }
 0x39c   : > { %3039 = vrot.lane.b32.xlu1 %v2966_v51, %s6867_s28  ;;  %3037 = vrot.lane.b32.xlu0 %v2965_v54, %s6867_s28 }
 0x39e   : > { %v2670_v41 = vpop.permute.xlu1 %2669  ;;  %v2668_v63 = vpop.permute.xlu0 %2667 }
 0x39f   : > { %2749 = vst.msk [vmem:[#allocation3 + $0x88] sm:$0xff] %vm2731_vm14, %v2670_v41  ;;  %2748 = vst.msk [vmem:[#allocation3 + $0x80] sm:$0xff] %vm2731_vm14, %v2668_v63 }
 0x3a0   : > { %3043 = vrot.lane.b32.xlu1 %v8792_v52, %s6867_s28  ;;  %3041 = vrot.lane.b32.xlu0 %v8794_v61, %s6867_s28 }
 0x3a2   : > { %v2674_v35 = vpop.permute.xlu1 %2673  ;;  %v2672_v36 = vpop.permute.xlu0 %2671 }
 0x3a3   : > { %2751 = vst.msk [vmem:[#allocation3 + $0x98] sm:$0xff] %vm2731_vm14, %v2674_v35  ;;  %2750 = vst.msk [vmem:[#allocation3 + $0x90] sm:$0xff] %vm2731_vm14, %v2672_v36  ;;  %v8862_v35 = vld [vmem:[#allocation2 + $0x26f] sm:$0xff]  ;;  %v8864_v36 = vld [vmem:[#allocation2 + $0x267] sm:$0xff] }
 0x3a4   : > { %3047 = vrot.lane.b32.xlu1 %v8802_v28, %s6867_s28  ;;  %3045 = vrot.lane.b32.xlu0 %v8804_v49, %s6867_s28 }
 0x3a6   : > { %v2678_v3 = vpop.permute.xlu1 %2677  ;;  %v2676_v0 = vpop.permute.xlu0 %2675 }
 0x3a7   : > { %2753 = vst.msk [vmem:[#allocation3 + $0xa8] sm:$0xff] %vm2731_vm14, %v2678_v3  ;;  %2752 = vst.msk [vmem:[#allocation3 + $0xa0] sm:$0xff] %vm2731_vm14, %v2676_v0 }
 0x3a8   : > { %3051 = vrot.lane.b32.xlu1 %v8812_v6, %s6867_s28  ;;  %3049 = vrot.lane.b32.xlu0 %v8814_v10, %s6867_s28 }
 0x3aa   : > { %v2682_v30 = vpop.permute.xlu1 %2681  ;;  %v2680_v22 = vpop.permute.xlu0 %2679 }
 0x3ab   : > { %2755 = vst.msk [vmem:[#allocation3 + $0xb8] sm:$0xff] %vm2731_vm14, %v2682_v30  ;;  %2754 = vst.msk [vmem:[#allocation3 + $0xb0] sm:$0xff] %vm2731_vm14, %v2680_v22  ;;  %v8872_v30 = vld [vmem:[#allocation2 + $0x28f] sm:$0xff]  ;;  %v8874_v22 = vld [vmem:[#allocation2 + $0x287] sm:$0xff] }
 0x3ac   : > { %3055 = vrot.lane.b32.xlu1 %v8822_v27, %s6867_s28  ;;  %3053 = vrot.lane.b32.xlu0 %v8824_v29, %s6867_s28 }
 0x3ae   : > { %v2686_v56 = vpop.permute.xlu1 %2685  ;;  %v2684_v47 = vpop.permute.xlu0 %2683 }
 0x3af   : > { %2757 = vst.msk [vmem:[#allocation3 + $0xc8] sm:$0xff] %vm2731_vm14, %v2686_v56  ;;  %2756 = vst.msk [vmem:[#allocation3 + $0xc0] sm:$0xff] %vm2731_vm14, %v2684_v47 }
 0x3b0   : > { %3059 = vrot.lane.b32.xlu1 %v8832_v16, %s6867_s28  ;;  %3057 = vrot.lane.b32.xlu0 %v8834_v5, %s6867_s28 }
 0x3b2   : > { %v2690_v51 = vpop.permute.xlu1 %2689  ;;  %v2688_v54 = vpop.permute.xlu0 %2687 }
 0x3b3   : > { %2759 = vst.msk [vmem:[#allocation3 + $0xd8] sm:$0xff] %vm2731_vm14, %v2690_v51  ;;  %2758 = vst.msk [vmem:[#allocation3 + $0xd0] sm:$0xff] %vm2731_vm14, %v2688_v54  ;;  %v8882_v51 = vld [vmem:[#allocation2 + $0x2af] sm:$0xff]  ;;  %v8884_v54 = vld [vmem:[#allocation2 + $0x2a7] sm:$0xff] }
 0x3b4   : > { %3063 = vrot.lane.b32.xlu1 %v8842_v43, %s6867_s28  ;;  %3061 = vrot.lane.b32.xlu0 %v8844_v20, %s6867_s28 }
 0x3b6   : > { %v2694_v41 = vpop.permute.xlu1 %2693  ;;  %v2692_v63 = vpop.permute.xlu0 %2691 }
 0x3b7   : > { %2761 = vst.msk [vmem:[#allocation3 + $0xe8] sm:$0xff] %vm2731_vm14, %v2694_v41  ;;  %2760 = vst.msk [vmem:[#allocation3 + $0xe0] sm:$0xff] %vm2731_vm14, %v2692_v63 }
 0x3b8   : > { %3067 = vrot.lane.b32.xlu1 %v8852_v21, %s6867_s28  ;;  %3065 = vrot.lane.b32.xlu0 %v8854_v24, %s6867_s28 }
 0x3ba   : > { %v2698_v3 = vpop.permute.xlu1 %2697  ;;  %v2696_v0 = vpop.permute.xlu0 %2695 }
 0x3bb   : > { %2763 = vst.msk [vmem:[#allocation3 + $0xf8] sm:$0xff] %vm2731_vm14, %v2698_v3  ;;  %2762 = vst.msk [vmem:[#allocation3 + $0xf0] sm:$0xff] %vm2731_vm14, %v2696_v0  ;;  %v8892_v3 = vld [vmem:[#allocation2 + $0x2cf] sm:$0xff]  ;;  %v8894_v0 = vld [vmem:[#allocation2 + $0x2c7] sm:$0xff]  ;;  %vm5435_vm14 = vcmask 884544  }
 0x3bc   : > { %3071 = vrot.lane.b32.xlu1 %v8862_v35, %s6867_s28  ;;  %3069 = vrot.lane.b32.xlu0 %v8864_v36, %s6867_s28 }
 0x3be   : > { %v2831_v56 = vpop.permute.xlu1 %2830  ;;  %v2829_v47 = vpop.permute.xlu0 %2828 }
 0x3bf   : > { %2926 = vst.msk [vmem:[#allocation3 + $0x8] sm:$0xff] %vm2924_vm15, %v2831_v56  ;;  %2925 = vst.msk [vmem:[#allocation3] sm:$0xff] %vm2924_vm15, %v2829_v47 }
 0x3c0   : > { %3075 = vrot.lane.b32.xlu1 %v8872_v30, %s6867_s28  ;;  %3073 = vrot.lane.b32.xlu0 %v8874_v22, %s6867_s28 }
 0x3c2   : > { %v2835_v41 = vpop.permute.xlu1 %2834  ;;  %v2833_v63 = vpop.permute.xlu0 %2832 }
 0x3c3   : > { %2928 = vst.msk [vmem:[#allocation3 + $0x18] sm:$0xff] %vm2924_vm15, %v2835_v41  ;;  %2927 = vst.msk [vmem:[#allocation3 + $0x10] sm:$0xff] %vm2924_vm15, %v2833_v63 }
 0x3c4   : > { %3079 = vrot.lane.b32.xlu1 %v8882_v51, %s6867_s28  ;;  %3077 = vrot.lane.b32.xlu0 %v8884_v54, %s6867_s28 }
 0x3c6   : > { %v2839_v56 = vpop.permute.xlu1 %2838  ;;  %v2837_v47 = vpop.permute.xlu0 %2836 }
 0x3c7   : > { %2930 = vst.msk [vmem:[#allocation3 + $0x28] sm:$0xff] %vm2924_vm15, %v2839_v56  ;;  %2929 = vst.msk [vmem:[#allocation3 + $0x20] sm:$0xff] %vm2924_vm15, %v2837_v47 }
 0x3c8   : > { %3083 = vrot.lane.b32.xlu1 %v8892_v3, %s6867_s28  ;;  %3081 = vrot.lane.b32.xlu0 %v8894_v0, %s6867_s28 }
 0x3ca   : > { %v2843_v41 = vpop.permute.xlu1 %2842  ;;  %v2841_v63 = vpop.permute.xlu0 %2840 }
 0x3cb   : > { %2932 = vst.msk [vmem:[#allocation3 + $0x38] sm:$0xff] %vm2924_vm15, %v2843_v41  ;;  %2931 = vst.msk [vmem:[#allocation3 + $0x30] sm:$0xff] %vm2924_vm15, %v2841_v63 }
 0x3cc   : > { %3216 = vrot.lane.b32.xlu1 %v8530_v42, %s6868_s29  ;;  %3214 = vrot.lane.b32.xlu0 %v8532_v45, %s6868_s29 }
 0x3ce   : > { %v2847_v56 = vpop.permute.xlu1 %2846  ;;  %v2845_v47 = vpop.permute.xlu0 %2844 }
 0x3cf   : > { %2934 = vst.msk [vmem:[#allocation3 + $0x48] sm:$0xff] %vm2924_vm15, %v2847_v56  ;;  %2933 = vst.msk [vmem:[#allocation3 + $0x40] sm:$0xff] %vm2924_vm15, %v2845_v47 }
 0x3d0   : > { %3220 = vrot.lane.b32.xlu1 %v8540_v46, %s6868_s29  ;;  %3218 = vrot.lane.b32.xlu0 %v8542_v59, %s6868_s29 }
 0x3d2   : > { %v2851_v41 = vpop.permute.xlu1 %2850  ;;  %v2849_v63 = vpop.permute.xlu0 %2848 }
 0x3d3   : > { %2936 = vst.msk [vmem:[#allocation3 + $0x58] sm:$0xff] %vm2924_vm15, %v2851_v41  ;;  %2935 = vst.msk [vmem:[#allocation3 + $0x50] sm:$0xff] %vm2924_vm15, %v2849_v63  ;;  %v8988_v41 = vld [vmem:[#allocation2 + $0x294] sm:$0xff]  ;;  %v8990_v63 = vld [vmem:[#allocation2 + $0x28c] sm:$0xff] }
 0x3d4   : > { %3224 = vrot.lane.b32.xlu1 %v8550_v62, %s6868_s29  ;;  %3222 = vrot.lane.b32.xlu0 %v8552_v23, %s6868_s29 }
 0x3d6   : > { %v2855_v42 = vpop.permute.xlu1 %2854  ;;  %v2853_v45 = vpop.permute.xlu0 %2852 }
 0x3d7   : > { %2938 = vst.msk [vmem:[#allocation3 + $0x68] sm:$0xff] %vm2924_vm15, %v2855_v42  ;;  %2937 = vst.msk [vmem:[#allocation3 + $0x60] sm:$0xff] %vm2924_vm15, %v2853_v45 }
 0x3d8   : > { %3228 = vrot.lane.b32.xlu1 %v8560_v33, %s6868_s29  ;;  %3226 = vrot.lane.b32.xlu0 %v8562_v11, %s6868_s29 }
 0x3da   : > { %v2859_v46 = vpop.permute.xlu1 %2858  ;;  %v2857_v59 = vpop.permute.xlu0 %2856 }
 0x3db   : > { %2940 = vst.msk [vmem:[#allocation3 + $0x78] sm:$0xff] %vm2924_vm15, %v2859_v46  ;;  %2939 = vst.msk [vmem:[#allocation3 + $0x70] sm:$0xff] %vm2924_vm15, %v2857_v59  ;;  %v8998_v46 = vld [vmem:[#allocation2 + $0x2b4] sm:$0xff]  ;;  %v9000_v59 = vld [vmem:[#allocation2 + $0x2ac] sm:$0xff] }
 0x3dc   : > { %3232 = vrot.lane.b32.xlu1 %v8570_v14, %s6868_s29  ;;  %3230 = vrot.lane.b32.xlu0 %v8572_v15, %s6868_s29 }
 0x3de   : > { %v2863_v62 = vpop.permute.xlu1 %2862  ;;  %v2861_v23 = vpop.permute.xlu0 %2860 }
 0x3df   : > { %2942 = vst.msk [vmem:[#allocation3 + $0x88] sm:$0xff] %vm2924_vm15, %v2863_v62  ;;  %2941 = vst.msk [vmem:[#allocation3 + $0x80] sm:$0xff] %vm2924_vm15, %v2861_v23 }
 0x3e0   : > { %3236 = vrot.lane.b32.xlu1 %v8580_v34, %s6868_s29  ;;  %3234 = vrot.lane.b32.xlu0 %v8582_v12, %s6868_s29 }
 0x3e2   : > { %v2867_v33 = vpop.permute.xlu1 %2866  ;;  %v2865_v11 = vpop.permute.xlu0 %2864 }
 0x3e3   : > { %2944 = vst.msk [vmem:[#allocation3 + $0x98] sm:$0xff] %vm2924_vm15, %v2867_v33  ;;  %2943 = vst.msk [vmem:[#allocation3 + $0x90] sm:$0xff] %vm2924_vm15, %v2865_v11  ;;  %v9008_v33 = vld [vmem:[#allocation2 + $0x2d4] sm:$0xff]  ;;  %v9010_v11 = vld [vmem:[#allocation2 + $0x2cc] sm:$0xff] }
 0x3e4   : > { %3240 = vrot.lane.b32.xlu1 %v8590_v37, %s6868_s29  ;;  %3238 = vrot.lane.b32.xlu0 %v8592_v38, %s6868_s29 }
 0x3e6   : > { %v2871_v14 = vpop.permute.xlu1 %2870  ;;  %v2869_v15 = vpop.permute.xlu0 %2868 }
 0x3e7   : > { %2946 = vst.msk [vmem:[#allocation3 + $0xa8] sm:$0xff] %vm2924_vm15, %v2871_v14  ;;  %2945 = vst.msk [vmem:[#allocation3 + $0xa0] sm:$0xff] %vm2924_vm15, %v2869_v15 }
 0x3e8   : > { %3244 = vrot.lane.b32.xlu1 %v8600_v39, %s6868_s29  ;;  %3242 = vrot.lane.b32.xlu0 %v8602_v40, %s6868_s29 }
 0x3ea   : > { %v2875_v34 = vpop.permute.xlu1 %2874  ;;  %v2873_v12 = vpop.permute.xlu0 %2872 }
 0x3eb   : > { %2948 = vst.msk [vmem:[#allocation3 + $0xb8] sm:$0xff] %vm2924_vm15, %v2875_v34  ;;  %2947 = vst.msk [vmem:[#allocation3 + $0xb0] sm:$0xff] %vm2924_vm15, %v2873_v12  ;;  %v3344_v34 = vld [vmem:[#allocation2 + $0x182] sm:$0xff] }
 0x3ec   : > { %3248 = vrot.lane.b32.xlu1 %v8610_v44, %s6868_s29  ;;  %3246 = vrot.lane.b32.xlu0 %v8612_v4, %s6868_s29  ;;  %v8968_v44 = vld [vmem:[#allocation2 + $0x254] sm:$0xff]  ;;  %v8970_v4 = vld [vmem:[#allocation2 + $0x24c] sm:$0xff] }
 0x3ee   : > { %v2879_v37 = vpop.permute.xlu1 %2878  ;;  %v2877_v38 = vpop.permute.xlu0 %2876 }
 0x3ef   : > { %2950 = vst.msk [vmem:[#allocation3 + $0xc8] sm:$0xff] %vm2924_vm15, %v2879_v37  ;;  %2949 = vst.msk [vmem:[#allocation3 + $0xc0] sm:$0xff] %vm2924_vm15, %v2877_v38  ;;  %v3346_v38 = vld [vmem:[#allocation2 + $0x1a2] sm:$0xff] }
 0x3f0   : > { %3252 = vrot.lane.b32.xlu1 %v8620_v8, %s6868_s29  ;;  %3250 = vrot.lane.b32.xlu0 %v8622_v9, %s6868_s29  ;;  %v8978_v9 = vld [vmem:[#allocation2 + $0x274] sm:$0xff] }
 0x3f2   : > { %v2883_v39 = vpop.permute.xlu1 %2882  ;;  %v2881_v40 = vpop.permute.xlu0 %2880 }
 0x3f3   : > { %2952 = vst.msk [vmem:[#allocation3 + $0xd8] sm:$0xff] %vm2924_vm15, %v2883_v39  ;;  %2951 = vst.msk [vmem:[#allocation3 + $0xd0] sm:$0xff] %vm2924_vm15, %v2881_v40 }
 0x3f4   : > { %3256 = vrot.lane.b32.xlu1 %v8630_v32, %s6868_s29  ;;  %3254 = vrot.lane.b32.xlu0 %v8632_v50, %s6868_s29  ;;  %v8980_v32 = vld [vmem:[#allocation2 + $0x26c] sm:$0xff] }
 0x3f6   : > { %v2887_v8 = vpop.permute.xlu1 %2886  ;;  %v2885_v56 = vpop.permute.xlu0 %2884 }
 0x3f7   : > { %2954 = vst.msk [vmem:[#allocation3 + $0xe8] sm:$0xff] %vm2924_vm15, %v2887_v8  ;;  %2953 = vst.msk [vmem:[#allocation3 + $0xe0] sm:$0xff] %vm2924_vm15, %v2885_v56  ;;  %v3348_v8 = vld [vmem:[#allocation2 + $0x1c2] sm:$0xff] }
 0x3f8   : > { %3260 = vrot.lane.b32.xlu1 %v8968_v44, %s6868_s29  ;;  %3258 = vrot.lane.b32.xlu0 %v8970_v4, %s6868_s29 }
 0x3fa   : > { %v2891_v50 = vpop.permute.xlu1 %2890  ;;  %v2889_v47 = vpop.permute.xlu0 %2888 }
 0x3fb   : > { %2956 = vst.msk [vmem:[#allocation3 + $0xf8] sm:$0xff] %vm2924_vm15, %v2891_v50  ;;  %2955 = vst.msk [vmem:[#allocation3 + $0xf0] sm:$0xff] %vm2924_vm15, %v2889_v47  ;;  %vm5628_vm15 = vcmask 917344  }
 0x3fc   : > { %3264 = vrot.lane.b32.xlu1 %v8978_v9, %s6868_s29  ;;  %3262 = vrot.lane.b32.xlu0 %v8980_v32, %s6868_s29 }
 0x3fe   : > { %v3024_v42 = vpop.permute.xlu1 %3023  ;;  %v3022_v45 = vpop.permute.xlu0 %3021 }
 0x3ff   : > { %3119 = vst.msk [vmem:[#allocation3 + $0x8] sm:$0xff] %vm3117_vm1, %v3024_v42  ;;  %3118 = vst.msk [vmem:[#allocation3] sm:$0xff] %vm3117_vm1, %v3022_v45 }
 0x400   : > { %3268 = vrot.lane.b32.xlu1 %v8988_v41, %s6868_s29  ;;  %3266 = vrot.lane.b32.xlu0 %v8990_v63, %s6868_s29 }
 0x402   : > { %v3028_v62 = vpop.permute.xlu1 %3027  ;;  %v3026_v23 = vpop.permute.xlu0 %3025 }
 0x403   : > { %3121 = vst.msk [vmem:[#allocation3 + $0x18] sm:$0xff] %vm3117_vm1, %v3028_v62  ;;  %3120 = vst.msk [vmem:[#allocation3 + $0x10] sm:$0xff] %vm3117_vm1, %v3026_v23 }
 0x404   : > { %3272 = vrot.lane.b32.xlu1 %v8998_v46, %s6868_s29  ;;  %3270 = vrot.lane.b32.xlu0 %v9000_v59, %s6868_s29 }
 0x406   : > { %v3032_v14 = vpop.permute.xlu1 %3031  ;;  %v3030_v15 = vpop.permute.xlu0 %3029 }
 0x407   : > { %3123 = vst.msk [vmem:[#allocation3 + $0x28] sm:$0xff] %vm3117_vm1, %v3032_v14  ;;  %3122 = vst.msk [vmem:[#allocation3 + $0x20] sm:$0xff] %vm3117_vm1, %v3030_v15 }
 0x408   : > { %3276 = vrot.lane.b32.xlu1 %v9008_v33, %s6868_s29  ;;  %3274 = vrot.lane.b32.xlu0 %v9010_v11, %s6868_s29  ;;  %s6879_s29 = smov 100  }
 0x40a   : > { %v3036_v12 = vpop.permute.xlu1 %3035  ;;  %v3034_v37 = vpop.permute.xlu0 %3033 }
 0x40b   : > { %3125 = vst.msk [vmem:[#allocation3 + $0x38] sm:$0xff] %vm3117_vm1, %v3036_v12  ;;  %3124 = vst.msk [vmem:[#allocation3 + $0x30] sm:$0xff] %vm3117_vm1, %v3034_v37 }
 0x40c   : > { %3410 = vrot.lane.b32.xlu1 %v8668_v2, %s6869_s30  ;;  %3408 = vrot.lane.b32.xlu0 %v3344_v34, %s6869_s30  ;;  %v3350_v2 = vld [vmem:[#allocation2 + $0x1e2] sm:$0xff] }
 0x40e   : > { %v3040_v39 = vpop.permute.xlu1 %3039  ;;  %v3038_v40 = vpop.permute.xlu0 %3037 }
 0x40f   : > { %3127 = vst.msk [vmem:[#allocation3 + $0x48] sm:$0xff] %vm3117_vm1, %v3040_v39  ;;  %3126 = vst.msk [vmem:[#allocation3 + $0x40] sm:$0xff] %vm3117_vm1, %v3038_v40 }
 0x410   : > { %3414 = vrot.lane.b32.xlu1 %v8676_v26, %s6869_s30  ;;  %3412 = vrot.lane.b32.xlu0 %v3346_v38, %s6869_s30  ;;  %v3352_v26 = vld [vmem:[#allocation2 + $0x202] sm:$0xff] }
 0x412   : > { %v3044_v56 = vpop.permute.xlu1 %3043  ;;  %v3042_v50 = vpop.permute.xlu0 %3041 }
 0x413   : > { %3129 = vst.msk [vmem:[#allocation3 + $0x58] sm:$0xff] %vm3117_vm1, %v3044_v56  ;;  %3128 = vst.msk [vmem:[#allocation3 + $0x50] sm:$0xff] %vm3117_vm1, %v3042_v50  ;;  %v3373_v50 = vld [vmem:[#allocation2 + $0x34a] sm:$0xff] }
 0x414   : > { %3418 = vrot.lane.b32.xlu1 %v8684_v55, %s6869_s30  ;;  %3416 = vrot.lane.b32.xlu0 %v3348_v8, %s6869_s30  ;;  %v3354_v55 = vld [vmem:[#allocation2 + $0x222] sm:$0xff] }
 0x416   : > { %v3048_v47 = vpop.permute.xlu1 %3047  ;;  %v3046_v42 = vpop.permute.xlu0 %3045 }
 0x417   : > { %3131 = vst.msk [vmem:[#allocation3 + $0x68] sm:$0xff] %vm3117_vm1, %v3048_v47  ;;  %3130 = vst.msk [vmem:[#allocation3 + $0x60] sm:$0xff] %vm3117_vm1, %v3046_v42 }
 0x418   : > { %3422 = vrot.lane.b32.xlu1 %v8692_v48, %s6869_s30  ;;  %3420 = vrot.lane.b32.xlu0 %v3350_v2, %s6869_s30  ;;  %v3372_v2 = vld [vmem:[#allocation2 + $0x342] sm:$0xff] }
 0x41a   : > { %v3052_v45 = vpop.permute.xlu1 %3051  ;;  %v3050_v62 = vpop.permute.xlu0 %3049 }
 0x41b   : > { %3133 = vst.msk [vmem:[#allocation3 + $0x78] sm:$0xff] %vm3117_vm1, %v3052_v45  ;;  %3132 = vst.msk [vmem:[#allocation3 + $0x70] sm:$0xff] %vm3117_vm1, %v3050_v62  ;;  %v3374_v45 = vld [vmem:[#allocation2 + $0x362] sm:$0xff] }
 0x41c   : > { %3426 = vrot.lane.b32.xlu1 %v8700_v53, %s6869_s30  ;;  %3424 = vrot.lane.b32.xlu0 %v3352_v26, %s6869_s30  ;;  %v3375_v26 = vld [vmem:[#allocation2 + $0x36a] sm:$0xff] }
 0x41e   : > { %v3056_v23 = vpop.permute.xlu1 %3055  ;;  %v3054_v14 = vpop.permute.xlu0 %3053 }
 0x41f   : > { %3135 = vst.msk [vmem:[#allocation3 + $0x88] sm:$0xff] %vm3117_vm1, %v3056_v23  ;;  %3134 = vst.msk [vmem:[#allocation3 + $0x80] sm:$0xff] %vm3117_vm1, %v3054_v14 }
 0x420   : > { %3430 = vrot.lane.b32.xlu1 %v8708_v57, %s6869_s30  ;;  %3428 = vrot.lane.b32.xlu0 %v3354_v55, %s6869_s30 }
 0x422   : > { %v3060_v48 = vpop.permute.xlu1 %3059  ;;  %v3058_v15 = vpop.permute.xlu0 %3057 }
 0x423   : > { %3137 = vst.msk [vmem:[#allocation3 + $0x98] sm:$0xff] %vm3117_vm1, %v3060_v48  ;;  %3136 = vst.msk [vmem:[#allocation3 + $0x90] sm:$0xff] %vm3117_vm1, %v3058_v15 }
 0x424   : > { %3434 = vrot.lane.b32.xlu1 %v8716_v60, %s6869_s30  ;;  %3432 = vrot.lane.b32.xlu0 %v8718_v25, %s6869_s30 }
 0x426   : > { %v3064_v53 = vpop.permute.xlu1 %3063  ;;  %v3062_v34 = vpop.permute.xlu0 %3061 }
 0x427   : > { %3139 = vst.msk [vmem:[#allocation3 + $0xa8] sm:$0xff] %vm3117_vm1, %v3064_v53  ;;  %3138 = vst.msk [vmem:[#allocation3 + $0xa0] sm:$0xff] %vm3117_vm1, %v3062_v34 }
 0x428   : > { %3438 = vrot.lane.b32.xlu1 %v8726_v17, %s6869_s30  ;;  %3436 = vrot.lane.b32.xlu0 %v8728_v13, %s6869_s30 }
 0x42a   : > { %v3068_v57 = vpop.permute.xlu1 %3067  ;;  %v3066_v12 = vpop.permute.xlu0 %3065 }
 0x42b   : > { %3141 = vst.msk [vmem:[#allocation3 + $0xb8] sm:$0xff] %vm3117_vm1, %v3068_v57  ;;  %3140 = vst.msk [vmem:[#allocation3 + $0xb0] sm:$0xff] %vm3117_vm1, %v3066_v12 }
 0x42c   : > { %3442 = vrot.lane.b32.xlu1 %v8736_v58, %s6869_s30  ;;  %3440 = vrot.lane.b32.xlu0 %v8738_v1, %s6869_s30  ;;  %v3367_v58 = vld [vmem:[#allocation2 + $0x2ea] sm:$0xff]  ;;  %v3366_v1 = vld [vmem:[#allocation2 + $0x2e2] sm:$0xff] }
 0x42e   : > { %v3072_v60 = vpop.permute.xlu1 %3071  ;;  %v3070_v25 = vpop.permute.xlu0 %3069 }
 0x42f   : > { %3143 = vst.msk [vmem:[#allocation3 + $0xc8] sm:$0xff] %vm3117_vm1, %v3072_v60  ;;  %3142 = vst.msk [vmem:[#allocation3 + $0xc0] sm:$0xff] %vm3117_vm1, %v3070_v25 }
 0x430   : > { %3446 = vrot.lane.b32.xlu1 %v8746_v18, %s6869_s30  ;;  %3444 = vrot.lane.b32.xlu0 %v8748_v19, %s6869_s30  ;;  %v3369_v18 = vld [vmem:[#allocation2 + $0x30a] sm:$0xff]  ;;  %v3368_v19 = vld [vmem:[#allocation2 + $0x302] sm:$0xff] }
 0x432   : > { %v3076_v17 = vpop.permute.xlu1 %3075  ;;  %v3074_v13 = vpop.permute.xlu0 %3073 }
 0x433   : > { %3145 = vst.msk [vmem:[#allocation3 + $0xd8] sm:$0xff] %vm3117_vm1, %v3076_v17  ;;  %3144 = vst.msk [vmem:[#allocation3 + $0xd0] sm:$0xff] %vm3117_vm1, %v3074_v13 }
 0x434   : > { %3450 = vrot.lane.b32.xlu1 %v8756_v31, %s6869_s30  ;;  %3448 = vrot.lane.b32.xlu0 %v8758_v7, %s6869_s30  ;;  %v3371_v31 = vld [vmem:[#allocation2 + $0x32a] sm:$0xff]  ;;  %v3370_v7 = vld [vmem:[#allocation2 + $0x322] sm:$0xff] }
 0x436   : > { %v3080_v37 = vpop.permute.xlu1 %3079  ;;  %v3078_v38 = vpop.permute.xlu0 %3077 }
 0x437   : > { %3147 = vst.msk [vmem:[#allocation3 + $0xe8] sm:$0xff] %vm3117_vm1, %v3080_v37  ;;  %3146 = vst.msk [vmem:[#allocation3 + $0xe0] sm:$0xff] %vm3117_vm1, %v3078_v38 }
 0x438   : > { %3454 = vrot.lane.b32.xlu1 %v3367_v58, %s6869_s30  ;;  %3452 = vrot.lane.b32.xlu0 %v3366_v1, %s6869_s30  ;;  %v3566_v58 = vld [vmem:[#allocation2 + $0x34f] sm:$0xff]  ;;  %v3565_v1 = vld [vmem:[#allocation2 + $0x347] sm:$0xff] }
 0x43a   : > { %v3084_v39 = vpop.permute.xlu1 %3083  ;;  %v3082_v40 = vpop.permute.xlu0 %3081 }
 0x43b   : > { %3149 = vst.msk [vmem:[#allocation3 + $0xf8] sm:$0xff] %vm3117_vm1, %v3084_v39  ;;  %3148 = vst.msk [vmem:[#allocation3 + $0xf0] sm:$0xff] %vm3117_vm1, %v3082_v40  ;;  %vm5878_vm1 = vcmask 916480  }
 0x43c   : > { %3458 = vrot.lane.b32.xlu1 %v3369_v18, %s6869_s30  ;;  %3456 = vrot.lane.b32.xlu0 %v3368_v19, %s6869_s30  ;;  %v3568_v18 = vld [vmem:[#allocation2 + $0x36f] sm:$0xff]  ;;  %v3567_v19 = vld [vmem:[#allocation2 + $0x367] sm:$0xff] }
 0x43e   : > { %v3217_v8 = vpop.permute.xlu1 %3216  ;;  %v3215_v56 = vpop.permute.xlu0 %3214 }
 0x43f   : > { %3312 = vst.msk [vmem:[#allocation3 + $0x8] sm:$0xff] %vm3310_vm2, %v3217_v8  ;;  %3311 = vst.msk [vmem:[#allocation3] sm:$0xff] %vm3310_vm2, %v3215_v56 }
 0x440   : > { %3462 = vrot.lane.b32.xlu1 %v3371_v31, %s6869_s30  ;;  %3460 = vrot.lane.b32.xlu0 %v3370_v7, %s6869_s30  ;;  %v3731_v31 = vld [vmem:[#allocation2 + $0x194] sm:$0xff]  ;;  %v3730_v7 = vld [vmem:[#allocation2 + $0x18c] sm:$0xff] }
 0x442   : > { %v3221_v47 = vpop.permute.xlu1 %3220  ;;  %v3219_v42 = vpop.permute.xlu0 %3218 }
 0x443   : > { %3314 = vst.msk [vmem:[#allocation3 + $0x18] sm:$0xff] %vm3310_vm2, %v3221_v47  ;;  %3313 = vst.msk [vmem:[#allocation3 + $0x10] sm:$0xff] %vm3310_vm2, %v3219_v42 }
 0x444   : > { %3466 = vrot.lane.b32.xlu1 %v3373_v50, %s6869_s30  ;;  %3464 = vrot.lane.b32.xlu0 %v3372_v2, %s6869_s30  ;;  %v3733_v50 = vld [vmem:[#allocation2 + $0x1b4] sm:$0xff]  ;;  %v3732_v2 = vld [vmem:[#allocation2 + $0x1ac] sm:$0xff] }
 0x446   : > { %v3225_v62 = vpop.permute.xlu1 %3224  ;;  %v3223_v55 = vpop.permute.xlu0 %3222 }
 0x447   : > { %3316 = vst.msk [vmem:[#allocation3 + $0x28] sm:$0xff] %vm3310_vm2, %v3225_v62  ;;  %3315 = vst.msk [vmem:[#allocation3 + $0x20] sm:$0xff] %vm3310_vm2, %v3223_v55 }
 0x448   : > { %3470 = vrot.lane.b32.xlu1 %v3375_v26, %s6869_s30  ;;  %3468 = vrot.lane.b32.xlu0 %v3374_v45, %s6869_s30  ;;  %v3735_v26 = vld [vmem:[#allocation2 + $0x1d4] sm:$0xff]  ;;  %v3734_v45 = vld [vmem:[#allocation2 + $0x1cc] sm:$0xff] }
 0x44a   : > { %v3229_v23 = vpop.permute.xlu1 %3228  ;;  %v3227_v14 = vpop.permute.xlu0 %3226 }
 0x44b   : > { %3318 = vst.msk [vmem:[#allocation3 + $0x38] sm:$0xff] %vm3310_vm2, %v3229_v23  ;;  %3317 = vst.msk [vmem:[#allocation3 + $0x30] sm:$0xff] %vm3310_vm2, %v3227_v14  ;;  %v3737_v23 = vld [vmem:[#allocation2 + $0x1f4] sm:$0xff]  ;;  %v3736_v14 = vld [vmem:[#allocation2 + $0x1ec] sm:$0xff] }
 0x44c   : > { %3603 = vrot.lane.b32.xlu1 %v8792_v52, %s6870_s6  ;;  %3601 = vrot.lane.b32.xlu0 %v8794_v61, %s6870_s6 }
 0x44e   : > { %v3233_v48 = vpop.permute.xlu1 %3232  ;;  %v3231_v15 = vpop.permute.xlu0 %3230 }
 0x44f   : > { %3320 = vst.msk [vmem:[#allocation3 + $0x48] sm:$0xff] %vm3310_vm2, %v3233_v48  ;;  %3319 = vst.msk [vmem:[#allocation3 + $0x40] sm:$0xff] %vm3310_vm2, %v3231_v15 }
 0x450   : > { %3607 = vrot.lane.b32.xlu1 %v8802_v28, %s6870_s6  ;;  %3605 = vrot.lane.b32.xlu0 %v8804_v49, %s6870_s6 }
 0x452   : > { %v3237_v53 = vpop.permute.xlu1 %3236  ;;  %v3235_v34 = vpop.permute.xlu0 %3234 }
 0x453   : > { %3322 = vst.msk [vmem:[#allocation3 + $0x58] sm:$0xff] %vm3310_vm2, %v3237_v53  ;;  %3321 = vst.msk [vmem:[#allocation3 + $0x50] sm:$0xff] %vm3310_vm2, %v3235_v34  ;;  %v3739_v53 = vld [vmem:[#allocation2 + $0x214] sm:$0xff]  ;;  %v3738_v34 = vld [vmem:[#allocation2 + $0x20c] sm:$0xff] }
 0x454   : > { %3611 = vrot.lane.b32.xlu1 %v8812_v6, %s6870_s6  ;;  %3609 = vrot.lane.b32.xlu0 %v8814_v10, %s6870_s6 }
 0x456   : > { %v3241_v52 = vpop.permute.xlu1 %3240  ;;  %v3239_v61 = vpop.permute.xlu0 %3238 }
 0x457   : > { %3324 = vst.msk [vmem:[#allocation3 + $0x68] sm:$0xff] %vm3310_vm2, %v3241_v52  ;;  %3323 = vst.msk [vmem:[#allocation3 + $0x60] sm:$0xff] %vm3310_vm2, %v3239_v61 }
 0x458   : > { %3615 = vrot.lane.b32.xlu1 %v8822_v27, %s6870_s6  ;;  %3613 = vrot.lane.b32.xlu0 %v8824_v29, %s6870_s6 }
 0x45a   : > { %v3245_v28 = vpop.permute.xlu1 %3244  ;;  %v3243_v49 = vpop.permute.xlu0 %3242 }
 0x45b   : > { %3326 = vst.msk [vmem:[#allocation3 + $0x78] sm:$0xff] %vm3310_vm2, %v3245_v28  ;;  %3325 = vst.msk [vmem:[#allocation3 + $0x70] sm:$0xff] %vm3310_vm2, %v3243_v49  ;;  %v3741_v28 = vld [vmem:[#allocation2 + $0x234] sm:$0xff]  ;;  %v3740_v49 = vld [vmem:[#allocation2 + $0x22c] sm:$0xff] }
 0x45c   : > { %3619 = vrot.lane.b32.xlu1 %v8832_v16, %s6870_s6  ;;  %3617 = vrot.lane.b32.xlu0 %v8834_v5, %s6870_s6 }
 0x45e   : > { %v3249_v6 = vpop.permute.xlu1 %3248  ;;  %v3247_v10 = vpop.permute.xlu0 %3246 }
 0x45f   : > { %3328 = vst.msk [vmem:[#allocation3 + $0x88] sm:$0xff] %vm3310_vm2, %v3249_v6  ;;  %3327 = vst.msk [vmem:[#allocation3 + $0x80] sm:$0xff] %vm3310_vm2, %v3247_v10 }
 0x460   : > { %3623 = vrot.lane.b32.xlu1 %v8842_v43, %s6870_s6  ;;  %3621 = vrot.lane.b32.xlu0 %v8844_v20, %s6870_s6 }
 0x462   : > { %v3253_v27 = vpop.permute.xlu1 %3252  ;;  %v3251_v29 = vpop.permute.xlu0 %3250 }
 0x463   : > { %3330 = vst.msk [vmem:[#allocation3 + $0x98] sm:$0xff] %vm3310_vm2, %v3253_v27  ;;  %3329 = vst.msk [vmem:[#allocation3 + $0x90] sm:$0xff] %vm3310_vm2, %v3251_v29 }
 0x464   : > { %3627 = vrot.lane.b32.xlu1 %v8852_v21, %s6870_s6  ;;  %3625 = vrot.lane.b32.xlu0 %v8854_v24, %s6870_s6 }
 0x466   : > { %v3257_v16 = vpop.permute.xlu1 %3256  ;;  %v3255_v5 = vpop.permute.xlu0 %3254 }
 0x467   : > { %3332 = vst.msk [vmem:[#allocation3 + $0xa8] sm:$0xff] %vm3310_vm2, %v3257_v16  ;;  %3331 = vst.msk [vmem:[#allocation3 + $0xa0] sm:$0xff] %vm3310_vm2, %v3255_v5 }
 0x468   : > { %3631 = vrot.lane.b32.xlu1 %v8862_v35, %s6870_s6  ;;  %3629 = vrot.lane.b32.xlu0 %v8864_v36, %s6870_s6 }
 0x46a   : > { %v3261_v43 = vpop.permute.xlu1 %3260  ;;  %v3259_v20 = vpop.permute.xlu0 %3258 }
 0x46b   : > { %3334 = vst.msk [vmem:[#allocation3 + $0xb8] sm:$0xff] %vm3310_vm2, %v3261_v43  ;;  %3333 = vst.msk [vmem:[#allocation3 + $0xb0] sm:$0xff] %vm3310_vm2, %v3259_v20 }
 0x46c   : > { %3635 = vrot.lane.b32.xlu1 %v8872_v30, %s6870_s6  ;;  %3633 = vrot.lane.b32.xlu0 %v8874_v22, %s6870_s6  ;;  %v3560_v30 = vld [vmem:[#allocation2 + $0x2ef] sm:$0xff]  ;;  %v3559_v22 = vld [vmem:[#allocation2 + $0x2e7] sm:$0xff] }
 0x46e   : > { %v3265_v21 = vpop.permute.xlu1 %3264  ;;  %v3263_v24 = vpop.permute.xlu0 %3262 }
 0x46f   : > { %3336 = vst.msk [vmem:[#allocation3 + $0xc8] sm:$0xff] %vm3310_vm2, %v3265_v21  ;;  %3335 = vst.msk [vmem:[#allocation3 + $0xc0] sm:$0xff] %vm3310_vm2, %v3263_v24 }
 0x470   : > { %3639 = vrot.lane.b32.xlu1 %v8882_v51, %s6870_s6  ;;  %3637 = vrot.lane.b32.xlu0 %v8884_v54, %s6870_s6  ;;  %v3562_v51 = vld [vmem:[#allocation2 + $0x30f] sm:$0xff]  ;;  %v3561_v54 = vld [vmem:[#allocation2 + $0x307] sm:$0xff] }
 0x472   : > { %v3269_v35 = vpop.permute.xlu1 %3268  ;;  %v3267_v36 = vpop.permute.xlu0 %3266 }
 0x473   : > { %3338 = vst.msk [vmem:[#allocation3 + $0xd8] sm:$0xff] %vm3310_vm2, %v3269_v35  ;;  %3337 = vst.msk [vmem:[#allocation3 + $0xd0] sm:$0xff] %vm3310_vm2, %v3267_v36 }
 0x474   : > { %3643 = vrot.lane.b32.xlu1 %v8892_v3, %s6870_s6  ;;  %3641 = vrot.lane.b32.xlu0 %v8894_v0, %s6870_s6  ;;  %v3564_v3 = vld [vmem:[#allocation2 + $0x32f] sm:$0xff]  ;;  %v3563_v0 = vld [vmem:[#allocation2 + $0x327] sm:$0xff] }
 0x476   : > { %v3273_v57 = vpop.permute.xlu1 %3272  ;;  %v3271_v12 = vpop.permute.xlu0 %3270 }
 0x477   : > { %3340 = vst.msk [vmem:[#allocation3 + $0xe8] sm:$0xff] %vm3310_vm2, %v3273_v57  ;;  %3339 = vst.msk [vmem:[#allocation3 + $0xe0] sm:$0xff] %vm3310_vm2, %v3271_v12  ;;  %v3759_v57 = vld [vmem:[#allocation2 + $0x354] sm:$0xff]  ;;  %v3758_v12 = vld [vmem:[#allocation2 + $0x34c] sm:$0xff] }
 0x478   : > { %3647 = vrot.lane.b32.xlu1 %v3560_v30, %s6870_s6  ;;  %3645 = vrot.lane.b32.xlu0 %v3559_v22, %s6870_s6 }
 0x47a   : > { %v3277_v60 = vpop.permute.xlu1 %3276  ;;  %v3275_v25 = vpop.permute.xlu0 %3274 }
 0x47b   : > { %3342 = vst.msk [vmem:[#allocation3 + $0xf8] sm:$0xff] %vm3310_vm2, %v3277_v60  ;;  %3341 = vst.msk [vmem:[#allocation3 + $0xf0] sm:$0xff] %vm3310_vm2, %v3275_v25  ;;  %v3761_v60 = vld [vmem:[#allocation2 + $0x374] sm:$0xff]  ;;  %v3760_v25 = vld [vmem:[#allocation2 + $0x36c] sm:$0xff] }
 0x47c   : > { %3651 = vrot.lane.b32.xlu1 %v3562_v51, %s6870_s6  ;;  %3649 = vrot.lane.b32.xlu0 %v3561_v54, %s6870_s6 }
 0x47e   : > { %v3411_v17 = vpop.permute.xlu1 %3410  ;;  %v3409_v13 = vpop.permute.xlu0 %3408 }
 0x47f   : > { %3506 = vst.msk [vmem:[#allocation3 + $0x8] sm:$0xff] %vm3504_vm3, %v3411_v17  ;;  %3505 = vst.msk [vmem:[#allocation3] sm:$0xff] %vm3504_vm3, %v3409_v13  ;;  %v3924_v17 = vld [vmem:[#allocation2 + $0x8] sm:$0xff]  ;;  %v3923_v13 = vld [vmem:[#allocation2] sm:$0xff] }
 0x480   : > { %3655 = vrot.lane.b32.xlu1 %v3564_v3, %s6870_s6  ;;  %3653 = vrot.lane.b32.xlu0 %v3563_v0, %s6870_s6 }
 0x482   : > { %v3415_v37 = vpop.permute.xlu1 %3414  ;;  %v3413_v38 = vpop.permute.xlu0 %3412 }
 0x483   : > { %3508 = vst.msk [vmem:[#allocation3 + $0x18] sm:$0xff] %vm3504_vm3, %v3415_v37  ;;  %3507 = vst.msk [vmem:[#allocation3 + $0x10] sm:$0xff] %vm3504_vm3, %v3413_v38  ;;  %v3926_v37 = vld [vmem:[#allocation2 + $0x28] sm:$0xff]  ;;  %v3925_v38 = vld [vmem:[#allocation2 + $0x20] sm:$0xff] }
 0x484   : > { %3659 = vrot.lane.b32.xlu1 %v3566_v58, %s6870_s6  ;;  %3657 = vrot.lane.b32.xlu0 %v3565_v1, %s6870_s6 }
 0x486   : > { %v3419_v39 = vpop.permute.xlu1 %3418  ;;  %v3417_v40 = vpop.permute.xlu0 %3416 }
 0x487   : > { %3510 = vst.msk [vmem:[#allocation3 + $0x28] sm:$0xff] %vm3504_vm3, %v3419_v39  ;;  %3509 = vst.msk [vmem:[#allocation3 + $0x20] sm:$0xff] %vm3504_vm3, %v3417_v40  ;;  %v3928_v39 = vld [vmem:[#allocation2 + $0x48] sm:$0xff]  ;;  %v3927_v40 = vld [vmem:[#allocation2 + $0x40] sm:$0xff] }
 0x488   : > { %3663 = vrot.lane.b32.xlu1 %v3568_v18, %s6870_s6  ;;  %3661 = vrot.lane.b32.xlu0 %v3567_v19, %s6870_s6 }
 0x48a   : > { %v3423_v8 = vpop.permute.xlu1 %3422  ;;  %v3421_v56 = vpop.permute.xlu0 %3420 }
 0x48b   : > { %3512 = vst.msk [vmem:[#allocation3 + $0x38] sm:$0xff] %vm3504_vm3, %v3423_v8  ;;  %3511 = vst.msk [vmem:[#allocation3 + $0x30] sm:$0xff] %vm3504_vm3, %v3421_v56  ;;  %v3930_v8 = vld [vmem:[#allocation2 + $0x68] sm:$0xff]  ;;  %v3929_v56 = vld [vmem:[#allocation2 + $0x60] sm:$0xff] }
 0x48c   : > { %3796 = vrot.lane.b32.xlu1 %v3731_v31, %s6871_s8  ;;  %3794 = vrot.lane.b32.xlu0 %v3730_v7, %s6871_s8 }
 0x48e   : > { %v3427_v47 = vpop.permute.xlu1 %3426  ;;  %v3425_v42 = vpop.permute.xlu0 %3424 }
 0x48f   : > { %3514 = vst.msk [vmem:[#allocation3 + $0x48] sm:$0xff] %vm3504_vm3, %v3427_v47  ;;  %3513 = vst.msk [vmem:[#allocation3 + $0x40] sm:$0xff] %vm3504_vm3, %v3425_v42  ;;  %v3932_v47 = vld [vmem:[#allocation2 + $0x88] sm:$0xff]  ;;  %v3931_v42 = vld [vmem:[#allocation2 + $0x80] sm:$0xff] }
 0x490   : > { %3800 = vrot.lane.b32.xlu1 %v3733_v50, %s6871_s8  ;;  %3798 = vrot.lane.b32.xlu0 %v3732_v2, %s6871_s8 }
 0x492   : > { %v3431_v62 = vpop.permute.xlu1 %3430  ;;  %v3429_v55 = vpop.permute.xlu0 %3428 }
 0x493   : > { %3516 = vst.msk [vmem:[#allocation3 + $0x58] sm:$0xff] %vm3504_vm3, %v3431_v62  ;;  %3515 = vst.msk [vmem:[#allocation3 + $0x50] sm:$0xff] %vm3504_vm3, %v3429_v55  ;;  %v3934_v62 = vld [vmem:[#allocation2 + $0xa8] sm:$0xff]  ;;  %v3933_v55 = vld [vmem:[#allocation2 + $0xa0] sm:$0xff] }
 0x494   : > { %3804 = vrot.lane.b32.xlu1 %v3735_v26, %s6871_s8  ;;  %3802 = vrot.lane.b32.xlu0 %v3734_v45, %s6871_s8 }
 0x496   : > { %v3435_v48 = vpop.permute.xlu1 %3434  ;;  %v3433_v15 = vpop.permute.xlu0 %3432 }
 0x497   : > { %3518 = vst.msk [vmem:[#allocation3 + $0x68] sm:$0xff] %vm3504_vm3, %v3435_v48  ;;  %3517 = vst.msk [vmem:[#allocation3 + $0x60] sm:$0xff] %vm3504_vm3, %v3433_v15  ;;  %v3936_v48 = vld [vmem:[#allocation2 + $0xc8] sm:$0xff]  ;;  %v3935_v15 = vld [vmem:[#allocation2 + $0xc0] sm:$0xff] }
 0x498   : > { %3808 = vrot.lane.b32.xlu1 %v3737_v23, %s6871_s8  ;;  %3806 = vrot.lane.b32.xlu0 %v3736_v14, %s6871_s8 }
 0x49a   : > { %v3439_v52 = vpop.permute.xlu1 %3438  ;;  %v3437_v61 = vpop.permute.xlu0 %3436 }
 0x49b   : > { %3520 = vst.msk [vmem:[#allocation3 + $0x78] sm:$0xff] %vm3504_vm3, %v3439_v52  ;;  %3519 = vst.msk [vmem:[#allocation3 + $0x70] sm:$0xff] %vm3504_vm3, %v3437_v61  ;;  %v9286_v52 = vld [vmem:[#allocation2 + $0xe8] sm:$0xff]  ;;  %v9288_v61 = vld [vmem:[#allocation2 + $0xe0] sm:$0xff] }
 0x49c   : > { %3812 = vrot.lane.b32.xlu1 %v3739_v53, %s6871_s8  ;;  %3810 = vrot.lane.b32.xlu0 %v3738_v34, %s6871_s8 }
 0x49e   : > { %v3443_v6 = vpop.permute.xlu1 %3442  ;;  %v3441_v10 = vpop.permute.xlu0 %3440 }
 0x49f   : > { %3522 = vst.msk [vmem:[#allocation3 + $0x88] sm:$0xff] %vm3504_vm3, %v3443_v6  ;;  %3521 = vst.msk [vmem:[#allocation3 + $0x80] sm:$0xff] %vm3504_vm3, %v3441_v10  ;;  %v9296_v6 = vld [vmem:[#allocation2 + $0x108] sm:$0xff]  ;;  %v9298_v10 = vld [vmem:[#allocation2 + $0x100] sm:$0xff] }
 0x4a0   : > { %3816 = vrot.lane.b32.xlu1 %v3741_v28, %s6871_s8  ;;  %3814 = vrot.lane.b32.xlu0 %v3740_v49, %s6871_s8 }
 0x4a2   : > { %v3447_v27 = vpop.permute.xlu1 %3446  ;;  %v3445_v29 = vpop.permute.xlu0 %3444 }
 0x4a3   : > { %3524 = vst.msk [vmem:[#allocation3 + $0x98] sm:$0xff] %vm3504_vm3, %v3447_v27  ;;  %3523 = vst.msk [vmem:[#allocation3 + $0x90] sm:$0xff] %vm3504_vm3, %v3445_v29 }
 0x4a4   : > { %3820 = vrot.lane.b32.xlu1 %v8968_v44, %s6871_s8  ;;  %3818 = vrot.lane.b32.xlu0 %v8970_v4, %s6871_s8 }
 0x4a6   : > { %v3451_v16 = vpop.permute.xlu1 %3450  ;;  %v3449_v5 = vpop.permute.xlu0 %3448 }
 0x4a7   : > { %3526 = vst.msk [vmem:[#allocation3 + $0xa8] sm:$0xff] %vm3504_vm3, %v3451_v16  ;;  %3525 = vst.msk [vmem:[#allocation3 + $0xa0] sm:$0xff] %vm3504_vm3, %v3449_v5  ;;  %v9306_v16 = vld [vmem:[#allocation2 + $0x128] sm:$0xff]  ;;  %v9308_v5 = vld [vmem:[#allocation2 + $0x120] sm:$0xff] }
 0x4a8   : > { %3824 = vrot.lane.b32.xlu1 %v8978_v9, %s6871_s8  ;;  %3822 = vrot.lane.b32.xlu0 %v8980_v32, %s6871_s8 }
 0x4aa   : > { %v3455_v43 = vpop.permute.xlu1 %3454  ;;  %v3453_v20 = vpop.permute.xlu0 %3452 }
 0x4ab   : > { %3528 = vst.msk [vmem:[#allocation3 + $0xb8] sm:$0xff] %vm3504_vm3, %v3455_v43  ;;  %3527 = vst.msk [vmem:[#allocation3 + $0xb0] sm:$0xff] %vm3504_vm3, %v3453_v20 }
 0x4ac   : > { %3828 = vrot.lane.b32.xlu1 %v8988_v41, %s6871_s8  ;;  %3826 = vrot.lane.b32.xlu0 %v8990_v63, %s6871_s8  ;;  %v3753_v41 = vld [vmem:[#allocation2 + $0x2f4] sm:$0xff]  ;;  %v3752_v63 = vld [vmem:[#allocation2 + $0x2ec] sm:$0xff] }
 0x4ae   : > { %v3459_v44 = vpop.permute.xlu1 %3458  ;;  %v3457_v4 = vpop.permute.xlu0 %3456 }
 0x4af   : > { %3530 = vst.msk [vmem:[#allocation3 + $0xc8] sm:$0xff] %vm3504_vm3, %v3459_v44  ;;  %3529 = vst.msk [vmem:[#allocation3 + $0xc0] sm:$0xff] %vm3504_vm3, %v3457_v4  ;;  %v9316_v44 = vld [vmem:[#allocation2 + $0x148] sm:$0xff]  ;;  %v9318_v4 = vld [vmem:[#allocation2 + $0x140] sm:$0xff] }
 0x4b0   : > { %3832 = vrot.lane.b32.xlu1 %v8998_v46, %s6871_s8  ;;  %3830 = vrot.lane.b32.xlu0 %v9000_v59, %s6871_s8  ;;  %v3755_v46 = vld [vmem:[#allocation2 + $0x314] sm:$0xff]  ;;  %v3754_v59 = vld [vmem:[#allocation2 + $0x30c] sm:$0xff] }
 0x4b2   : > { %v3463_v9 = vpop.permute.xlu1 %3462  ;;  %v3461_v32 = vpop.permute.xlu0 %3460 }
 0x4b3   : > { %3532 = vst.msk [vmem:[#allocation3 + $0xd8] sm:$0xff] %vm3504_vm3, %v3463_v9  ;;  %3531 = vst.msk [vmem:[#allocation3 + $0xd0] sm:$0xff] %vm3504_vm3, %v3461_v32 }
 0x4b4   : > { %3836 = vrot.lane.b32.xlu1 %v9008_v33, %s6871_s8  ;;  %3834 = vrot.lane.b32.xlu0 %v9010_v11, %s6871_s8  ;;  %v3757_v33 = vld [vmem:[#allocation2 + $0x334] sm:$0xff]  ;;  %v3756_v11 = vld [vmem:[#allocation2 + $0x32c] sm:$0xff] }
 0x4b6   : > { %v3467_v21 = vpop.permute.xlu1 %3466  ;;  %v3465_v24 = vpop.permute.xlu0 %3464 }
 0x4b7   : > { %3534 = vst.msk [vmem:[#allocation3 + $0xe8] sm:$0xff] %vm3504_vm3, %v3467_v21  ;;  %3533 = vst.msk [vmem:[#allocation3 + $0xe0] sm:$0xff] %vm3504_vm3, %v3465_v24 }
 0x4b8   : > { %3840 = vrot.lane.b32.xlu1 %v3753_v41, %s6871_s8  ;;  %3838 = vrot.lane.b32.xlu0 %v3752_v63, %s6871_s8  ;;  %v9326_v41 = vld [vmem:[#allocation2 + $0x168] sm:$0xff]  ;;  %v9328_v63 = vld [vmem:[#allocation2 + $0x160] sm:$0xff] }
 0x4ba   : > { %v3471_v35 = vpop.permute.xlu1 %3470  ;;  %v3469_v36 = vpop.permute.xlu0 %3468 }
 0x4bb   : > { %3536 = vst.msk [vmem:[#allocation3 + $0xf8] sm:$0xff] %vm3504_vm3, %v3471_v35  ;;  %3535 = vst.msk [vmem:[#allocation3 + $0xf0] sm:$0xff] %vm3504_vm3, %v3469_v36 }
 0x4bc   : > { %3844 = vrot.lane.b32.xlu1 %v3755_v46, %s6871_s8  ;;  %3842 = vrot.lane.b32.xlu0 %v3754_v59, %s6871_s8  ;;  %v9336_v46 = vld [vmem:[#allocation2 + $0x188] sm:$0xff]  ;;  %v9338_v59 = vld [vmem:[#allocation2 + $0x180] sm:$0xff] }
 0x4be   : > { %v3604_v30 = vpop.permute.xlu1 %3603  ;;  %v3602_v22 = vpop.permute.xlu0 %3601 }
 0x4bf   : > { %3699 = vst.msk [vmem:[#allocation3 + $0x8] sm:$0xff] %vm3697_vm4, %v3604_v30  ;;  %3698 = vst.msk [vmem:[#allocation3] sm:$0xff] %vm3697_vm4, %v3602_v22 }
 0x4c0   : > { %3848 = vrot.lane.b32.xlu1 %v3757_v33, %s6871_s8  ;;  %3846 = vrot.lane.b32.xlu0 %v3756_v11, %s6871_s8  ;;  %v9346_v33 = vld [vmem:[#allocation2 + $0x1a8] sm:$0xff]  ;;  %v9348_v11 = vld [vmem:[#allocation2 + $0x1a0] sm:$0xff] }
 0x4c2   : > { %v3608_v51 = vpop.permute.xlu1 %3607  ;;  %v3606_v54 = vpop.permute.xlu0 %3605 }
 0x4c3   : > { %3701 = vst.msk [vmem:[#allocation3 + $0x18] sm:$0xff] %vm3697_vm4, %v3608_v51  ;;  %3700 = vst.msk [vmem:[#allocation3 + $0x10] sm:$0xff] %vm3697_vm4, %v3606_v54 }
 0x4c4   : > { %3852 = vrot.lane.b32.xlu1 %v3759_v57, %s6871_s8  ;;  %3850 = vrot.lane.b32.xlu0 %v3758_v12, %s6871_s8  ;;  %v9356_v57 = vld [vmem:[#allocation2 + $0x1c8] sm:$0xff]  ;;  %v9358_v12 = vld [vmem:[#allocation2 + $0x1c0] sm:$0xff] }
 0x4c6   : > { %v3612_v3 = vpop.permute.xlu1 %3611  ;;  %v3610_v0 = vpop.permute.xlu0 %3609 }
 0x4c7   : > { %3703 = vst.msk [vmem:[#allocation3 + $0x28] sm:$0xff] %vm3697_vm4, %v3612_v3  ;;  %3702 = vst.msk [vmem:[#allocation3 + $0x20] sm:$0xff] %vm3697_vm4, %v3610_v0 }
 0x4c8   : > { %3856 = vrot.lane.b32.xlu1 %v3761_v60, %s6871_s8  ;;  %3854 = vrot.lane.b32.xlu0 %v3760_v25, %s6871_s8  ;;  %v9366_v60 = vld [vmem:[#allocation2 + $0x1e8] sm:$0xff]  ;;  %v9368_v25 = vld [vmem:[#allocation2 + $0x1e0] sm:$0xff]  ;;  %s6483_s8 = sshll.u32 %s6930_s19, 12 }
 0x4ca   : > { %v3616_v58 = vpop.permute.xlu1 %3615  ;;  %v3614_v1 = vpop.permute.xlu0 %3613 }
 0x4cb   : > { %3705 = vst.msk [vmem:[#allocation3 + $0x38] sm:$0xff] %vm3697_vm4, %v3616_v58  ;;  %3704 = vst.msk [vmem:[#allocation3 + $0x30] sm:$0xff] %vm3697_vm4, %v3614_v1 }
 0x4cc   : > { %3989 = vrot.lane.b32.xlu1 %v3924_v17, %s6872_s9  ;;  %3987 = vrot.lane.b32.xlu0 %v3923_v13, %s6872_s9  ;;  %v4117_v17 = vld [vmem:[#allocation2 + $0xf] sm:$0xff]  ;;  %v4116_v13 = vld [vmem:[#allocation2 + $0x7] sm:$0xff] }
 0x4ce   : > { %v3620_v18 = vpop.permute.xlu1 %3619  ;;  %v3618_v19 = vpop.permute.xlu0 %3617 }
 0x4cf   : > { %3707 = vst.msk [vmem:[#allocation3 + $0x48] sm:$0xff] %vm3697_vm4, %v3620_v18  ;;  %3706 = vst.msk [vmem:[#allocation3 + $0x40] sm:$0xff] %vm3697_vm4, %v3618_v19 }
 0x4d0   : > { %3993 = vrot.lane.b32.xlu1 %v3926_v37, %s6872_s9  ;;  %3991 = vrot.lane.b32.xlu0 %v3925_v38, %s6872_s9  ;;  %v4119_v37 = vld [vmem:[#allocation2 + $0x2f] sm:$0xff]  ;;  %v4118_v38 = vld [vmem:[#allocation2 + $0x27] sm:$0xff] }
 0x4d2   : > { %v3624_v31 = vpop.permute.xlu1 %3623  ;;  %v3622_v7 = vpop.permute.xlu0 %3621 }
 0x4d3   : > { %3709 = vst.msk [vmem:[#allocation3 + $0x58] sm:$0xff] %vm3697_vm4, %v3624_v31  ;;  %3708 = vst.msk [vmem:[#allocation3 + $0x50] sm:$0xff] %vm3697_vm4, %v3622_v7 }
 0x4d4   : > { %3997 = vrot.lane.b32.xlu1 %v3928_v39, %s6872_s9  ;;  %3995 = vrot.lane.b32.xlu0 %v3927_v40, %s6872_s9  ;;  %v4121_v39 = vld [vmem:[#allocation2 + $0x4f] sm:$0xff]  ;;  %v4120_v40 = vld [vmem:[#allocation2 + $0x47] sm:$0xff] }
 0x4d6   : > { %v3628_v50 = vpop.permute.xlu1 %3627  ;;  %v3626_v2 = vpop.permute.xlu0 %3625 }
 0x4d7   : > { %3711 = vst.msk [vmem:[#allocation3 + $0x68] sm:$0xff] %vm3697_vm4, %v3628_v50  ;;  %3710 = vst.msk [vmem:[#allocation3 + $0x60] sm:$0xff] %vm3697_vm4, %v3626_v2 }
 0x4d8   : > { %4001 = vrot.lane.b32.xlu1 %v3930_v8, %s6872_s9  ;;  %3999 = vrot.lane.b32.xlu0 %v3929_v56, %s6872_s9  ;;  %v4123_v8 = vld [vmem:[#allocation2 + $0x6f] sm:$0xff]  ;;  %v4122_v56 = vld [vmem:[#allocation2 + $0x67] sm:$0xff] }
 0x4da   : > { %v3632_v26 = vpop.permute.xlu1 %3631  ;;  %v3630_v45 = vpop.permute.xlu0 %3629 }
 0x4db   : > { %3713 = vst.msk [vmem:[#allocation3 + $0x78] sm:$0xff] %vm3697_vm4, %v3632_v26  ;;  %3712 = vst.msk [vmem:[#allocation3 + $0x70] sm:$0xff] %vm3697_vm4, %v3630_v45 }
 0x4dc   : > { %4005 = vrot.lane.b32.xlu1 %v3932_v47, %s6872_s9  ;;  %4003 = vrot.lane.b32.xlu0 %v3931_v42, %s6872_s9  ;;  %v4125_v47 = vld [vmem:[#allocation2 + $0x8f] sm:$0xff]  ;;  %v4124_v42 = vld [vmem:[#allocation2 + $0x87] sm:$0xff] }
 0x4de   : > { %v3636_v23 = vpop.permute.xlu1 %3635  ;;  %v3634_v14 = vpop.permute.xlu0 %3633 }
 0x4df   : > { %3715 = vst.msk [vmem:[#allocation3 + $0x88] sm:$0xff] %vm3697_vm4, %v3636_v23  ;;  %3714 = vst.msk [vmem:[#allocation3 + $0x80] sm:$0xff] %vm3697_vm4, %v3634_v14 }
 0x4e0   : > { %4009 = vrot.lane.b32.xlu1 %v3934_v62, %s6872_s9  ;;  %4007 = vrot.lane.b32.xlu0 %v3933_v55, %s6872_s9  ;;  %v4127_v62 = vld [vmem:[#allocation2 + $0xaf] sm:$0xff]  ;;  %v4126_v55 = vld [vmem:[#allocation2 + $0xa7] sm:$0xff] }
 0x4e2   : > { %v3640_v53 = vpop.permute.xlu1 %3639  ;;  %v3638_v34 = vpop.permute.xlu0 %3637 }
 0x4e3   : > { %3717 = vst.msk [vmem:[#allocation3 + $0x98] sm:$0xff] %vm3697_vm4, %v3640_v53  ;;  %3716 = vst.msk [vmem:[#allocation3 + $0x90] sm:$0xff] %vm3697_vm4, %v3638_v34 }
 0x4e4   : > { %4013 = vrot.lane.b32.xlu1 %v3936_v48, %s6872_s9  ;;  %4011 = vrot.lane.b32.xlu0 %v3935_v15, %s6872_s9  ;;  %v4129_v48 = vld [vmem:[#allocation2 + $0xcf] sm:$0xff]  ;;  %v4128_v15 = vld [vmem:[#allocation2 + $0xc7] sm:$0xff] }
 0x4e6   : > { %v3644_v28 = vpop.permute.xlu1 %3643  ;;  %v3642_v49 = vpop.permute.xlu0 %3641 }
 0x4e7   : > { %3719 = vst.msk [vmem:[#allocation3 + $0xa8] sm:$0xff] %vm3697_vm4, %v3644_v28  ;;  %3718 = vst.msk [vmem:[#allocation3 + $0xa0] sm:$0xff] %vm3697_vm4, %v3642_v49  ;;  %v9404_v28 = vld [vmem:[#allocation2 + $0xef] sm:$0xff]  ;;  %v9406_v49 = vld [vmem:[#allocation2 + $0xe7] sm:$0xff] }
 0x4e8   : > { %4017 = vrot.lane.b32.xlu1 %v9286_v52, %s6872_s9  ;;  %4015 = vrot.lane.b32.xlu0 %v9288_v61, %s6872_s9 }
 0x4ea   : > { %v3648_v27 = vpop.permute.xlu1 %3647  ;;  %v3646_v29 = vpop.permute.xlu0 %3645 }
 0x4eb   : > { %3721 = vst.msk [vmem:[#allocation3 + $0xb8] sm:$0xff] %vm3697_vm4, %v3648_v27  ;;  %3720 = vst.msk [vmem:[#allocation3 + $0xb0] sm:$0xff] %vm3697_vm4, %v3646_v29 }
 0x4ec   : > { %4021 = vrot.lane.b32.xlu1 %v9296_v6, %s6872_s9  ;;  %4019 = vrot.lane.b32.xlu0 %v9298_v10, %s6872_s9 }
 0x4ee   : > { %v3652_v43 = vpop.permute.xlu1 %3651  ;;  %v3650_v20 = vpop.permute.xlu0 %3649 }
 0x4ef   : > { %3723 = vst.msk [vmem:[#allocation3 + $0xc8] sm:$0xff] %vm3697_vm4, %v3652_v43  ;;  %3722 = vst.msk [vmem:[#allocation3 + $0xc0] sm:$0xff] %vm3697_vm4, %v3650_v20  ;;  %v4133_v43 = vld [vmem:[#allocation2 + $0x10f] sm:$0xff]  ;;  %v9414_v20 = vld [vmem:[#allocation2 + $0x107] sm:$0xff] }
 0x4f0   : > { %4025 = vrot.lane.b32.xlu1 %v9306_v16, %s6872_s9  ;;  %4023 = vrot.lane.b32.xlu0 %v9308_v5, %s6872_s9 }
 0x4f2   : > { %v3656_v9 = vpop.permute.xlu1 %3655  ;;  %v3654_v32 = vpop.permute.xlu0 %3653 }
 0x4f3   : > { %3725 = vst.msk [vmem:[#allocation3 + $0xd8] sm:$0xff] %vm3697_vm4, %v3656_v9  ;;  %3724 = vst.msk [vmem:[#allocation3 + $0xd0] sm:$0xff] %vm3697_vm4, %v3654_v32 }
 0x4f4   : > { %4029 = vrot.lane.b32.xlu1 %v9316_v44, %s6872_s9  ;;  %4027 = vrot.lane.b32.xlu0 %v9318_v4, %s6872_s9 }
 0x4f6   : > { %v3660_v21 = vpop.permute.xlu1 %3659  ;;  %v3658_v24 = vpop.permute.xlu0 %3657 }
 0x4f7   : > { %3727 = vst.msk [vmem:[#allocation3 + $0xe8] sm:$0xff] %vm3697_vm4, %v3660_v21  ;;  %3726 = vst.msk [vmem:[#allocation3 + $0xe0] sm:$0xff] %vm3697_vm4, %v3658_v24  ;;  %v4135_v21 = vld [vmem:[#allocation2 + $0x12f] sm:$0xff]  ;;  %v4134_v24 = vld [vmem:[#allocation2 + $0x127] sm:$0xff] }
 0x4f8   : > { %4033 = vrot.lane.b32.xlu1 %v9326_v41, %s6872_s9  ;;  %4031 = vrot.lane.b32.xlu0 %v9328_v63, %s6872_s9 }
 0x4fa   : > { %v3664_v35 = vpop.permute.xlu1 %3663  ;;  %v3662_v36 = vpop.permute.xlu0 %3661 }
 0x4fb   : > { %3729 = vst.msk [vmem:[#allocation3 + $0xf8] sm:$0xff] %vm3697_vm4, %v3664_v35  ;;  %3728 = vst.msk [vmem:[#allocation3 + $0xf0] sm:$0xff] %vm3697_vm4, %v3662_v36 }
 0x4fc   : > { %4037 = vrot.lane.b32.xlu1 %v9336_v46, %s6872_s9  ;;  %4035 = vrot.lane.b32.xlu0 %v9338_v59, %s6872_s9 }
 0x4fe   : > { %v3797_v30 = vpop.permute.xlu1 %3796  ;;  %v3795_v22 = vpop.permute.xlu0 %3794 }
 0x4ff   : > { %3892 = vst.msk [vmem:[#allocation3 + $0x8] sm:$0xff] %vm3890_vm5, %v3797_v30  ;;  %3891 = vst.msk [vmem:[#allocation3] sm:$0xff] %vm3890_vm5, %v3795_v22  ;;  %v4137_v30 = vld [vmem:[#allocation2 + $0x14f] sm:$0xff]  ;;  %v4136_v22 = vld [vmem:[#allocation2 + $0x147] sm:$0xff] }
 0x500   : > { %4041 = vrot.lane.b32.xlu1 %v9346_v33, %s6872_s9  ;;  %4039 = vrot.lane.b32.xlu0 %v9348_v11, %s6872_s9 }
 0x502   : > { %v3801_v51 = vpop.permute.xlu1 %3800  ;;  %v3799_v54 = vpop.permute.xlu0 %3798 }
 0x503   : > { %3894 = vst.msk [vmem:[#allocation3 + $0x18] sm:$0xff] %vm3890_vm5, %v3801_v51  ;;  %3893 = vst.msk [vmem:[#allocation3 + $0x10] sm:$0xff] %vm3890_vm5, %v3799_v54 }
 0x504   : > { %4045 = vrot.lane.b32.xlu1 %v9356_v57, %s6872_s9  ;;  %4043 = vrot.lane.b32.xlu0 %v9358_v12, %s6872_s9 }
 0x506   : > { %v3805_v3 = vpop.permute.xlu1 %3804  ;;  %v3803_v0 = vpop.permute.xlu0 %3802 }
 0x507   : > { %3896 = vst.msk [vmem:[#allocation3 + $0x28] sm:$0xff] %vm3890_vm5, %v3805_v3  ;;  %3895 = vst.msk [vmem:[#allocation3 + $0x20] sm:$0xff] %vm3890_vm5, %v3803_v0  ;;  %v4139_v3 = vld [vmem:[#allocation2 + $0x16f] sm:$0xff]  ;;  %v4138_v0 = vld [vmem:[#allocation2 + $0x167] sm:$0xff] }
 0x508   : > { %4049 = vrot.lane.b32.xlu1 %v9366_v60, %s6872_s9  ;;  %4047 = vrot.lane.b32.xlu0 %v9368_v25, %s6872_s9 }
 0x50a   : > { %v3809_v58 = vpop.permute.xlu1 %3808  ;;  %v3807_v1 = vpop.permute.xlu0 %3806 }
 0x50b   : > { %3898 = vst.msk [vmem:[#allocation3 + $0x38] sm:$0xff] %vm3890_vm5, %v3809_v58  ;;  %3897 = vst.msk [vmem:[#allocation3 + $0x30] sm:$0xff] %vm3890_vm5, %v3807_v1  ;;  %v4141_v58 = vld [vmem:[#allocation2 + $0x18f] sm:$0xff]  ;;  %v4140_v1 = vld [vmem:[#allocation2 + $0x187] sm:$0xff] }
 0x50c   : > { %4182 = vrot.lane.b32.xlu1 %v4117_v17, %s6873_s10  ;;  %4180 = vrot.lane.b32.xlu0 %v4116_v13, %s6873_s10 }
 0x50e   : > { %v3813_v18 = vpop.permute.xlu1 %3812  ;;  %v3811_v19 = vpop.permute.xlu0 %3810 }
 0x50f   : > { %3900 = vst.msk [vmem:[#allocation3 + $0x48] sm:$0xff] %vm3890_vm5, %v3813_v18  ;;  %3899 = vst.msk [vmem:[#allocation3 + $0x40] sm:$0xff] %vm3890_vm5, %v3811_v19  ;;  %v4143_v18 = vld [vmem:[#allocation2 + $0x1af] sm:$0xff]  ;;  %v4142_v19 = vld [vmem:[#allocation2 + $0x1a7] sm:$0xff] }
 0x510   : > { %4186 = vrot.lane.b32.xlu1 %v4119_v37, %s6873_s10  ;;  %4184 = vrot.lane.b32.xlu0 %v4118_v38, %s6873_s10 }
 0x512   : > { %v3817_v31 = vpop.permute.xlu1 %3816  ;;  %v3815_v7 = vpop.permute.xlu0 %3814 }
 0x513   : > { %3902 = vst.msk [vmem:[#allocation3 + $0x58] sm:$0xff] %vm3890_vm5, %v3817_v31  ;;  %3901 = vst.msk [vmem:[#allocation3 + $0x50] sm:$0xff] %vm3890_vm5, %v3815_v7  ;;  %v9441_v31 = vld [vmem:[#allocation2 + $0x1cf] sm:$0xff]  ;;  %v9443_v7 = vld [vmem:[#allocation2 + $0x1c7] sm:$0xff] }
 0x514   : > { %4190 = vrot.lane.b32.xlu1 %v4121_v39, %s6873_s10  ;;  %4188 = vrot.lane.b32.xlu0 %v4120_v40, %s6873_s10 }
 0x516   : > { %v3821_v50 = vpop.permute.xlu1 %3820  ;;  %v3819_v2 = vpop.permute.xlu0 %3818 }
 0x517   : > { %3904 = vst.msk [vmem:[#allocation3 + $0x68] sm:$0xff] %vm3890_vm5, %v3821_v50  ;;  %3903 = vst.msk [vmem:[#allocation3 + $0x60] sm:$0xff] %vm3890_vm5, %v3819_v2  ;;  %v9451_v50 = vld [vmem:[#allocation2 + $0x1ef] sm:$0xff]  ;;  %v9453_v2 = vld [vmem:[#allocation2 + $0x1e7] sm:$0xff] }
 0x518   : > { %4194 = vrot.lane.b32.xlu1 %v4123_v8, %s6873_s10  ;;  %4192 = vrot.lane.b32.xlu0 %v4122_v56, %s6873_s10 }
 0x51a   : > { %v3825_v26 = vpop.permute.xlu1 %3824  ;;  %v3823_v45 = vpop.permute.xlu0 %3822 }
 0x51b   : > { %3906 = vst.msk [vmem:[#allocation3 + $0x78] sm:$0xff] %vm3890_vm5, %v3825_v26  ;;  %3905 = vst.msk [vmem:[#allocation3 + $0x70] sm:$0xff] %vm3890_vm5, %v3823_v45  ;;  %v4310_v26 = vld [vmem:[#allocation2 + $0x16] sm:$0xff]  ;;  %v4309_v45 = vld [vmem:[#allocation2 + $0xe] sm:$0xff] }
 0x51c   : > { %4198 = vrot.lane.b32.xlu1 %v4125_v47, %s6873_s10  ;;  %4196 = vrot.lane.b32.xlu0 %v4124_v42, %s6873_s10 }
 0x51e   : > { %v3829_v23 = vpop.permute.xlu1 %3828  ;;  %v3827_v14 = vpop.permute.xlu0 %3826 }
 0x51f   : > { %3908 = vst.msk [vmem:[#allocation3 + $0x88] sm:$0xff] %vm3890_vm5, %v3829_v23  ;;  %3907 = vst.msk [vmem:[#allocation3 + $0x80] sm:$0xff] %vm3890_vm5, %v3827_v14  ;;  %v4312_v23 = vld [vmem:[#allocation2 + $0x36] sm:$0xff]  ;;  %v4311_v14 = vld [vmem:[#allocation2 + $0x2e] sm:$0xff] }
 0x520   : > { %4202 = vrot.lane.b32.xlu1 %v4127_v62, %s6873_s10  ;;  %4200 = vrot.lane.b32.xlu0 %v4126_v55, %s6873_s10 }
 0x522   : > { %v3833_v53 = vpop.permute.xlu1 %3832  ;;  %v3831_v34 = vpop.permute.xlu0 %3830 }
 0x523   : > { %3910 = vst.msk [vmem:[#allocation3 + $0x98] sm:$0xff] %vm3890_vm5, %v3833_v53  ;;  %3909 = vst.msk [vmem:[#allocation3 + $0x90] sm:$0xff] %vm3890_vm5, %v3831_v34  ;;  %v4314_v53 = vld [vmem:[#allocation2 + $0x56] sm:$0xff]  ;;  %v4313_v34 = vld [vmem:[#allocation2 + $0x4e] sm:$0xff] }
 0x524   : > { %4206 = vrot.lane.b32.xlu1 %v4129_v48, %s6873_s10  ;;  %4204 = vrot.lane.b32.xlu0 %v4128_v15, %s6873_s10 }
 0x526   : > { %v3837_v27 = vpop.permute.xlu1 %3836  ;;  %v3835_v29 = vpop.permute.xlu0 %3834 }
 0x527   : > { %3912 = vst.msk [vmem:[#allocation3 + $0xa8] sm:$0xff] %vm3890_vm5, %v3837_v27  ;;  %3911 = vst.msk [vmem:[#allocation3 + $0xa0] sm:$0xff] %vm3890_vm5, %v3835_v29 }
 0x528   : > { %4210 = vrot.lane.b32.xlu1 %v9404_v28, %s6873_s10  ;;  %4208 = vrot.lane.b32.xlu0 %v9406_v49, %s6873_s10 }
 0x52a   : > { %v3841_v9 = vpop.permute.xlu1 %3840  ;;  %v3839_v32 = vpop.permute.xlu0 %3838 }
 0x52b   : > { %3914 = vst.msk [vmem:[#allocation3 + $0xb8] sm:$0xff] %vm3890_vm5, %v3841_v9  ;;  %3913 = vst.msk [vmem:[#allocation3 + $0xb0] sm:$0xff] %vm3890_vm5, %v3839_v32  ;;  %v4315_v9 = vld [vmem:[#allocation2 + $0x6e] sm:$0xff] }
 0x52c   : > { %4214 = vrot.lane.b32.xlu1 %v4133_v43, %s6873_s10  ;;  %4212 = vrot.lane.b32.xlu0 %v9414_v20, %s6873_s10  ;;  %v4316_v43 = vld [vmem:[#allocation2 + $0x76] sm:$0xff] }
 0x52e   : > { %v3845_v35 = vpop.permute.xlu1 %3844  ;;  %v3843_v36 = vpop.permute.xlu0 %3842 }
 0x52f   : > { %3916 = vst.msk [vmem:[#allocation3 + $0xc8] sm:$0xff] %vm3890_vm5, %v3845_v35  ;;  %3915 = vst.msk [vmem:[#allocation3 + $0xc0] sm:$0xff] %vm3890_vm5, %v3843_v36  ;;  %v4317_v35 = vld [vmem:[#allocation2 + $0x8e] sm:$0xff] }
 0x530   : > { %4218 = vrot.lane.b32.xlu1 %v4135_v21, %s6873_s10  ;;  %4216 = vrot.lane.b32.xlu0 %v4134_v24, %s6873_s10  ;;  %v4318_v24 = vld [vmem:[#allocation2 + $0x96] sm:$0xff] }
 0x532   : > { %v3849_v51 = vpop.permute.xlu1 %3848  ;;  %v3847_v54 = vpop.permute.xlu0 %3846 }
 0x533   : > { %3918 = vst.msk [vmem:[#allocation3 + $0xd8] sm:$0xff] %vm3890_vm5, %v3849_v51  ;;  %3917 = vst.msk [vmem:[#allocation3 + $0xd0] sm:$0xff] %vm3890_vm5, %v3847_v54  ;;  %v4319_v51 = vld [vmem:[#allocation2 + $0xae] sm:$0xff] }
 0x534   : > { %4222 = vrot.lane.b32.xlu1 %v4137_v30, %s6873_s10  ;;  %4220 = vrot.lane.b32.xlu0 %v4136_v22, %s6873_s10  ;;  %v4320_v22 = vld [vmem:[#allocation2 + $0xb6] sm:$0xff] }
 0x536   : > { %v3853_v17 = vpop.permute.xlu1 %3852  ;;  %v3851_v13 = vpop.permute.xlu0 %3850 }
 0x537   : > { %3920 = vst.msk [vmem:[#allocation3 + $0xe8] sm:$0xff] %vm3890_vm5, %v3853_v17  ;;  %3919 = vst.msk [vmem:[#allocation3 + $0xe0] sm:$0xff] %vm3890_vm5, %v3851_v13  ;;  %v4321_v17 = vld [vmem:[#allocation2 + $0xce] sm:$0xff] }
 0x538   : > { %4226 = vrot.lane.b32.xlu1 %v4139_v3, %s6873_s10  ;;  %4224 = vrot.lane.b32.xlu0 %v4138_v0, %s6873_s10  ;;  %v4322_v0 = vld [vmem:[#allocation2 + $0xd6] sm:$0xff] }
 0x53a   : > { %v3857_v37 = vpop.permute.xlu1 %3856  ;;  %v3855_v38 = vpop.permute.xlu0 %3854 }
 0x53b   : > { %3922 = vst.msk [vmem:[#allocation3 + $0xf8] sm:$0xff] %vm3890_vm5, %v3857_v37  ;;  %3921 = vst.msk [vmem:[#allocation3 + $0xf0] sm:$0xff] %vm3890_vm5, %v3855_v38  ;;  %v9491_v37 = vld [vmem:[#allocation2 + $0xee] sm:$0xff] }
 0x53c   : > { %4230 = vrot.lane.b32.xlu1 %v4141_v58, %s6873_s10  ;;  %4228 = vrot.lane.b32.xlu0 %v4140_v1, %s6873_s10  ;;  %v9489_v1 = vld [vmem:[#allocation2 + $0xf6] sm:$0xff] }
 0x53e   : > { %v3990_v39 = vpop.permute.xlu1 %3989  ;;  %v3988_v40 = vpop.permute.xlu0 %3987 }
 0x53f   : > { %4085 = vst.msk [vmem:[#allocation3 + $0x8] sm:$0xff] %vm4083_vm6, %v3990_v39  ;;  %4084 = vst.msk [vmem:[#allocation3] sm:$0xff] %vm4083_vm6, %v3988_v40  ;;  %v9501_v39 = vld [vmem:[#allocation2 + $0x10e] sm:$0xff] }
 0x540   : > { %4234 = vrot.lane.b32.xlu1 %v4143_v18, %s6873_s10  ;;  %4232 = vrot.lane.b32.xlu0 %v4142_v19, %s6873_s10  ;;  %v9499_v19 = vld [vmem:[#allocation2 + $0x116] sm:$0xff] }
 0x542   : > { %v3994_v8 = vpop.permute.xlu1 %3993  ;;  %v3992_v56 = vpop.permute.xlu0 %3991 }
 0x543   : > { %4087 = vst.msk [vmem:[#allocation3 + $0x18] sm:$0xff] %vm4083_vm6, %v3994_v8  ;;  %4086 = vst.msk [vmem:[#allocation3 + $0x10] sm:$0xff] %vm4083_vm6, %v3992_v56  ;;  %v9509_v56 = vld [vmem:[#allocation2 + $0x136] sm:$0xff] }
 0x544   : > { %4238 = vrot.lane.b32.xlu1 %v9441_v31, %s6873_s10  ;;  %4236 = vrot.lane.b32.xlu0 %v9443_v7, %s6873_s10 }
 0x546   : > { %v3998_v47 = vpop.permute.xlu1 %3997  ;;  %v3996_v42 = vpop.permute.xlu0 %3995 }
 0x547   : > { %4089 = vst.msk [vmem:[#allocation3 + $0x28] sm:$0xff] %vm4083_vm6, %v3998_v47  ;;  %4088 = vst.msk [vmem:[#allocation3 + $0x20] sm:$0xff] %vm4083_vm6, %v3996_v42  ;;  %v9511_v47 = vld [vmem:[#allocation2 + $0x12e] sm:$0xff] }
 0x548   : > { %4242 = vrot.lane.b32.xlu1 %v9451_v50, %s6873_s10  ;;  %4240 = vrot.lane.b32.xlu0 %v9453_v2, %s6873_s10 }
 0x54a   : > { %v4002_v62 = vpop.permute.xlu1 %4001  ;;  %v4000_v55 = vpop.permute.xlu0 %3999 }
 0x54b   : > { %4091 = vst.msk [vmem:[#allocation3 + $0x38] sm:$0xff] %vm4083_vm6, %v4002_v62  ;;  %4090 = vst.msk [vmem:[#allocation3 + $0x30] sm:$0xff] %vm4083_vm6, %v4000_v55  ;;  %v4329_v62 = vld [vmem:[#allocation2 + $0x14e] sm:$0xff] }
 0x54c   : > { %4375 = vrot.lane.b32.xlu1 %v4310_v26, %s6874_s11  ;;  %4373 = vrot.lane.b32.xlu0 %v4309_v45, %s6874_s11  ;;  %v4330_v45 = vld [vmem:[#allocation2 + $0x156] sm:$0xff] }
 0x54e   : > { %v4006_v48 = vpop.permute.xlu1 %4005  ;;  %v4004_v15 = vpop.permute.xlu0 %4003 }
 0x54f   : > { %4093 = vst.msk [vmem:[#allocation3 + $0x48] sm:$0xff] %vm4083_vm6, %v4006_v48  ;;  %4092 = vst.msk [vmem:[#allocation3 + $0x40] sm:$0xff] %vm4083_vm6, %v4004_v15  ;;  %v4331_v48 = vld [vmem:[#allocation2 + $0x16e] sm:$0xff] }
 0x550   : > { %4379 = vrot.lane.b32.xlu1 %v4312_v23, %s6874_s11  ;;  %4377 = vrot.lane.b32.xlu0 %v4311_v14, %s6874_s11  ;;  %v4332_v14 = vld [vmem:[#allocation2 + $0x176] sm:$0xff] }
 0x552   : > { %v4010_v27 = vpop.permute.xlu1 %4009  ;;  %v4008_v29 = vpop.permute.xlu0 %4007 }
 0x553   : > { %4095 = vst.msk [vmem:[#allocation3 + $0x58] sm:$0xff] %vm4083_vm6, %v4010_v27  ;;  %4094 = vst.msk [vmem:[#allocation3 + $0x50] sm:$0xff] %vm4083_vm6, %v4008_v29  ;;  %v4333_v27 = vld [vmem:[#allocation2 + $0x18e] sm:$0xff] }
 0x554   : > { %4383 = vrot.lane.b32.xlu1 %v4314_v53, %s6874_s11  ;;  %4381 = vrot.lane.b32.xlu0 %v4313_v34, %s6874_s11  ;;  %v4334_v34 = vld [vmem:[#allocation2 + $0x196] sm:$0xff] }
 0x556   : > { %v4014_v32 = vpop.permute.xlu1 %4013  ;;  %v4012_v21 = vpop.permute.xlu0 %4011 }
 0x557   : > { %4097 = vst.msk [vmem:[#allocation3 + $0x68] sm:$0xff] %vm4083_vm6, %v4014_v32  ;;  %4096 = vst.msk [vmem:[#allocation3 + $0x60] sm:$0xff] %vm4083_vm6, %v4012_v21  ;;  %v4335_v32 = vld [vmem:[#allocation2 + $0x1ae] sm:$0xff] }
 0x558   : > { %4387 = vrot.lane.b32.xlu1 %v4316_v43, %s6874_s11  ;;  %4385 = vrot.lane.b32.xlu0 %v4315_v9, %s6874_s11  ;;  %v4336_v9 = vld [vmem:[#allocation2 + $0x1b6] sm:$0xff] }
 0x55a   : > { %v4018_v36 = vpop.permute.xlu1 %4017  ;;  %v4016_v30 = vpop.permute.xlu0 %4015 }
 0x55b   : > { %4099 = vst.msk [vmem:[#allocation3 + $0x78] sm:$0xff] %vm4083_vm6, %v4018_v36  ;;  %4098 = vst.msk [vmem:[#allocation3 + $0x70] sm:$0xff] %vm4083_vm6, %v4016_v30  ;;  %v9537_v36 = vld [vmem:[#allocation2 + $0x1ce] sm:$0xff] }
 0x55c   : > { %4391 = vrot.lane.b32.xlu1 %v4318_v24, %s6874_s11  ;;  %4389 = vrot.lane.b32.xlu0 %v4317_v35, %s6874_s11  ;;  %v9535_v35 = vld [vmem:[#allocation2 + $0x1d6] sm:$0xff] }
 0x55e   : > { %v4022_v54 = vpop.permute.xlu1 %4021  ;;  %v4020_v3 = vpop.permute.xlu0 %4019 }
 0x55f   : > { %4101 = vst.msk [vmem:[#allocation3 + $0x88] sm:$0xff] %vm4083_vm6, %v4022_v54  ;;  %4100 = vst.msk [vmem:[#allocation3 + $0x80] sm:$0xff] %vm4083_vm6, %v4020_v3  ;;  %v9547_v54 = vld [vmem:[#allocation2 + $0x1ee] sm:$0xff] }
 0x560   : > { %4395 = vrot.lane.b32.xlu1 %v4320_v22, %s6874_s11  ;;  %4393 = vrot.lane.b32.xlu0 %v4319_v51, %s6874_s11  ;;  %v9545_v51 = vld [vmem:[#allocation2 + $0x1f6] sm:$0xff] }
 0x562   : > { %v4026_v13 = vpop.permute.xlu1 %4025  ;;  %v4024_v58 = vpop.permute.xlu0 %4023 }
 0x563   : > { %4103 = vst.msk [vmem:[#allocation3 + $0x98] sm:$0xff] %vm4083_vm6, %v4026_v13  ;;  %4102 = vst.msk [vmem:[#allocation3 + $0x90] sm:$0xff] %vm4083_vm6, %v4024_v58 }
 0x564   : > { %4399 = vrot.lane.b32.xlu1 %v4322_v0, %s6874_s11  ;;  %4397 = vrot.lane.b32.xlu0 %v4321_v17, %s6874_s11 }
 0x566   : > { %v4030_v38 = vpop.permute.xlu1 %4029  ;;  %v4028_v18 = vpop.permute.xlu0 %4027 }
 0x567   : > { %4105 = vst.msk [vmem:[#allocation3 + $0xa8] sm:$0xff] %vm4083_vm6, %v4030_v38  ;;  %4104 = vst.msk [vmem:[#allocation3 + $0xa0] sm:$0xff] %vm4083_vm6, %v4028_v18 }
 0x568   : > { %4403 = vrot.lane.b32.xlu1 %v9489_v1, %s6874_s11  ;;  %4401 = vrot.lane.b32.xlu0 %v9491_v37, %s6874_s11 }
 0x56a   : > { %v4034_v40 = vpop.permute.xlu1 %4033  ;;  %v4032_v8 = vpop.permute.xlu0 %4031 }
 0x56b   : > { %4107 = vst.msk [vmem:[#allocation3 + $0xb8] sm:$0xff] %vm4083_vm6, %v4034_v40  ;;  %4106 = vst.msk [vmem:[#allocation3 + $0xb0] sm:$0xff] %vm4083_vm6, %v4032_v8  ;;  %v5663_v8 = vld [vmem:[%s7200_s5 + $0x10] sm:$0xff] }
 0x56c   : > { %4407 = vrot.lane.b32.xlu1 %v9499_v19, %s6874_s11  ;;  %4405 = vrot.lane.b32.xlu0 %v9501_v39, %s6874_s11 }
 0x56e   : > { %v4038_v42 = vpop.permute.xlu1 %4037  ;;  %v4036_v26 = vpop.permute.xlu0 %4035 }
 0x56f   : > { %4109 = vst.msk [vmem:[#allocation3 + $0xc8] sm:$0xff] %vm4083_vm6, %v4038_v42  ;;  %4108 = vst.msk [vmem:[#allocation3 + $0xc0] sm:$0xff] %vm4083_vm6, %v4036_v26  ;;  %v5664_v42 = vld [vmem:[%s7200_s5 + $0x18] sm:$0xff] }
 0x570   : > { %4411 = vrot.lane.b32.xlu1 %v9509_v56, %s6874_s11  ;;  %4409 = vrot.lane.b32.xlu0 %v9511_v47, %s6874_s11 }
 0x572   : > { %v4042_v55 = vpop.permute.xlu1 %4041  ;;  %v4040_v23 = vpop.permute.xlu0 %4039 }
 0x573   : > { %4111 = vst.msk [vmem:[#allocation3 + $0xd8] sm:$0xff] %vm4083_vm6, %v4042_v55  ;;  %4110 = vst.msk [vmem:[#allocation3 + $0xd0] sm:$0xff] %vm4083_vm6, %v4040_v23  ;;  %v5666_v55 = vld [vmem:[%s7200_s5 + $0x28] sm:$0xff]  ;;  %v5694_v23 = vsel %vm196_vm0, %v5663_v8, 0.0 }
 0x574   : > { %4415 = vrot.lane.b32.xlu1 %v4330_v45, %s6874_s11  ;;  %4413 = vrot.lane.b32.xlu0 %v4329_v62, %s6874_s11  ;;  %v9617_v45 = vld [vmem:[#allocation2 + $0x200] sm:$0xff] }
 0x575   : > { %v5665_v62 = vld [vmem:[%s7200_s5 + $0x20] sm:$0xff] }
 0x576   : > { %v4046_v15 = vpop.permute.xlu1 %4045  ;;  %v4044_v53 = vpop.permute.xlu0 %4043 }
 0x577   : > { %4113 = vst.msk [vmem:[#allocation3 + $0xe8] sm:$0xff] %vm4083_vm6, %v4046_v15  ;;  %4112 = vst.msk [vmem:[#allocation3 + $0xe0] sm:$0xff] %vm4083_vm6, %v4044_v53  ;;  %v5696_v15 = vsel %vm196_vm0, %v5665_v62, 0.0 }
 0x578   : > { %4419 = vrot.lane.b32.xlu1 %v4332_v14, %s6874_s11  ;;  %4417 = vrot.lane.b32.xlu0 %v4331_v48, %s6874_s11 }
 0x57a   : > { %v4050_v29 = vpop.permute.xlu1 %4049  ;;  %v4048_v43 = vpop.permute.xlu0 %4047 }
 0x57b   : > { %4115 = vst.msk [vmem:[#allocation3 + $0xf8] sm:$0xff] %vm4083_vm6, %v4050_v29  ;;  %4114 = vst.msk [vmem:[#allocation3 + $0xf0] sm:$0xff] %vm4083_vm6, %v4048_v43  ;;  %v5668_v29 = vld [vmem:[%s7200_s5 + $0x38] sm:$0xff]  ;;  %v9633_v43 = vld [vmem:[#allocation2 + $0x228] sm:$0xff] }
 0x57c   : > { %4423 = vrot.lane.b32.xlu1 %v4334_v34, %s6874_s11  ;;  %4421 = vrot.lane.b32.xlu0 %v4333_v27, %s6874_s11  ;;  %v5727_v34 = vsel %vm196_vm0, %v5666_v55, 0.0  ;;  %v5667_v27 = vld [vmem:[%s7200_s5 + $0x30] sm:$0xff] }
 0x57e   : > { %v4183_v21 = vpop.permute.xlu1 %4182  ;;  %v4181_v24 = vpop.permute.xlu0 %4180 }
 0x57f   : > { %4278 = vst.msk [vmem:[#allocation3 + $0x8] sm:$0xff] %vm4276_vm7, %v4183_v21  ;;  %4277 = vst.msk [vmem:[#allocation3] sm:$0xff] %vm4276_vm7, %v4181_v24  ;;  %v5729_v24 = vsel %vm196_vm0, %v5668_v29, 0.0 }
 0x580   : > { %4427 = vrot.lane.b32.xlu1 %v4336_v9, %s6874_s11  ;;  %4425 = vrot.lane.b32.xlu0 %v4335_v32, %s6874_s11  ;;  %v5698_v32 = vsel %vm196_vm0, %v5667_v27, 0.0 }
 0x582   : > { %v4187_v30 = vpop.permute.xlu1 %4186  ;;  %v4185_v22 = vpop.permute.xlu0 %4184 }
 0x583   : > { %4280 = vst.msk [vmem:[#allocation3 + $0x18] sm:$0xff] %vm4276_vm7, %v4187_v30  ;;  %4279 = vst.msk [vmem:[#allocation3 + $0x10] sm:$0xff] %vm4276_vm7, %v4185_v22  ;;  %v9637_v30 = vld [vmem:[#allocation2 + $0x220] sm:$0xff] }
 0x584   : > { %4431 = vrot.lane.b32.xlu1 %v9535_v35, %s6874_s11  ;;  %4429 = vrot.lane.b32.xlu0 %v9537_v36, %s6874_s11  ;;  %v5669_v22 = vld [vmem:[%s7200_s5 + $0x40] sm:$0xff] }
 0x586   : > { %v4191_v3 = vpop.permute.xlu1 %4190  ;;  %v4189_v0 = vpop.permute.xlu0 %4188 }
 0x587   : > { %4282 = vst.msk [vmem:[#allocation3 + $0x28] sm:$0xff] %vm4276_vm7, %v4191_v3  ;;  %4281 = vst.msk [vmem:[#allocation3 + $0x20] sm:$0xff] %vm4276_vm7, %v4189_v0  ;;  %v5670_v3 = vld [vmem:[%s7200_s5 + $0x48] sm:$0xff] }
 0x588   : > { %4435 = vrot.lane.b32.xlu1 %v9545_v51, %s6874_s11  ;;  %4433 = vrot.lane.b32.xlu0 %v9547_v54, %s6874_s11 }
 0x58a   : > { %v4195_v17 = vpop.permute.xlu1 %4194  ;;  %v4193_v13 = vpop.permute.xlu0 %4192 }
 0x58b   : > { %4284 = vst.msk [vmem:[#allocation3 + $0x38] sm:$0xff] %vm4276_vm7, %v4195_v17  ;;  %4283 = vst.msk [vmem:[#allocation3 + $0x30] sm:$0xff] %vm4276_vm7, %v4193_v13 }
 0x58c   : > { %4568 = vrot.lane.b32.xlu1 %v9286_v52, %s6875_s12  ;;  %4566 = vrot.lane.b32.xlu0 %v9288_v61, %s6875_s12 }
 0x58e   : > { %v4199_v58 = vpop.permute.xlu1 %4198  ;;  %v4197_v38 = vpop.permute.xlu0 %4196 }
 0x58f   : > { %4286 = vst.msk [vmem:[#allocation3 + $0x48] sm:$0xff] %vm4276_vm7, %v4199_v58  ;;  %4285 = vst.msk [vmem:[#allocation3 + $0x40] sm:$0xff] %vm4276_vm7, %v4197_v38  ;;  %v5700_v58 = vsel %vm196_vm0, %v5669_v22, 0.0 }
 0x590   : > { %4572 = vrot.lane.b32.xlu1 %v9296_v6, %s6875_s12  ;;  %4570 = vrot.lane.b32.xlu0 %v9298_v10, %s6875_s12 }
 0x592   : > { %v4203_v18 = vpop.permute.xlu1 %4202  ;;  %v4201_v40 = vpop.permute.xlu0 %4200 }
 0x593   : > { %4288 = vst.msk [vmem:[#allocation3 + $0x58] sm:$0xff] %vm4276_vm7, %v4203_v18  ;;  %4287 = vst.msk [vmem:[#allocation3 + $0x50] sm:$0xff] %vm4276_vm7, %v4201_v40  ;;  %v5731_v18 = vsel %vm196_vm0, %v5670_v3, 0.0  ;;  %v5671_v40 = vld [vmem:[%s7200_s5 + $0x50] sm:$0xff] }
 0x594   : > { %4576 = vrot.lane.b32.xlu1 %v9306_v16, %s6875_s12  ;;  %4574 = vrot.lane.b32.xlu0 %v9308_v5, %s6875_s12 }
 0x596   : > { %v4207_v52 = vpop.permute.xlu1 %4206  ;;  %v4205_v61 = vpop.permute.xlu0 %4204 }
 0x597   : > { %4290 = vst.msk [vmem:[#allocation3 + $0x68] sm:$0xff] %vm4276_vm7, %v4207_v52  ;;  %4289 = vst.msk [vmem:[#allocation3 + $0x60] sm:$0xff] %vm4276_vm7, %v4205_v61  ;;  %v5672_v52 = vld [vmem:[%s7200_s5 + $0x58] sm:$0xff]  ;;  %v4525_v61 = vld [vmem:[#allocation2 + $0x248] sm:$0xff] }
 0x598   : > { %4580 = vrot.lane.b32.xlu1 %v9316_v44, %s6875_s12  ;;  %4578 = vrot.lane.b32.xlu0 %v9318_v4, %s6875_s12 }
 0x59a   : > { %v4211_v6 = vpop.permute.xlu1 %4210  ;;  %v4209_v10 = vpop.permute.xlu0 %4208 }
 0x59b   : > { %4292 = vst.msk [vmem:[#allocation3 + $0x78] sm:$0xff] %vm4276_vm7, %v4211_v6  ;;  %4291 = vst.msk [vmem:[#allocation3 + $0x70] sm:$0xff] %vm4276_vm7, %v4209_v10  ;;  %v5702_v10 = vsel %vm196_vm0, %v5671_v40, 0.0 }
 0x59c   : > { %4584 = vrot.lane.b32.xlu1 %v9326_v41, %s6875_s12  ;;  %4582 = vrot.lane.b32.xlu0 %v9328_v63, %s6875_s12 }
 0x59e   : > { %v4215_v16 = vpop.permute.xlu1 %4214  ;;  %v4213_v5 = vpop.permute.xlu0 %4212 }
 0x59f   : > { %4294 = vst.msk [vmem:[#allocation3 + $0x88] sm:$0xff] %vm4276_vm7, %v4215_v16  ;;  %4293 = vst.msk [vmem:[#allocation3 + $0x80] sm:$0xff] %vm4276_vm7, %v4213_v5  ;;  %v5733_v5 = vsel %vm196_vm0, %v5672_v52, 0.0 }
 0x5a0   : > { %4588 = vrot.lane.b32.xlu1 %v9336_v46, %s6875_s12  ;;  %4586 = vrot.lane.b32.xlu0 %v9338_v59, %s6875_s12 }
 0x5a2   : > { %v4219_v44 = vpop.permute.xlu1 %4218  ;;  %v4217_v4 = vpop.permute.xlu0 %4216 }
 0x5a3   : > { %4296 = vst.msk [vmem:[#allocation3 + $0x98] sm:$0xff] %vm4276_vm7, %v4219_v44  ;;  %4295 = vst.msk [vmem:[#allocation3 + $0x90] sm:$0xff] %vm4276_vm7, %v4217_v4  ;;  %v4524_v44 = vld [vmem:[#allocation2 + $0x240] sm:$0xff] }
 0x5a4   : > { %4592 = vrot.lane.b32.xlu1 %v9346_v33, %s6875_s12  ;;  %4590 = vrot.lane.b32.xlu0 %v9348_v11, %s6875_s12  ;;  %v5661_v33 = vld [vmem:[%s7200_s5] sm:$0xff]  ;;  %v5662_v11 = vld [vmem:[%s7200_s5 + $0x8] sm:$0xff] }
 0x5a5   : > { %v5724_v26 = vsel %vm196_vm0, %v5662_v11, 0.0  ;;  %v5673_v4 = vld [vmem:[%s7200_s5 + $0x60] sm:$0xff] }
 0x5a6   : > { %v4223_v41 = vpop.permute.xlu1 %4222  ;;  %v4221_v63 = vpop.permute.xlu0 %4220 }
 0x5a7   : > { %4298 = vst.msk [vmem:[#allocation3 + $0xa8] sm:$0xff] %vm4276_vm7, %v4223_v41  ;;  %4297 = vst.msk [vmem:[#allocation3 + $0xa0] sm:$0xff] %vm4276_vm7, %v4221_v63  ;;  %v5674_v41 = vld [vmem:[%s7200_s5 + $0x68] sm:$0xff] }
 0x5a8   : > { %4596 = vrot.lane.b32.xlu1 %v9356_v57, %s6875_s12  ;;  %4594 = vrot.lane.b32.xlu0 %v9358_v12, %s6875_s12  ;;  %v9611_v57 = vld [vmem:[#allocation2 + $0x208] sm:$0xff]  ;;  %v5693_v12 = vsel %vm196_vm0, %v5661_v33, 0.0  ;;  %v5704_v33 = vsel %vm196_vm0, %v5673_v4, 0.0  ;;  %v5735_v8 = vsel %vm196_vm0, %v5674_v41, 0.0 }
 0x5a9   : > { %v5695_v48 = vadd.f32 %v5694_v23, %v5693_v12  ;;  %v4527_v12 = vld [vmem:[#allocation2 + $0x268] sm:$0xff] }
 0x5aa   : > { %v4227_v46 = vpop.permute.xlu1 %4226  ;;  %v4225_v59 = vpop.permute.xlu0 %4224 }
 0x5ab   : > { %4300 = vst.msk [vmem:[#allocation3 + $0xb8] sm:$0xff] %vm4276_vm7, %v4227_v46  ;;  %4299 = vst.msk [vmem:[#allocation3 + $0xb0] sm:$0xff] %vm4276_vm7, %v4225_v59  ;;  %v5697_v9 = vadd.f32 %v5696_v15, %v5695_v48 }
 0x5ac   : > { %4600 = vrot.lane.b32.xlu1 %v9366_v60, %s6875_s12  ;;  %4598 = vrot.lane.b32.xlu0 %v9368_v25, %s6875_s12  ;;  %v5725_v60 = vsel %vm196_vm0, %v5664_v42, 0.0  ;;  %v5675_v42 = vld [vmem:[%s7200_s5 + $0x70] sm:$0xff] }
 0x5ad   : > { %v5726_v53 = vadd.f32 %v5725_v60, %v5724_v26  ;;  %v5699_v13 = vadd.f32 %v5698_v32, %v5697_v9  ;;  %v5676_v26 = vld [vmem:[%s7200_s5 + $0x78] sm:$0xff]  ;;  %v5706_v55 = vsel %vm196_vm0, %v5675_v42, 0.0  ;;  %v4526_v60 = vld [vmem:[#allocation2 + $0x260] sm:$0xff]  ;;  %v5679_v32 = vld [vmem:[%s7200_s5 + $0x90] sm:$0xff] }
 0x5ae   : > { %v4231_v14 = vpop.permute.xlu1 %4230  ;;  %v4229_v25 = vpop.permute.xlu0 %4228  ;;  %v5737_v48 = vsel %vm196_vm0, %v5676_v26, 0.0  ;;  %v5710_v3 = vsel %vm196_vm0, %v5679_v32, 0.0 }
 0x5af   : > { %4302 = vst.msk [vmem:[#allocation3 + $0xc8] sm:$0xff] %vm4276_vm7, %v4231_v14  ;;  %4301 = vst.msk [vmem:[#allocation3 + $0xc0] sm:$0xff] %vm4276_vm7, %v4229_v25  ;;  %v5728_v21 = vadd.f32 %v5727_v34, %v5726_v53  ;;  %v5701_v6 = vadd.f32 %v5700_v58, %v5699_v13  ;;  %v5677_v14 = vld [vmem:[%s7200_s5 + $0x80] sm:$0xff]  ;;  %v5678_v25 = vld [vmem:[%s7200_s5 + $0x88] sm:$0xff] }
 0x5b0   : > { %4604 = vrot.lane.b32.xlu1 %v9611_v57, %s6875_s12  ;;  %4602 = vrot.lane.b32.xlu0 %v9617_v45, %s6875_s12  ;;  %v5708_v27 = vsel %vm196_vm0, %v5677_v14, 0.0  ;;  %v5739_v9 = vsel %vm196_vm0, %v5678_v25, 0.0  ;;  %v5681_v13 = vld [vmem:[%s7200_s5 + $0xa0] sm:$0xff]  ;;  %v5682_v58 = vld [vmem:[%s7200_s5 + $0xa8] sm:$0xff] }
 0x5b1   : > { %v5730_v38 = vadd.f32 %v5729_v24, %v5728_v21  ;;  %v5703_v59 = vadd.f32 %v5702_v10, %v5701_v6  ;;  %v5680_v21 = vld [vmem:[%s7200_s5 + $0x98] sm:$0xff]  ;;  %v4529_v24 = vld [vmem:[#allocation2 + $0x288] sm:$0xff]  ;;  %v5743_v10 = vsel %vm196_vm0, %v5682_v58, 0.0 }
 0x5b2   : > { %v4235_v0 = vpop.permute.xlu1 %4234  ;;  %v4233_v17 = vpop.permute.xlu0 %4232  ;;  %v5688_v14 = vld [vmem:[%s7200_s5 + $0xd8] sm:$0xff] }
 0x5b3   : > { %4304 = vst.msk [vmem:[#allocation3 + $0xd8] sm:$0xff] %vm4276_vm7, %v4235_v0  ;;  %4303 = vst.msk [vmem:[#allocation3 + $0xd0] sm:$0xff] %vm4276_vm7, %v4233_v17  ;;  %v5732_v16 = vadd.f32 %v5731_v18, %v5730_v38  ;;  %v5705_v62 = vadd.f32 %v5704_v33, %v5703_v59  ;;  %v4528_v17 = vld [vmem:[#allocation2 + $0x280] sm:$0xff]  ;;  %v5741_v38 = vsel %vm196_vm0, %v5680_v21, 0.0 }
 0x5b4   : > { %4608 = vrot.lane.b32.xlu1 %v9633_v43, %s6875_s12  ;;  %4606 = vrot.lane.b32.xlu0 %v9637_v30, %s6875_s12  ;;  %v4530_v59 = vld [vmem:[#allocation2 + $0x2a0] sm:$0xff] }
 0x5b5   : > { %v5734_v11 = vadd.f32 %v5733_v5, %v5732_v16  ;;  %v5707_v34 = vadd.f32 %v5706_v55, %v5705_v62  ;;  %v5683_v16 = vld [vmem:[%s7200_s5 + $0xb0] sm:$0xff]  ;;  %v5684_v5 = vld [vmem:[%s7200_s5 + $0xb8] sm:$0xff]  ;;  %v5685_v33 = vld [vmem:[%s7200_s5 + $0xc0] sm:$0xff] }
 0x5b6   : > { %v4239_v63 = vpop.permute.xlu1 %4238  ;;  %v4237_v46 = vpop.permute.xlu0 %4236  ;;  %v5714_v41 = vsel %vm196_vm0, %v5683_v16, 0.0  ;;  %v5716_v26 = vsel %vm196_vm0, %v5685_v33, 0.0 }
 0x5b7   : > { %4306 = vst.msk [vmem:[#allocation3 + $0xe8] sm:$0xff] %vm4276_vm7, %v4239_v63  ;;  %4305 = vst.msk [vmem:[#allocation3 + $0xe0] sm:$0xff] %vm4276_vm7, %v4237_v46  ;;  %v5736_v23 = vadd.f32 %v5735_v8, %v5734_v11  ;;  %v5709_v22 = vadd.f32 %v5708_v27, %v5707_v34  ;;  %v5745_v46 = vsel %vm196_vm0, %v5684_v5, 0.0  ;;  %v5686_v11 = vld [vmem:[%s7200_s5 + $0xc8] sm:$0xff]  ;;  %v5689_v34 = vld [vmem:[%s7200_s5 + $0xe0] sm:$0xff] }
 0x5b8   : > { %4612 = vrot.lane.b32.xlu1 %v4525_v61, %s6875_s12  ;;  %4610 = vrot.lane.b32.xlu0 %v4524_v44, %s6875_s12  ;;  %v5712_v61 = vsel %vm196_vm0, %v5681_v13, 0.0  ;;  %v4531_v44 = vld [vmem:[#allocation2 + $0x2a8] sm:$0xff]  ;;  %v5747_v55 = vsel %vm196_vm0, %v5686_v11, 0.0  ;;  %v5765_v11 = vld [vmem:[%s10431_s2] sm:$0xf] }
 0x5b9   : > { %v5738_v29 = vadd.f32 %v5737_v48, %v5736_v23  ;;  %v5711_v52 = vadd.f32 %v5710_v3, %v5709_v22  ;;  %v5687_v23 = vld [vmem:[%s7200_s5 + $0xd0] sm:$0xff]  ;;  %v5690_v27 = vld [vmem:[%s7200_s5 + $0xe8] sm:$0xff]  ;;  %6547 = vmatpush3.msk.msra.mxu0 %vm5770_vm9, %v5765_v11 }
 0x5ba   : > { %v4243_v15 = vpop.permute.xlu1 %4242  ;;  %v4241_v53 = vpop.permute.xlu0 %4240  ;;  %v5718_v48 = vsel %vm196_vm0, %v5687_v23, 0.0  ;;  %v5751_v3 = vsel %vm196_vm0, %v5690_v27, 0.0  ;;  %v6780_v23 = vld [vmem:[#allocation2 + $0x1c0] sm:$0xff]  ;;  %v9845_v11 = vld [vmem:[#allocation2 + $0x216] sm:$0xff] }
 0x5bb   : > { %4308 = vst.msk [vmem:[#allocation3 + $0xf8] sm:$0xff] %vm4276_vm7, %v4243_v15  ;;  %4307 = vst.msk [vmem:[#allocation3 + $0xf0] sm:$0xff] %vm4276_vm7, %v4241_v53  ;;  %v5740_v0 = vadd.f32 %v5739_v9, %v5738_v29  ;;  %v5713_v4 = vadd.f32 %v5712_v61, %v5711_v52  ;;  %v9702_v53 = vld [vmem:[#allocation2 + $0x2c0] sm:$0xff]  ;;  %v5749_v29 = vsel %vm196_vm0, %v5688_v14, 0.0  ;;  %v5862_v14 = vld [vmem:[%s10430_s1 + $0x10] sm:$0xff] }
 0x5bc   : > { %4616 = vrot.lane.b32.xlu1 %v4527_v12, %s6875_s12  ;;  %4614 = vrot.lane.b32.xlu0 %v4526_v60, %s6875_s12  ;;  %v9698_v60 = vld [vmem:[#allocation2 + $0x2c8] sm:$0xff]  ;;  %v5864_v27 = vld [vmem:[%s10430_s1 + $0x20] sm:$0xff] }
 0x5bd   : > { %v5742_v6 = vadd.f32 %v5741_v38, %v5740_v0  ;;  %v5715_v12 = vadd.f32 %v5714_v41, %v5713_v4  ;;  %v5691_v0 = vld [vmem:[%s7200_s5 + $0xf0] sm:$0xff] }
 0x5be   : > { %v4376_v18 = vpop.permute.xlu1 %4375  ;;  %v4374_v40 = vpop.permute.xlu0 %4373  ;;  %v5722_v58 = vsel %vm196_vm0, %v5691_v0, 0.0 }
 0x5bf   : > { %4471 = vst.msk [vmem:[#allocation3 + $0x8] sm:$0xff] %vm4469_vm8, %v4376_v18  ;;  %4470 = vst.msk [vmem:[#allocation3] sm:$0xff] %vm4469_vm8, %v4374_v40  ;;  %v5744_v63 = vadd.f32 %v5743_v10, %v5742_v6  ;;  %v5717_v25 = vadd.f32 %v5716_v26, %v5715_v12 }
 0x5c0   : > { %4620 = vrot.lane.b32.xlu1 %v4529_v24, %s6875_s12  ;;  %4618 = vrot.lane.b32.xlu0 %v4528_v17, %s6875_s12  ;;  %v5720_v24 = vsel %vm196_vm0, %v5689_v34, 0.0  ;;  %v5692_v17 = vld [vmem:[%s7200_s5 + $0xf8] sm:$0xff]  ;;  %s6876_s5 = smov 92  }
 0x5c1   : > { %v5746_v62 = vadd.f32 %v5745_v46, %v5744_v63  ;;  %v5719_v21 = vadd.f32 %v5718_v48, %v5717_v25  ;;  %v5753_v18 = vsel %vm196_vm0, %v5692_v17, 0.0  ;;  %v5863_v25 = vld [vmem:[%s10430_s1 + $0x18] sm:$0xff] }
 0x5c2   : > { %v4380_v8 = vpop.permute.xlu1 %4379  ;;  %v4378_v42 = vpop.permute.xlu0 %4377  ;;  %v6659_v48 = vpack.c.bf16 %v5863_v25, %v5862_v14  ;;  %v6783_v25 = vld [vmem:[#allocation2 + $0x1e7] sm:$0xff] }
 0x5c3   : > { %4473 = vst.msk [vmem:[#allocation3 + $0x18] sm:$0xff] %vm4469_vm8, %v4380_v8  ;;  %4472 = vst.msk [vmem:[#allocation3 + $0x10] sm:$0xff] %vm4469_vm8, %v4378_v42  ;;  %v5748_v15 = vadd.f32 %v5747_v55, %v5746_v62  ;;  %v5721_v13 = vadd.f32 %v5720_v24, %v5719_v21  ;;  %v5861_v8 = vld [vmem:[%s10430_s1 + $0x8] sm:$0xff] }
 0x5c4   : > { %4624 = vrot.lane.b32.xlu1 %v4531_v44, %s6875_s12  ;;  %4622 = vrot.lane.b32.xlu0 %v4530_v59, %s6875_s12 }
 0x5c5   : > { %v5750_v22 = vadd.f32 %v5749_v29, %v5748_v15  ;;  %v5723_v61 = vadd.f32 %v5722_v58, %v5721_v13  ;;  %v5865_v29 = vld [vmem:[%s10430_s1 + $0x28] sm:$0xff] }
 0x5c6   : > { %v4384_v9 = vpop.permute.xlu1 %4383  ;;  %v4382_v32 = vpop.permute.xlu0 %4381  ;;  %v5869_v58 = vld [vmem:[%s10430_s1 + $0x48] sm:$0xff] }
 0x5c7   : > { %4475 = vst.msk [vmem:[#allocation3 + $0x28] sm:$0xff] %vm4469_vm8, %v4384_v9  ;;  %4474 = vst.msk [vmem:[#allocation3 + $0x20] sm:$0xff] %vm4469_vm8, %v4382_v32  ;;  %v5752_v38 = vadd.f32 %v5751_v3, %v5750_v22  ;;  %v5755_v10 = vsel %vm196_vm0, %v5723_v61, 0.0  ;;  %v5291_v9 = vld [vmem:[#allocation2 + $0x2c7] sm:$0xff]  ;;  %v6663_v32 = vpack.c.bf16 %v5865_v29, %v5864_v27  ;;  %v5867_v22 = vld [vmem:[%s10430_s1 + $0x38] sm:$0xff] }
 0x5c8   : > { %4628 = vrot.lane.b32.xlu1 %v9698_v60, %s6875_s12  ;;  %4626 = vrot.lane.b32.xlu0 %v9702_v53, %s6875_s12  ;;  %v9789_v3 = vld [vmem:[#allocation2 + $0x207] sm:$0xff]  ;;  %v5871_v61 = vld [vmem:[%s10430_s1 + $0x58] sm:$0xff]  ;;  %v5294_v27 = vld [vmem:[#allocation2 + $0x2ef] sm:$0xff]  ;;  %s10377_s12 = scalar_lea.hbm %s10433_s4, %s6483_s8 }
 0x5c9   : > { %v5754_v6 = vadd.f32 %v5753_v18, %v5752_v38  ;;  %v5292_v38 = vld [vmem:[#allocation2 + $0x2cf] sm:$0xff] }
 0x5ca   : > { %v4388_v40 = vpop.permute.xlu1 %4387  ;;  %v4386_v52 = vpop.permute.xlu0 %4385 }
 0x5cb   : > { %4477 = vst.msk [vmem:[#allocation3 + $0x38] sm:$0xff] %vm4469_vm8, %v4388_v40  ;;  %4476 = vst.msk [vmem:[#allocation3 + $0x30] sm:$0xff] %vm4469_vm8, %v4386_v52  ;;  %v5756_v16 = vsel %vm196_vm0, %v5754_v6, 0.0  ;;  %v5484_v6 = vld [vmem:[#allocation2 + $0x2ce] sm:$0xff] }
 0x5cc   : > { %4761 = vrot.lane.b32.xlu1 %v9404_v28, %s6876_s5  ;;  %4759 = vrot.lane.b32.xlu0 %v9406_v49, %s6876_s5  ;;  %v5757_v5 = vadd.f32 %v5756_v16, %v5755_v10 }
 0x5ce   : > { %v4392_v44 = vpop.permute.xlu1 %4391  ;;  %v4390_v4 = vpop.permute.xlu0 %4389  ;;  %v5758_v41 = vrot.slane %v5757_v5, 4 }
 0x5cf   : > { %4479 = vst.msk [vmem:[#allocation3 + $0x48] sm:$0xff] %vm4469_vm8, %v4392_v44  ;;  %4478 = vst.msk [vmem:[#allocation3 + $0x40] sm:$0xff] %vm4469_vm8, %v4390_v4  ;;  %v5873_v44 = vld [vmem:[%s10430_s1 + $0x68] sm:$0xff] }
 0x5d0   : > { %4793 = vrot.lane.b32.xlu1 %v9451_v50, %s6876_s5  ;;  %4791 = vrot.lane.b32.xlu0 %v9453_v2, %s6876_s5  ;;  %v5759_v28 = vadd.f32 %v5758_v41, %v5757_v5  ;;  %v9825_v4 = vld [vmem:[#allocation2 + $0x20f] sm:$0xff] }
 0x5d2   : > { %v4396_v49 = vpop.permute.xlu1 %4395  ;;  %v4394_v63 = vpop.permute.xlu0 %4393  ;;  %v5760_v46 = vrot.slane %v5759_v28, 2 }
 0x5d3   : > { %4481 = vst.msk [vmem:[#allocation3 + $0x58] sm:$0xff] %vm4469_vm8, %v4396_v49  ;;  %4480 = vst.msk [vmem:[#allocation3 + $0x50] sm:$0xff] %vm4469_vm8, %v4394_v63  ;;  %v9832_v63 = vld [vmem:[#allocation2 + $0x20e] sm:$0xff] }
 0x5d4   : > { %4984 = vrot.lane.b32.xlu1 %v9547_v54, %s6877_s13  ;;  %4952 = vrot.lane.b32.xlu0 %v9491_v37, %s6877_s13  ;;  %v5761_v59 = vadd.f32 %v5760_v46, %v5759_v28  ;;  %v5860_v37 = vld [vmem:[%s10430_s1] sm:$0xff] }
 0x5d5   : > { %v6655_v62 = vpack.c.bf16 %v5861_v8, %v5860_v37 }
 0x5d6   : > { %v4400_v50 = vpop.permute.xlu1 %4399  ;;  %v4398_v33 = vpop.permute.xlu0 %4397  ;;  %v5762_v2 = vrot.slane %v5761_v59, 1 }
 0x5d7   : > { %4483 = vst.msk [vmem:[#allocation3 + $0x68] sm:$0xff] %vm4469_vm8, %v4400_v50  ;;  %4482 = vst.msk [vmem:[#allocation3 + $0x60] sm:$0xff] %vm4469_vm8, %v4398_v33  ;;  %6656 = vmatprep.subr.bf16.mxu1 %v6655_v62  ;;  %6684 = vmatprep.subr.bf16.mxu0 %v6655_v62  ;;  %v5485_v50 = vld [vmem:[#allocation2 + $0x2d6] sm:$0xff] }
 0x5d8   : > { %4986 = vrot.lane.b32.xlu1 %v9545_v51, %s6877_s13  ;;  %4954 = vrot.lane.b32.xlu0 %v9489_v1, %s6877_s13  ;;  %v5763_v42 = vadd.f32 %v5762_v2, %v5761_v59  ;;  %v10509_v1 = vmov 0.0  }
 0x5d9   : > { %6548 = vmatprep.mubr.msk.f32.mxu0 %vm6878_vm10, %v10509_v1  ;;  %6658 = vmatpush3.bf16.msra.mxu1 %v6655_v62 }
 0x5da   : > { %v4404_v12 = vpop.permute.xlu1 %4403  ;;  %v4402_v26 = vpop.permute.xlu0 %4401  ;;  %v5764_v55 = vmul.f32 0.00390625, %v5763_v42  ;;  %6660 = vmatprep.subr.bf16.mxu1 %v6659_v48  ;;  %v5084_v42 = vld [vmem:[#allocation2 + $0x1e0] sm:$0xff] }
 0x5db   : > { %4485 = vst.msk [vmem:[#allocation3 + $0x78] sm:$0xff] %vm4469_vm8, %v4404_v12  ;;  %4484 = vst.msk [vmem:[#allocation3 + $0x70] sm:$0xff] %vm4469_vm8, %v4402_v26 }
 0x5dc   : > { %5178 = vrot.lane.b32.xlu1 %v9702_v53, %s6879_s29  ;;  %5146 = vrot.lane.b32.xlu0 %v6780_v23, %s6879_s29  ;;  %v6781_v53 = vld [vmem:[#allocation2 + $0x1c8] sm:$0xff] }
 0x5dd   : > { %6549 = vmatmul.mubr.msk.f32.vlgmr.msra.gmra.mrb[0].mxu0 %vm196_vm0, %v5764_v55  ;;  %6662 = vmatpush3.bf16.msra.mxu1 %v6659_v48  ;;  %vm4662_vm0 = vcmask 753344  }
 0x5de   : > { %v4408_v15 = vpop.permute.xlu1 %4407  ;;  %v4406_v34 = vpop.permute.xlu0 %4405  ;;  %6686 = vmatpush3.bf16.msra.mxu0 %v6655_v62  ;;  %6664 = vmatprep.subr.bf16.mxu1 %v6663_v32  ;;  %v5085_v62 = vld [vmem:[#allocation2 + $0x1e8] sm:$0xff] }
 0x5df   : > { %4487 = vst.msk [vmem:[#allocation3 + $0x88] sm:$0xff] %vm4469_vm8, %v4408_v15  ;;  %4486 = vst.msk [vmem:[#allocation3 + $0x80] sm:$0xff] %vm4469_vm8, %v4406_v34  ;;  %6688 = vmatprep.subr.bf16.mxu0 %v6659_v48 }
 0x5e0   : > { %5180 = vrot.lane.b32.xlu1 %v9698_v60, %s6879_s29  ;;  %5148 = vrot.lane.b32.xlu0 %v6781_v53, %s6879_s29  ;;  %v5866_v60 = vld [vmem:[%s10430_s1 + $0x30] sm:$0xff]  ;;  %v6784_v53 = vld [vmem:[#allocation2 + $0x127] sm:$0xff] }
 0x5e1   : > { %v6667_v0 = vpack.c.bf16 %v5867_v22, %v5866_v60  ;;  %6666 = vmatpush3.bf16.msra.mxu1 %v6663_v32  ;;  %v9881_v22 = vld [vmem:[#allocation2 + $0x22f] sm:$0xff] }
 0x5e2   : > { %v4412_v21 = vpop.permute.xlu1 %4411  ;;  %v4410_v24 = vpop.permute.xlu0 %4409  ;;  %6690 = vmatpush3.bf16.msra.mxu0 %v6659_v48  ;;  %v9865_v48 = vld [vmem:[#allocation2 + $0x227] sm:$0xff] }
 0x5e3   : > { %4489 = vst.msk [vmem:[#allocation3 + $0x98] sm:$0xff] %vm4469_vm8, %v4412_v21  ;;  %4488 = vst.msk [vmem:[#allocation3 + $0x90] sm:$0xff] %vm4469_vm8, %v4410_v24  ;;  %6692 = vmatprep.subr.bf16.mxu0 %v6663_v32  ;;  %6668 = vmatprep.subr.bf16.mxu1 %v6667_v0  ;;  %v5486_v21 = vld [vmem:[#allocation2 + $0x2ee] sm:$0xff] }
 0x5e4   : > { %5371 = vrot.lane.b32.xlu1 %v5291_v9, %s6880_s20  ;;  %5339 = vrot.lane.b32.xlu0 %v9443_v7, %s6880_s20  ;;  %v5868_v7 = vld [vmem:[%s10430_s1 + $0x40] sm:$0xff] }
 0x5e5   : > { %v6671_v18 = vpack.c.bf16 %v5869_v58, %v5868_v7  ;;  %6670 = vmatpush3.bf16.msra.mxu1 %v6667_v0  ;;  %v9888_v7 = vld [vmem:[#allocation2 + $0x22e] sm:$0xff] }
 0x5e6   : > { %v4416_v17 = vpop.permute.xlu1 %4415  ;;  %v4414_v13 = vpop.permute.xlu0 %4413  ;;  %6694 = vmatpush3.bf16.msra.mxu0 %v6663_v32  ;;  %v6785_v32 = vld [vmem:[#allocation2 + $0x1ef] sm:$0xff] }
 0x5e7   : > { %4491 = vst.msk [vmem:[#allocation3 + $0xa8] sm:$0xff] %vm4469_vm8, %v4416_v17  ;;  %4490 = vst.msk [vmem:[#allocation3 + $0xa0] sm:$0xff] %vm4469_vm8, %v4414_v13  ;;  %6696 = vmatprep.subr.bf16.mxu0 %v6667_v0  ;;  %6672 = vmatprep.subr.bf16.mxu1 %v6671_v18  ;;  %v6786_v13 = vld [vmem:[#allocation2 + $0x12f] sm:$0xff] }
 0x5e8   : > { %4795 = vrot.lane.b32.xlu1 %v9789_v3, %s6876_s5  ;;  %4763 = vrot.lane.b32.xlu0 %v9414_v20, %s6876_s5  ;;  %v5870_v20 = vld [vmem:[%s10430_s1 + $0x50] sm:$0xff] }
 0x5e9   : > { %v6675_v10 = vpack.c.bf16 %v5871_v61, %v5870_v20  ;;  %6674 = vmatpush3.bf16.msra.mxu1 %v6671_v18 }
 0x5ea   : > { %v4420_v40 = vpop.permute.xlu1 %4419  ;;  %v4418_v52 = vpop.permute.xlu0 %4417  ;;  %6698 = vmatpush3.bf16.msra.mxu0 %v6667_v0 }
 0x5eb   : > { %4493 = vst.msk [vmem:[#allocation3 + $0xb8] sm:$0xff] %vm4469_vm8, %v4420_v40  ;;  %4492 = vst.msk [vmem:[#allocation3 + $0xb0] sm:$0xff] %vm4469_vm8, %v4418_v52  ;;  %6700 = vmatprep.subr.bf16.mxu0 %v6671_v18  ;;  %6676 = vmatprep.subr.bf16.mxu1 %v6675_v10  ;;  %v9901_v52 = vld [vmem:[#allocation2 + $0x236] sm:$0xff] }
 0x5ec   : > { %5373 = vrot.lane.b32.xlu1 %v5292_v38, %s6880_s20  ;;  %5341 = vrot.lane.b32.xlu0 %v9441_v31, %s6880_s20  ;;  %v5872_v31 = vld [vmem:[%s10430_s1 + $0x60] sm:$0xff] }
 0x5ed   : > { %v6679_v41 = vpack.c.bf16 %v5873_v44, %v5872_v31  ;;  %6678 = vmatpush3.bf16.msra.mxu1 %v6675_v10 }
 0x5ee   : > { %v4424_v16 = vpop.permute.xlu1 %4423  ;;  %v4422_v5 = vpop.permute.xlu0 %4421  ;;  %6702 = vmatpush3.bf16.msra.mxu0 %v6671_v18 }
 0x5ef   : > { %4495 = vst.msk [vmem:[#allocation3 + $0xc8] sm:$0xff] %vm4469_vm8, %v4424_v16  ;;  %4494 = vst.msk [vmem:[#allocation3 + $0xc0] sm:$0xff] %vm4469_vm8, %v4422_v5  ;;  %6704 = vmatprep.subr.bf16.mxu0 %v6675_v10  ;;  %6680 = vmatprep.subr.bf16.mxu1 %v6679_v41 }
 0x5f0   : > { %5564 = vrot.lane.b32.xlu1 %v5484_v6, %s6881_s22  ;;  %5532 = vrot.lane.b32.xlu0 %v9537_v36, %s6881_s22  ;;  %v6782_v36 = vld [vmem:[#allocation2 + $0x10f] sm:$0xff] }
 0x5f1   : > { %6682 = vmatpush3.bf16.msra.mxu1 %v6679_v41 }
 0x5f2   : > { %v4428_v28 = vpop.permute.xlu1 %4427  ;;  %v4426_v49 = vpop.permute.xlu0 %4425  ;;  %6706 = vmatpush3.bf16.msra.mxu0 %v6675_v10 }
 0x5f3   : > { %4497 = vst.msk [vmem:[#allocation3 + $0xd8] sm:$0xff] %vm4469_vm8, %v4428_v28  ;;  %4496 = vst.msk [vmem:[#allocation3 + $0xd0] sm:$0xff] %vm4469_vm8, %v4426_v49  ;;  %6708 = vmatprep.subr.bf16.mxu0 %v6679_v41 }
 0x5f4   : > { %4797 = vrot.lane.b32.xlu1 %v9825_v4, %s6876_s5  ;;  %4765 = vrot.lane.b32.xlu0 %v6782_v36, %s6876_s5 }
 0x5f6   : > { %v4432_v46 = vpop.permute.xlu1 %4431  ;;  %v4430_v59 = vpop.permute.xlu0 %4429  ;;  %6710 = vmatpush3.bf16.msra.mxu0 %v6679_v41  ;;  %v4701_v41 = vld [vmem:[#allocation2 + $0x147] sm:$0xff] }
 0x5f7   : > { %4499 = vst.msk [vmem:[#allocation3 + $0xe8] sm:$0xff] %vm4469_vm8, %v4432_v46  ;;  %4498 = vst.msk [vmem:[#allocation3 + $0xe0] sm:$0xff] %vm4469_vm8, %v4430_v59 }
 0x5f8   : > { %4988 = vrot.lane.b32.xlu1 %v9832_v63, %s6877_s13  ;;  %4956 = vrot.lane.b32.xlu0 %v9501_v39, %s6877_s13  ;;  %v5100_v39 = vld [vmem:[#allocation2 + $0x2e0] sm:$0xff] }
 0x5fa   : > { %v4436_v33 = vpop.permute.xlu1 %4435  ;;  %v4434_v2 = vpop.permute.xlu0 %4433 }
 0x5fb   : > { %4501 = vst.msk [vmem:[#allocation3 + $0xf8] sm:$0xff] %vm4469_vm8, %v4436_v33  ;;  %4500 = vst.msk [vmem:[#allocation3 + $0xf0] sm:$0xff] %vm4469_vm8, %v4434_v2  ;;  %v9941_v33 = vld [vmem:[#allocation2 + $0x24f] sm:$0xff] }
 0x5fc   : > { %5566 = vrot.lane.b32.xlu1 %v5485_v50, %s6881_s22  ;;  %5534 = vrot.lane.b32.xlu0 %v9535_v35, %s6881_s22  ;;  %v5101_v35 = vld [vmem:[#allocation2 + $0x2e8] sm:$0xff] }
 0x5fd   : > { %v4702_v2 = vld [vmem:[#allocation2 + $0x14f] sm:$0xff] }
 0x5fe   : > { %v4569_v37 = vpop.permute.xlu1 %4568  ;;  %v4567_v8 = vpop.permute.xlu0 %4566 }
 0x5ff   : > { %4664 = vst.msk [vmem:[#allocation3 + $0x8] sm:$0xff] %vm4662_vm0, %v4569_v37  ;;  %4663 = vst.msk [vmem:[#allocation3] sm:$0xff] %vm4662_vm0, %v4567_v8 }
 0x600   : > { %4990 = vrot.lane.b32.xlu1 %v9845_v11, %s6877_s13  ;;  %4958 = vrot.lane.b32.xlu0 %v9499_v19, %s6877_s13  ;;  %v5293_v19 = vld [vmem:[#allocation2 + $0x2e7] sm:$0xff] }
 0x602   : > { %v4573_v12 = vpop.permute.xlu1 %4572  ;;  %v4571_v26 = vpop.permute.xlu0 %4570 }
 0x603   : > { %4666 = vst.msk [vmem:[#allocation3 + $0x18] sm:$0xff] %vm4662_vm0, %v4573_v12  ;;  %4665 = vst.msk [vmem:[#allocation3 + $0x10] sm:$0xff] %vm4662_vm0, %v4571_v26  ;;  %v5489_v12 = vld [vmem:[#allocation2 + $0x316] sm:$0xff] }
 0x604   : > { %5182 = vrot.lane.b32.xlu1 %v5100_v39, %s6879_s29  ;;  %5150 = vrot.lane.b32.xlu0 %v5084_v42, %s6879_s29 }
 0x606   : > { %v4577_v1 = vpop.permute.xlu1 %4576  ;;  %v4575_v55 = vpop.permute.xlu0 %4574 }
 0x607   : > { %4668 = vst.msk [vmem:[#allocation3 + $0x28] sm:$0xff] %vm4662_vm0, %v4577_v1  ;;  %4667 = vst.msk [vmem:[#allocation3 + $0x20] sm:$0xff] %vm4662_vm0, %v4575_v55 }
 0x608   : > { %5184 = vrot.lane.b32.xlu1 %v5101_v35, %s6879_s29  ;;  %5152 = vrot.lane.b32.xlu0 %v5085_v62, %s6879_s29  ;;  %v9960_v62 = vld [vmem:[#allocation2 + $0x256] sm:$0xff] }
 0x60a   : > { %v4581_v23 = vpop.permute.xlu1 %4580  ;;  %v4579_v14 = vpop.permute.xlu0 %4578 }
 0x60b   : > { %4670 = vst.msk [vmem:[#allocation3 + $0x38] sm:$0xff] %vm4662_vm0, %v4581_v23  ;;  %4669 = vst.msk [vmem:[#allocation3 + $0x30] sm:$0xff] %vm4662_vm0, %v4579_v14  ;;  %v5104_v23 = vld [vmem:[#allocation2 + $0x320] sm:$0xff] }
 0x60c   : > { %5375 = vrot.lane.b32.xlu1 %v5293_v19, %s6880_s20  ;;  %5343 = vrot.lane.b32.xlu0 %v6783_v25, %s6880_s20  ;;  %v6788_v19 = vld [vmem:[#allocation2 + $0x156] sm:$0xff] }
 0x60e   : > { %v4585_v15 = vpop.permute.xlu1 %4584  ;;  %v4583_v34 = vpop.permute.xlu0 %4582 }
 0x60f   : > { %4672 = vst.msk [vmem:[#allocation3 + $0x48] sm:$0xff] %vm4662_vm0, %v4585_v15  ;;  %4671 = vst.msk [vmem:[#allocation3 + $0x40] sm:$0xff] %vm4662_vm0, %v4583_v34 }
 0x610   : > { %4799 = vrot.lane.b32.xlu1 %v9865_v48, %s6876_s5  ;;  %4767 = vrot.lane.b32.xlu0 %v6784_v53, %s6876_s5  ;;  %v5297_v53 = vld [vmem:[#allocation2 + $0x327] sm:$0xff] }
 0x612   : > { %v4589_v29 = vpop.permute.xlu1 %4588  ;;  %v4587_v9 = vpop.permute.xlu0 %4586 }
 0x613   : > { %4674 = vst.msk [vmem:[#allocation3 + $0x58] sm:$0xff] %vm4662_vm0, %v4589_v29  ;;  %4673 = vst.msk [vmem:[#allocation3 + $0x50] sm:$0xff] %vm4662_vm0, %v4587_v9  ;;  %v4703_v9 = vld [vmem:[#allocation2 + $0x167] sm:$0xff] }
 0x614   : > { %5377 = vrot.lane.b32.xlu1 %v5294_v27, %s6880_s20  ;;  %5345 = vrot.lane.b32.xlu0 %v6785_v32, %s6880_s20 }
 0x616   : > { %v4593_v24 = vpop.permute.xlu1 %4592  ;;  %v4591_v60 = vpop.permute.xlu0 %4590 }
 0x617   : > { %4676 = vst.msk [vmem:[#allocation3 + $0x68] sm:$0xff] %vm4662_vm0, %v4593_v24  ;;  %4675 = vst.msk [vmem:[#allocation3 + $0x60] sm:$0xff] %vm4662_vm0, %v4591_v60 }
 0x618   : > { %5568 = vrot.lane.b32.xlu1 %v5486_v21, %s6881_s22  ;;  %5536 = vrot.lane.b32.xlu0 %v9547_v54, %s6881_s22  ;;  %v5487_v54 = vld [vmem:[#allocation2 + $0x2f6] sm:$0xff] }
 0x61a   : > { %v4597_v0 = vpop.permute.xlu1 %4596  ;;  %v4595_v17 = vpop.permute.xlu0 %4594 }
 0x61b   : > { %4678 = vst.msk [vmem:[#allocation3 + $0x78] sm:$0xff] %vm4662_vm0, %v4597_v0  ;;  %4677 = vst.msk [vmem:[#allocation3 + $0x70] sm:$0xff] %vm4662_vm0, %v4595_v17 }
 0x61c   : > { %4801 = vrot.lane.b32.xlu1 %v9881_v22, %s6876_s5  ;;  %4769 = vrot.lane.b32.xlu0 %v6786_v13, %s6876_s5  ;;  %v9999_v13 = vld [vmem:[#allocation2 + $0x26f] sm:$0xff] }
 0x61e   : > { %v4601_v58 = vpop.permute.xlu1 %4600  ;;  %v4599_v38 = vpop.permute.xlu0 %4598 }
 0x61f   : > { %4680 = vst.msk [vmem:[#allocation3 + $0x88] sm:$0xff] %vm4662_vm0, %v4601_v58  ;;  %4679 = vst.msk [vmem:[#allocation3 + $0x80] sm:$0xff] %vm4662_vm0, %v4599_v38  ;;  %v4704_v58 = vld [vmem:[#allocation2 + $0x16f] sm:$0xff] }
 0x620   : > { %4992 = vrot.lane.b32.xlu1 %v9888_v7, %s6877_s13  ;;  %4960 = vrot.lane.b32.xlu0 %v9511_v47, %s6877_s13  ;;  %v5102_v47 = vld [vmem:[#allocation2 + $0x300] sm:$0xff] }
 0x622   : > { %v4605_v18 = vpop.permute.xlu1 %4604  ;;  %v4603_v40 = vpop.permute.xlu0 %4602 }
 0x623   : > { %4682 = vst.msk [vmem:[#allocation3 + $0x98] sm:$0xff] %vm4662_vm0, %v4605_v18  ;;  %4681 = vst.msk [vmem:[#allocation3 + $0x90] sm:$0xff] %vm4662_vm0, %v4603_v40  ;;  %v4896_v40 = vld [vmem:[#allocation2 + $0x16e] sm:$0xff] }
 0x624   : > { %5570 = vrot.lane.b32.xlu1 %v5487_v54, %s6881_s22  ;;  %5538 = vrot.lane.b32.xlu0 %v9545_v51, %s6881_s22  ;;  %v5103_v51 = vld [vmem:[#allocation2 + $0x308] sm:$0xff] }
 0x626   : > { %v4609_v20 = vpop.permute.xlu1 %4608  ;;  %v4607_v61 = vpop.permute.xlu0 %4606 }
 0x627   : > { %4684 = vst.msk [vmem:[#allocation3 + $0xa8] sm:$0xff] %vm4662_vm0, %v4609_v20  ;;  %4683 = vst.msk [vmem:[#allocation3 + $0xa0] sm:$0xff] %vm4662_vm0, %v4607_v61 }
 0x628   : > { %4994 = vrot.lane.b32.xlu1 %v9901_v52, %s6877_s13  ;;  %4962 = vrot.lane.b32.xlu0 %v9509_v56, %s6877_s13  ;;  %v5295_v56 = vld [vmem:[#allocation2 + $0x307] sm:$0xff] }
 0x62a   : > { %v4613_v6 = vpop.permute.xlu1 %4612  ;;  %v4611_v10 = vpop.permute.xlu0 %4610 }
 0x62b   : > { %4686 = vst.msk [vmem:[#allocation3 + $0xb8] sm:$0xff] %vm4662_vm0, %v4613_v6  ;;  %4685 = vst.msk [vmem:[#allocation3 + $0xb0] sm:$0xff] %vm4662_vm0, %v4611_v10 }
 0x62c   : > { %5186 = vrot.lane.b32.xlu1 %v5102_v47, %s6879_s29  ;;  %5154 = vrot.lane.b32.xlu0 %v9617_v45, %s6879_s29  ;;  %v9924_v45 = vld [vmem:[#allocation2 + $0x247] sm:$0xff]  ;;  %v5491_v47 = vld [vmem:[#allocation2 + $0x336] sm:$0xff] }
 0x62e   : > { %v4617_v16 = vpop.permute.xlu1 %4616  ;;  %v4615_v5 = vpop.permute.xlu0 %4614 }
 0x62f   : > { %4688 = vst.msk [vmem:[#allocation3 + $0xc8] sm:$0xff] %vm4662_vm0, %v4617_v16  ;;  %4687 = vst.msk [vmem:[#allocation3 + $0xc0] sm:$0xff] %vm4662_vm0, %v4615_v5  ;;  %v4897_v16 = vld [vmem:[#allocation2 + $0x176] sm:$0xff] }
 0x630   : > { %5188 = vrot.lane.b32.xlu1 %v5103_v51, %s6879_s29  ;;  %5156 = vrot.lane.b32.xlu0 %v9611_v57, %s6879_s29  ;;  %v5296_v57 = vld [vmem:[#allocation2 + $0x30f] sm:$0xff] }
 0x631   : > { %v10020_v51 = vld [vmem:[#allocation2 + $0x276] sm:$0xff] }
 0x632   : > { %v4621_v31 = vpop.permute.xlu1 %4620  ;;  %v4619_v44 = vpop.permute.xlu0 %4618 }
 0x633   : > { %4690 = vst.msk [vmem:[#allocation3 + $0xd8] sm:$0xff] %vm4662_vm0, %v4621_v31  ;;  %4689 = vst.msk [vmem:[#allocation3 + $0xd0] sm:$0xff] %vm4662_vm0, %v4619_v44 }
 0x634   : > { %5379 = vrot.lane.b32.xlu1 %v5295_v56, %s6880_s20  ;;  %5347 = vrot.lane.b32.xlu0 %v9789_v3, %s6880_s20  ;;  %v5488_v3 = vld [vmem:[#allocation2 + $0x30e] sm:$0xff] }
 0x636   : > { %v4625_v28 = vpop.permute.xlu1 %4624  ;;  %v4623_v49 = vpop.permute.xlu0 %4622 }
 0x637   : > { %4692 = vst.msk [vmem:[#allocation3 + $0xe8] sm:$0xff] %vm4662_vm0, %v4625_v28  ;;  %4691 = vst.msk [vmem:[#allocation3 + $0xe0] sm:$0xff] %vm4662_vm0, %v4623_v49 }
 0x638   : > { %4803 = vrot.lane.b32.xlu1 %v9924_v45, %s6876_s5  ;;  %4771 = vrot.lane.b32.xlu0 %v4701_v41, %s6876_s5  ;;  %v5090_v41 = vld [vmem:[#allocation2 + $0x240] sm:$0xff] }
 0x63a   : > { %v4629_v36 = vpop.permute.xlu1 %4628  ;;  %v4627_v46 = vpop.permute.xlu0 %4626 }
 0x63b   : > { %4694 = vst.msk [vmem:[#allocation3 + $0xf8] sm:$0xff] %vm4662_vm0, %v4629_v36  ;;  %4693 = vst.msk [vmem:[#allocation3 + $0xf0] sm:$0xff] %vm4662_vm0, %v4627_v46  ;;  %v5091_v36 = vld [vmem:[#allocation2 + $0x248] sm:$0xff] }
 0x63c   : > { %5381 = vrot.lane.b32.xlu1 %v5296_v57, %s6880_s20  ;;  %5349 = vrot.lane.b32.xlu0 %v9825_v4, %s6880_s20  ;;  %v9948_v4 = vld [vmem:[#allocation2 + $0x24e] sm:$0xff] }
 0x63d   : > { %v5107_v57 = vld [vmem:[#allocation2 + $0x348] sm:$0xff] }
 0x63e   : > { %v4762_v59 = vpop.permute.xlu1 %4761  ;;  %v4760_v50 = vpop.permute.xlu0 %4759 }
 0x63f   : > { %4857 = vst.msk [vmem:[#allocation3 + $0x8] sm:$0xff] %vm4855_vm11, %v4762_v59  ;;  %4856 = vst.msk [vmem:[#allocation3] sm:$0xff] %vm4855_vm11, %v4760_v50  ;;  %v5299_v59 = vld [vmem:[#allocation2 + $0x347] sm:$0xff] }
 0x640   : > { %5572 = vrot.lane.b32.xlu1 %v5488_v3, %s6881_s22  ;;  %5540 = vrot.lane.b32.xlu0 %v9832_v63, %s6881_s22  ;;  %v6787_v63 = vld [vmem:[#allocation2 + $0x14e] sm:$0xff] }
 0x642   : > { %v4794_v37 = vpop.permute.xlu1 %4793  ;;  %v4792_v8 = vpop.permute.xlu0 %4791 }
 0x643   : > { %4873 = vst.msk [vmem:[#allocation3 + $0x88] sm:$0xff] %vm4855_vm11, %v4794_v37  ;;  %4872 = vst.msk [vmem:[#allocation3 + $0x80] sm:$0xff] %vm4855_vm11, %v4792_v8  ;;  %v10042_v37 = vld [vmem:[#allocation2 + $0x287] sm:$0xff] }
 0x644   : > { %4805 = vrot.lane.b32.xlu1 %v9941_v33, %s6876_s5  ;;  %4773 = vrot.lane.b32.xlu0 %v4702_v2, %s6876_s5  ;;  %v4705_v8 = vld [vmem:[#allocation2 + $0x187] sm:$0xff] }
 0x646   : > { %v4985_v39 = vpop.permute.xlu1 %4984  ;;  %v4953_v42 = vpop.permute.xlu0 %4952 }
 0x647   : > { %5065 = vst.msk [vmem:[#allocation3 + $0x80] sm:$0xff] %vm5048_vm12, %v4985_v39  ;;  %5049 = vst.msk [vmem:[#allocation3] sm:$0xff] %vm5048_vm12, %v4953_v42 }
 0x648   : > { %4996 = vrot.lane.b32.xlu1 %v9948_v4, %s6877_s13  ;;  %4964 = vrot.lane.b32.xlu0 %v6787_v63, %s6877_s13  ;;  %v5300_v63 = vld [vmem:[#allocation2 + $0x34f] sm:$0xff] }
 0x64a   : > { %v4987_v26 = vpop.permute.xlu1 %4986  ;;  %v4955_v35 = vpop.permute.xlu0 %4954 }
 0x64b   : > { %5066 = vst.msk [vmem:[#allocation3 + $0x88] sm:$0xff] %vm5048_vm12, %v4987_v26  ;;  %5050 = vst.msk [vmem:[#allocation3 + $0x8] sm:$0xff] %vm5048_vm12, %v4955_v35 }
 0x64c   : > { %5574 = vrot.lane.b32.xlu1 %v5489_v12, %s6881_s22  ;;  %5542 = vrot.lane.b32.xlu0 %v9845_v11, %s6881_s22  ;;  %v5105_v11 = vld [vmem:[#allocation2 + $0x328] sm:$0xff] }
 0x64e   : > { %v5179_v1 = vpop.permute.xlu1 %5178  ;;  %v5147_v55 = vpop.permute.xlu0 %5146 }
 0x64f   : > { %5259 = vst.msk [vmem:[#allocation3 + $0x80] sm:$0xff] %vm5242_vm13, %v5179_v1  ;;  %5243 = vst.msk [vmem:[#allocation3] sm:$0xff] %vm5242_vm13, %v5147_v55  ;;  %v10059_v55 = vld [vmem:[#allocation2 + $0x28f] sm:$0xff] }
 0x650   : > { %4998 = vrot.lane.b32.xlu1 %v9960_v62, %s6877_s13  ;;  %4966 = vrot.lane.b32.xlu0 %v6788_v19, %s6877_s13  ;;  %v4706_v19 = vld [vmem:[#allocation2 + $0x18f] sm:$0xff] }
 0x652   : > { %v5181_v14 = vpop.permute.xlu1 %5180  ;;  %v5149_v25 = vpop.permute.xlu0 %5148 }
 0x653   : > { %5260 = vst.msk [vmem:[#allocation3 + $0x88] sm:$0xff] %vm5242_vm13, %v5181_v14  ;;  %5244 = vst.msk [vmem:[#allocation3 + $0x8] sm:$0xff] %vm5242_vm13, %v5149_v25 }
 0x654   : > { %5190 = vrot.lane.b32.xlu1 %v5104_v23, %s6879_s29  ;;  %5158 = vrot.lane.b32.xlu0 %v9637_v30, %s6879_s29  ;;  %v9982_v30 = vld [vmem:[#allocation2 + $0x267] sm:$0xff] }
 0x656   : > { %v5372_v15 = vpop.permute.xlu1 %5371  ;;  %v5340_v34 = vpop.permute.xlu0 %5339 }
 0x657   : > { %5452 = vst.msk [vmem:[#allocation3 + $0x80] sm:$0xff] %vm5435_vm14, %v5372_v15  ;;  %5436 = vst.msk [vmem:[#allocation3] sm:$0xff] %vm5435_vm14, %v5340_v34 }
 0x658   : > { %5192 = vrot.lane.b32.xlu1 %v5105_v11, %s6879_s29  ;;  %5160 = vrot.lane.b32.xlu0 %v9633_v43, %s6879_s29  ;;  %v5298_v43 = vld [vmem:[#allocation2 + $0x32f] sm:$0xff] }
 0x65a   : > { %v4796_v27 = vpop.permute.xlu1 %4795  ;;  %v4764_v29 = vpop.permute.xlu0 %4763 }
 0x65b   : > { %4874 = vst.msk [vmem:[#allocation3 + $0x90] sm:$0xff] %vm4855_vm11, %v4796_v27  ;;  %4858 = vst.msk [vmem:[#allocation3 + $0x10] sm:$0xff] %vm4855_vm11, %v4764_v29 }
 0x65c   : > { %5383 = vrot.lane.b32.xlu1 %v5297_v53, %s6880_s20  ;;  %5351 = vrot.lane.b32.xlu0 %v9865_v48, %s6880_s20  ;;  %v5490_v48 = vld [vmem:[#allocation2 + $0x32e] sm:$0xff]  ;;  %v5493_v53 = vld [vmem:[#allocation2 + $0x356] sm:$0xff] }
 0x65e   : > { %v5374_v32 = vpop.permute.xlu1 %5373  ;;  %v5342_v21 = vpop.permute.xlu0 %5341 }
 0x65f   : > { %5453 = vst.msk [vmem:[#allocation3 + $0x88] sm:$0xff] %vm5435_vm14, %v5374_v32  ;;  %5437 = vst.msk [vmem:[#allocation3 + $0x8] sm:$0xff] %vm5435_vm14, %v5342_v21  ;;  %v4899_v32 = vld [vmem:[#allocation2 + $0x196] sm:$0xff] }
 0x660   : > { %4807 = vrot.lane.b32.xlu1 %v9982_v30, %s6876_s5  ;;  %4775 = vrot.lane.b32.xlu0 %v4703_v9, %s6876_s5  ;;  %v10080_v9 = vld [vmem:[#allocation2 + $0x296] sm:$0xff] }
 0x662   : > { %v5565_v24 = vpop.permute.xlu1 %5564  ;;  %v5533_v60 = vpop.permute.xlu0 %5532 }
 0x663   : > { %5645 = vst.msk [vmem:[#allocation3 + $0x80] sm:$0xff] %vm5628_vm15, %v5565_v24  ;;  %5629 = vst.msk [vmem:[#allocation3] sm:$0xff] %vm5628_vm15, %v5533_v60 }
 0x664   : > { %5385 = vrot.lane.b32.xlu1 %v5298_v43, %s6880_s20  ;;  %5353 = vrot.lane.b32.xlu0 %v9881_v22, %s6880_s20 }
 0x666   : > { %v4798_v0 = vpop.permute.xlu1 %4797  ;;  %v4766_v17 = vpop.permute.xlu0 %4765 }
 0x667   : > { %4875 = vst.msk [vmem:[#allocation3 + $0x98] sm:$0xff] %vm4855_vm11, %v4798_v0  ;;  %4859 = vst.msk [vmem:[#allocation3 + $0x18] sm:$0xff] %vm4855_vm11, %v4766_v17 }
 0x668   : > { %5576 = vrot.lane.b32.xlu1 %v5490_v48, %s6881_s22  ;;  %5544 = vrot.lane.b32.xlu0 %v9888_v7, %s6881_s22  ;;  %v10008_v7 = vld [vmem:[#allocation2 + $0x26e] sm:$0xff]  ;;  %v5092_v48 = vld [vmem:[#allocation2 + $0x260] sm:$0xff] }
 0x66a   : > { %v4989_v38 = vpop.permute.xlu1 %4988  ;;  %v4957_v54 = vpop.permute.xlu0 %4956  ;;  %v5844_v18 = vld [vmem:[#allocation3] sm:$0xff] }
 0x66b   : > { %v6105_v22 = vld [vmem:[#allocation3 + $0x80] sm:$0xff]  ;;  %5067 = vst.msk [vmem:[#allocation3 + $0x90] sm:$0xff] %vm5048_vm12, %v4989_v38  ;;  %5051 = vst.msk [vmem:[#allocation3 + $0x10] sm:$0xff] %vm5048_vm12, %v4957_v54  ;;  %6579 = vmatprep.mubr.msk.f32.mxu1 %vm5878_vm1, %v5844_v18  ;;  %v5093_v38 = vld [vmem:[#allocation2 + $0x268] sm:$0xff] }
 0x66c   : > { %6631 = vmatprep.mubr.msk.f32.mxu0 %vm5878_vm1, %v6105_v22  ;;  %4809 = vrot.lane.b32.xlu1 %v9999_v13, %s6876_s5  ;;  %v5301_v22 = vld [vmem:[#allocation2 + $0x367] sm:$0xff] }
 0x66d   : > { %4777 = vrot.lane.b32.xlu0 %v4704_v58, %s6876_s5  ;;  %v5109_v58 = vld [vmem:[#allocation2 + $0x368] sm:$0xff] }
 0x66e   : > { %v5567_v20 = vpop.permute.xlu1 %5566  ;;  %v5535_v61 = vpop.permute.xlu0 %5534 }
 0x66f   : > { %5646 = vst.msk [vmem:[#allocation3 + $0x88] sm:$0xff] %vm5628_vm15, %v5567_v20  ;;  %5630 = vst.msk [vmem:[#allocation3 + $0x8] sm:$0xff] %vm5628_vm15, %v5535_v61  ;;  %v10102_v61 = vld [vmem:[#allocation2 + $0x2a7] sm:$0xff] }
 0x670   : > { %5000 = vrot.lane.b32.xlu1 %v10008_v7, %s6877_s13 }
 0x671   : > { %4968 = vrot.lane.b32.xlu0 %v4896_v40, %s6877_s13 }
 0x672   : > { %v4991_v6 = vpop.permute.xlu1 %4990  ;;  %v4959_v10 = vpop.permute.xlu0 %4958 }
 0x673   : > { %5068 = vst.msk [vmem:[#allocation3 + $0x98] sm:$0xff] %vm5048_vm12, %v4991_v6  ;;  %5052 = vst.msk [vmem:[#allocation3 + $0x18] sm:$0xff] %vm5048_vm12, %v4959_v10 }
 0x674   : > { %5578 = vrot.lane.b32.xlu1 %v5491_v47, %s6881_s22  ;;  %v4707_v47 = vld [vmem:[#allocation2 + $0x1a7] sm:$0xff] }
 0x675   : > { %5546 = vrot.lane.b32.xlu0 %v9901_v52, %s6881_s22  ;;  %v5106_v52 = vld [vmem:[#allocation2 + $0x340] sm:$0xff] }
 0x676   : > { %v5183_v5 = vpop.permute.xlu1 %5182  ;;  %v5151_v56 = vpop.permute.xlu0 %5150  ;;  %v5845_v31 = vld [vmem:[#allocation3 + $0x8] sm:$0xff] }
 0x677   : > { %v6106_v44 = vld [vmem:[#allocation3 + $0x88] sm:$0xff]  ;;  %5261 = vst.msk [vmem:[#allocation3 + $0x90] sm:$0xff] %vm5242_vm13, %v5183_v5  ;;  %5245 = vst.msk [vmem:[#allocation3 + $0x10] sm:$0xff] %vm5242_vm13, %v5151_v56  ;;  %6580 = vmatmul.mubr.msk.f32.vlgmr.msra.gmra.mrb[0].mxu1 %vm5878_vm1, %v5845_v31 }
 0x678   : > { %6632 = vmatmul.mubr.msk.f32.vlgmr.msra.gmra.mrb[2].mxu0 %vm5878_vm1, %v6106_v44  ;;  %5002 = vrot.lane.b32.xlu1 %v10020_v51, %s6877_s13 }
 0x679   : > { %4970 = vrot.lane.b32.xlu0 %v4897_v16, %s6877_s13  ;;  %v5302_v16 = vld [vmem:[#allocation2 + $0x36f] sm:$0xff] }
 0x67a   : > { %v5185_v28 = vpop.permute.xlu1 %5184  ;;  %v5153_v49 = vpop.permute.xlu0 %5152 }
 0x67b   : > { %5262 = vst.msk [vmem:[#allocation3 + $0x98] sm:$0xff] %vm5242_vm13, %v5185_v28  ;;  %5246 = vst.msk [vmem:[#allocation3 + $0x18] sm:$0xff] %vm5242_vm13, %v5153_v49 }
 0x67c   : > { %5194 = vrot.lane.b32.xlu1 %v5106_v52, %s6879_s29  ;;  %v10119_v52 = vld [vmem:[#allocation2 + $0x2af] sm:$0xff] }
 0x67d   : > { %5162 = vrot.lane.b32.xlu0 %v5090_v41, %s6879_s29  ;;  %v4708_v41 = vld [vmem:[#allocation2 + $0x1af] sm:$0xff] }
 0x67e   : > { %v5376_v46 = vpop.permute.xlu1 %5375  ;;  %v5344_v3 = vpop.permute.xlu0 %5343 }
 0x67f   : > { %5454 = vst.msk [vmem:[#allocation3 + $0x90] sm:$0xff] %vm5435_vm14, %v5376_v46  ;;  %5438 = vst.msk [vmem:[#allocation3 + $0x10] sm:$0xff] %vm5435_vm14, %v5344_v3 }
 0x680   : > { %5196 = vrot.lane.b32.xlu1 %v5107_v57, %s6879_s29 }
 0x681   : > { %5164 = vrot.lane.b32.xlu0 %v5091_v36, %s6879_s29 }
 0x682   : > { %v4800_v50 = vpop.permute.xlu1 %4799  ;;  %v4768_v2 = vpop.permute.xlu0 %4767 }
 0x683   : > { %4876 = vst.msk [vmem:[#allocation3 + $0xa0] sm:$0xff] %vm4855_vm11, %v4800_v50  ;;  %4860 = vst.msk [vmem:[#allocation3 + $0x20] sm:$0xff] %vm4855_vm11, %v4768_v2 }
 0x684   : > { %5387 = vrot.lane.b32.xlu1 %v5299_v59, %s6880_s20  ;;  %v5495_v59 = vld [vmem:[#allocation2 + $0x376] sm:$0xff] }
 0x685   : > { %5355 = vrot.lane.b32.xlu0 %v9924_v45, %s6880_s20  ;;  %v5492_v45 = vld [vmem:[#allocation2 + $0x34e] sm:$0xff] }
 0x686   : > { %v5378_v39 = vpop.permute.xlu1 %5377  ;;  %v5346_v42 = vpop.permute.xlu0 %5345 }
 0x687   : > { %5455 = vst.msk [vmem:[#allocation3 + $0x98] sm:$0xff] %vm5435_vm14, %v5378_v39  ;;  %5439 = vst.msk [vmem:[#allocation3 + $0x18] sm:$0xff] %vm5435_vm14, %v5346_v42  ;;  %v10142_v42 = vld [vmem:[#allocation2 + $0x2b6] sm:$0xff] }
 0x688   : > { %4811 = vrot.lane.b32.xlu1 %v10042_v37, %s6876_s5 }
 0x689   : > { %4779 = vrot.lane.b32.xlu0 %v4705_v8, %s6876_s5 }
 0x68a   : > { %v5569_v12 = vpop.permute.xlu1 %5568  ;;  %v5537_v26 = vpop.permute.xlu0 %5536 }
 0x68b   : > { %5647 = vst.msk [vmem:[#allocation3 + $0x90] sm:$0xff] %vm5628_vm15, %v5569_v12  ;;  %5631 = vst.msk [vmem:[#allocation3 + $0x10] sm:$0xff] %vm5628_vm15, %v5537_v26 }
 0x68c   : > { %5389 = vrot.lane.b32.xlu1 %v5300_v63, %s6880_s20  ;;  %v4901_v63 = vld [vmem:[#allocation2 + $0x1b6] sm:$0xff] }
 0x68d   : > { %5357 = vrot.lane.b32.xlu0 %v9941_v33, %s6880_s20  ;;  %v10068_v33 = vld [vmem:[#allocation2 + $0x28e] sm:$0xff] }
 0x68e   : > { %v4802_v35 = vpop.permute.xlu1 %4801  ;;  %v4770_v1 = vpop.permute.xlu0 %4769 }
 0x68f   : > { %4877 = vst.msk [vmem:[#allocation3 + $0xa8] sm:$0xff] %vm4855_vm11, %v4802_v35  ;;  %4861 = vst.msk [vmem:[#allocation3 + $0x28] sm:$0xff] %vm4855_vm11, %v4770_v1  ;;  %v5094_v1 = vld [vmem:[#allocation2 + $0x280] sm:$0xff] }
 0x690   : > { %5580 = vrot.lane.b32.xlu1 %v5492_v45, %s6881_s22 }
 0x691   : > { %5548 = vrot.lane.b32.xlu0 %v9948_v4, %s6881_s22  ;;  %v4898_v4 = vld [vmem:[#allocation2 + $0x18e] sm:$0xff] }
 0x692   : > { %v4993_v23 = vpop.permute.xlu1 %4992  ;;  %v4961_v14 = vpop.permute.xlu0 %4960  ;;  %v5846_v25 = vld [vmem:[#allocation3 + $0x10] sm:$0xff] }
 0x693   : > { %v6107_v11 = vld [vmem:[#allocation3 + $0x90] sm:$0xff]  ;;  %5069 = vst.msk [vmem:[#allocation3 + $0xa0] sm:$0xff] %vm5048_vm12, %v4993_v23  ;;  %5053 = vst.msk [vmem:[#allocation3 + $0x20] sm:$0xff] %vm5048_vm12, %v4961_v14  ;;  %6582 = vmatprep.mubr.msk.f32.mxu1 %vm5878_vm1, %v5846_v25  ;;  %v5111_v14 = vld [vmem:[#allocation2 + $0x388] sm:$0xff] }
 0x694   : > { %6634 = vmatprep.mubr.msk.f32.mxu0 %vm5878_vm1, %v6107_v11  ;;  %4813 = vrot.lane.b32.xlu1 %v10059_v55, %s6876_s5  ;;  %v5095_v25 = vld [vmem:[#allocation2 + $0x288] sm:$0xff] }
 0x695   : > { %4781 = vrot.lane.b32.xlu0 %v4706_v19, %s6876_s5 }
 0x696   : > { %v5571_v15 = vpop.permute.xlu1 %5570  ;;  %v5539_v34 = vpop.permute.xlu0 %5538 }
 0x697   : > { %5648 = vst.msk [vmem:[#allocation3 + $0x98] sm:$0xff] %vm5628_vm15, %v5571_v15  ;;  %5632 = vst.msk [vmem:[#allocation3 + $0x18] sm:$0xff] %vm5628_vm15, %v5539_v34  ;;  %v5303_v15 = vld [vmem:[#allocation2 + $0x387] sm:$0xff] }
 0x698   : > { %5004 = vrot.lane.b32.xlu1 %v10068_v33, %s6877_s13 }
 0x699   : > { %4972 = vrot.lane.b32.xlu0 %v4898_v4, %s6877_s13 }
 0x69a   : > { %v4995_v27 = vpop.permute.xlu1 %4994  ;;  %v4963_v29 = vpop.permute.xlu0 %4962 }
 0x69b   : > { %5070 = vst.msk [vmem:[#allocation3 + $0xa8] sm:$0xff] %vm5048_vm12, %v4995_v27  ;;  %5054 = vst.msk [vmem:[#allocation3 + $0x28] sm:$0xff] %vm5048_vm12, %v4963_v29  ;;  %v4725_v27 = vld [vmem:[#allocation2 + $0x2c7] sm:$0xff] }
 0x69c   : > { %5582 = vrot.lane.b32.xlu1 %v5493_v53, %s6881_s22  ;;  %v4709_v29 = vld [vmem:[#allocation2 + $0x1c7] sm:$0xff] }
 0x69d   : > { %5550 = vrot.lane.b32.xlu0 %v9960_v62, %s6881_s22  ;;  %v5108_v62 = vld [vmem:[#allocation2 + $0x360] sm:$0xff] }
 0x69e   : > { %v5187_v21 = vpop.permute.xlu1 %5186  ;;  %v5155_v43 = vpop.permute.xlu0 %5154  ;;  %v5847_v24 = vld [vmem:[#allocation3 + $0x18] sm:$0xff] }
 0x69f   : > { %v6108_v60 = vld [vmem:[#allocation3 + $0x98] sm:$0xff]  ;;  %5263 = vst.msk [vmem:[#allocation3 + $0xa0] sm:$0xff] %vm5242_vm13, %v5187_v21  ;;  %5247 = vst.msk [vmem:[#allocation3 + $0x20] sm:$0xff] %vm5242_vm13, %v5155_v43  ;;  %6583 = vmatmul.mubr.msk.f32.gmra.mrb[2].mxu1 %vm5878_vm1, %v5847_v24  ;;  %v5304_v43 = vld [vmem:[#allocation2 + $0x38f] sm:$0xff] }
 0x6a0   : > { %6635 = vmatmul.mubr.msk.f32.gmra.mrb[4].mxu0 %vm5878_vm1, %v6108_v60  ;;  %5006 = vrot.lane.b32.xlu1 %v10080_v9, %s6877_s13 }
 0x6a1   : > { %4974 = vrot.lane.b32.xlu0 %v4899_v32, %s6877_s13 }
 0x6a2   : > { %v5189_v0 = vpop.permute.xlu1 %5188  ;;  %v5157_v17 = vpop.permute.xlu0 %5156 }
 0x6a3   : > { %5264 = vst.msk [vmem:[#allocation3 + $0xa8] sm:$0xff] %vm5242_vm13, %v5189_v0  ;;  %5248 = vst.msk [vmem:[#allocation3 + $0x28] sm:$0xff] %vm5242_vm13, %v5157_v17  ;;  %v4726_v0 = vld [vmem:[#allocation2 + $0x2cf] sm:$0xff] }
 0x6a4   : > { %5198 = vrot.lane.b32.xlu1 %v5108_v62, %s6879_s29  ;;  %v4710_v17 = vld [vmem:[#allocation2 + $0x1cf] sm:$0xff] }
 0x6a5   : > { %5166 = vrot.lane.b32.xlu0 %v5092_v48, %s6879_s29 }
 0x6a6   : > { %v5380_v54 = vpop.permute.xlu1 %5379  ;;  %v5348_v18 = vpop.permute.xlu0 %5347 }
 0x6a7   : > { %5456 = vst.msk [vmem:[#allocation3 + $0xa0] sm:$0xff] %vm5435_vm14, %v5380_v54  ;;  %5440 = vst.msk [vmem:[#allocation3 + $0x20] sm:$0xff] %vm5435_vm14, %v5348_v18 }
 0x6a8   : > { %5200 = vrot.lane.b32.xlu1 %v5109_v58, %s6879_s29 }
 0x6a9   : > { %5168 = vrot.lane.b32.xlu0 %v5093_v38, %s6879_s29 }
 0x6aa   : > { %v4804_v40 = vpop.permute.xlu1 %4803  ;;  %v4772_v20 = vpop.permute.xlu0 %4771 }
 0x6ab   : > { %4878 = vst.msk [vmem:[#allocation3 + $0xb0] sm:$0xff] %vm4855_vm11, %v4804_v40  ;;  %4862 = vst.msk [vmem:[#allocation3 + $0x30] sm:$0xff] %vm4855_vm11, %v4772_v20  ;;  %v5497_v20 = vld [vmem:[#allocation2 + $0x396] sm:$0xff] }
 0x6ac   : > { %5391 = vrot.lane.b32.xlu1 %v5301_v22, %s6880_s20 }
 0x6ad   : > { %5359 = vrot.lane.b32.xlu0 %v9982_v30, %s6880_s20  ;;  %v5494_v30 = vld [vmem:[#allocation2 + $0x36e] sm:$0xff] }
 0x6ae   : > { %v5382_v6 = vpop.permute.xlu1 %5381  ;;  %v5350_v10 = vpop.permute.xlu0 %5349 }
 0x6af   : > { %5457 = vst.msk [vmem:[#allocation3 + $0xa8] sm:$0xff] %vm5435_vm14, %v5382_v6  ;;  %5441 = vst.msk [vmem:[#allocation3 + $0x28] sm:$0xff] %vm5435_vm14, %v5350_v10  ;;  %v4919_v10 = vld [vmem:[#allocation2 + $0x2d6] sm:$0xff] }
 0x6b0   : > { %4815 = vrot.lane.b32.xlu1 %v10102_v61, %s6876_s5  ;;  %v10137_v8 = vpop.f32.mrb[0].mxu0 }
 0x6b1   : > { %4783 = vrot.lane.b32.xlu0 %v4707_v47, %s6876_s5  ;;  %v6550_v39 = vpop.f32.mrb[1].mxu0 }
 0x6b2   : > { %v5573_v5 = vpop.permute.xlu1 %5572  ;;  %v5541_v56 = vpop.permute.xlu0 %5540 }
 0x6b3   : > { %5649 = vst.msk [vmem:[#allocation3 + $0xa0] sm:$0xff] %vm5628_vm15, %v5573_v5  ;;  %5633 = vst.msk [vmem:[#allocation3 + $0x20] sm:$0xff] %vm5628_vm15, %v5541_v56 }
 0x6b4   : > { %5393 = vrot.lane.b32.xlu1 %v5302_v16, %s6880_s20  ;;  %v4903_v16 = vld [vmem:[#allocation2 + $0x1d6] sm:$0xff] }
 0x6b5   : > { %5361 = vrot.lane.b32.xlu0 %v9999_v13, %s6880_s20  ;;  %v10128_v13 = vld [vmem:[#allocation2 + $0x2ae] sm:$0xff] }
 0x6b6   : > { %v4806_v31 = vpop.permute.xlu1 %4805  ;;  %v4774_v44 = vpop.permute.xlu0 %4773 }
 0x6b7   : > { %4879 = vst.msk [vmem:[#allocation3 + $0xb8] sm:$0xff] %vm4855_vm11, %v4806_v31  ;;  %4863 = vst.msk [vmem:[#allocation3 + $0x38] sm:$0xff] %vm4855_vm11, %v4774_v44  ;;  %v5112_v44 = vld [vmem:[#allocation2 + $0x3a0] sm:$0xff] }
 0x6b8   : > { %5584 = vrot.lane.b32.xlu1 %v5494_v30, %s6881_s22 }
 0x6b9   : > { %5552 = vrot.lane.b32.xlu0 %v10008_v7, %s6881_s22  ;;  %v4900_v7 = vld [vmem:[#allocation2 + $0x1ae] sm:$0xff] }
 0x6ba   : > { %v4997_v28 = vpop.permute.xlu1 %4996  ;;  %v4965_v49 = vpop.permute.xlu0 %4964  ;;  %v5848_v57 = vld [vmem:[#allocation3 + $0x20] sm:$0xff] }
 0x6bb   : > { %v6109_v36 = vld [vmem:[#allocation3 + $0xa0] sm:$0xff]  ;;  %5071 = vst.msk [vmem:[#allocation3 + $0xb0] sm:$0xff] %vm5048_vm12, %v4997_v28  ;;  %5055 = vst.msk [vmem:[#allocation3 + $0x30] sm:$0xff] %vm5048_vm12, %v4965_v49  ;;  %6585 = vmatprep.mubr.msk.f32.mxu1 %vm5878_vm1, %v5848_v57  ;;  %v5113_v49 = vld [vmem:[#allocation2 + $0x3a8] sm:$0xff] }
 0x6bc   : > { %6637 = vmatprep.mubr.msk.f32.mxu0 %vm5878_vm1, %v6109_v36  ;;  %4817 = vrot.lane.b32.xlu1 %v10119_v52, %s6876_s5  ;;  %v5097_v57 = vld [vmem:[#allocation2 + $0x2a8] sm:$0xff] }
 0x6bd   : > { %4785 = vrot.lane.b32.xlu0 %v4708_v41, %s6876_s5 }
 0x6be   : > { %v5575_v46 = vpop.permute.xlu1 %5574  ;;  %v5543_v3 = vpop.permute.xlu0 %5542 }
 0x6bf   : > { %5650 = vst.msk [vmem:[#allocation3 + $0xa8] sm:$0xff] %vm5628_vm15, %v5575_v46  ;;  %5634 = vst.msk [vmem:[#allocation3 + $0x28] sm:$0xff] %vm5628_vm15, %v5543_v3  ;;  %v5305_v46 = vld [vmem:[#allocation2 + $0x3a7] sm:$0xff] }
 0x6c0   : > { %5008 = vrot.lane.b32.xlu1 %v10128_v13, %s6877_s13 }
 0x6c1   : > { %4976 = vrot.lane.b32.xlu0 %v4900_v7, %s6877_s13 }
 0x6c2   : > { %v4999_v50 = vpop.permute.xlu1 %4998  ;;  %v4967_v2 = vpop.permute.xlu0 %4966 }
 0x6c3   : > { %5072 = vst.msk [vmem:[#allocation3 + $0xb8] sm:$0xff] %vm5048_vm12, %v4999_v50  ;;  %5056 = vst.msk [vmem:[#allocation3 + $0x38] sm:$0xff] %vm5048_vm12, %v4967_v2  ;;  %v5306_v50 = vld [vmem:[#allocation2 + $0x3af] sm:$0xff] }
 0x6c4   : > { %5586 = vrot.lane.b32.xlu1 %v5495_v59, %s6881_s22 }
 0x6c5   : > { %5554 = vrot.lane.b32.xlu0 %v10020_v51, %s6881_s22  ;;  %v5110_v51 = vld [vmem:[#allocation2 + $0x380] sm:$0xff] }
 0x6c6   : > { %v5191_v12 = vpop.permute.xlu1 %5190  ;;  %v5159_v26 = vpop.permute.xlu0 %5158  ;;  %v5849_v45 = vld [vmem:[#allocation3 + $0x28] sm:$0xff] }
 0x6c7   : > { %v6110_v35 = vld [vmem:[#allocation3 + $0xa8] sm:$0xff]  ;;  %5265 = vst.msk [vmem:[#allocation3 + $0xb0] sm:$0xff] %vm5242_vm13, %v5191_v12  ;;  %5249 = vst.msk [vmem:[#allocation3 + $0x30] sm:$0xff] %vm5242_vm13, %v5159_v26  ;;  %6586 = vmatmul.mubr.msk.f32.gmra.mrb[4].mxu1 %vm5878_vm1, %v5849_v45 }
 0x6c8   : > { %6638 = vmatmul.mubr.msk.f32.gmra.mrb[6].mxu0 %vm5878_vm1, %v6110_v35  ;;  %5010 = vrot.lane.b32.xlu1 %v10142_v42, %s6877_s13 }
 0x6c9   : > { %4978 = vrot.lane.b32.xlu0 %v4901_v63, %s6877_s13  ;;  %v5498_v63 = vld [vmem:[#allocation2 + $0x3ae] sm:$0xff] }
 0x6ca   : > { %v5193_v19 = vpop.permute.xlu1 %5192  ;;  %v5161_v23 = vpop.permute.xlu0 %5160 }
 0x6cb   : > { %5266 = vst.msk [vmem:[#allocation3 + $0xb8] sm:$0xff] %vm5242_vm13, %v5193_v19  ;;  %5250 = vst.msk [vmem:[#allocation3 + $0x38] sm:$0xff] %vm5242_vm13, %v5161_v23 }
 0x6cc   : > { %5202 = vrot.lane.b32.xlu1 %v5110_v51, %s6879_s29 }
 0x6cd   : > { %5170 = vrot.lane.b32.xlu0 %v5094_v1, %s6879_s29 }
 0x6ce   : > { %v5384_v11 = vpop.permute.xlu1 %5383  ;;  %v5352_v4 = vpop.permute.xlu0 %5351 }
 0x6cf   : > { %5458 = vst.msk [vmem:[#allocation3 + $0xb0] sm:$0xff] %vm5435_vm14, %v5384_v11  ;;  %5442 = vst.msk [vmem:[#allocation3 + $0x30] sm:$0xff] %vm5435_vm14, %v5352_v4 }
 0x6d0   : > { %5204 = vrot.lane.b32.xlu1 %v5111_v14, %s6879_s29 }
 0x6d1   : > { %5172 = vrot.lane.b32.xlu0 %v5095_v25, %s6879_s29 }
 0x6d2   : > { %v4808_v34 = vpop.permute.xlu1 %4807  ;;  %v4776_v53 = vpop.permute.xlu0 %4775 }
 0x6d3   : > { %4880 = vst.msk [vmem:[#allocation3 + $0xc0] sm:$0xff] %vm4855_vm11, %v4808_v34  ;;  %4864 = vst.msk [vmem:[#allocation3 + $0x40] sm:$0xff] %vm4855_vm11, %v4776_v53 }
 0x6d4   : > { %5395 = vrot.lane.b32.xlu1 %v5303_v15, %s6880_s20 }
 0x6d5   : > { %5363 = vrot.lane.b32.xlu0 %v10042_v37, %s6880_s20  ;;  %v5496_v37 = vld [vmem:[#allocation2 + $0x38e] sm:$0xff] }
 0x6d6   : > { %v5386_v32 = vpop.permute.xlu1 %5385  ;;  %v5354_v21 = vpop.permute.xlu0 %5353 }
 0x6d7   : > { %5459 = vst.msk [vmem:[#allocation3 + $0xb8] sm:$0xff] %vm5435_vm14, %v5386_v32  ;;  %5443 = vst.msk [vmem:[#allocation3 + $0x38] sm:$0xff] %vm5435_vm14, %v5354_v21 }
 0x6d8   : > { %4819 = vrot.lane.b32.xlu1 %v4725_v27, %s6876_s5 }
 0x6d9   : > { %4787 = vrot.lane.b32.xlu0 %v4709_v29, %s6876_s5 }
 0x6da   : > { %v5577_v24 = vpop.permute.xlu1 %5576  ;;  %v5545_v60 = vpop.permute.xlu0 %5544 }
 0x6db   : > { %5651 = vst.msk [vmem:[#allocation3 + $0xb0] sm:$0xff] %vm5628_vm15, %v5577_v24  ;;  %5635 = vst.msk [vmem:[#allocation3 + $0x30] sm:$0xff] %vm5628_vm15, %v5545_v60 }
 0x6dc   : > { %5397 = vrot.lane.b32.xlu1 %v5304_v43, %s6880_s20 }
 0x6dd   : > { %5365 = vrot.lane.b32.xlu0 %v10059_v55, %s6880_s20  ;;  %v4918_v55 = vld [vmem:[#allocation2 + $0x2ce] sm:$0xff] }
 0x6de   : > { %v4810_v62 = vpop.permute.xlu1 %4809 }
 0x6df   : > { %v4778_v48 = vpop.permute.xlu0 %4777  ;;  %4881 = vst.msk [vmem:[#allocation3 + $0xc8] sm:$0xff] %vm4855_vm11, %v4810_v62 }
 0x6e0   : > { %4865 = vst.msk [vmem:[#allocation3 + $0x48] sm:$0xff] %vm4855_vm11, %v4778_v48  ;;  %5588 = vrot.lane.b32.xlu1 %v5496_v37, %s6881_s22 }
 0x6e1   : > { %5556 = vrot.lane.b32.xlu0 %v10068_v33, %s6881_s22  ;;  %v4902_v33 = vld [vmem:[#allocation2 + $0x1ce] sm:$0xff] }
 0x6e2   : > { %v5001_v58 = vpop.permute.xlu1 %5000  ;;  %v5850_v54 = vld [vmem:[#allocation3 + $0x30] sm:$0xff] }
 0x6e3   : > { %v4969_v38 = vpop.permute.xlu0 %4968  ;;  %v6111_v18 = vld [vmem:[#allocation3 + $0xb0] sm:$0xff]  ;;  %5073 = vst.msk [vmem:[#allocation3 + $0xc0] sm:$0xff] %vm5048_vm12, %v5001_v58  ;;  %6588 = vmatprep.mubr.msk.f32.mxu1 %vm5878_vm1, %v5850_v54 }
 0x6e4   : > { %5057 = vst.msk [vmem:[#allocation3 + $0x40] sm:$0xff] %vm5048_vm12, %v4969_v38  ;;  %6640 = vmatprep.mubr.msk.f32.mxu0 %vm5878_vm1, %v6111_v18  ;;  %4821 = vrot.lane.b32.xlu1 %v4726_v0, %s6876_s5 }
 0x6e5   : > { %4789 = vrot.lane.b32.xlu0 %v4710_v17, %s6876_s5 }
 0x6e6   : > { %v5579_v22 = vpop.permute.xlu1 %5578 }
 0x6e7   : > { %v5547_v40 = vpop.permute.xlu0 %5546  ;;  %5652 = vst.msk [vmem:[#allocation3 + $0xb8] sm:$0xff] %vm5628_vm15, %v5579_v22  ;;  %v5874_v22 = vlaneseq }
 0x6e8   : > { %5636 = vst.msk [vmem:[#allocation3 + $0x38] sm:$0xff] %vm5628_vm15, %v5547_v40  ;;  %5012 = vrot.lane.b32.xlu1 %v4918_v55, %s6877_s13 }
 0x6e9   : > { %4980 = vrot.lane.b32.xlu0 %v4902_v33, %s6877_s13 }
 0x6ea   : > { %v5003_v47 = vpop.permute.xlu1 %5002 }
 0x6eb   : > { %v4971_v6 = vpop.permute.xlu0 %4970  ;;  %5074 = vst.msk [vmem:[#allocation3 + $0xc8] sm:$0xff] %vm5048_vm12, %v5003_v47 }
 0x6ec   : > { %5058 = vst.msk [vmem:[#allocation3 + $0x48] sm:$0xff] %vm5048_vm12, %v4971_v6  ;;  %5590 = vrot.lane.b32.xlu1 %v5497_v20, %s6881_s22 }
 0x6ed   : > { %5558 = vrot.lane.b32.xlu0 %v10080_v9, %s6881_s22  ;;  %v5096_v9 = vld [vmem:[#allocation2 + $0x2a0] sm:$0xff] }
 0x6ee   : > { %v5195_v5 = vpop.permute.xlu1 %5194  ;;  %v6112_v31 = vld [vmem:[#allocation3 + $0xb8] sm:$0xff] }
 0x6ef   : > { %v5163_v56 = vpop.permute.xlu0 %5162  ;;  %v5851_v30 = vld [vmem:[#allocation3 + $0x38] sm:$0xff]  ;;  %5267 = vst.msk [vmem:[#allocation3 + $0xc0] sm:$0xff] %vm5242_vm13, %v5195_v5  ;;  %6641 = vmatmul.mubr.msk.f32.gmra.mrb[8].mxu0 %vm5878_vm1, %v6112_v31 }
 0x6f0   : > { %5251 = vst.msk [vmem:[#allocation3 + $0x40] sm:$0xff] %vm5242_vm13, %v5163_v56  ;;  %6589 = vmatmul.mubr.msk.f32.gmra.mrb[6].mxu1 %vm5878_vm1, %v5851_v30  ;;  %5014 = vrot.lane.b32.xlu1 %v4919_v10, %s6877_s13  ;;  %v5875_v10 = vshrl.u32 %v5874_v22, 7 }
 0x6f1   : > { %4982 = vrot.lane.b32.xlu0 %v4903_v16, %s6877_s13  ;;  %v5766_v16 = vld [vmem:[%s10432_s3] sm:$0x1] }
 0x6f2   : > { %v5197_v41 = vpop.permute.xlu1 %5196  ;;  %v5841_v30 = vadd.f32 %v10137_v8, %v5766_v16  ;;  %v5876_v31 = vsub.s32 0, %v5875_v10 }
 0x6f3   : > { %v5165_v28 = vpop.permute.xlu0 %5164  ;;  %5268 = vst.msk [vmem:[#allocation3 + $0xc8] sm:$0xff] %vm5242_vm13, %v5197_v41 }
 0x6f4   : > { %5252 = vst.msk [vmem:[#allocation3 + $0x48] sm:$0xff] %vm5242_vm13, %v5165_v28  ;;  %5206 = vrot.lane.b32.xlu1 %v5112_v44, %s6879_s29  ;;  %v10270_v41 = vrot.slane %v5841_v30, %v5876_v31 }
 0x6f5   : > { %5174 = vrot.lane.b32.xlu0 %v5096_v9, %s6879_s29 }
 0x6f6   : > { %v5388_v36 = vpop.permute.xlu1 %5387 }
 0x6f7   : > { %v5356_v7 = vpop.permute.xlu0 %5355  ;;  %5460 = vst.msk [vmem:[#allocation3 + $0xc0] sm:$0xff] %vm5435_vm14, %v5388_v36 }
 0x6f8   : > { %5444 = vst.msk [vmem:[#allocation3 + $0x40] sm:$0xff] %vm5435_vm14, %v5356_v7  ;;  %5208 = vrot.lane.b32.xlu1 %v5113_v49, %s6879_s29 }
 0x6f9   : > { %5176 = vrot.lane.b32.xlu0 %v5097_v57, %s6879_s29  ;;  %s188_s29 = sand.u32 1, %s6843_s16  }
 0x6fa   : > { %v4812_v3 = vpop.permute.xlu1 %4811  ;;  %s10387_s19 = scalar_lea.sflag [#allocation5], %s188_s29 }
 0x6fb   : > { %v4780_v59 = vpop.permute.xlu0 %4779  ;;  %4882 = vst.msk [vmem:[#allocation3 + $0xd0] sm:$0xff] %vm4855_vm11, %v4812_v3 }
 0x6fc   : > { %4866 = vst.msk [vmem:[#allocation3 + $0x50] sm:$0xff] %vm4855_vm11, %v4780_v59  ;;  %5399 = vrot.lane.b32.xlu1 %v5305_v46, %s6880_s20 }
 0x6fd   : > { %5367 = vrot.lane.b32.xlu0 %v10102_v61, %s6880_s20  ;;  %v5499_v61 = vld [vmem:[#allocation2 + $0x3b6] sm:$0xff] }
 0x6fe   : > { %v5390_v2 = vpop.permute.xlu1 %5389 }
 0x6ff   : > { %v5358_v39 = vpop.permute.xlu0 %5357  ;;  %5461 = vst.msk [vmem:[#allocation3 + $0xc8] sm:$0xff] %vm5435_vm14, %v5390_v2 }
 0x700   : > { %5445 = vst.msk [vmem:[#allocation3 + $0x48] sm:$0xff] %vm5435_vm14, %v5358_v39  ;;  %5401 = vrot.lane.b32.xlu1 %v5306_v50, %s6880_s20 }
 0x701   : > { %5369 = vrot.lane.b32.xlu0 %v10119_v52, %s6880_s20  ;;  %s6440_s20 = sshll.u32 %s188_s29, 8 }
 0x702   : > { %v5581_v12 = vpop.permute.xlu1 %5580  ;;  %s10282_s6 = scalar_lea.vmem [#allocation4], %s6440_s20 }
 0x703   : > { %v5549_v26 = vpop.permute.xlu0 %5548  ;;  %5653 = vst.msk [vmem:[#allocation3 + $0xc0] sm:$0xff] %vm5628_vm15, %v5581_v12  ;;  %s6374_s9 = sshll.u32 %s10282_s6, 4  ;;  %s10380_s9 = int_to_ptr.vmem [resolvable:$true] %s6374_s9 }
 0x704   : > { %5637 = vst.msk [vmem:[#allocation3 + $0x40] sm:$0xff] %vm5628_vm15, %v5549_v26  ;;  %5592 = vrot.lane.b32.xlu1 %v5498_v63, %s6881_s22  ;;  %s6789_s14 = scalar_lea.vmem %s10380_s9, 4096 }
 0x705   : > { %5560 = vrot.lane.b32.xlu0 %v10128_v13, %s6881_s22  ;;  %p6790_p11 = scmp.ne.s32.totalorder %s10380_s9, %s6789_s14 }
 0x706   : > { %v4814_v45 = vpop.permute.xlu1 %4813 }
 0x707   : > { %v4782_v35 = vpop.permute.xlu0 %4781  ;;  %4883 = vst.msk [vmem:[#allocation3 + $0xd8] sm:$0xff] %vm4855_vm11, %v4814_v45  ;;  %p6791_p12 = pnand %p6790_p11, %p6947_p5 }
 0x708   : > { %4867 = vst.msk [vmem:[#allocation3 + $0x58] sm:$0xff] %vm4855_vm11, %v4782_v35  ;;  %5594 = vrot.lane.b32.xlu1 %v5499_v61, %s6881_s22 }
 0x709   : > { %5562 = vrot.lane.b32.xlu0 %v10142_v42, %s6881_s22  ;;  %p6792_p13 = pneg %p6791_p12  ;;  %s6882_s22 = smov [#allocation4]  }
 0x70a   : > { %v5005_v52 = vpop.permute.xlu1 %5004  ;;  %v6113_v19 = vld [vmem:[#allocation3 + $0xc0] sm:$0xff]  ;;  %s6793_s23 = sshll.u32 %s6882_s22, 4  ;;  %s6794_s23 = int_to_ptr.vmem [resolvable:$false] %s6793_s23 }
 0x70b   : > { %v4973_v51 = vpop.permute.xlu0 %4972  ;;  %v5852_v1 = vld [vmem:[#allocation3 + $0x40] sm:$0xff]  ;;  %5075 = vst.msk [vmem:[#allocation3 + $0xd0] sm:$0xff] %vm5048_vm12, %v5005_v52  ;;  %6643 = vmatprep.mubr.msk.f32.mxu0 %vm5878_vm1, %v6113_v19  ;;  %s6795_s27 = scalar_lea.vmem %s6794_s23, 8192  ;;  %p6796_p0 = scmp.lt.s32.totalorder %s10380_s9, %s6794_s23 }
 0x70c   : > { %5059 = vst.msk [vmem:[#allocation3 + $0x50] sm:$0xff] %vm5048_vm12, %v4973_v51  ;;  %6591 = vmatprep.mubr.msk.f32.mxu1 %vm5878_vm1, %v5852_v1  ;;  %p6797_p1 = scmp.lt.s32.totalorder %s6795_s27, %s6789_s14 }
 0x70e   : > { %v5583_v13 = vpop.permute.xlu1 %5582  ;;  %p6798_p2 = por %p6797_p1, %p6796_p0 }
 0x70f   : > { %v5551_v23 = vpop.permute.xlu0 %5550  ;;  %5654 = vst.msk [vmem:[#allocation3 + $0xc8] sm:$0xff] %vm5628_vm15, %v5583_v13 }
 0x710   : > { %5638 = vst.msk [vmem:[#allocation3 + $0x48] sm:$0xff] %vm5628_vm15, %v5551_v23  ;;  %p6799_p3 = pnand %p6798_p2, %p6792_p13 }
 0x712   : > { %v5007_v14 = vpop.permute.xlu1 %5006 }
 0x713   : > { %v4975_v42 = vpop.permute.xlu0 %4974  ;;  %5076 = vst.msk [vmem:[#allocation3 + $0xd8] sm:$0xff] %vm5048_vm12, %v5007_v14 }
 0x714   : > { %5060 = vst.msk [vmem:[#allocation3 + $0x58] sm:$0xff] %vm5048_vm12, %v4975_v42 }
 0x716   : > { %v5199_v25 = vpop.permute.xlu1 %5198  ;;  %v6114_v15 = vld [vmem:[#allocation3 + $0xc8] sm:$0xff] }
 0x717   : > { %v5167_v11 = vpop.permute.xlu0 %5166  ;;  %v5853_v4 = vld [vmem:[#allocation3 + $0x48] sm:$0xff]  ;;  %5269 = vst.msk [vmem:[#allocation3 + $0xd0] sm:$0xff] %vm5242_vm13, %v5199_v25  ;;  %6644 = vmatmul.mubr.msk.f32.gmra.mrb[10].mxu0 %vm5878_vm1, %v6114_v15 }
 0x718   : > { %5253 = vst.msk [vmem:[#allocation3 + $0x50] sm:$0xff] %vm5242_vm13, %v5167_v11  ;;  %6592 = vmatmul.mubr.msk.f32.gmra.mrb[8].mxu1 %vm5878_vm1, %v5853_v4 }
 0x71a   : > { %v5201_v34 = vpop.permute.xlu1 %5200 }
 0x71b   : > { %v5169_v53 = vpop.permute.xlu0 %5168  ;;  %5270 = vst.msk [vmem:[#allocation3 + $0xd8] sm:$0xff] %vm5242_vm13, %v5201_v34 }
 0x71c   : > { %5254 = vst.msk [vmem:[#allocation3 + $0x58] sm:$0xff] %vm5242_vm13, %v5169_v53 }
 0x71e   : > { %v5392_v27 = vpop.permute.xlu1 %5391 }
 0x71f   : > { %v5360_v29 = vpop.permute.xlu0 %5359  ;;  %5462 = vst.msk [vmem:[#allocation3 + $0xd0] sm:$0xff] %vm5435_vm14, %v5392_v27 }
 0x720   : > { %5446 = vst.msk [vmem:[#allocation3 + $0x50] sm:$0xff] %vm5435_vm14, %v5360_v29 }
 0x722   : > { %v4816_v32 = vpop.permute.xlu1 %4815 }
 0x723   : > { %v4784_v21 = vpop.permute.xlu0 %4783  ;;  %4884 = vst.msk [vmem:[#allocation3 + $0xe0] sm:$0xff] %vm4855_vm11, %v4816_v32 }
 0x724   : > { %4868 = vst.msk [vmem:[#allocation3 + $0x60] sm:$0xff] %vm4855_vm11, %v4784_v21 }
 0x726   : > { %v5394_v43 = vpop.permute.xlu1 %5393 }
 0x727   : > { %v5362_v24 = vpop.permute.xlu0 %5361  ;;  %5463 = vst.msk [vmem:[#allocation3 + $0xd8] sm:$0xff] %vm5435_vm14, %v5394_v43 }
 0x728   : > { %5447 = vst.msk [vmem:[#allocation3 + $0x58] sm:$0xff] %vm5435_vm14, %v5362_v24 }
 0x72a   : > { %v5585_v60 = vpop.permute.xlu1 %5584 }
 0x72b   : > { %v5553_v37 = vpop.permute.xlu0 %5552  ;;  %5655 = vst.msk [vmem:[#allocation3 + $0xd0] sm:$0xff] %vm5628_vm15, %v5585_v60 }
 0x72c   : > { %5639 = vst.msk [vmem:[#allocation3 + $0x50] sm:$0xff] %vm5628_vm15, %v5553_v37 }
 0x72e   : > { %v4818_v62 = vpop.permute.xlu1 %4817 }
 0x72f   : > { %v4786_v48 = vpop.permute.xlu0 %4785  ;;  %4885 = vst.msk [vmem:[#allocation3 + $0xe8] sm:$0xff] %vm4855_vm11, %v4818_v62 }
 0x730   : > { %4869 = vst.msk [vmem:[#allocation3 + $0x68] sm:$0xff] %vm4855_vm11, %v4786_v48 }
 0x732   : > { %v5009_v0 = vpop.permute.xlu1 %5008  ;;  %v6115_v38 = vld [vmem:[#allocation3 + $0xd0] sm:$0xff] }
 0x733   : > { %v4977_v17 = vpop.permute.xlu0 %4976  ;;  %v5854_v58 = vld [vmem:[#allocation3 + $0x50] sm:$0xff]  ;;  %5077 = vst.msk [vmem:[#allocation3 + $0xe0] sm:$0xff] %vm5048_vm12, %v5009_v0  ;;  %6646 = vmatprep.mubr.msk.f32.mxu0 %vm5878_vm1, %v6115_v38 }
 0x734   : > { %5061 = vst.msk [vmem:[#allocation3 + $0x60] sm:$0xff] %vm5048_vm12, %v4977_v17  ;;  %6594 = vmatprep.mubr.msk.f32.mxu1 %vm5878_vm1, %v5854_v58 }
 0x736   : > { %v5587_v54 = vpop.permute.xlu1 %5586 }
 0x737   : > { %v5555_v18 = vpop.permute.xlu0 %5554  ;;  %5656 = vst.msk [vmem:[#allocation3 + $0xd8] sm:$0xff] %vm5628_vm15, %v5587_v54 }
 0x738   : > { %5640 = vst.msk [vmem:[#allocation3 + $0x58] sm:$0xff] %vm5628_vm15, %v5555_v18 }
 0x73a   : > { %v5011_v55 = vpop.permute.xlu1 %5010 }
 0x73b   : > { %v4979_v33 = vpop.permute.xlu0 %4978  ;;  %5078 = vst.msk [vmem:[#allocation3 + $0xe8] sm:$0xff] %vm5048_vm12, %v5011_v55 }
 0x73c   : > { %5062 = vst.msk [vmem:[#allocation3 + $0x68] sm:$0xff] %vm5048_vm12, %v4979_v33 }
 0x73e   : > { %v5203_v40 = vpop.permute.xlu1 %5202  ;;  %v6116_v6 = vld [vmem:[#allocation3 + $0xd8] sm:$0xff] }
 0x73f   : > { %v5171_v20 = vpop.permute.xlu0 %5170  ;;  %v5855_v47 = vld [vmem:[#allocation3 + $0x58] sm:$0xff]  ;;  %5271 = vst.msk [vmem:[#allocation3 + $0xe0] sm:$0xff] %vm5242_vm13, %v5203_v40  ;;  %6647 = vmatmul.mubr.msk.f32.gmra.mrb[12].mxu0 %vm5878_vm1, %v6116_v6 }
 0x740   : > { %5255 = vst.msk [vmem:[#allocation3 + $0x60] sm:$0xff] %vm5242_vm13, %v5171_v20  ;;  %6595 = vmatmul.mubr.msk.f32.gmra.mrb[10].mxu1 %vm5878_vm1, %v5855_v47 }
 0x742   : > { %v5205_v5 = vpop.permute.xlu1 %5204 }
 0x743   : > { %v5173_v56 = vpop.permute.xlu0 %5172  ;;  %5272 = vst.msk [vmem:[#allocation3 + $0xe8] sm:$0xff] %vm5242_vm13, %v5205_v5 }
 0x744   : > { %5256 = vst.msk [vmem:[#allocation3 + $0x68] sm:$0xff] %vm5242_vm13, %v5173_v56 }
 0x746   : > { %v5396_v44 = vpop.permute.xlu1 %5395 }
 0x747   : > { %v5364_v9 = vpop.permute.xlu0 %5363  ;;  %5464 = vst.msk [vmem:[#allocation3 + $0xe0] sm:$0xff] %vm5435_vm14, %v5396_v44 }
 0x748   : > { %5448 = vst.msk [vmem:[#allocation3 + $0x60] sm:$0xff] %vm5435_vm14, %v5364_v9 }
 0x74a   : > { %v4820_v28 = vpop.permute.xlu1 %4819  ;;  %v6581_v8 = vpop.f32.mrb[0].mxu1 }
 0x74b   : > { %v6633_v49 = vpop.f32.mrb[2].mxu0  ;;  %4886 = vst.msk [vmem:[#allocation3 + $0xf0] sm:$0xff] %vm4855_vm11, %v4820_v28  ;;  %v4788_v36 = vpop.permute.xlu0 %4787  ;;  %v5999_v7 = vadd.f32 %v6581_v8, %v10270_v41 }
 0x74c   : > { %v6255_v57 = vadd.f32 %v6633_v49, %v10270_v41  ;;  %4870 = vst.msk [vmem:[#allocation3 + $0x70] sm:$0xff] %vm4855_vm11, %v4788_v36  ;;  %v5993_v46 = vpop.f32.mrb[1].mxu1  ;;  %v6249_v3 = vpop.f32.mrb[3].mxu0 }
 0x74d   : > { %v5994_v50 = vadd.f32 %v5993_v46, %v10270_v41  ;;  %v6250_v2 = vadd.f32 %v6249_v3, %v10270_v41  ;;  %v6073_v39 = vmax.f32 %v5999_v7, 0.0 }
 0x74e   : > { %v6329_v59 = vmax.f32 %v6255_v57, 0.0  ;;  %v5398_v63 = vpop.permute.xlu1 %5397 }
 0x74f   : > { %v6072_v12 = vmax.f32 %v5994_v50, 0.0  ;;  %v6328_v26 = vmax.f32 %v6250_v2, 0.0  ;;  %5465 = vst.msk [vmem:[#allocation3 + $0xe8] sm:$0xff] %vm5435_vm14, %v5398_v63  ;;  %v5366_v61 = vpop.permute.xlu0 %5365  ;;  %6089 = vst [vmem:[%s10282_s6 + $0x8] sm:$0xff] %v6073_v39 }
 0x750   : > { %6345 = vst [vmem:[%s10282_s6 + $0x88] sm:$0xff] %v6329_v59  ;;  %5449 = vst.msk [vmem:[#allocation3 + $0x68] sm:$0xff] %vm5435_vm14, %v5366_v61 }
 0x751   : > { %6088 = vst [vmem:[%s10282_s6] sm:$0xff] %v6072_v12  ;;  %6344 = vst [vmem:[%s10282_s6 + $0x80] sm:$0xff] %v6328_v26 }
 0x752   : > { %v5589_v45 = vpop.permute.xlu1 %5588 }
 0x753   : > { %5657 = vst.msk [vmem:[#allocation3 + $0xe0] sm:$0xff] %vm5628_vm15, %v5589_v45  ;;  %v5557_v35 = vpop.permute.xlu0 %5556 }
 0x754   : > { %5641 = vst.msk [vmem:[#allocation3 + $0x60] sm:$0xff] %vm5628_vm15, %v5557_v35 }
 0x756   : > { %v4822_v52 = vpop.permute.xlu1 %4821 }
 0x757   : > { %4887 = vst.msk [vmem:[#allocation3 + $0xf8] sm:$0xff] %vm4855_vm11, %v4822_v52  ;;  %v4790_v51 = vpop.permute.xlu0 %4789 }
 0x758   : > { %4871 = vst.msk [vmem:[#allocation3 + $0x78] sm:$0xff] %vm4855_vm11, %v4790_v51 }
 0x75a   : > { %v5013_v1 = vpop.permute.xlu1 %5012  ;;  %v6117_v19 = vld [vmem:[#allocation3 + $0xe0] sm:$0xff] }
 0x75b   : > { %5079 = vst.msk [vmem:[#allocation3 + $0xf0] sm:$0xff] %vm5048_vm12, %v5013_v1  ;;  %v4981_v13 = vpop.permute.xlu0 %4980  ;;  %v5856_v23 = vld [vmem:[#allocation3 + $0x60] sm:$0xff]  ;;  %6649 = vmatprep.mubr.msk.f32.mxu0 %vm5878_vm1, %v6117_v19 }
 0x75c   : > { %5063 = vst.msk [vmem:[#allocation3 + $0x70] sm:$0xff] %vm5048_vm12, %v4981_v13  ;;  %6597 = vmatprep.mubr.msk.f32.mxu1 %vm5878_vm1, %v5856_v23 }
 0x75e   : > { %v5591_v14 = vpop.permute.xlu1 %5590 }
 0x75f   : > { %5658 = vst.msk [vmem:[#allocation3 + $0xe8] sm:$0xff] %vm5628_vm15, %v5591_v14  ;;  %v5559_v42 = vpop.permute.xlu0 %5558 }
 0x760   : > { %5642 = vst.msk [vmem:[#allocation3 + $0x68] sm:$0xff] %vm5628_vm15, %v5559_v42 }
 0x762   : > { %v5015_v25 = vpop.permute.xlu1 %5014 }
 0x763   : > { %5080 = vst.msk [vmem:[#allocation3 + $0xf8] sm:$0xff] %vm5048_vm12, %v5015_v25  ;;  %v4983_v11 = vpop.permute.xlu0 %4982 }
 0x764   : > { %5064 = vst.msk [vmem:[#allocation3 + $0x78] sm:$0xff] %vm5048_vm12, %v4983_v11 }
 0x766   : > { %v5207_v4 = vpop.permute.xlu1 %5206  ;;  %v6118_v15 = vld [vmem:[#allocation3 + $0xe8] sm:$0xff] }
 0x767   : > { %5273 = vst.msk [vmem:[#allocation3 + $0xf0] sm:$0xff] %vm5242_vm13, %v5207_v4  ;;  %v5175_v34 = vpop.permute.xlu0 %5174  ;;  %v5857_v53 = vld [vmem:[#allocation3 + $0x68] sm:$0xff]  ;;  %6650 = vmatmul.mubr.msk.f32.gmra.mrb[14].mxu0 %vm5878_vm1, %v6118_v15 }
 0x768   : > { %5257 = vst.msk [vmem:[#allocation3 + $0x70] sm:$0xff] %vm5242_vm13, %v5175_v34  ;;  %6598 = vmatmul.mubr.msk.f32.gmra.mrb[12].mxu1 %vm5878_vm1, %v5857_v53 }
 0x76a   : > { %v5209_v27 = vpop.permute.xlu1 %5208 }
 0x76b   : > { %5274 = vst.msk [vmem:[#allocation3 + $0xf8] sm:$0xff] %vm5242_vm13, %v5209_v27  ;;  %v5177_v29 = vpop.permute.xlu0 %5176 }
 0x76c   : > { %5258 = vst.msk [vmem:[#allocation3 + $0x78] sm:$0xff] %vm5242_vm13, %v5177_v29 }
 0x76e   : > { %v5400_v32 = vpop.permute.xlu1 %5399 }
 0x76f   : > { %5466 = vst.msk [vmem:[#allocation3 + $0xf0] sm:$0xff] %vm5435_vm14, %v5400_v32  ;;  %v5368_v21 = vpop.permute.xlu0 %5367 }
 0x770   : > { %5450 = vst.msk [vmem:[#allocation3 + $0x70] sm:$0xff] %vm5435_vm14, %v5368_v21 }
 0x772   : > { %v5402_v43 = vpop.permute.xlu1 %5401  ;;  %v6584_v62 = vpop.f32.mrb[2].mxu1 }
 0x773   : > { %v6636_v24 = vpop.f32.mrb[4].mxu0  ;;  %5467 = vst.msk [vmem:[#allocation3 + $0xf8] sm:$0xff] %vm5435_vm14, %v5402_v43  ;;  %v5370_v37 = vpop.permute.xlu0 %5369  ;;  %v6009_v48 = vadd.f32 %v6584_v62, %v10270_v41 }
 0x774   : > { %v6265_v60 = vadd.f32 %v6636_v24, %v10270_v41  ;;  %5451 = vst.msk [vmem:[#allocation3 + $0x78] sm:$0xff] %vm5435_vm14, %v5370_v37  ;;  %v6003_v0 = vpop.f32.mrb[3].mxu1  ;;  %v6259_v17 = vpop.f32.mrb[5].mxu0 }
 0x775   : > { %v6004_v38 = vadd.f32 %v6003_v0, %v10270_v41  ;;  %v6260_v54 = vadd.f32 %v6259_v17, %v10270_v41  ;;  %v6075_v18 = vmax.f32 %v6009_v48, 0.0 }
 0x776   : > { %v6331_v58 = vmax.f32 %v6265_v60, 0.0  ;;  %v5593_v55 = vpop.permute.xlu1 %5592 }
 0x777   : > { %v6074_v33 = vmax.f32 %v6004_v38, 0.0  ;;  %v6330_v22 = vmax.f32 %v6260_v54, 0.0  ;;  %5659 = vst.msk [vmem:[#allocation3 + $0xf0] sm:$0xff] %vm5628_vm15, %v5593_v55  ;;  %v5561_v40 = vpop.permute.xlu0 %5560  ;;  %6091 = vst [vmem:[%s10282_s6 + $0x18] sm:$0xff] %v6075_v18 }
 0x778   : > { %6347 = vst [vmem:[%s10282_s6 + $0x98] sm:$0xff] %v6331_v58  ;;  %5643 = vst.msk [vmem:[#allocation3 + $0x70] sm:$0xff] %vm5628_vm15, %v5561_v40 }
 0x779   : > { %6090 = vst [vmem:[%s10282_s6 + $0x10] sm:$0xff] %v6074_v33  ;;  %6346 = vst [vmem:[%s10282_s6 + $0x90] sm:$0xff] %v6330_v22 }
 0x77a   : > { %v5595_v20 = vpop.permute.xlu1 %5594 }
 0x77b   : > { %5660 = vst.msk [vmem:[#allocation3 + $0xf8] sm:$0xff] %vm5628_vm15, %v5595_v20  ;;  %v5563_v47 = vpop.permute.xlu0 %5562 }
 0x77c   : > { %5644 = vst.msk [vmem:[#allocation3 + $0x78] sm:$0xff] %vm5628_vm15, %v5563_v47 }
 0x77e   : > { %v6119_v6 = vld [vmem:[#allocation3 + $0xf0] sm:$0xff] }
 0x77f   : > { %v5858_v10 = vld [vmem:[#allocation3 + $0x70] sm:$0xff]  ;;  %6652 = vmatprep.mubr.msk.f32.mxu0 %vm5878_vm1, %v6119_v6 }
 0x780   : > { %6600 = vmatprep.mubr.msk.f32.mxu1 %vm5878_vm1, %v5858_v10 }
 0x782   : > { %v6120_v16 = vld [vmem:[#allocation3 + $0xf8] sm:$0xff] }
 0x783   : > { %v5859_v5 = vld [vmem:[#allocation3 + $0x78] sm:$0xff]  ;;  %6653 = vmatmul.mubr.msk.f32.gmra.mrb[16].mxu0 %vm5878_vm1, %v6120_v16 }
 0x784   : > { %6601 = vmatmul.mubr.msk.f32.gmra.mrb[14].mxu1 %vm5878_vm1, %v5859_v5 }
 0x79a   : > { %v6587_v56 = vpop.f32.mrb[4].mxu1 }
 0x79b   : > { %v6639_v30 = vpop.f32.mrb[6].mxu0  ;;  %v6019_v31 = vadd.f32 %v6587_v56, %v10270_v41  ;;  %v6013_v9 = vpop.f32.mrb[5].mxu1 }
 0x79c   : > { %v6275_v44 = vadd.f32 %v6639_v30, %v10270_v41  ;;  %v6269_v28 = vpop.f32.mrb[7].mxu0  ;;  %v6014_v49 = vadd.f32 %v6013_v9, %v10270_v41 }
 0x79d   : > { %v6270_v57 = vadd.f32 %v6269_v28, %v10270_v41  ;;  %v6077_v36 = vmax.f32 %v6019_v31, 0.0 }
 0x79e   : > { %v6333_v8 = vmax.f32 %v6275_v44, 0.0  ;;  %v6076_v7 = vmax.f32 %v6014_v49, 0.0 }
 0x79f   : > { %v6332_v46 = vmax.f32 %v6270_v57, 0.0  ;;  %6093 = vst [vmem:[%s10282_s6 + $0x28] sm:$0xff] %v6077_v36 }
 0x7a0   : > { %6349 = vst [vmem:[%s10282_s6 + $0xa8] sm:$0xff] %v6333_v8  ;;  %6092 = vst [vmem:[%s10282_s6 + $0x20] sm:$0xff] %v6076_v7 }
 0x7a1   : > { %6348 = vst [vmem:[%s10282_s6 + $0xa0] sm:$0xff] %v6332_v46 }
 0x7c2   : > { %v6642_v59 = vpop.f32.mrb[8].mxu0 }
 0x7c3   : > { %v6590_v3 = vpop.f32.mrb[6].mxu1  ;;  %v6285_v2 = vadd.f32 %v6642_v59, %v10270_v41  ;;  %v6279_v63 = vpop.f32.mrb[9].mxu0 }
 0x7c4   : > { %v6029_v50 = vadd.f32 %v6590_v3, %v10270_v41  ;;  %v6023_v39 = vpop.f32.mrb[7].mxu1  ;;  %v6280_v26 = vadd.f32 %v6279_v63, %v10270_v41 }
 0x7c5   : > { %v6024_v12 = vadd.f32 %v6023_v39, %v10270_v41  ;;  %v6335_v45 = vmax.f32 %v6285_v2, 0.0 }
 0x7c6   : > { %v6079_v61 = vmax.f32 %v6029_v50, 0.0  ;;  %v6334_v52 = vmax.f32 %v6280_v26, 0.0 }
 0x7c7   : > { %v6078_v35 = vmax.f32 %v6024_v12, 0.0  ;;  %6351 = vst [vmem:[%s10282_s6 + $0xb8] sm:$0xff] %v6335_v45 }
 0x7c8   : > { %6095 = vst [vmem:[%s10282_s6 + $0x38] sm:$0xff] %v6079_v61  ;;  %6350 = vst [vmem:[%s10282_s6 + $0xb0] sm:$0xff] %v6334_v52 }
 0x7c9   : > { %6094 = vst [vmem:[%s10282_s6 + $0x30] sm:$0xff] %v6078_v35 }
 0x7ea   : > { %v6645_v1 = vpop.f32.mrb[10].mxu0 }
 0x7eb   : > { %v6593_v51 = vpop.f32.mrb[8].mxu1  ;;  %v6295_v13 = vadd.f32 %v6645_v1, %v10270_v41  ;;  %v6289_v14 = vpop.f32.mrb[11].mxu0 }
 0x7ec   : > { %v6039_v19 = vadd.f32 %v6593_v51, %v10270_v41  ;;  %v6033_v23 = vpop.f32.mrb[9].mxu1  ;;  %v6290_v25 = vadd.f32 %v6289_v14, %v10270_v41 }
 0x7ed   : > { %v6034_v42 = vadd.f32 %v6033_v23, %v10270_v41  ;;  %v6337_v4 = vmax.f32 %v6295_v13, 0.0 }
 0x7ee   : > { %v6081_v11 = vmax.f32 %v6039_v19, 0.0  ;;  %v6336_v34 = vmax.f32 %v6290_v25, 0.0 }
 0x7ef   : > { %v6080_v15 = vmax.f32 %v6034_v42, 0.0  ;;  %6353 = vst [vmem:[%s10282_s6 + $0xc8] sm:$0xff] %v6337_v4 }
 0x7f0   : > { %6097 = vst [vmem:[%s10282_s6 + $0x48] sm:$0xff] %v6081_v11  ;;  %6352 = vst [vmem:[%s10282_s6 + $0xc0] sm:$0xff] %v6336_v34 }
 0x7f1   : > { %6096 = vst [vmem:[%s10282_s6 + $0x40] sm:$0xff] %v6080_v15 }
 0x812   : > { %v6648_v27 = vpop.f32.mrb[12].mxu0 }
 0x813   : > { %v6596_v53 = vpop.f32.mrb[10].mxu1  ;;  %v6305_v32 = vadd.f32 %v6648_v27, %v10270_v41  ;;  %v6299_v43 = vpop.f32.mrb[13].mxu0 }
 0x814   : > { %v6049_v29 = vadd.f32 %v6596_v53, %v10270_v41  ;;  %v6043_v21 = vpop.f32.mrb[11].mxu1  ;;  %v6300_v60 = vadd.f32 %v6299_v43, %v10270_v41 }
 0x815   : > { %v6044_v24 = vadd.f32 %v6043_v21, %v10270_v41  ;;  %v6339_v62 = vmax.f32 %v6305_v32, 0.0 }
 0x816   : > { %v6083_v37 = vmax.f32 %v6049_v29, 0.0  ;;  %v6338_v0 = vmax.f32 %v6300_v60, 0.0 }
 0x817   : > { %v6082_v48 = vmax.f32 %v6044_v24, 0.0  ;;  %6355 = vst [vmem:[%s10282_s6 + $0xd8] sm:$0xff] %v6339_v62 }
 0x818   : > { %6099 = vst [vmem:[%s10282_s6 + $0x58] sm:$0xff] %v6083_v37  ;;  %6354 = vst [vmem:[%s10282_s6 + $0xd0] sm:$0xff] %v6338_v0 }
 0x819   : > { %6098 = vst [vmem:[%s10282_s6 + $0x50] sm:$0xff] %v6082_v48 }
 0x83a   : > { %v6651_v17 = vpop.f32.mrb[14].mxu0 }
 0x83b   : > { %v6599_v58 = vpop.f32.mrb[12].mxu1  ;;  %v6315_v38 = vadd.f32 %v6651_v17, %v10270_v41  ;;  %v6309_v54 = vpop.f32.mrb[15].mxu0 }
 0x83c   : > { %v6059_v18 = vadd.f32 %v6599_v58, %v10270_v41  ;;  %v6053_v55 = vpop.f32.mrb[13].mxu1  ;;  %v6310_v33 = vadd.f32 %v6309_v54, %v10270_v41 }
 0x83d   : > { %v6341_v22 = vmax.f32 %v6315_v38, 0.0  ;;  %v6054_v40 = vadd.f32 %v6053_v55, %v10270_v41 }
 0x83e   : > { %v6085_v20 = vmax.f32 %v6059_v18, 0.0  ;;  %v6340_v47 = vmax.f32 %v6310_v33, 0.0 }
 0x83f   : > { %6357 = vst [vmem:[%s10282_s6 + $0xe8] sm:$0xff] %v6341_v22  ;;  %v6084_v6 = vmax.f32 %v6054_v40, 0.0 }
 0x840   : > { %6101 = vst [vmem:[%s10282_s6 + $0x68] sm:$0xff] %v6085_v20  ;;  %6356 = vst [vmem:[%s10282_s6 + $0xe0] sm:$0xff] %v6340_v47 }
 0x841   : > { %6100 = vst [vmem:[%s10282_s6 + $0x60] sm:$0xff] %v6084_v6 }
 0x856   : > { %v6654_v10 = vpop.f32.mrb[16].mxu0 }
 0x857   : > { %v6602_v16 = vpop.f32.mrb[14].mxu1  ;;  %v6325_v5 = vadd.f32 %v6654_v10, %v10270_v41  ;;  %v6319_v56 = vpop.f32.mrb[17].mxu0 }
 0x858   : > { %v6069_v30 = vadd.f32 %v6602_v16, %v10270_v41  ;;  %v6063_v31 = vpop.f32.mrb[15].mxu1  ;;  %v6320_v44 = vadd.f32 %v6319_v56, %v10270_v41 }
 0x859   : > { %v6343_v9 = vmax.f32 %v6325_v5, 0.0  ;;  %v6064_v28 = vadd.f32 %v6063_v31, %v10270_v41 }
 0x85a   : > { %v6087_v49 = vmax.f32 %v6069_v30, 0.0  ;;  %v6342_v57 = vmax.f32 %v6320_v44, 0.0 }
 0x85b   : > { %6359 = vst [vmem:[%s10282_s6 + $0xf8] sm:$0xff] %v6343_v9  ;;  %v6086_v36 = vmax.f32 %v6064_v28, 0.0 }
 0x85c   : > { %6103 = vst [vmem:[%s10282_s6 + $0x78] sm:$0xff] %v6087_v49  ;;  %6358 = vst [vmem:[%s10282_s6 + $0xf0] sm:$0xff] %v6342_v57 }
 0x85d   : > { %6102 = vst [vmem:[%s10282_s6 + $0x70] sm:$0xff] %v6086_v36 }
 0x85e   : > { %6802 = shalt.err (!%p6799_p3)
}
 0x85f   : > { %s6803_s28 = scalar_lea.hbm %s10377_s12, 4096  ;;  %s6807_s13 = scalar_lea.hbm %s10433_s4, 8192 }
 0x860   : > { %p6804_p4 = scmp.ne.s32.totalorder %s10377_s12, %s6803_s28  ;;  %p6808_p9 = scmp.lt.u32.totalorder %s10377_s12, %s10433_s4 }
 0x861   : > { %p6809_p10 = scmp.lt.u32.totalorder %s6807_s13, %s6803_s28  ;;  %p6811_p12 = scmp.lt.u32.totalorder %s6803_s28, %s10377_s12 }
 0x862   : > { %p6805_p7 = pnand %p6804_p4, %p6947_p5 }
 0x863   : > { %p6810_p11 = por %p6809_p10, %p6808_p9 }
 0x864   : > { %p6806_p8 = pneg %p6805_p7 }
 0x865   : > { %p6812_p13 = por %p6811_p12, %p6810_p11 }
 0x867   : > { %p6813_p0 = pnand %p6812_p13, %p6806_p8 }
 0x869   : > { %6816 = shalt.err (!%p6813_p0)
}
 0x86a   : > { %s6883_s6 = smov 128  }
 0x86b   : > { %6711 = dma.vmem_to_hbm [thread:$0]  (%p6947_p5), %s10380_s9, 4096, %s10377_s12, %s10387_s19, %s6883_s6, %s6883_s6, %s6855_s7  }
 0x86c PF: > { %p6717_p1 = scmp.ge.s32.totalorder %s6851_s18, 2  ;;  %s6389_s8 = sand.u32 1, %s6839_s15  }
 0x86d   : > { %s6390_s10 = scalar_lea.sflag [#allocation5], %s6389_s8 }
 0x86e   : > { %p6714_p2 = pnand %p6717_p1, %p6951_p6 }
 0x870   : > { %6834 = dma.done.wait (!%p6714_p2), %s6390_s10, 4096  }
 0x871   : > { %6836 = vsyncadd (!%p6714_p2), %s6390_s10, 4294963200  ;;  %p14_p3 = scmp.ge.s32.totalorder %s6934_s21, 4   ;;  %s10510_s15 = smov %s6843_s16 }
 0x872   : > { %s10511_s16 = smov %s6847_s17  ;;  %s10512_s17 = smov %s6945_s24 }
 0x873   : > { %s10513_s18 = smov %s6934_s21  ;;  %16 = sbr.rel (!%p14_p3) target bundleno = 3 (0x3), region = 79 }
 0x87a   :  { %6395 = vsyncpa [#allocation5], 1 }
 0x87b   :  { %6397 = vsyncpa [#allocation5 + $0x1], 1 }

</bundles_post_ra>
